<compile_context>
chip_gen: v6e
topology: v6e:2x2x1
jax: 0.10.0
libtpu: 0.0.40
codegen_flags: <defaults>
</compile_context>

<pallas_src>
import jax
import jax.numpy as jnp
from jax.experimental import pallas as pl
from jax.experimental.pallas import tpu as pltpu

# ----------------- small synthetic config -----------------
B = 2                 # batch
FEATURE_SIZE = 64     # feature_size
QST_VOCAB = 50        # qst_vocab_size
ANS_VOCAB = 10        # ans_vocab_size
QST_EMBED = 32        # qst_embed_size
NUM_LAYERS = 1        # num_layers (LSTM)
HIDDEN = 64           # hidden_size
SEQ_LEN = 8           # question length
NUM_CHANNELS = 512    # SAN attention channels (fixed by the architecture)
IMG_HW = 14           # CNN feature map is 14x14 -> 196 (hard-coded view in PyTorch)
SPATIAL = IMG_HW * IMG_HW
IMG_CIN = 3
K_PATCH = IMG_CIN * 9     # 27 im2col features
K_PAD = 32                # padded contraction depth for the conv GEMM
OUT_PAD = 128             # lane-dense logits (sliced to ANS_VOCAB in the wrapper)
NUM_ATT_LAYERS = 2

BF = jnp.bfloat16
F32 = jnp.float32


def _dot(a, b_bf16):
    """MXU matmul: bf16 operands, f32 accumulation."""
    return jnp.dot(a.astype(BF), b_bf16, preferred_element_type=F32)


# ----------------- the single fused kernel (one grid step == one sample) -----------------
def _vqa_fused_kernel(
    patches_ref, emb_ref,
    conv_w_ref, conv_b_ref,
    imgfc_w_ref, imgfc_b_ref,
    w_ih_ref, b_gates_ref, w_hh_ref,
    qfc_w_ref, qfc_b_ref,
    att_wi_ref, att_bi_ref, att_wq_ref, att_bq_ref, att_wa_ref, att_ba_ref,
    mlp_w_ref, mlp_b_ref,
    out_ref,
):
    S = SPATIAL
    H = HIDDEN
    T = SEQ_LEN

    # ---- ImgAttentionEncoder: conv stand-in GEMM + ReLU, then fc + Tanh ----
    patches = patches_ref[0]                                              # (S, K_PAD)
    conv = jnp.maximum(_dot(patches, conv_w_ref[...]) + conv_b_ref[...], 0.0)   # (S, 512)
    vi = jnp.tanh(_dot(conv, imgfc_w_ref[...]) + imgfc_b_ref[...])        # (S, F) f32

    # ---- QstEncoder: tanh(embedding) -> LSTM -> tanh(cat(h,c)) -> fc ----
    xb = jnp.tanh(emb_ref[0]).astype(BF)                                  # (T, E)
    # per-gate (i, f, g, o) input projections, hoisted out of the recurrence
    xg = [jnp.dot(xb, w_ih_ref[g], preferred_element_type=F32) + b_gates_ref[g]
          for g in range(4)]                                              # 4 x (T, H)
    whh = [w_hh_ref[g] for g in range(4)]                                 # 4 x (H, H) bf16

    h = jnp.zeros((1, H), F32)
    c = jnp.zeros((1, H), F32)
    for t in range(T):                        # statically unrolled recurrence
        hb = h.astype(BF)
        pre = [xg[g][t:t + 1, :] + jnp.dot(hb, whh[g], preferred_element_type=F32)
               for g in range(4)]
        i_g = jax.nn.sigmoid(pre[0])
        f_g = jax.nn.sigmoid(pre[1])
        g_g = jnp.tanh(pre[2])
        o_g = jax.nn.sigmoid(pre[3])
        c = f_g * c + i_g * g_g
        h = o_g * jnp.tanh(c)

    # tanh(cat(h, c)) @ Wq == tanh(h) @ Wq_top + tanh(c) @ Wq_bot  (no in-kernel concat)
    u = (jnp.dot(jnp.tanh(h).astype(BF), qfc_w_ref[0], preferred_element_type=F32)
         + jnp.dot(jnp.tanh(c).astype(BF), qfc_w_ref[1], preferred_element_type=F32)
         + qfc_b_ref[...])                                                # (1, F)

    # ---- Stacked attention (2 layers, SHARED weights) ----
    hi = _dot(vi, att_wi_ref[...]) + att_bi_ref[...]                      # (S, C), hoisted once
    ones_row = jnp.ones((1, S), BF)                                       # MXU pooling vector
    for _ in range(NUM_ATT_LAYERS):
        hq = _dot(u, att_wq_ref[...]) + att_bq_ref[...]                   # (1, C)
        ha = jnp.tanh(hi + hq)                                            # (S, C)
        # TODO(synk): nn.Dropout(p=0.5) is identity at inference (eval mode); not applied.
        sc = _dot(ha, att_wa_ref[...]) + att_ba_ref[...]                  # (S, 1)
        m = jnp.max(sc, axis=0, keepdims=True)
        e = jnp.exp(sc - m)                                               # (S, 1)
        # softmax-weighted pooling over the 196 regions on the MXU:
        num = jnp.dot(ones_row, (e * vi).astype(BF), preferred_element_type=F32)  # (1, F)
        den = jnp.dot(ones_row, e.astype(BF), preferred_element_type=F32)          # (1, 1)
        u = num / den + u                                                 # vi_attended + vq

    # ---- MLP head (Dropout identity at inference); lane-dense padded logits ----
    out = _dot(u, mlp_w_ref[...]) + mlp_b_ref[...]                        # (1, OUT_PAD)
    out_ref[...] = out.reshape(1, 1, OUT_PAD)


# ----------------- glue: im2col for the 3x3 SAME conv stand-in -----------------
def im2col_3x3_same(x):
    # x: (B, C, H, W) NCHW -> patches (B, H*W, C*9); feature index = c*9 + i*3 + j
    Bb, C, H, W = x.shape
    xp = jnp.pad(x, ((0, 0), (0, 0), (1, 1), (1, 1)))
    cols = []
    for c in range(C):
        for i in range(3):
            for j in range(3):
                cols.append(xp[:, c, i:i + H, j:j + W])
    patches = jnp.stack(cols, axis=-1)               # (B, H, W, C*9)
    return patches.reshape(Bb, H * W, C * 9)


# ----------------- deterministic parameter init (PyTorch layouts) -----------------
def init_params(key):
    ks = jax.random.split(key, 20)

    def w(k, shape, scale=0.05):
        return scale * jax.random.normal(k, shape, dtype=jnp.float32)

    p = {}
    # Image encoder.
    # TODO(synk): pretrained frozen VGG19 `features[:-2]` backbone cannot be loaded here;
    # replaced by a deterministic single 3x3 conv + ReLU stand-in producing (B, 512, 14, 14).
    p["conv_w"] = w(ks[0], (NUM_CHANNELS, IMG_CIN, 3, 3))        # (Cout, Cin, kh, kw)
    p["conv_b"] = w(ks[1], (NUM_CHANNELS,))
    p["imgfc_w"] = w(ks[2], (FEATURE_SIZE, NUM_CHANNELS))        # Linear(512, F)
    p["imgfc_b"] = w(ks[3], (FEATURE_SIZE,))
    # Question encoder.
    p["embed"] = w(ks[4], (QST_VOCAB, QST_EMBED), scale=0.1)
    p["w_ih"] = w(ks[5], (4 * HIDDEN, QST_EMBED))                # LSTM gates (i,f,g,o)
    p["w_hh"] = w(ks[6], (4 * HIDDEN, HIDDEN))
    p["b_ih"] = w(ks[7], (4 * HIDDEN,))
    p["b_hh"] = w(ks[8], (4 * HIDDEN,))
    p["qfc_w"] = w(ks[9], (FEATURE_SIZE, 2 * NUM_LAYERS * HIDDEN))
    p["qfc_b"] = w(ks[10], (FEATURE_SIZE,))
    # SAN attention — ONE shared module used twice (ModuleList([a] * 2) shares weights).
    p["att_wi"] = w(ks[11], (NUM_CHANNELS, FEATURE_SIZE))        # ff_image
    p["att_bi"] = w(ks[12], (NUM_CHANNELS,))
    p["att_wq"] = w(ks[13], (NUM_CHANNELS, FEATURE_SIZE))        # ff_questions
    p["att_bq"] = w(ks[14], (NUM_CHANNELS,))
    p["att_wa"] = w(ks[15], (1, NUM_CHANNELS))                   # ff_attention
    p["att_ba"] = w(ks[16], (1,))
    # MLP head.
    p["mlp_w"] = w(ks[17], (ANS_VOCAB, FEATURE_SIZE))
    p["mlp_b"] = w(ks[18], (ANS_VOCAB,))
    return p


# ----------------- one-time weight layout prep (transpose / pad / bf16) -----------------
def prepare_params(p):
    H = HIDDEN
    kp = {}
    kp["embed"] = p["embed"]                                             # lookup table, f32
    conv_w = p["conv_w"].reshape(NUM_CHANNELS, K_PATCH).T                 # (27, 512)
    kp["conv_w"] = jnp.pad(conv_w, ((0, K_PAD - K_PATCH), (0, 0))).astype(BF)
    kp["conv_b"] = p["conv_b"].reshape(1, NUM_CHANNELS)
    kp["imgfc_w"] = p["imgfc_w"].T.astype(BF)                             # (512, F)
    kp["imgfc_b"] = p["imgfc_b"].reshape(1, FEATURE_SIZE)
    # LSTM: split the (4H, .) PyTorch weights into tile-aligned per-gate (in, H) blocks.
    kp["w_ih"] = jnp.transpose(p["w_ih"].reshape(4, H, QST_EMBED), (0, 2, 1)).astype(BF)
    kp["w_hh"] = jnp.transpose(p["w_hh"].reshape(4, H, H), (0, 2, 1)).astype(BF)
    kp["b_gates"] = (p["b_ih"] + p["b_hh"]).reshape(4, 1, H)
    kp["qfc_w"] = p["qfc_w"].T.reshape(2, H, FEATURE_SIZE).astype(BF)     # [h-half, c-half]
    kp["qfc_b"] = p["qfc_b"].reshape(1, FEATURE_SIZE)
    kp["att_wi"] = p["att_wi"].T.astype(BF)                               # (F, C)
    kp["att_bi"] = p["att_bi"].reshape(1, NUM_CHANNELS)
    kp["att_wq"] = p["att_wq"].T.astype(BF)
    kp["att_bq"] = p["att_bq"].reshape(1, NUM_CHANNELS)
    kp["att_wa"] = p["att_wa"].T.astype(BF)                               # (C, 1)
    kp["att_ba"] = p["att_ba"].reshape(1, 1)
    kp["mlp_w"] = jnp.pad(p["mlp_w"].T, ((0, 0), (0, OUT_PAD - ANS_VOCAB))).astype(BF)
    kp["mlp_b"] = jnp.pad(p["mlp_b"], (0, OUT_PAD - ANS_VOCAB)).reshape(1, OUT_PAD)
    return kp


# ----------------- full forward pass: glue + one fused pallas_call -----------------
def vqa_forward(kp, image, question):
    Bb = image.shape[0]

    # plain-JAX glue: patch extraction (padded to K_PAD) and embedding lookup
    patches = im2col_3x3_same(image)                                      # (B, 196, 27)
    patches = jnp.pad(patches, ((0, 0), (0, 0), (0, K_PAD - K_PATCH)))    # (B, 196, 32)
    emb = jnp.take(kp["embed"], question, axis=0)                         # (B, T, E)

    def w_spec(shape):
        return pl.BlockSpec(shape, lambda b: (0,) * len(shape))

    out_padded = pl.pallas_call(
        _vqa_fused_kernel,
        out_shape=jax.ShapeDtypeStruct((Bb, 1, OUT_PAD), F32),
        grid=(Bb,),
        in_specs=[
            pl.BlockSpec((1, SPATIAL, K_PAD), lambda b: (b, 0, 0)),       # patches
            pl.BlockSpec((1, SEQ_LEN, QST_EMBED), lambda b: (b, 0, 0)),   # embeddings
            w_spec((K_PAD, NUM_CHANNELS)),            # conv_w
            w_spec((1, NUM_CHANNELS)),                # conv_b
            w_spec((NUM_CHANNELS, FEATURE_SIZE)),     # imgfc_w
            w_spec((1, FEATURE_SIZE)),                # imgfc_b
            w_spec((4, QST_EMBED, HIDDEN)),           # w_ih (per gate)
            w_spec((4, 1, HIDDEN)),                   # b_ih + b_hh (per gate)
            w_spec((4, HIDDEN, HIDDEN)),              # w_hh (per gate)
            w_spec((2, HIDDEN, FEATURE_SIZE)),        # qfc_w (h-half, c-half)
            w_spec((1, FEATURE_SIZE)),                # qfc_b
            w_spec((FEATURE_SIZE, NUM_CHANNELS)),     # att_wi
            w_spec((1, NUM_CHANNELS)),                # att_bi
            w_spec((FEATURE_SIZE, NUM_CHANNELS)),     # att_wq
            w_spec((1, NUM_CHANNELS)),                # att_bq
            w_spec((NUM_CHANNELS, 1)),                # att_wa
            w_spec((1, 1)),                           # att_ba
            w_spec((FEATURE_SIZE, OUT_PAD)),          # mlp_w (lane-padded)
            w_spec((1, OUT_PAD)),                     # mlp_b (lane-padded)
        ],
        out_specs=pl.BlockSpec((1, 1, OUT_PAD), lambda b: (b, 0, 0)),
        compiler_params=pltpu.CompilerParams(
            dimension_semantics=("parallel",)),       # 2-TC split on v7x
    )(
        patches, emb,
        kp["conv_w"], kp["conv_b"],
        kp["imgfc_w"], kp["imgfc_b"],
        kp["w_ih"], kp["b_gates"], kp["w_hh"],
        kp["qfc_w"], kp["qfc_b"],
        kp["att_wi"], kp["att_bi"], kp["att_wq"], kp["att_bq"],
        kp["att_wa"], kp["att_ba"],
        kp["mlp_w"], kp["mlp_b"],
    )
    return out_padded.reshape(Bb, OUT_PAD)[:, :ANS_VOCAB]


if __name__ == "__main__":
    key = jax.random.PRNGKey(0)
    k_img, k_qst, k_par = jax.random.split(key, 3)
    image = jax.random.normal(k_img, (B, IMG_CIN, IMG_HW, IMG_HW), dtype=jnp.float32)
    question = jax.random.randint(k_qst, (B, SEQ_LEN), 0, QST_VOCAB)

    params = init_params(k_par)
    kparams = prepare_params(params)      # one-time weight layout prep (not in the hot path)

    fwd = jax.jit(vqa_forward)
    out = fwd(kparams, image, question)
    out = jax.block_until_ready(out)
    assert out.shape == (B, ANS_VOCAB) and out.dtype == jnp.float32
    print("KERNEL_OK")
</pallas_src>

<mosaic_0001>
module attributes {stable_mosaic.version = 11 : i64} {
  func.func @_vqa_fused_kernel(%arg0: i32, %arg1: memref<1x196x32xf32, #tpu.memory_space<vmem>>, %arg2: memref<1x8x32xf32, #tpu.memory_space<vmem>>, %arg3: memref<32x512xbf16, #tpu.memory_space<vmem>>, %arg4: memref<1x512xf32, #tpu.memory_space<vmem>>, %arg5: memref<512x64xbf16, #tpu.memory_space<vmem>>, %arg6: memref<1x64xf32, #tpu.memory_space<vmem>>, %arg7: memref<4x32x64xbf16, #tpu.memory_space<vmem>>, %arg8: memref<4x1x64xf32, #tpu.memory_space<vmem>>, %arg9: memref<4x64x64xbf16, #tpu.memory_space<vmem>>, %arg10: memref<2x64x64xbf16, #tpu.memory_space<vmem>>, %arg11: memref<1x64xf32, #tpu.memory_space<vmem>>, %arg12: memref<64x512xbf16, #tpu.memory_space<vmem>>, %arg13: memref<1x512xf32, #tpu.memory_space<vmem>>, %arg14: memref<64x512xbf16, #tpu.memory_space<vmem>>, %arg15: memref<1x512xf32, #tpu.memory_space<vmem>>, %arg16: memref<512x1xbf16, #tpu.memory_space<vmem>>, %arg17: memref<1x1xf32, #tpu.memory_space<vmem>>, %arg18: memref<64x128xbf16, #tpu.memory_space<vmem>>, %arg19: memref<1x128xf32, #tpu.memory_space<vmem>>, %arg20: memref<1x1x128xf32, #tpu.memory_space<vmem>>) attributes {dimension_semantics = [#tpu.dimension_semantics<parallel>], iteration_bounds = array<i64: 2>, scalar_prefetch = 0 : i64, scratch_operands = 0 : i64, tpu.core_type = #tpu.core_type<tc>, window_params = [{transform_indices = @transform_0, window_bounds = array<i64: 1, 196, 32>}, {transform_indices = @transform_1, window_bounds = array<i64: 1, 8, 32>}, {pipeline_mode = #tpu.pipeline_mode<synchronous>, transform_indices = @transform_2, window_bounds = array<i64: 32, 512>}, {pipeline_mode = #tpu.pipeline_mode<synchronous>, transform_indices = @transform_3, window_bounds = array<i64: 1, 512>}, {pipeline_mode = #tpu.pipeline_mode<synchronous>, transform_indices = @transform_4, window_bounds = array<i64: 512, 64>}, {pipeline_mode = #tpu.pipeline_mode<synchronous>, transform_indices = @transform_5, window_bounds = array<i64: 1, 64>}, {pipeline_mode = #tpu.pipeline_mode<synchronous>, transform_indices = @transform_6, window_bounds = array<i64: 4, 32, 64>}, {pipeline_mode = #tpu.pipeline_mode<synchronous>, transform_indices = @transform_7, window_bounds = array<i64: 4, 1, 64>}, {pipeline_mode = #tpu.pipeline_mode<synchronous>, transform_indices = @transform_8, window_bounds = array<i64: 4, 64, 64>}, {pipeline_mode = #tpu.pipeline_mode<synchronous>, transform_indices = @transform_9, window_bounds = array<i64: 2, 64, 64>}, {pipeline_mode = #tpu.pipeline_mode<synchronous>, transform_indices = @transform_10, window_bounds = array<i64: 1, 64>}, {pipeline_mode = #tpu.pipeline_mode<synchronous>, transform_indices = @transform_11, window_bounds = array<i64: 64, 512>}, {pipeline_mode = #tpu.pipeline_mode<synchronous>, transform_indices = @transform_12, window_bounds = array<i64: 1, 512>}, {pipeline_mode = #tpu.pipeline_mode<synchronous>, transform_indices = @transform_13, window_bounds = array<i64: 64, 512>}, {pipeline_mode = #tpu.pipeline_mode<synchronous>, transform_indices = @transform_14, window_bounds = array<i64: 1, 512>}, {pipeline_mode = #tpu.pipeline_mode<synchronous>, transform_indices = @transform_15, window_bounds = array<i64: 512, 1>}, {pipeline_mode = #tpu.pipeline_mode<synchronous>, transform_indices = @transform_16, window_bounds = array<i64: 1, 1>}, {pipeline_mode = #tpu.pipeline_mode<synchronous>, transform_indices = @transform_17, window_bounds = array<i64: 64, 128>}, {pipeline_mode = #tpu.pipeline_mode<synchronous>, transform_indices = @transform_18, window_bounds = array<i64: 1, 128>}, {transform_indices = @transform_19, window_bounds = array<i64: 1, 1, 128>}]} {
    %c0 = arith.constant 0 : index
    %c0_0 = arith.constant 0 : index
    %c0_1 = arith.constant 0 : index
    %0 = vector.load %arg1[%c0, %c0_0, %c0_1] : memref<1x196x32xf32, #tpu.memory_space<vmem>>, vector<1x196x32xf32>
    %1 = vector.shape_cast %0 : vector<1x196x32xf32> to vector<196x32xf32>
    %c0_2 = arith.constant 0 : index
    %c0_3 = arith.constant 0 : index
    %2 = vector.load %arg3[%c0_2, %c0_3] : memref<32x512xbf16, #tpu.memory_space<vmem>>, vector<32x512xbf16>
    %3 = arith.truncf %1 : vector<196x32xf32> to vector<196x32xbf16>
    %cst = arith.constant dense<0.000000e+00> : vector<196x512xf32>
    %4 = tpu.matmul %3, %2, %cst {dimension_numbers = #tpu.dot_dimension_numbers<[1], [0], [0], [1], [0, 0, 1, 1], [], []>} : vector<196x32xbf16>, vector<32x512xbf16>, vector<196x512xf32> -> vector<196x512xf32>
    %c0_4 = arith.constant 0 : index
    %c0_5 = arith.constant 0 : index
    %5 = vector.load %arg4[%c0_4, %c0_5] : memref<1x512xf32, #tpu.memory_space<vmem>>, vector<1x512xf32>
    %6 = vector.broadcast %5 : vector<1x512xf32> to vector<196x512xf32>
    %7 = arith.addf %4, %6 : vector<196x512xf32>
    %cst_6 = arith.constant 0.000000e+00 : f32
    %8 = vector.broadcast %cst_6 : f32 to vector<196x512xf32>
    %9 = arith.maximumf %7, %8 : vector<196x512xf32>
    %c0_7 = arith.constant 0 : index
    %c0_8 = arith.constant 0 : index
    %10 = vector.load %arg5[%c0_7, %c0_8] : memref<512x64xbf16, #tpu.memory_space<vmem>>, vector<512x64xbf16>
    %11 = arith.truncf %9 : vector<196x512xf32> to vector<196x512xbf16>
    %cst_9 = arith.constant dense<0.000000e+00> : vector<196x64xf32>
    %12 = tpu.matmul %11, %10, %cst_9 {dimension_numbers = #tpu.dot_dimension_numbers<[1], [0], [0], [1], [0, 0, 1, 1], [], []>} : vector<196x512xbf16>, vector<512x64xbf16>, vector<196x64xf32> -> vector<196x64xf32>
    %c0_10 = arith.constant 0 : index
    %c0_11 = arith.constant 0 : index
    %13 = vector.load %arg6[%c0_10, %c0_11] : memref<1x64xf32, #tpu.memory_space<vmem>>, vector<1x64xf32>
    %14 = vector.broadcast %13 : vector<1x64xf32> to vector<196x64xf32>
    %15 = arith.addf %12, %14 : vector<196x64xf32>
    %16 = math.tanh %15 : vector<196x64xf32>
    %c0_12 = arith.constant 0 : index
    %c0_13 = arith.constant 0 : index
    %c0_14 = arith.constant 0 : index
    %17 = vector.load %arg2[%c0_12, %c0_13, %c0_14] : memref<1x8x32xf32, #tpu.memory_space<vmem>>, vector<1x8x32xf32>
    %18 = vector.shape_cast %17 : vector<1x8x32xf32> to vector<8x32xf32>
    %19 = math.tanh %18 : vector<8x32xf32>
    %20 = arith.truncf %19 : vector<8x32xf32> to vector<8x32xbf16>
    %c0_15 = arith.constant 0 : index
    %c0_16 = arith.constant 0 : index
    %c0_17 = arith.constant 0 : index
    %21 = vector.load %arg7[%c0_15, %c0_16, %c0_17] : memref<4x32x64xbf16, #tpu.memory_space<vmem>>, vector<1x32x64xbf16>
    %22 = vector.shape_cast %21 : vector<1x32x64xbf16> to vector<32x64xbf16>
    %cst_18 = arith.constant dense<0.000000e+00> : vector<8x64xf32>
    %23 = tpu.matmul %20, %22, %cst_18 {dimension_numbers = #tpu.dot_dimension_numbers<[1], [0], [0], [1], [0, 0, 1, 1], [], []>} : vector<8x32xbf16>, vector<32x64xbf16>, vector<8x64xf32> -> vector<8x64xf32>
    %c0_19 = arith.constant 0 : index
    %c0_20 = arith.constant 0 : index
    %c0_21 = arith.constant 0 : index
    %24 = vector.load %arg8[%c0_19, %c0_20, %c0_21] : memref<4x1x64xf32, #tpu.memory_space<vmem>>, vector<1x1x64xf32>
    %25 = vector.shape_cast %24 : vector<1x1x64xf32> to vector<1x64xf32>
    %26 = vector.broadcast %25 : vector<1x64xf32> to vector<8x64xf32>
    %27 = arith.addf %23, %26 : vector<8x64xf32>
    %c1 = arith.constant 1 : index
    %c0_22 = arith.constant 0 : index
    %c0_23 = arith.constant 0 : index
    %28 = vector.load %arg7[%c1, %c0_22, %c0_23] : memref<4x32x64xbf16, #tpu.memory_space<vmem>>, vector<1x32x64xbf16>
    %29 = vector.shape_cast %28 : vector<1x32x64xbf16> to vector<32x64xbf16>
    %cst_24 = arith.constant dense<0.000000e+00> : vector<8x64xf32>
    %30 = tpu.matmul %20, %29, %cst_24 {dimension_numbers = #tpu.dot_dimension_numbers<[1], [0], [0], [1], [0, 0, 1, 1], [], []>} : vector<8x32xbf16>, vector<32x64xbf16>, vector<8x64xf32> -> vector<8x64xf32>
    %c1_25 = arith.constant 1 : index
    %c0_26 = arith.constant 0 : index
    %c0_27 = arith.constant 0 : index
    %31 = vector.load %arg8[%c1_25, %c0_26, %c0_27] : memref<4x1x64xf32, #tpu.memory_space<vmem>>, vector<1x1x64xf32>
    %32 = vector.shape_cast %31 : vector<1x1x64xf32> to vector<1x64xf32>
    %33 = vector.broadcast %32 : vector<1x64xf32> to vector<8x64xf32>
    %34 = arith.addf %30, %33 : vector<8x64xf32>
    %c2 = arith.constant 2 : index
    %c0_28 = arith.constant 0 : index
    %c0_29 = arith.constant 0 : index
    %35 = vector.load %arg7[%c2, %c0_28, %c0_29] : memref<4x32x64xbf16, #tpu.memory_space<vmem>>, vector<1x32x64xbf16>
    %36 = vector.shape_cast %35 : vector<1x32x64xbf16> to vector<32x64xbf16>
    %cst_30 = arith.constant dense<0.000000e+00> : vector<8x64xf32>
    %37 = tpu.matmul %20, %36, %cst_30 {dimension_numbers = #tpu.dot_dimension_numbers<[1], [0], [0], [1], [0, 0, 1, 1], [], []>} : vector<8x32xbf16>, vector<32x64xbf16>, vector<8x64xf32> -> vector<8x64xf32>
    %c2_31 = arith.constant 2 : index
    %c0_32 = arith.constant 0 : index
    %c0_33 = arith.constant 0 : index
    %38 = vector.load %arg8[%c2_31, %c0_32, %c0_33] : memref<4x1x64xf32, #tpu.memory_space<vmem>>, vector<1x1x64xf32>
    %39 = vector.shape_cast %38 : vector<1x1x64xf32> to vector<1x64xf32>
    %40 = vector.broadcast %39 : vector<1x64xf32> to vector<8x64xf32>
    %41 = arith.addf %37, %40 : vector<8x64xf32>
    %c3 = arith.constant 3 : index
    %c0_34 = arith.constant 0 : index
    %c0_35 = arith.constant 0 : index
    %42 = vector.load %arg7[%c3, %c0_34, %c0_35] : memref<4x32x64xbf16, #tpu.memory_space<vmem>>, vector<1x32x64xbf16>
    %43 = vector.shape_cast %42 : vector<1x32x64xbf16> to vector<32x64xbf16>
    %cst_36 = arith.constant dense<0.000000e+00> : vector<8x64xf32>
    %44 = tpu.matmul %20, %43, %cst_36 {dimension_numbers = #tpu.dot_dimension_numbers<[1], [0], [0], [1], [0, 0, 1, 1], [], []>} : vector<8x32xbf16>, vector<32x64xbf16>, vector<8x64xf32> -> vector<8x64xf32>
    %c3_37 = arith.constant 3 : index
    %c0_38 = arith.constant 0 : index
    %c0_39 = arith.constant 0 : index
    %45 = vector.load %arg8[%c3_37, %c0_38, %c0_39] : memref<4x1x64xf32, #tpu.memory_space<vmem>>, vector<1x1x64xf32>
    %46 = vector.shape_cast %45 : vector<1x1x64xf32> to vector<1x64xf32>
    %47 = vector.broadcast %46 : vector<1x64xf32> to vector<8x64xf32>
    %48 = arith.addf %44, %47 : vector<8x64xf32>
    %c0_40 = arith.constant 0 : index
    %c0_41 = arith.constant 0 : index
    %c0_42 = arith.constant 0 : index
    %49 = vector.load %arg9[%c0_40, %c0_41, %c0_42] : memref<4x64x64xbf16, #tpu.memory_space<vmem>>, vector<1x64x64xbf16>
    %50 = vector.shape_cast %49 : vector<1x64x64xbf16> to vector<64x64xbf16>
    %c1_43 = arith.constant 1 : index
    %c0_44 = arith.constant 0 : index
    %c0_45 = arith.constant 0 : index
    %51 = vector.load %arg9[%c1_43, %c0_44, %c0_45] : memref<4x64x64xbf16, #tpu.memory_space<vmem>>, vector<1x64x64xbf16>
    %52 = vector.shape_cast %51 : vector<1x64x64xbf16> to vector<64x64xbf16>
    %c2_46 = arith.constant 2 : index
    %c0_47 = arith.constant 0 : index
    %c0_48 = arith.constant 0 : index
    %53 = vector.load %arg9[%c2_46, %c0_47, %c0_48] : memref<4x64x64xbf16, #tpu.memory_space<vmem>>, vector<1x64x64xbf16>
    %54 = vector.shape_cast %53 : vector<1x64x64xbf16> to vector<64x64xbf16>
    %c3_49 = arith.constant 3 : index
    %c0_50 = arith.constant 0 : index
    %c0_51 = arith.constant 0 : index
    %55 = vector.load %arg9[%c3_49, %c0_50, %c0_51] : memref<4x64x64xbf16, #tpu.memory_space<vmem>>, vector<1x64x64xbf16>
    %56 = vector.shape_cast %55 : vector<1x64x64xbf16> to vector<64x64xbf16>
    %cst_52 = arith.constant 0.000000e+00 : f32
    %57 = vector.broadcast %cst_52 : f32 to vector<1x64xf32>
    %cst_53 = arith.constant 0.000000e+00 : f32
    %58 = vector.broadcast %cst_53 : f32 to vector<1x64xf32>
    %59 = arith.truncf %57 : vector<1x64xf32> to vector<1x64xbf16>
    %60 = vector.extract_strided_slice %27 {offsets = [0, 0], sizes = [1, 64], strides = [1, 1]} : vector<8x64xf32> to vector<1x64xf32>
    %cst_54 = arith.constant dense<0.000000e+00> : vector<1x64xf32>
    %61 = tpu.matmul %59, %50, %cst_54 {dimension_numbers = #tpu.dot_dimension_numbers<[1], [0], [0], [1], [0, 0, 1, 1], [], []>} : vector<1x64xbf16>, vector<64x64xbf16>, vector<1x64xf32> -> vector<1x64xf32>
    %62 = arith.addf %60, %61 : vector<1x64xf32>
    %63 = vector.extract_strided_slice %34 {offsets = [0, 0], sizes = [1, 64], strides = [1, 1]} : vector<8x64xf32> to vector<1x64xf32>
    %cst_55 = arith.constant dense<0.000000e+00> : vector<1x64xf32>
    %64 = tpu.matmul %59, %52, %cst_55 {dimension_numbers = #tpu.dot_dimension_numbers<[1], [0], [0], [1], [0, 0, 1, 1], [], []>} : vector<1x64xbf16>, vector<64x64xbf16>, vector<1x64xf32> -> vector<1x64xf32>
    %65 = arith.addf %63, %64 : vector<1x64xf32>
    %66 = vector.extract_strided_slice %41 {offsets = [0, 0], sizes = [1, 64], strides = [1, 1]} : vector<8x64xf32> to vector<1x64xf32>
    %cst_56 = arith.constant dense<0.000000e+00> : vector<1x64xf32>
    %67 = tpu.matmul %59, %54, %cst_56 {dimension_numbers = #tpu.dot_dimension_numbers<[1], [0], [0], [1], [0, 0, 1, 1], [], []>} : vector<1x64xbf16>, vector<64x64xbf16>, vector<1x64xf32> -> vector<1x64xf32>
    %68 = arith.addf %66, %67 : vector<1x64xf32>
    %69 = vector.extract_strided_slice %48 {offsets = [0, 0], sizes = [1, 64], strides = [1, 1]} : vector<8x64xf32> to vector<1x64xf32>
    %cst_57 = arith.constant dense<0.000000e+00> : vector<1x64xf32>
    %70 = tpu.matmul %59, %56, %cst_57 {dimension_numbers = #tpu.dot_dimension_numbers<[1], [0], [0], [1], [0, 0, 1, 1], [], []>} : vector<1x64xbf16>, vector<64x64xbf16>, vector<1x64xf32> -> vector<1x64xf32>
    %71 = arith.addf %69, %70 : vector<1x64xf32>
    %72 = arith.negf %62 : vector<1x64xf32>
    %73 = math.exp %72 : vector<1x64xf32>
    %cst_58 = arith.constant 1.000000e+00 : f32
    %74 = vector.broadcast %cst_58 : f32 to vector<1x64xf32>
    %75 = arith.addf %74, %73 : vector<1x64xf32>
    %76 = arith.divf %74, %75 : vector<1x64xf32>
    %77 = arith.negf %65 : vector<1x64xf32>
    %78 = math.exp %77 : vector<1x64xf32>
    %cst_59 = arith.constant 1.000000e+00 : f32
    %79 = vector.broadcast %cst_59 : f32 to vector<1x64xf32>
    %80 = arith.addf %79, %78 : vector<1x64xf32>
    %81 = arith.divf %79, %80 : vector<1x64xf32>
    %82 = math.tanh %68 : vector<1x64xf32>
    %83 = arith.negf %71 : vector<1x64xf32>
    %84 = math.exp %83 : vector<1x64xf32>
    %cst_60 = arith.constant 1.000000e+00 : f32
    %85 = vector.broadcast %cst_60 : f32 to vector<1x64xf32>
    %86 = arith.addf %85, %84 : vector<1x64xf32>
    %87 = arith.divf %85, %86 : vector<1x64xf32>
    %88 = arith.mulf %81, %58 : vector<1x64xf32>
    %89 = arith.mulf %76, %82 : vector<1x64xf32>
    %90 = arith.addf %88, %89 : vector<1x64xf32>
    %91 = math.tanh %90 : vector<1x64xf32>
    %92 = arith.mulf %87, %91 : vector<1x64xf32>
    %93 = arith.truncf %92 : vector<1x64xf32> to vector<1x64xbf16>
    %94 = vector.extract_strided_slice %27 {offsets = [1, 0], sizes = [1, 64], strides = [1, 1]} : vector<8x64xf32> to vector<1x64xf32>
    %cst_61 = arith.constant dense<0.000000e+00> : vector<1x64xf32>
    %95 = tpu.matmul %93, %50, %cst_61 {dimension_numbers = #tpu.dot_dimension_numbers<[1], [0], [0], [1], [0, 0, 1, 1], [], []>} : vector<1x64xbf16>, vector<64x64xbf16>, vector<1x64xf32> -> vector<1x64xf32>
    %96 = arith.addf %94, %95 : vector<1x64xf32>
    %97 = vector.extract_strided_slice %34 {offsets = [1, 0], sizes = [1, 64], strides = [1, 1]} : vector<8x64xf32> to vector<1x64xf32>
    %cst_62 = arith.constant dense<0.000000e+00> : vector<1x64xf32>
    %98 = tpu.matmul %93, %52, %cst_62 {dimension_numbers = #tpu.dot_dimension_numbers<[1], [0], [0], [1], [0, 0, 1, 1], [], []>} : vector<1x64xbf16>, vector<64x64xbf16>, vector<1x64xf32> -> vector<1x64xf32>
    %99 = arith.addf %97, %98 : vector<1x64xf32>
    %100 = vector.extract_strided_slice %41 {offsets = [1, 0], sizes = [1, 64], strides = [1, 1]} : vector<8x64xf32> to vector<1x64xf32>
    %cst_63 = arith.constant dense<0.000000e+00> : vector<1x64xf32>
    %101 = tpu.matmul %93, %54, %cst_63 {dimension_numbers = #tpu.dot_dimension_numbers<[1], [0], [0], [1], [0, 0, 1, 1], [], []>} : vector<1x64xbf16>, vector<64x64xbf16>, vector<1x64xf32> -> vector<1x64xf32>
    %102 = arith.addf %100, %101 : vector<1x64xf32>
    %103 = vector.extract_strided_slice %48 {offsets = [1, 0], sizes = [1, 64], strides = [1, 1]} : vector<8x64xf32> to vector<1x64xf32>
    %cst_64 = arith.constant dense<0.000000e+00> : vector<1x64xf32>
    %104 = tpu.matmul %93, %56, %cst_64 {dimension_numbers = #tpu.dot_dimension_numbers<[1], [0], [0], [1], [0, 0, 1, 1], [], []>} : vector<1x64xbf16>, vector<64x64xbf16>, vector<1x64xf32> -> vector<1x64xf32>
    %105 = arith.addf %103, %104 : vector<1x64xf32>
    %106 = arith.negf %96 : vector<1x64xf32>
    %107 = math.exp %106 : vector<1x64xf32>
    %cst_65 = arith.constant 1.000000e+00 : f32
    %108 = vector.broadcast %cst_65 : f32 to vector<1x64xf32>
    %109 = arith.addf %108, %107 : vector<1x64xf32>
    %110 = arith.divf %108, %109 : vector<1x64xf32>
    %111 = arith.negf %99 : vector<1x64xf32>
    %112 = math.exp %111 : vector<1x64xf32>
    %cst_66 = arith.constant 1.000000e+00 : f32
    %113 = vector.broadcast %cst_66 : f32 to vector<1x64xf32>
    %114 = arith.addf %113, %112 : vector<1x64xf32>
    %115 = arith.divf %113, %114 : vector<1x64xf32>
    %116 = math.tanh %102 : vector<1x64xf32>
    %117 = arith.negf %105 : vector<1x64xf32>
    %118 = math.exp %117 : vector<1x64xf32>
    %cst_67 = arith.constant 1.000000e+00 : f32
    %119 = vector.broadcast %cst_67 : f32 to vector<1x64xf32>
    %120 = arith.addf %119, %118 : vector<1x64xf32>
    %121 = arith.divf %119, %120 : vector<1x64xf32>
    %122 = arith.mulf %115, %90 : vector<1x64xf32>
    %123 = arith.mulf %110, %116 : vector<1x64xf32>
    %124 = arith.addf %122, %123 : vector<1x64xf32>
    %125 = math.tanh %124 : vector<1x64xf32>
    %126 = arith.mulf %121, %125 : vector<1x64xf32>
    %127 = arith.truncf %126 : vector<1x64xf32> to vector<1x64xbf16>
    %128 = vector.extract_strided_slice %27 {offsets = [2, 0], sizes = [1, 64], strides = [1, 1]} : vector<8x64xf32> to vector<1x64xf32>
    %cst_68 = arith.constant dense<0.000000e+00> : vector<1x64xf32>
    %129 = tpu.matmul %127, %50, %cst_68 {dimension_numbers = #tpu.dot_dimension_numbers<[1], [0], [0], [1], [0, 0, 1, 1], [], []>} : vector<1x64xbf16>, vector<64x64xbf16>, vector<1x64xf32> -> vector<1x64xf32>
    %130 = arith.addf %128, %129 : vector<1x64xf32>
    %131 = vector.extract_strided_slice %34 {offsets = [2, 0], sizes = [1, 64], strides = [1, 1]} : vector<8x64xf32> to vector<1x64xf32>
    %cst_69 = arith.constant dense<0.000000e+00> : vector<1x64xf32>
    %132 = tpu.matmul %127, %52, %cst_69 {dimension_numbers = #tpu.dot_dimension_numbers<[1], [0], [0], [1], [0, 0, 1, 1], [], []>} : vector<1x64xbf16>, vector<64x64xbf16>, vector<1x64xf32> -> vector<1x64xf32>
    %133 = arith.addf %131, %132 : vector<1x64xf32>
    %134 = vector.extract_strided_slice %41 {offsets = [2, 0], sizes = [1, 64], strides = [1, 1]} : vector<8x64xf32> to vector<1x64xf32>
    %cst_70 = arith.constant dense<0.000000e+00> : vector<1x64xf32>
    %135 = tpu.matmul %127, %54, %cst_70 {dimension_numbers = #tpu.dot_dimension_numbers<[1], [0], [0], [1], [0, 0, 1, 1], [], []>} : vector<1x64xbf16>, vector<64x64xbf16>, vector<1x64xf32> -> vector<1x64xf32>
    %136 = arith.addf %134, %135 : vector<1x64xf32>
    %137 = vector.extract_strided_slice %48 {offsets = [2, 0], sizes = [1, 64], strides = [1, 1]} : vector<8x64xf32> to vector<1x64xf32>
    %cst_71 = arith.constant dense<0.000000e+00> : vector<1x64xf32>
    %138 = tpu.matmul %127, %56, %cst_71 {dimension_numbers = #tpu.dot_dimension_numbers<[1], [0], [0], [1], [0, 0, 1, 1], [], []>} : vector<1x64xbf16>, vector<64x64xbf16>, vector<1x64xf32> -> vector<1x64xf32>
    %139 = arith.addf %137, %138 : vector<1x64xf32>
    %140 = arith.negf %130 : vector<1x64xf32>
    %141 = math.exp %140 : vector<1x64xf32>
    %cst_72 = arith.constant 1.000000e+00 : f32
    %142 = vector.broadcast %cst_72 : f32 to vector<1x64xf32>
    %143 = arith.addf %142, %141 : vector<1x64xf32>
    %144 = arith.divf %142, %143 : vector<1x64xf32>
    %145 = arith.negf %133 : vector<1x64xf32>
    %146 = math.exp %145 : vector<1x64xf32>
    %cst_73 = arith.constant 1.000000e+00 : f32
    %147 = vector.broadcast %cst_73 : f32 to vector<1x64xf32>
    %148 = arith.addf %147, %146 : vector<1x64xf32>
    %149 = arith.divf %147, %148 : vector<1x64xf32>
    %150 = math.tanh %136 : vector<1x64xf32>
    %151 = arith.negf %139 : vector<1x64xf32>
    %152 = math.exp %151 : vector<1x64xf32>
    %cst_74 = arith.constant 1.000000e+00 : f32
    %153 = vector.broadcast %cst_74 : f32 to vector<1x64xf32>
    %154 = arith.addf %153, %152 : vector<1x64xf32>
    %155 = arith.divf %153, %154 : vector<1x64xf32>
    %156 = arith.mulf %149, %124 : vector<1x64xf32>
    %157 = arith.mulf %144, %150 : vector<1x64xf32>
    %158 = arith.addf %156, %157 : vector<1x64xf32>
    %159 = math.tanh %158 : vector<1x64xf32>
    %160 = arith.mulf %155, %159 : vector<1x64xf32>
    %161 = arith.truncf %160 : vector<1x64xf32> to vector<1x64xbf16>
    %162 = vector.extract_strided_slice %27 {offsets = [3, 0], sizes = [1, 64], strides = [1, 1]} : vector<8x64xf32> to vector<1x64xf32>
    %cst_75 = arith.constant dense<0.000000e+00> : vector<1x64xf32>
    %163 = tpu.matmul %161, %50, %cst_75 {dimension_numbers = #tpu.dot_dimension_numbers<[1], [0], [0], [1], [0, 0, 1, 1], [], []>} : vector<1x64xbf16>, vector<64x64xbf16>, vector<1x64xf32> -> vector<1x64xf32>
    %164 = arith.addf %162, %163 : vector<1x64xf32>
    %165 = vector.extract_strided_slice %34 {offsets = [3, 0], sizes = [1, 64], strides = [1, 1]} : vector<8x64xf32> to vector<1x64xf32>
    %cst_76 = arith.constant dense<0.000000e+00> : vector<1x64xf32>
    %166 = tpu.matmul %161, %52, %cst_76 {dimension_numbers = #tpu.dot_dimension_numbers<[1], [0], [0], [1], [0, 0, 1, 1], [], []>} : vector<1x64xbf16>, vector<64x64xbf16>, vector<1x64xf32> -> vector<1x64xf32>
    %167 = arith.addf %165, %166 : vector<1x64xf32>
    %168 = vector.extract_strided_slice %41 {offsets = [3, 0], sizes = [1, 64], strides = [1, 1]} : vector<8x64xf32> to vector<1x64xf32>
    %cst_77 = arith.constant dense<0.000000e+00> : vector<1x64xf32>
    %169 = tpu.matmul %161, %54, %cst_77 {dimension_numbers = #tpu.dot_dimension_numbers<[1], [0], [0], [1], [0, 0, 1, 1], [], []>} : vector<1x64xbf16>, vector<64x64xbf16>, vector<1x64xf32> -> vector<1x64xf32>
    %170 = arith.addf %168, %169 : vector<1x64xf32>
    %171 = vector.extract_strided_slice %48 {offsets = [3, 0], sizes = [1, 64], strides = [1, 1]} : vector<8x64xf32> to vector<1x64xf32>
    %cst_78 = arith.constant dense<0.000000e+00> : vector<1x64xf32>
    %172 = tpu.matmul %161, %56, %cst_78 {dimension_numbers = #tpu.dot_dimension_numbers<[1], [0], [0], [1], [0, 0, 1, 1], [], []>} : vector<1x64xbf16>, vector<64x64xbf16>, vector<1x64xf32> -> vector<1x64xf32>
    %173 = arith.addf %171, %172 : vector<1x64xf32>
    %174 = arith.negf %164 : vector<1x64xf32>
    %175 = math.exp %174 : vector<1x64xf32>
    %cst_79 = arith.constant 1.000000e+00 : f32
    %176 = vector.broadcast %cst_79 : f32 to vector<1x64xf32>
    %177 = arith.addf %176, %175 : vector<1x64xf32>
    %178 = arith.divf %176, %177 : vector<1x64xf32>
    %179 = arith.negf %167 : vector<1x64xf32>
    %180 = math.exp %179 : vector<1x64xf32>
    %cst_80 = arith.constant 1.000000e+00 : f32
    %181 = vector.broadcast %cst_80 : f32 to vector<1x64xf32>
    %182 = arith.addf %181, %180 : vector<1x64xf32>
    %183 = arith.divf %181, %182 : vector<1x64xf32>
    %184 = math.tanh %170 : vector<1x64xf32>
    %185 = arith.negf %173 : vector<1x64xf32>
    %186 = math.exp %185 : vector<1x64xf32>
    %cst_81 = arith.constant 1.000000e+00 : f32
    %187 = vector.broadcast %cst_81 : f32 to vector<1x64xf32>
    %188 = arith.addf %187, %186 : vector<1x64xf32>
    %189 = arith.divf %187, %188 : vector<1x64xf32>
    %190 = arith.mulf %183, %158 : vector<1x64xf32>
    %191 = arith.mulf %178, %184 : vector<1x64xf32>
    %192 = arith.addf %190, %191 : vector<1x64xf32>
    %193 = math.tanh %192 : vector<1x64xf32>
    %194 = arith.mulf %189, %193 : vector<1x64xf32>
    %195 = arith.truncf %194 : vector<1x64xf32> to vector<1x64xbf16>
    %196 = vector.extract_strided_slice %27 {offsets = [4, 0], sizes = [1, 64], strides = [1, 1]} : vector<8x64xf32> to vector<1x64xf32>
    %cst_82 = arith.constant dense<0.000000e+00> : vector<1x64xf32>
    %197 = tpu.matmul %195, %50, %cst_82 {dimension_numbers = #tpu.dot_dimension_numbers<[1], [0], [0], [1], [0, 0, 1, 1], [], []>} : vector<1x64xbf16>, vector<64x64xbf16>, vector<1x64xf32> -> vector<1x64xf32>
    %198 = arith.addf %196, %197 : vector<1x64xf32>
    %199 = vector.extract_strided_slice %34 {offsets = [4, 0], sizes = [1, 64], strides = [1, 1]} : vector<8x64xf32> to vector<1x64xf32>
    %cst_83 = arith.constant dense<0.000000e+00> : vector<1x64xf32>
    %200 = tpu.matmul %195, %52, %cst_83 {dimension_numbers = #tpu.dot_dimension_numbers<[1], [0], [0], [1], [0, 0, 1, 1], [], []>} : vector<1x64xbf16>, vector<64x64xbf16>, vector<1x64xf32> -> vector<1x64xf32>
    %201 = arith.addf %199, %200 : vector<1x64xf32>
    %202 = vector.extract_strided_slice %41 {offsets = [4, 0], sizes = [1, 64], strides = [1, 1]} : vector<8x64xf32> to vector<1x64xf32>
    %cst_84 = arith.constant dense<0.000000e+00> : vector<1x64xf32>
    %203 = tpu.matmul %195, %54, %cst_84 {dimension_numbers = #tpu.dot_dimension_numbers<[1], [0], [0], [1], [0, 0, 1, 1], [], []>} : vector<1x64xbf16>, vector<64x64xbf16>, vector<1x64xf32> -> vector<1x64xf32>
    %204 = arith.addf %202, %203 : vector<1x64xf32>
    %205 = vector.extract_strided_slice %48 {offsets = [4, 0], sizes = [1, 64], strides = [1, 1]} : vector<8x64xf32> to vector<1x64xf32>
    %cst_85 = arith.constant dense<0.000000e+00> : vector<1x64xf32>
    %206 = tpu.matmul %195, %56, %cst_85 {dimension_numbers = #tpu.dot_dimension_numbers<[1], [0], [0], [1], [0, 0, 1, 1], [], []>} : vector<1x64xbf16>, vector<64x64xbf16>, vector<1x64xf32> -> vector<1x64xf32>
    %207 = arith.addf %205, %206 : vector<1x64xf32>
    %208 = arith.negf %198 : vector<1x64xf32>
    %209 = math.exp %208 : vector<1x64xf32>
    %cst_86 = arith.constant 1.000000e+00 : f32
    %210 = vector.broadcast %cst_86 : f32 to vector<1x64xf32>
    %211 = arith.addf %210, %209 : vector<1x64xf32>
    %212 = arith.divf %210, %211 : vector<1x64xf32>
    %213 = arith.negf %201 : vector<1x64xf32>
    %214 = math.exp %213 : vector<1x64xf32>
    %cst_87 = arith.constant 1.000000e+00 : f32
    %215 = vector.broadcast %cst_87 : f32 to vector<1x64xf32>
    %216 = arith.addf %215, %214 : vector<1x64xf32>
    %217 = arith.divf %215, %216 : vector<1x64xf32>
    %218 = math.tanh %204 : vector<1x64xf32>
    %219 = arith.negf %207 : vector<1x64xf32>
    %220 = math.exp %219 : vector<1x64xf32>
    %cst_88 = arith.constant 1.000000e+00 : f32
    %221 = vector.broadcast %cst_88 : f32 to vector<1x64xf32>
    %222 = arith.addf %221, %220 : vector<1x64xf32>
    %223 = arith.divf %221, %222 : vector<1x64xf32>
    %224 = arith.mulf %217, %192 : vector<1x64xf32>
    %225 = arith.mulf %212, %218 : vector<1x64xf32>
    %226 = arith.addf %224, %225 : vector<1x64xf32>
    %227 = math.tanh %226 : vector<1x64xf32>
    %228 = arith.mulf %223, %227 : vector<1x64xf32>
    %229 = arith.truncf %228 : vector<1x64xf32> to vector<1x64xbf16>
    %230 = vector.extract_strided_slice %27 {offsets = [5, 0], sizes = [1, 64], strides = [1, 1]} : vector<8x64xf32> to vector<1x64xf32>
    %cst_89 = arith.constant dense<0.000000e+00> : vector<1x64xf32>
    %231 = tpu.matmul %229, %50, %cst_89 {dimension_numbers = #tpu.dot_dimension_numbers<[1], [0], [0], [1], [0, 0, 1, 1], [], []>} : vector<1x64xbf16>, vector<64x64xbf16>, vector<1x64xf32> -> vector<1x64xf32>
    %232 = arith.addf %230, %231 : vector<1x64xf32>
    %233 = vector.extract_strided_slice %34 {offsets = [5, 0], sizes = [1, 64], strides = [1, 1]} : vector<8x64xf32> to vector<1x64xf32>
    %cst_90 = arith.constant dense<0.000000e+00> : vector<1x64xf32>
    %234 = tpu.matmul %229, %52, %cst_90 {dimension_numbers = #tpu.dot_dimension_numbers<[1], [0], [0], [1], [0, 0, 1, 1], [], []>} : vector<1x64xbf16>, vector<64x64xbf16>, vector<1x64xf32> -> vector<1x64xf32>
    %235 = arith.addf %233, %234 : vector<1x64xf32>
    %236 = vector.extract_strided_slice %41 {offsets = [5, 0], sizes = [1, 64], strides = [1, 1]} : vector<8x64xf32> to vector<1x64xf32>
    %cst_91 = arith.constant dense<0.000000e+00> : vector<1x64xf32>
    %237 = tpu.matmul %229, %54, %cst_91 {dimension_numbers = #tpu.dot_dimension_numbers<[1], [0], [0], [1], [0, 0, 1, 1], [], []>} : vector<1x64xbf16>, vector<64x64xbf16>, vector<1x64xf32> -> vector<1x64xf32>
    %238 = arith.addf %236, %237 : vector<1x64xf32>
    %239 = vector.extract_strided_slice %48 {offsets = [5, 0], sizes = [1, 64], strides = [1, 1]} : vector<8x64xf32> to vector<1x64xf32>
    %cst_92 = arith.constant dense<0.000000e+00> : vector<1x64xf32>
    %240 = tpu.matmul %229, %56, %cst_92 {dimension_numbers = #tpu.dot_dimension_numbers<[1], [0], [0], [1], [0, 0, 1, 1], [], []>} : vector<1x64xbf16>, vector<64x64xbf16>, vector<1x64xf32> -> vector<1x64xf32>
    %241 = arith.addf %239, %240 : vector<1x64xf32>
    %242 = arith.negf %232 : vector<1x64xf32>
    %243 = math.exp %242 : vector<1x64xf32>
    %cst_93 = arith.constant 1.000000e+00 : f32
    %244 = vector.broadcast %cst_93 : f32 to vector<1x64xf32>
    %245 = arith.addf %244, %243 : vector<1x64xf32>
    %246 = arith.divf %244, %245 : vector<1x64xf32>
    %247 = arith.negf %235 : vector<1x64xf32>
    %248 = math.exp %247 : vector<1x64xf32>
    %cst_94 = arith.constant 1.000000e+00 : f32
    %249 = vector.broadcast %cst_94 : f32 to vector<1x64xf32>
    %250 = arith.addf %249, %248 : vector<1x64xf32>
    %251 = arith.divf %249, %250 : vector<1x64xf32>
    %252 = math.tanh %238 : vector<1x64xf32>
    %253 = arith.negf %241 : vector<1x64xf32>
    %254 = math.exp %253 : vector<1x64xf32>
    %cst_95 = arith.constant 1.000000e+00 : f32
    %255 = vector.broadcast %cst_95 : f32 to vector<1x64xf32>
    %256 = arith.addf %255, %254 : vector<1x64xf32>
    %257 = arith.divf %255, %256 : vector<1x64xf32>
    %258 = arith.mulf %251, %226 : vector<1x64xf32>
    %259 = arith.mulf %246, %252 : vector<1x64xf32>
    %260 = arith.addf %258, %259 : vector<1x64xf32>
    %261 = math.tanh %260 : vector<1x64xf32>
    %262 = arith.mulf %257, %261 : vector<1x64xf32>
    %263 = arith.truncf %262 : vector<1x64xf32> to vector<1x64xbf16>
    %264 = vector.extract_strided_slice %27 {offsets = [6, 0], sizes = [1, 64], strides = [1, 1]} : vector<8x64xf32> to vector<1x64xf32>
    %cst_96 = arith.constant dense<0.000000e+00> : vector<1x64xf32>
    %265 = tpu.matmul %263, %50, %cst_96 {dimension_numbers = #tpu.dot_dimension_numbers<[1], [0], [0], [1], [0, 0, 1, 1], [], []>} : vector<1x64xbf16>, vector<64x64xbf16>, vector<1x64xf32> -> vector<1x64xf32>
    %266 = arith.addf %264, %265 : vector<1x64xf32>
    %267 = vector.extract_strided_slice %34 {offsets = [6, 0], sizes = [1, 64], strides = [1, 1]} : vector<8x64xf32> to vector<1x64xf32>
    %cst_97 = arith.constant dense<0.000000e+00> : vector<1x64xf32>
    %268 = tpu.matmul %263, %52, %cst_97 {dimension_numbers = #tpu.dot_dimension_numbers<[1], [0], [0], [1], [0, 0, 1, 1], [], []>} : vector<1x64xbf16>, vector<64x64xbf16>, vector<1x64xf32> -> vector<1x64xf32>
    %269 = arith.addf %267, %268 : vector<1x64xf32>
    %270 = vector.extract_strided_slice %41 {offsets = [6, 0], sizes = [1, 64], strides = [1, 1]} : vector<8x64xf32> to vector<1x64xf32>
    %cst_98 = arith.constant dense<0.000000e+00> : vector<1x64xf32>
    %271 = tpu.matmul %263, %54, %cst_98 {dimension_numbers = #tpu.dot_dimension_numbers<[1], [0], [0], [1], [0, 0, 1, 1], [], []>} : vector<1x64xbf16>, vector<64x64xbf16>, vector<1x64xf32> -> vector<1x64xf32>
    %272 = arith.addf %270, %271 : vector<1x64xf32>
    %273 = vector.extract_strided_slice %48 {offsets = [6, 0], sizes = [1, 64], strides = [1, 1]} : vector<8x64xf32> to vector<1x64xf32>
    %cst_99 = arith.constant dense<0.000000e+00> : vector<1x64xf32>
    %274 = tpu.matmul %263, %56, %cst_99 {dimension_numbers = #tpu.dot_dimension_numbers<[1], [0], [0], [1], [0, 0, 1, 1], [], []>} : vector<1x64xbf16>, vector<64x64xbf16>, vector<1x64xf32> -> vector<1x64xf32>
    %275 = arith.addf %273, %274 : vector<1x64xf32>
    %276 = arith.negf %266 : vector<1x64xf32>
    %277 = math.exp %276 : vector<1x64xf32>
    %cst_100 = arith.constant 1.000000e+00 : f32
    %278 = vector.broadcast %cst_100 : f32 to vector<1x64xf32>
    %279 = arith.addf %278, %277 : vector<1x64xf32>
    %280 = arith.divf %278, %279 : vector<1x64xf32>
    %281 = arith.negf %269 : vector<1x64xf32>
    %282 = math.exp %281 : vector<1x64xf32>
    %cst_101 = arith.constant 1.000000e+00 : f32
    %283 = vector.broadcast %cst_101 : f32 to vector<1x64xf32>
    %284 = arith.addf %283, %282 : vector<1x64xf32>
    %285 = arith.divf %283, %284 : vector<1x64xf32>
    %286 = math.tanh %272 : vector<1x64xf32>
    %287 = arith.negf %275 : vector<1x64xf32>
    %288 = math.exp %287 : vector<1x64xf32>
    %cst_102 = arith.constant 1.000000e+00 : f32
    %289 = vector.broadcast %cst_102 : f32 to vector<1x64xf32>
    %290 = arith.addf %289, %288 : vector<1x64xf32>
    %291 = arith.divf %289, %290 : vector<1x64xf32>
    %292 = arith.mulf %285, %260 : vector<1x64xf32>
    %293 = arith.mulf %280, %286 : vector<1x64xf32>
    %294 = arith.addf %292, %293 : vector<1x64xf32>
    %295 = math.tanh %294 : vector<1x64xf32>
    %296 = arith.mulf %291, %295 : vector<1x64xf32>
    %297 = arith.truncf %296 : vector<1x64xf32> to vector<1x64xbf16>
    %298 = vector.extract_strided_slice %27 {offsets = [7, 0], sizes = [1, 64], strides = [1, 1]} : vector<8x64xf32> to vector<1x64xf32>
    %cst_103 = arith.constant dense<0.000000e+00> : vector<1x64xf32>
    %299 = tpu.matmul %297, %50, %cst_103 {dimension_numbers = #tpu.dot_dimension_numbers<[1], [0], [0], [1], [0, 0, 1, 1], [], []>} : vector<1x64xbf16>, vector<64x64xbf16>, vector<1x64xf32> -> vector<1x64xf32>
    %300 = arith.addf %298, %299 : vector<1x64xf32>
    %301 = vector.extract_strided_slice %34 {offsets = [7, 0], sizes = [1, 64], strides = [1, 1]} : vector<8x64xf32> to vector<1x64xf32>
    %cst_104 = arith.constant dense<0.000000e+00> : vector<1x64xf32>
    %302 = tpu.matmul %297, %52, %cst_104 {dimension_numbers = #tpu.dot_dimension_numbers<[1], [0], [0], [1], [0, 0, 1, 1], [], []>} : vector<1x64xbf16>, vector<64x64xbf16>, vector<1x64xf32> -> vector<1x64xf32>
    %303 = arith.addf %301, %302 : vector<1x64xf32>
    %304 = vector.extract_strided_slice %41 {offsets = [7, 0], sizes = [1, 64], strides = [1, 1]} : vector<8x64xf32> to vector<1x64xf32>
    %cst_105 = arith.constant dense<0.000000e+00> : vector<1x64xf32>
    %305 = tpu.matmul %297, %54, %cst_105 {dimension_numbers = #tpu.dot_dimension_numbers<[1], [0], [0], [1], [0, 0, 1, 1], [], []>} : vector<1x64xbf16>, vector<64x64xbf16>, vector<1x64xf32> -> vector<1x64xf32>
    %306 = arith.addf %304, %305 : vector<1x64xf32>
    %307 = vector.extract_strided_slice %48 {offsets = [7, 0], sizes = [1, 64], strides = [1, 1]} : vector<8x64xf32> to vector<1x64xf32>
    %cst_106 = arith.constant dense<0.000000e+00> : vector<1x64xf32>
    %308 = tpu.matmul %297, %56, %cst_106 {dimension_numbers = #tpu.dot_dimension_numbers<[1], [0], [0], [1], [0, 0, 1, 1], [], []>} : vector<1x64xbf16>, vector<64x64xbf16>, vector<1x64xf32> -> vector<1x64xf32>
    %309 = arith.addf %307, %308 : vector<1x64xf32>
    %310 = arith.negf %300 : vector<1x64xf32>
    %311 = math.exp %310 : vector<1x64xf32>
    %cst_107 = arith.constant 1.000000e+00 : f32
    %312 = vector.broadcast %cst_107 : f32 to vector<1x64xf32>
    %313 = arith.addf %312, %311 : vector<1x64xf32>
    %314 = arith.divf %312, %313 : vector<1x64xf32>
    %315 = arith.negf %303 : vector<1x64xf32>
    %316 = math.exp %315 : vector<1x64xf32>
    %cst_108 = arith.constant 1.000000e+00 : f32
    %317 = vector.broadcast %cst_108 : f32 to vector<1x64xf32>
    %318 = arith.addf %317, %316 : vector<1x64xf32>
    %319 = arith.divf %317, %318 : vector<1x64xf32>
    %320 = math.tanh %306 : vector<1x64xf32>
    %321 = arith.negf %309 : vector<1x64xf32>
    %322 = math.exp %321 : vector<1x64xf32>
    %cst_109 = arith.constant 1.000000e+00 : f32
    %323 = vector.broadcast %cst_109 : f32 to vector<1x64xf32>
    %324 = arith.addf %323, %322 : vector<1x64xf32>
    %325 = arith.divf %323, %324 : vector<1x64xf32>
    %326 = arith.mulf %319, %294 : vector<1x64xf32>
    %327 = arith.mulf %314, %320 : vector<1x64xf32>
    %328 = arith.addf %326, %327 : vector<1x64xf32>
    %329 = math.tanh %328 : vector<1x64xf32>
    %330 = arith.mulf %325, %329 : vector<1x64xf32>
    %331 = math.tanh %330 : vector<1x64xf32>
    %332 = arith.truncf %331 : vector<1x64xf32> to vector<1x64xbf16>
    %c0_110 = arith.constant 0 : index
    %c0_111 = arith.constant 0 : index
    %c0_112 = arith.constant 0 : index
    %333 = vector.load %arg10[%c0_110, %c0_111, %c0_112] : memref<2x64x64xbf16, #tpu.memory_space<vmem>>, vector<1x64x64xbf16>
    %334 = vector.shape_cast %333 : vector<1x64x64xbf16> to vector<64x64xbf16>
    %cst_113 = arith.constant dense<0.000000e+00> : vector<1x64xf32>
    %335 = tpu.matmul %332, %334, %cst_113 {dimension_numbers = #tpu.dot_dimension_numbers<[1], [0], [0], [1], [0, 0, 1, 1], [], []>} : vector<1x64xbf16>, vector<64x64xbf16>, vector<1x64xf32> -> vector<1x64xf32>
    %336 = math.tanh %328 : vector<1x64xf32>
    %337 = arith.truncf %336 : vector<1x64xf32> to vector<1x64xbf16>
    %c1_114 = arith.constant 1 : index
    %c0_115 = arith.constant 0 : index
    %c0_116 = arith.constant 0 : index
    %338 = vector.load %arg10[%c1_114, %c0_115, %c0_116] : memref<2x64x64xbf16, #tpu.memory_space<vmem>>, vector<1x64x64xbf16>
    %339 = vector.shape_cast %338 : vector<1x64x64xbf16> to vector<64x64xbf16>
    %cst_117 = arith.constant dense<0.000000e+00> : vector<1x64xf32>
    %340 = tpu.matmul %337, %339, %cst_117 {dimension_numbers = #tpu.dot_dimension_numbers<[1], [0], [0], [1], [0, 0, 1, 1], [], []>} : vector<1x64xbf16>, vector<64x64xbf16>, vector<1x64xf32> -> vector<1x64xf32>
    %341 = arith.addf %335, %340 : vector<1x64xf32>
    %c0_118 = arith.constant 0 : index
    %c0_119 = arith.constant 0 : index
    %342 = vector.load %arg11[%c0_118, %c0_119] : memref<1x64xf32, #tpu.memory_space<vmem>>, vector<1x64xf32>
    %343 = arith.addf %341, %342 : vector<1x64xf32>
    %c0_120 = arith.constant 0 : index
    %c0_121 = arith.constant 0 : index
    %344 = vector.load %arg12[%c0_120, %c0_121] : memref<64x512xbf16, #tpu.memory_space<vmem>>, vector<64x512xbf16>
    %345 = arith.truncf %16 : vector<196x64xf32> to vector<196x64xbf16>
    %cst_122 = arith.constant dense<0.000000e+00> : vector<196x512xf32>
    %346 = tpu.matmul %345, %344, %cst_122 {dimension_numbers = #tpu.dot_dimension_numbers<[1], [0], [0], [1], [0, 0, 1, 1], [], []>} : vector<196x64xbf16>, vector<64x512xbf16>, vector<196x512xf32> -> vector<196x512xf32>
    %c0_123 = arith.constant 0 : index
    %c0_124 = arith.constant 0 : index
    %347 = vector.load %arg13[%c0_123, %c0_124] : memref<1x512xf32, #tpu.memory_space<vmem>>, vector<1x512xf32>
    %348 = vector.broadcast %347 : vector<1x512xf32> to vector<196x512xf32>
    %349 = arith.addf %346, %348 : vector<196x512xf32>
    %cst_125 = arith.constant 1.000000e+00 : bf16
    %350 = vector.broadcast %cst_125 : bf16 to vector<1x196xbf16>
    %c0_126 = arith.constant 0 : index
    %c0_127 = arith.constant 0 : index
    %351 = vector.load %arg14[%c0_126, %c0_127] : memref<64x512xbf16, #tpu.memory_space<vmem>>, vector<64x512xbf16>
    %352 = arith.truncf %343 : vector<1x64xf32> to vector<1x64xbf16>
    %cst_128 = arith.constant dense<0.000000e+00> : vector<1x512xf32>
    %353 = tpu.matmul %352, %351, %cst_128 {dimension_numbers = #tpu.dot_dimension_numbers<[1], [0], [0], [1], [0, 0, 1, 1], [], []>} : vector<1x64xbf16>, vector<64x512xbf16>, vector<1x512xf32> -> vector<1x512xf32>
    %c0_129 = arith.constant 0 : index
    %c0_130 = arith.constant 0 : index
    %354 = vector.load %arg15[%c0_129, %c0_130] : memref<1x512xf32, #tpu.memory_space<vmem>>, vector<1x512xf32>
    %355 = arith.addf %353, %354 : vector<1x512xf32>
    %356 = vector.broadcast %355 : vector<1x512xf32> to vector<196x512xf32>
    %357 = arith.addf %349, %356 : vector<196x512xf32>
    %358 = math.tanh %357 : vector<196x512xf32>
    %c0_131 = arith.constant 0 : index
    %c0_132 = arith.constant 0 : index
    %359 = vector.load %arg16[%c0_131, %c0_132] : memref<512x1xbf16, #tpu.memory_space<vmem>>, vector<512x1xbf16>
    %360 = arith.truncf %358 : vector<196x512xf32> to vector<196x512xbf16>
    %cst_133 = arith.constant dense<0.000000e+00> : vector<196x1xf32>
    %361 = tpu.matmul %360, %359, %cst_133 {dimension_numbers = #tpu.dot_dimension_numbers<[1], [0], [0], [1], [0, 0, 1, 1], [], []>} : vector<196x512xbf16>, vector<512x1xbf16>, vector<196x1xf32> -> vector<196x1xf32>
    %c0_134 = arith.constant 0 : index
    %c0_135 = arith.constant 0 : index
    %362 = vector.load %arg17[%c0_134, %c0_135] : memref<1x1xf32, #tpu.memory_space<vmem>>, vector<1x1xf32>
    %363 = vector.broadcast %362 : vector<1x1xf32> to vector<196x1xf32>
    %364 = arith.addf %361, %363 : vector<196x1xf32>
    %cst_136 = arith.constant dense<0xFF800000> : vector<1xf32>
    %365 = vector.multi_reduction <maximumf>, %364, %cst_136 [0] : vector<196x1xf32> to vector<1xf32>
    %366 = vector.shape_cast %365 : vector<1xf32> to vector<1x1xf32>
    %367 = vector.broadcast %366 : vector<1x1xf32> to vector<196x1xf32>
    %368 = arith.subf %364, %367 : vector<196x1xf32>
    %369 = math.exp %368 : vector<196x1xf32>
    %370 = vector.broadcast %369 : vector<196x1xf32> to vector<196x64xf32>
    %371 = arith.mulf %370, %16 : vector<196x64xf32>
    %372 = arith.truncf %371 : vector<196x64xf32> to vector<196x64xbf16>
    %cst_137 = arith.constant dense<0.000000e+00> : vector<1x64xf32>
    %373 = tpu.matmul %350, %372, %cst_137 {dimension_numbers = #tpu.dot_dimension_numbers<[1], [0], [0], [1], [0, 0, 1, 1], [], []>} : vector<1x196xbf16>, vector<196x64xbf16>, vector<1x64xf32> -> vector<1x64xf32>
    %374 = arith.truncf %369 : vector<196x1xf32> to vector<196x1xbf16>
    %cst_138 = arith.constant dense<0.000000e+00> : vector<1x1xf32>
    %375 = tpu.matmul %350, %374, %cst_138 {dimension_numbers = #tpu.dot_dimension_numbers<[1], [0], [0], [1], [0, 0, 1, 1], [], []>} : vector<1x196xbf16>, vector<196x1xbf16>, vector<1x1xf32> -> vector<1x1xf32>
    %376 = vector.broadcast %375 : vector<1x1xf32> to vector<1x64xf32>
    %377 = arith.divf %373, %376 : vector<1x64xf32>
    %378 = arith.addf %377, %343 : vector<1x64xf32>
    %c0_139 = arith.constant 0 : index
    %c0_140 = arith.constant 0 : index
    %379 = vector.load %arg14[%c0_139, %c0_140] : memref<64x512xbf16, #tpu.memory_space<vmem>>, vector<64x512xbf16>
    %380 = arith.truncf %378 : vector<1x64xf32> to vector<1x64xbf16>
    %cst_141 = arith.constant dense<0.000000e+00> : vector<1x512xf32>
    %381 = tpu.matmul %380, %379, %cst_141 {dimension_numbers = #tpu.dot_dimension_numbers<[1], [0], [0], [1], [0, 0, 1, 1], [], []>} : vector<1x64xbf16>, vector<64x512xbf16>, vector<1x512xf32> -> vector<1x512xf32>
    %c0_142 = arith.constant 0 : index
    %c0_143 = arith.constant 0 : index
    %382 = vector.load %arg15[%c0_142, %c0_143] : memref<1x512xf32, #tpu.memory_space<vmem>>, vector<1x512xf32>
    %383 = arith.addf %381, %382 : vector<1x512xf32>
    %384 = vector.broadcast %383 : vector<1x512xf32> to vector<196x512xf32>
    %385 = arith.addf %349, %384 : vector<196x512xf32>
    %386 = math.tanh %385 : vector<196x512xf32>
    %c0_144 = arith.constant 0 : index
    %c0_145 = arith.constant 0 : index
    %387 = vector.load %arg16[%c0_144, %c0_145] : memref<512x1xbf16, #tpu.memory_space<vmem>>, vector<512x1xbf16>
    %388 = arith.truncf %386 : vector<196x512xf32> to vector<196x512xbf16>
    %cst_146 = arith.constant dense<0.000000e+00> : vector<196x1xf32>
    %389 = tpu.matmul %388, %387, %cst_146 {dimension_numbers = #tpu.dot_dimension_numbers<[1], [0], [0], [1], [0, 0, 1, 1], [], []>} : vector<196x512xbf16>, vector<512x1xbf16>, vector<196x1xf32> -> vector<196x1xf32>
    %c0_147 = arith.constant 0 : index
    %c0_148 = arith.constant 0 : index
    %390 = vector.load %arg17[%c0_147, %c0_148] : memref<1x1xf32, #tpu.memory_space<vmem>>, vector<1x1xf32>
    %391 = vector.broadcast %390 : vector<1x1xf32> to vector<196x1xf32>
    %392 = arith.addf %389, %391 : vector<196x1xf32>
    %cst_149 = arith.constant dense<0xFF800000> : vector<1xf32>
    %393 = vector.multi_reduction <maximumf>, %392, %cst_149 [0] : vector<196x1xf32> to vector<1xf32>
    %394 = vector.shape_cast %393 : vector<1xf32> to vector<1x1xf32>
    %395 = vector.broadcast %394 : vector<1x1xf32> to vector<196x1xf32>
    %396 = arith.subf %392, %395 : vector<196x1xf32>
    %397 = math.exp %396 : vector<196x1xf32>
    %398 = vector.broadcast %397 : vector<196x1xf32> to vector<196x64xf32>
    %399 = arith.mulf %398, %16 : vector<196x64xf32>
    %400 = arith.truncf %399 : vector<196x64xf32> to vector<196x64xbf16>
    %cst_150 = arith.constant dense<0.000000e+00> : vector<1x64xf32>
    %401 = tpu.matmul %350, %400, %cst_150 {dimension_numbers = #tpu.dot_dimension_numbers<[1], [0], [0], [1], [0, 0, 1, 1], [], []>} : vector<1x196xbf16>, vector<196x64xbf16>, vector<1x64xf32> -> vector<1x64xf32>
    %402 = arith.truncf %397 : vector<196x1xf32> to vector<196x1xbf16>
    %cst_151 = arith.constant dense<0.000000e+00> : vector<1x1xf32>
    %403 = tpu.matmul %350, %402, %cst_151 {dimension_numbers = #tpu.dot_dimension_numbers<[1], [0], [0], [1], [0, 0, 1, 1], [], []>} : vector<1x196xbf16>, vector<196x1xbf16>, vector<1x1xf32> -> vector<1x1xf32>
    %404 = vector.broadcast %403 : vector<1x1xf32> to vector<1x64xf32>
    %405 = arith.divf %401, %404 : vector<1x64xf32>
    %406 = arith.addf %405, %378 : vector<1x64xf32>
    %c0_152 = arith.constant 0 : index
    %c0_153 = arith.constant 0 : index
    %407 = vector.load %arg18[%c0_152, %c0_153] : memref<64x128xbf16, #tpu.memory_space<vmem>>, vector<64x128xbf16>
    %408 = arith.truncf %406 : vector<1x64xf32> to vector<1x64xbf16>
    %cst_154 = arith.constant dense<0.000000e+00> : vector<1x128xf32>
    %409 = tpu.matmul %408, %407, %cst_154 {dimension_numbers = #tpu.dot_dimension_numbers<[1], [0], [0], [1], [0, 0, 1, 1], [], []>} : vector<1x64xbf16>, vector<64x128xbf16>, vector<1x128xf32> -> vector<1x128xf32>
    %c0_155 = arith.constant 0 : index
    %c0_156 = arith.constant 0 : index
    %410 = vector.load %arg19[%c0_155, %c0_156] : memref<1x128xf32, #tpu.memory_space<vmem>>, vector<1x128xf32>
    %411 = arith.addf %409, %410 : vector<1x128xf32>
    %412 = vector.shape_cast %411 : vector<1x128xf32> to vector<1x1x128xf32>
    %c0_157 = arith.constant 0 : index
    %c0_158 = arith.constant 0 : index
    %c0_159 = arith.constant 0 : index
    %413 = vector.load %arg20[%c0_157, %c0_158, %c0_159] : memref<1x1x128xf32, #tpu.memory_space<vmem>>, vector<1x1x128xf32>
    tpu.vector_store %arg20[%c0_157, %c0_158, %c0_159], %412 {strides = array<i32>} : memref<1x1x128xf32, #tpu.memory_space<vmem>>, vector<1x1x128xf32>,
    return
  }
  func.func @transform_0(%arg0: i32) -> (i32, i32, i32) {
    %c0_i32 = arith.constant 0 : i32
    %c0_i32_0 = arith.constant 0 : i32
    %c0_i32_1 = arith.constant 0 : i32
    return %arg0, %c0_i32, %c0_i32_0 : i32, i32, i32
  }
  func.func @transform_1(%arg0: i32) -> (i32, i32, i32) {
    %c0_i32 = arith.constant 0 : i32
    %c0_i32_0 = arith.constant 0 : i32
    %c0_i32_1 = arith.constant 0 : i32
    return %arg0, %c0_i32, %c0_i32_0 : i32, i32, i32
  }
  func.func @transform_2(%arg0: i32) -> (i32, i32) {
    %c0_i32 = arith.constant 0 : i32
    %c0_i32_0 = arith.constant 0 : i32
    %c0_i32_1 = arith.constant 0 : i32
    return %c0_i32, %c0_i32_0 : i32, i32
  }
  func.func @transform_3(%arg0: i32) -> (i32, i32) {
    %c0_i32 = arith.constant 0 : i32
    %c0_i32_0 = arith.constant 0 : i32
    %c0_i32_1 = arith.constant 0 : i32
    return %c0_i32, %c0_i32_0 : i32, i32
  }
  func.func @transform_4(%arg0: i32) -> (i32, i32) {
    %c0_i32 = arith.constant 0 : i32
    %c0_i32_0 = arith.constant 0 : i32
    %c0_i32_1 = arith.constant 0 : i32
    return %c0_i32, %c0_i32_0 : i32, i32
  }
  func.func @transform_5(%arg0: i32) -> (i32, i32) {
    %c0_i32 = arith.constant 0 : i32
    %c0_i32_0 = arith.constant 0 : i32
    %c0_i32_1 = arith.constant 0 : i32
    return %c0_i32, %c0_i32_0 : i32, i32
  }
  func.func @transform_6(%arg0: i32) -> (i32, i32, i32) {
    %c0_i32 = arith.constant 0 : i32
    %c0_i32_0 = arith.constant 0 : i32
    %c0_i32_1 = arith.constant 0 : i32
    %c0_i32_2 = arith.constant 0 : i32
    return %c0_i32, %c0_i32_0, %c0_i32_1 : i32, i32, i32
  }
  func.func @transform_7(%arg0: i32) -> (i32, i32, i32) {
    %c0_i32 = arith.constant 0 : i32
    %c0_i32_0 = arith.constant 0 : i32
    %c0_i32_1 = arith.constant 0 : i32
    %c0_i32_2 = arith.constant 0 : i32
    return %c0_i32, %c0_i32_0, %c0_i32_1 : i32, i32, i32
  }
  func.func @transform_8(%arg0: i32) -> (i32, i32, i32) {
    %c0_i32 = arith.constant 0 : i32
    %c0_i32_0 = arith.constant 0 : i32
    %c0_i32_1 = arith.constant 0 : i32
    %c0_i32_2 = arith.constant 0 : i32
    return %c0_i32, %c0_i32_0, %c0_i32_1 : i32, i32, i32
  }
  func.func @transform_9(%arg0: i32) -> (i32, i32, i32) {
    %c0_i32 = arith.constant 0 : i32
    %c0_i32_0 = arith.constant 0 : i32
    %c0_i32_1 = arith.constant 0 : i32
    %c0_i32_2 = arith.constant 0 : i32
    return %c0_i32, %c0_i32_0, %c0_i32_1 : i32, i32, i32
  }
  func.func @transform_10(%arg0: i32) -> (i32, i32) {
    %c0_i32 = arith.constant 0 : i32
    %c0_i32_0 = arith.constant 0 : i32
    %c0_i32_1 = arith.constant 0 : i32
    return %c0_i32, %c0_i32_0 : i32, i32
  }
  func.func @transform_11(%arg0: i32) -> (i32, i32) {
    %c0_i32 = arith.constant 0 : i32
    %c0_i32_0 = arith.constant 0 : i32
    %c0_i32_1 = arith.constant 0 : i32
    return %c0_i32, %c0_i32_0 : i32, i32
  }
  func.func @transform_12(%arg0: i32) -> (i32, i32) {
    %c0_i32 = arith.constant 0 : i32
    %c0_i32_0 = arith.constant 0 : i32
    %c0_i32_1 = arith.constant 0 : i32
    return %c0_i32, %c0_i32_0 : i32, i32
  }
  func.func @transform_13(%arg0: i32) -> (i32, i32) {
    %c0_i32 = arith.constant 0 : i32
    %c0_i32_0 = arith.constant 0 : i32
    %c0_i32_1 = arith.constant 0 : i32
    return %c0_i32, %c0_i32_0 : i32, i32
  }
  func.func @transform_14(%arg0: i32) -> (i32, i32) {
    %c0_i32 = arith.constant 0 : i32
    %c0_i32_0 = arith.constant 0 : i32
    %c0_i32_1 = arith.constant 0 : i32
    return %c0_i32, %c0_i32_0 : i32, i32
  }
  func.func @transform_15(%arg0: i32) -> (i32, i32) {
    %c0_i32 = arith.constant 0 : i32
    %c0_i32_0 = arith.constant 0 : i32
    %c0_i32_1 = arith.constant 0 : i32
    return %c0_i32, %c0_i32_0 : i32, i32
  }
  func.func @transform_16(%arg0: i32) -> (i32, i32) {
    %c0_i32 = arith.constant 0 : i32
    %c0_i32_0 = arith.constant 0 : i32
    %c0_i32_1 = arith.constant 0 : i32
    return %c0_i32, %c0_i32_0 : i32, i32
  }
  func.func @transform_17(%arg0: i32) -> (i32, i32) {
    %c0_i32 = arith.constant 0 : i32
    %c0_i32_0 = arith.constant 0 : i32
    %c0_i32_1 = arith.constant 0 : i32
    return %c0_i32, %c0_i32_0 : i32, i32
  }
  func.func @transform_18(%arg0: i32) -> (i32, i32) {
    %c0_i32 = arith.constant 0 : i32
    %c0_i32_0 = arith.constant 0 : i32
    %c0_i32_1 = arith.constant 0 : i32
    return %c0_i32, %c0_i32_0 : i32, i32
  }
  func.func @transform_19(%arg0: i32) -> (i32, i32, i32) {
    %c0_i32 = arith.constant 0 : i32
    %c0_i32_0 = arith.constant 0 : i32
    %c0_i32_1 = arith.constant 0 : i32
    return %arg0, %c0_i32, %c0_i32_0 : i32, i32, i32
  }
}

</mosaic_0001>

<bundles_post_ra>
// kernel: vqa_forward.1
= control target key start
LH: loop header
LB: loop body
LE: loop exit
PB: predicated region body
PF: predicated region fallthrough
CT: control target
= control target key end

     0   :  { %s13191_s0 = inlined_call_operand.vmem [shape: f32[2,196,32], index: 0, kind: input, shape index: {}]   ;;  %s13192_s1 = inlined_call_operand.vmem [shape: f32[2,8,32], index: 1, kind: input, shape index: {}]   ;;  %s13193_s2 = inlined_call_operand.vmem [shape: bf16[32,512], index: 2, kind: input, shape index: {}]   ;;  %s13194_s3 = inlined_call_operand.vmem [shape: f32[1,512], index: 3, kind: input, shape index: {}]   ;;  %s13195_s4 = inlined_call_operand.vmem [shape: bf16[512,64], index: 4, kind: input, shape index: {}]   ;;  %s13196_s5 = inlined_call_operand.vmem [shape: f32[1,64], index: 5, kind: input, shape index: {}]   ;;  %s13197_s6 = inlined_call_operand.vmem [shape: bf16[4,32,64], index: 6, kind: input, shape index: {}]   ;;  %s13198_s7 = inlined_call_operand.vmem [shape: f32[4,1,64], index: 7, kind: input, shape index: {}]   ;;  %s13199_s8 = inlined_call_operand.vmem [shape: bf16[4,64,64], index: 8, kind: input, shape index: {}]   ;;  %s13200_s9 = inlined_call_operand.vmem [shape: bf16[2,64,64], index: 9, kind: input, shape index: {}]   ;;  %s13201_s10 = inlined_call_operand.vmem [shape: f32[1,64], index: 10, kind: input, shape index: {}]   ;;  %s13202_s11 = inlined_call_operand.vmem [shape: bf16[64,512], index: 11, kind: input, shape index: {}]   ;;  %s13203_s12 = inlined_call_operand.vmem [shape: f32[1,512], index: 12, kind: input, shape index: {}]   ;;  %s13204_s13 = inlined_call_operand.vmem [shape: bf16[64,512], index: 13, kind: input, shape index: {}]   ;;  %s13205_s14 = inlined_call_operand.vmem [shape: f32[1,512], index: 14, kind: input, shape index: {}]   ;;  %s13206_s15 = inlined_call_operand.vmem [shape: bf16[512,1], index: 15, kind: input, shape index: {}]   ;;  %s13207_s16 = inlined_call_operand.<no memory space> [shape: f32[1,1], index: 16, kind: input, shape index: {}]   ;;  %s13208_s17 = inlined_call_operand.vmem [shape: bf16[64,128], index: 17, kind: input, shape index: {}]   ;;  %s13209_s18 = inlined_call_operand.vmem [shape: f32[1,128], index: 18, kind: input, shape index: {}]   ;;  %s13210_s19 = inlined_call_operand.hbm [shape: f32[2,1,128], index: 19, kind: output, shape index: {}]  }
   0x1   :  { %13405 = sst [smem:[#allocation150_spill]] %s13191_s0  ;;  %v24_v0 = vstv %s13207_s16 }
   0x2   :  { %13406 = sst [smem:[#allocation151_spill]] %s13192_s1  ;;  %25 = vst [vmem:[#allocation2] sm:$0x1] %v24_v0 }
   0x3   :  { %13407 = sst [smem:[#allocation152_spill]] %s13193_s2 }
   0x4   :  { %13408 = sst [smem:[#allocation153_spill]] %s13194_s3 }
   0x5   :  { %26 = vsyncpa [#allocation4], 0 }
   0x6   :  { %28 = vsyncpa [#allocation4 + $0x1], 0  ;;  %s9765_s20 = smov 0   ;;  %s9767_s21 = smov 0  }
   0x7   :  { %s9769_s1 = smov 0   ;;  %s9771_s22 = smov 0  }
   0x8 LB: > { %13409 = sst [smem:[#allocation6_spill]] %s9643_s20  ;;  %s9786_s16 = sadd.s32 4294967295, %s9655_s22   ;;  %s9655_s22 = sphi %s9771_s22, %s13877_s22   ;;  %s9651_s1 = sphi %s9769_s1, %s13879_s1   ;;  %s9647_s21 = sphi %s9767_s21, %s13881_s21   ;;  %s9643_s20 = sphi %s9765_s20, %s13880_s20  }
   0x9   : > { %13410 = sst [smem:[#allocation7_spill]] %s9651_s1  ;;  %s7110_s2 = sadd.s32 4294967294, %s9655_s22  }
   0xa   : > { %13411 = sst [smem:[#allocation8_spill]] %s9655_s22  ;;  %s9790_s23 = sadd.s32 1, %s9655_s22  }
   0xb   : > { %13412 = sst [smem:[#allocation9_spill]] %s9790_s23  ;;  %s450_s24 = sadd.s32 1, %s9651_s1 }
   0xc   : > { %s447_s25 = ssub.s32 %s9655_s22, %s9790_s23  ;;  %p460_p0 = scmp.ne.s32.totalorder %s9651_s1, %s9647_s21 }
   0xd   : > { %p448_p1 = scmp.eq.s32.totalorder %s447_s25, 0  ;;  %p461_p2 = scmp.eq.s32.totalorder %s9786_s16, 1 }
   0xe   : > { %p466_p3 = scmp.ne.s32.totalorder %s9647_s21, %s9643_s20  ;;  %p467_p4 = scmp.eq.s32.totalorder %s7110_s2, 1 }
   0xf   : > { %s9801_s3 = scalar_select %p448_p1, %s9651_s1, %s450_s24  }
  0x10   : > { %p9803_p5 = por %p461_p2, %p460_p0  ;;  %p9807_p6 = por %p467_p4, %p466_p3 }
  0x11   : > { %13413 = sst [smem:[#allocation10_spill]] %s9801_s3  ;;  %p7113_p7 = scmp.ge.s32.totalorder %s9655_s22, 1 }
  0x12   : > { %s13415_s27 = scalar_select %p9807_p6, 1, 0 }
  0x13   : > { %p551_p8 = scmp.lt.s32.totalorder %s9655_s22, 3 }
  0x14   : > { %13416 = sst [smem:[#allocation11_spill]] %s13415_s27 }
  0x15   : > { %p552_p9 = pnand %p7113_p7, %p551_p8 }
  0x17   : > { %555 = sbr.rel (%p552_p9) target bundleno = 4733 (0x127d), region = 96 }
  0x1c   : > { %s13417_s0 = sld [smem:[#allocation152_spill]]  ;;  %p610_p10 = scmp.lt.s32.totalorder %s9786_s16, 1  ;;  %v13218_v3 = vmov 0   ;;  %vm729_vm0 = vcmask 261120   ;;  %v8696_v17 = vld [vmem:[%s13195_s4 + $0xf8] sm:$0xff]   ;;  %v8700_v24 = vld [vmem:[%s13195_s4 + $0xf0] sm:$0xff]  }
  0x1d   : > { %801 = vmatprep.mubr.bf16.mxu0 %v13218_v3  ;;  %921 = vmatprep.mubr.bf16.mxu1 %v13218_v3  ;;  %s13418_s23 = sld [smem:[#allocation150_spill]]  ;;  %v8697_v19 = vld [vmem:[%s13195_s4 + $0xb8] sm:$0xff]   ;;  %v8701_v25 = vld [vmem:[%s13195_s4 + $0xb0] sm:$0xff]   ;;  %v8704_v29 = vld [vmem:[%s13195_s4 + $0x68] sm:$0xff]   ;;  %vm9659_vm1 = vmmov 0   ;;  %vm2126_vm2 = vcmask 523264  }
  0x1e   : > { %s9826_s28 = scalar_select %p610_p10, %s9786_s16, 1  ;;  %8683 = vset.pattern.permute.xlu1 %v13218_v3  ;;  %8682 = vset.pattern.permute.xlu0 %v13218_v3  ;;  %v8698_v20 = vld [vmem:[%s13195_s4 + $0x78] sm:$0xff]   ;;  %v8702_v26 = vld [vmem:[%s13195_s4 + $0x70] sm:$0xff]   ;;  %v8705_v30 = vld [vmem:[%s13195_s4 + $0x28] sm:$0xff]   ;;  %vm5519_vm3 = vcmask 7168   ;;  %vm5814_vm4 = vcmask 556032  }
  0x1f   : > { %v8699_v23 = vld [vmem:[%s13195_s4 + $0x38] sm:$0xff]   ;;  %v8703_v27 = vld [vmem:[%s13195_s4 + $0x30] sm:$0xff]   ;;  %v8706_v33 = vld [vmem:[%s13195_s4 + $0x60] sm:$0xff]   ;;  %s13420_s25 = sld [smem:[#allocation153_spill]]  ;;  %vm5564_vm5 = vcmask 3072   ;;  %vm5818_vm6 = vcmask 1041408  }
  0x20   : > { %s8638_s30 = smul.u32 200, %s9826_s28  ;;  %v8708_v34 = vld [vmem:[%s13195_s4 + $0xe8] sm:$0xff]   ;;  %v8707_v36 = vld [vmem:[%s13195_s4 + $0x20] sm:$0xff]   ;;  %v8710_v38 = vld [vmem:[%s13195_s4 + $0x58] sm:$0xff]   ;;  %s13424_s1 = sld [smem:[#allocation151_spill]] }
  0x21   : > { %v8709_v35 = vld [vmem:[%s13195_s4 + $0xa8] sm:$0xff]   ;;  %v8711_v39 = vld [vmem:[%s13195_s4 + $0x18] sm:$0xff]   ;;  %v8712_v57 = vld [vmem:[%s13195_s4 + $0x50] sm:$0xff]   ;;  %s7428_s3 = sshll.u32 %s9786_s16, 4  ;;  %s9661_s16 = smov [#allocation3]  }
  0x22   : > { %v8684_v1 = vld [vmem:[%s13417_s0 + $0x24] ss:$16 sps:$4 sm:$0xff]   ;;  %v8686_v2 = vld [vmem:[%s13417_s0 + $0x20] ss:$16 sps:$4 sm:$0xff]   ;;  %v8692_v6 = vld [vmem:[%s13417_s0 + $0x2c] ss:$16 sps:$4 sm:$0xff]   ;;  %s13150_s24 = scalar_lea.hbm %s13210_s19, %s7428_s3 }
  0x23   : > { %781 = vmatprep.subr.bf16.mxu0 %v8684_v1  ;;  %8634 = vmatprep.subr.bf16.mxu1 %v8684_v1  ;;  %v8687_v4 = vld [vmem:[%s13417_s0 + $0x4] ss:$16 sps:$4 sm:$0xff]   ;;  %v8689_v5 = vld [vmem:[%s13417_s0] ss:$16 sps:$4 sm:$0xff]   ;;  %s9840_s27 = scalar_lea.vmem %s13418_s23, %s8638_s30  ;;  %v8690_v7 = vld [vmem:[%s13417_s0 + $0x28] ss:$16 sps:$4 sm:$0xff]  }
  0x24   : > { %782 = vmatpush1.bf16.msra.mxu0 %v8686_v2  ;;  %8636 = vmatpush1.bf16.msra.mxu1 %v8686_v2  ;;  %v621_v8 = vld [vmem:[%s9840_s27] sm:$0xff]  ;;  %v622_v9 = vld [vmem:[%s9840_s27 + $0x8] sm:$0xff]  ;;  %v623_v15 = vld [vmem:[%s9840_s27 + $0x10] sm:$0xff]  ;;  %s608_s23 = sand.u32 1, %s9647_s21  }
  0x25   : > { %783 = vmatprep.subr.bf16.mxu0 %v8687_v4  ;;  %8635 = vmatprep.subr.bf16.mxu1 %v8687_v4  ;;  %v645_v10 = vld [vmem:[%s9840_s27 + $0xc0] sm:$0xf]  ;;  %v654_v11 = vpack.c.bf16 %v622_v9, %v621_v8  ;;  %v8695_v13 = vld [vmem:[%s13417_s0 + $0xc] ss:$16 sps:$4 sm:$0xff]   ;;  %v8693_v14 = vld [vmem:[%s13417_s0 + $0x8] ss:$16 sps:$4 sm:$0xff]  }
  0x26   : > { %v9848_v12 = vpack.c.bf16 %v645_v10, %v645_v10  ;;  %v624_v16 = vld [vmem:[%s9840_s27 + $0x18] sm:$0xff]  ;;  %v625_v21 = vld [vmem:[%s9840_s27 + $0x20] sm:$0xff]  ;;  %v626_v22 = vld [vmem:[%s9840_s27 + $0x28] sm:$0xff]  ;;  %s609_s29 = scalar_lea.vmem [#allocation3], %s608_s23 }
  0x27   : > { %v655_v18 = vpack.c.bf16 %v624_v16, %v623_v15  ;;  %v656_v28 = vpack.c.bf16 %v626_v22, %v625_v21  ;;  %v627_v31 = vld [vmem:[%s9840_s27 + $0x30] sm:$0xff]  ;;  %v628_v32 = vld [vmem:[%s9840_s27 + $0x38] sm:$0xff]  ;;  %v629_v40 = vld [vmem:[%s9840_s27 + $0x40] sm:$0xff]  ;;  %s7043_s30 = sshll.u32 %s609_s29, 4  ;;  %s13152_s30 = int_to_ptr.vmem [resolvable:$true] %s7043_s30 }
  0x28   : > { %784 = vmatpush1.bf16.msra.mxu0 %v8689_v5  ;;  %8637 = vmatpush1.bf16.msra.mxu1 %v8689_v5  ;;  %v657_v37 = vpack.c.bf16 %v628_v32, %v627_v31  ;;  %v630_v41 = vld [vmem:[%s9840_s27 + $0x48] sm:$0xff]  ;;  %v631_v43 = vld [vmem:[%s9840_s27 + $0x50] sm:$0xff]  ;;  %v632_v44 = vld [vmem:[%s9840_s27 + $0x58] sm:$0xff] }
  0x29   : > { %942 = vmatprep.subr.bf16.mxu1 %v8692_v6  ;;  %7431 = vmatprep.subr.bf16.mxu0 %v8698_v20  ;;  %v658_v42 = vpack.c.bf16 %v630_v41, %v629_v40  ;;  %v659_v45 = vpack.c.bf16 %v632_v44, %v631_v43  ;;  %v633_v46 = vld [vmem:[%s9840_s27 + $0x60] sm:$0xff]  ;;  %v634_v47 = vld [vmem:[%s9840_s27 + $0x68] sm:$0xff]  ;;  %v635_v49 = vld [vmem:[%s9840_s27 + $0x70] sm:$0xff] }
  0x2a   : > { %v660_v48 = vpack.c.bf16 %v634_v47, %v633_v46  ;;  %v636_v50 = vld [vmem:[%s9840_s27 + $0x78] sm:$0xff]  ;;  %v637_v52 = vld [vmem:[%s9840_s27 + $0x80] sm:$0xff]  ;;  %v638_v53 = vld [vmem:[%s9840_s27 + $0x88] sm:$0xff] }
  0x2b   : > { %7124 = vmatmul.mubr.msk.bf16.vlgmr.msra.gmra.mxu0 %vm729_vm0, %v654_v11  ;;  %7136 = vmatmul.mubr.msk.bf16.vlgmr.msra.gmra.mxu1 %vm729_vm0, %v9848_v12  ;;  %v661_v51 = vpack.c.bf16 %v636_v50, %v635_v49  ;;  %v662_v54 = vpack.c.bf16 %v638_v53, %v637_v52  ;;  %v639_v55 = vld [vmem:[%s9840_s27 + $0x90] sm:$0xff]  ;;  %v640_v56 = vld [vmem:[%s9840_s27 + $0x98] sm:$0xff]  ;;  %v8713_v58 = vld [vmem:[%s13195_s4 + $0xe0] sm:$0xff]  }
  0x2c   : > { %943 = vmatpush1.bf16.msra.mxu1 %v8690_v7  ;;  %811 = vmatprep.mubr.bf16.mxu0 %v13218_v3  ;;  %v8714_v59 = vld [vmem:[%s13195_s4 + $0x10] sm:$0xff]   ;;  %v8715_v60 = vld [vmem:[%s13195_s4 + $0xa0] sm:$0xff]   ;;  %v663_v61 = vpack.c.bf16 %v640_v56, %v639_v55  ;;  %v8716_v62 = vld [vmem:[%s13195_s4 + $0x48] sm:$0xff]  }
  0x2d   : > { %944 = vmatprep.subr.bf16.mxu1 %v8695_v13  ;;  %962 = vmatprep.mubr.bf16.mxu1 %v13218_v3  ;;  %v8717_v63 = vld [vmem:[%s13195_s4 + $0xd8] sm:$0xff]   ;;  %v8718_v0 = vld [vmem:[%s13195_s4 + $0x8] sm:$0xff]   ;;  %v641_v2 = vld [vmem:[%s9840_s27 + $0xa0] sm:$0xff] }
  0x2e   : > { %7432 = vmatpush3.bf16.msra.mxu0 %v8699_v23  ;;  %v8719_v1 = vld [vmem:[%s13195_s4 + $0x98] sm:$0xff]   ;;  %v642_v4 = vld [vmem:[%s9840_s27 + $0xa8] sm:$0xff]  ;;  %v8720_v5 = vld [vmem:[%s13195_s4 + $0x40] sm:$0xff]  }
  0x2f   : > { %7433 = vmatprep.subr.bf16.mxu0 %v8702_v26  ;;  %v8721_v6 = vld [vmem:[%s13195_s4 + $0xd0] sm:$0xff]   ;;  %v8722_v7 = vld [vmem:[%s13195_s4] sm:$0xff]   ;;  %v664_v9 = vpack.c.bf16 %v642_v4, %v641_v2  ;;  %v8724_v10 = vld [vmem:[%s13195_s4 + $0xc8] sm:$0xff]  }
  0x30   : > { %945 = vmatpush1.bf16.msra.mxu1 %v8693_v14  ;;  %v8723_v8 = vld [vmem:[%s13195_s4 + $0x90] sm:$0xff]   ;;  %v644_v14 = vld [vmem:[%s9840_s27 + $0xb8] sm:$0xff]  ;;  %v8726_v15 = vld [vmem:[%s13195_s4 + $0xc0] sm:$0xff]  }
  0x31   : > { %7525 = vmatprep.subr.bf16.mxu1 %v8696_v17  ;;  %v643_v13 = vld [vmem:[%s9840_s27 + $0xb0] sm:$0xff]  ;;  %v8727_v16 = vld [vmem:[%s13195_s4 + $0x80] sm:$0xff]   ;;  %v8728_v55 = vld [vmem:[%s13197_s6 + $0x8] sm:$0xff]   ;;  %s7115_s27 = sshll.u32 %s9826_s28, 3 }
  0x32   : > { %7434 = vmatpush3.bf16.msra.mxu0 %v8703_v27  ;;  %v665_v17 = vpack.c.bf16 %v644_v14, %v643_v13  ;;  %v667_v22 = vld [vmem:[%s13420_s25] sm:$0xf]  ;;  %s618_s28 = scalar_lea.vmem %s13424_s1, %s7115_s27  ;;  %s7031_s25 = scalar_lea.sflag [#allocation4], %s608_s23 }
  0x33   : > { %7125 = vmatmul.mubr.msk.bf16.gmra.mxu0 %vm729_vm0, %v655_v18  ;;  %7137 = vmatmul.mubr.msk.bf16.vlgmr.msra.gmra.mxu1 %vm729_vm0, %v654_v11  ;;  %v8725_v11 = vld [vmem:[%s13195_s4 + $0x88] sm:$0xff]   ;;  %s9595_s1 = scalar_lea.vmem %s13152_s30, 16 }
  0x34   : > { %821 = vmatprep.mubr.bf16.mxu0 %v13218_v3  ;;  %972 = vmatprep.mubr.bf16.mxu1 %v13218_v3  ;;  %p9596_p11 = scmp.ne.s32.totalorder %s13152_s30, %s9595_s1 }
  0x35   : > { %7526 = vmatpush3.bf16.msra.mxu1 %v8697_v19  ;;  %7435 = vmatprep.subr.bf16.mxu0 %v8704_v29  ;;  %v669_v19 = vlaneseq }
  0x36   : > { %7527 = vmatprep.subr.bf16.mxu1 %v8700_v24  ;;  %7436 = vmatpush3.bf16.msra.mxu0 %v8705_v30  ;;  %p9597_p12 = pnand %p9596_p11, %p9803_p5 }
  0x37   : > { %7437 = vmatprep.subr.bf16.mxu0 %v8706_v33  ;;  %v670_v20 = vshrl.u32 %v669_v19, 7 }
  0x38   : > { %p9598_p13 = pneg %p9597_p12 }
  0x39   : > { %7528 = vmatpush3.bf16.msra.mxu1 %v8701_v25  ;;  %v10028_v21 = vsub.s32 0, %v670_v20  ;;  %v10033_v23 = vsub.s32 1, %v670_v20 }
  0x3a   : > { %7529 = vmatprep.subr.bf16.mxu1 %v8708_v34  ;;  %7438 = vmatpush3.bf16.msra.mxu0 %v8707_v36  ;;  %v10048_v34 = vsub.s32 3, %v670_v20 }
  0x3b   : > { %7126 = vmatmul.mubr.msk.bf16.gmra.mxu0 %vm729_vm0, %v656_v28  ;;  %7138 = vmatmul.mubr.msk.bf16.gmra.mxu1 %vm729_vm0, %v655_v18  ;;  %v13220_v18 = vmov 0.0   ;;  %13419 = vst [vmem:[#allocation12_spill] sm:$0xff] %v10028_v21  ;;  %13421 = vst [vmem:[#allocation13_spill] sm:$0xff] %v10033_v23  ;;  %v10041_v26 = vrot.slane %v667_v22, %v10033_v23 }
  0x3c   : > { %831 = vmatprep.mubr.bf16.mxu0 %v13218_v3  ;;  %982 = vmatprep.mubr.bf16.mxu1 %v13218_v3  ;;  %13422 = vst [vmem:[#allocation14_spill] sm:$0xff] %v10048_v34 }
  0x3d   : > { %7530 = vmatpush3.bf16.msra.mxu1 %v8709_v35  ;;  %7439 = vmatprep.subr.bf16.mxu0 %v8710_v38 }
  0x3e   : > { %7440 = vmatpush3.bf16.msra.mxu0 %v8711_v39  ;;  %7531 = vmatprep.subr.bf16.mxu1 %v8713_v58 }
  0x3f   : > { %7441 = vmatprep.subr.bf16.mxu0 %v8712_v57 }
  0x41   : > { %7532 = vmatpush3.bf16.msra.mxu1 %v8715_v60 }
  0x42   : > { %7442 = vmatpush3.bf16.msra.mxu0 %v8714_v59  ;;  %7533 = vmatprep.subr.bf16.mxu1 %v8717_v63 }
  0x43   : > { %7127 = vmatmul.mubr.msk.bf16.gmra.mxu0 %vm729_vm0, %v657_v37  ;;  %7139 = vmatmul.mubr.msk.bf16.gmra.mxu1 %vm729_vm0, %v656_v28 }
  0x44   : > { %841 = vmatprep.mubr.bf16.mxu0 %v13218_v3  ;;  %992 = vmatprep.mubr.bf16.mxu1 %v13218_v3 }
  0x45   : > { %7443 = vmatprep.subr.bf16.mxu0 %v8716_v62  ;;  %7534 = vmatpush3.bf16.msra.mxu1 %v8719_v1 }
  0x46   : > { %7444 = vmatpush3.bf16.msra.mxu0 %v8718_v0  ;;  %7535 = vmatprep.subr.bf16.mxu1 %v8721_v6 }
  0x47   : > { %7445 = vmatprep.subr.bf16.mxu0 %v8720_v5 }
  0x49   : > { %7536 = vmatpush3.bf16.msra.mxu1 %v8723_v8 }
  0x4a   : > { %7446 = vmatpush3.bf16.msra.mxu0 %v8722_v7  ;;  %7537 = vmatprep.subr.bf16.mxu1 %v8724_v10  ;;  %v8730_v7 = vld [vmem:[%s13197_s6] sm:$0xff]  }
  0x4b   : > { %7128 = vmatmul.mubr.msk.bf16.gmra.mxu0 %vm729_vm0, %v658_v42  ;;  %7140 = vmatmul.mubr.msk.bf16.gmra.mxu1 %vm729_vm0, %v657_v37  ;;  %v10050_v37 = vsub.s32 2, %v670_v20 }
  0x4c   : > { %851 = vmatprep.mubr.bf16.mxu0 %v13218_v3  ;;  %1002 = vmatprep.mubr.bf16.mxu1 %v13218_v3 }
  0x4d   : > { %7538 = vmatpush3.bf16.msra.mxu1 %v8725_v11  ;;  %8182 = vmatprep.subr.bf16.mxu0 %v13220_v18  ;;  %13423 = vst [vmem:[#allocation15_spill] sm:$0xff] %v10050_v37  ;;  %v10058_v47 = vrot.slane %v667_v22, %v10050_v37 }
  0x4e   : > { %7539 = vmatprep.subr.bf16.mxu1 %v8726_v15 }
  0x51   : > { %7540 = vmatpush3.bf16.msra.mxu1 %v8727_v16 }
  0x52   : > { %8190 = vmatprep.subr.bf16.mxu1 %v13220_v18 }
  0x53   : > { %7129 = vmatmul.mubr.msk.bf16.gmra.mxu0 %vm729_vm0, %v659_v45  ;;  %7141 = vmatmul.mubr.msk.bf16.gmra.mxu1 %vm729_vm0, %v658_v42 }
  0x54   : > { %861 = vmatprep.mubr.bf16.mxu0 %v13218_v3  ;;  %1012 = vmatprep.mubr.bf16.mxu1 %v13218_v3 }
  0x5b   : > { %7130 = vmatmul.mubr.msk.bf16.gmra.mxu0 %vm729_vm0, %v660_v48  ;;  %7142 = vmatmul.mubr.msk.bf16.gmra.mxu1 %vm729_vm0, %v659_v45  ;;  %v10054_v45 = vrot.slane %v667_v22, %v10048_v34 }
  0x5c   : > { %871 = vmatprep.mubr.bf16.mxu0 %v13218_v3  ;;  %1022 = vmatprep.mubr.bf16.mxu1 %v13218_v3 }
  0x63   : > { %7131 = vmatmul.mubr.msk.bf16.gmra.mxu0 %vm729_vm0, %v661_v51  ;;  %7143 = vmatmul.mubr.msk.bf16.gmra.mxu1 %vm729_vm0, %v660_v48 }
  0x64   : > { %881 = vmatprep.mubr.bf16.mxu0 %v13218_v3  ;;  %1032 = vmatprep.mubr.bf16.mxu1 %v13218_v3 }
  0x6b   : > { %7132 = vmatmul.mubr.msk.bf16.gmra.mxu0 %vm729_vm0, %v662_v54  ;;  %7144 = vmatmul.mubr.msk.bf16.gmra.mxu1 %vm729_vm0, %v661_v51 }
  0x6c   : > { %891 = vmatprep.mubr.bf16.mxu0 %v13218_v3  ;;  %1042 = vmatprep.mubr.bf16.mxu1 %v13218_v3 }
  0x73   : > { %7133 = vmatmul.mubr.msk.bf16.gmra.mxu0 %vm729_vm0, %v663_v61  ;;  %7145 = vmatmul.mubr.msk.bf16.gmra.mxu1 %vm729_vm0, %v662_v54 }
  0x74   : > { %901 = vmatprep.mubr.bf16.mxu0 %v13218_v3  ;;  %1052 = vmatprep.mubr.bf16.mxu1 %v13218_v3 }
  0x7b   : > { %7134 = vmatmul.mubr.msk.bf16.gmra.mxu0 %vm729_vm0, %v664_v9  ;;  %7146 = vmatmul.mubr.msk.bf16.gmra.mxu1 %vm729_vm0, %v663_v61 }
  0x7c   : > { %911 = vmatprep.mubr.bf16.mxu0 %v13218_v3  ;;  %1062 = vmatprep.mubr.bf16.mxu1 %v13218_v3 }
  0x83   : > { %7135 = vmatmul.mubr.msk.bf16.gmra.mxu0 %vm729_vm0, %v665_v17  ;;  %7147 = vmatmul.mubr.msk.bf16.gmra.mxu1 %vm729_vm0, %v664_v9 }
  0x84   : > { %1072 = vmatprep.mubr.bf16.mxu1 %v13218_v3 }
  0x8b   : > { %7148 = vmatmul.mubr.msk.bf16.gmra.mxu1 %vm729_vm0, %v665_v17 }
  0x8c   : > { %1082 = vmatprep.mubr.bf16.mxu1 %v13218_v3 }
  0x93   : > { %7149 = vmatmul.mubr.msk.bf16.gmra.mxu1 %vm729_vm0, %v9848_v12  ;;  %v10038_v12 = vrot.slane %v667_v22, %v10028_v21  ;;  %v8729_v22 = vld [vmem:[%s13197_s6 + $0x18] sm:$0xff]  }
  0xeb   : > { %v803_v24 = vpop.f32.mrf.mxu0  ;;  %v10035_v25 = vpop.f32.mrf.mxu1 }
  0xec   : > { %v804_v29 = vadd.f32 %v803_v24, %v10038_v12 }
  0xed   : > { %v805_v27 = vpop.f32.mrf.mxu0  ;;  %v10043_v28 = vpop.f32.mrf.mxu1 }
  0xee   : > { %v806_v30 = vadd.f32 %v805_v27, %v10041_v26  ;;  %v1091_v38 = vmax.f32 %v804_v29, 0.0 }
  0xef   : > { %v807_v31 = vpop.f32.mrf.mxu0  ;;  %v927_v32 = vpop.f32.mrf.mxu1 }
  0xf0   : > { %v808_v33 = vadd.f32 %v807_v31, %v10038_v12  ;;  %v1092_v41 = vmax.f32 %v806_v30, 0.0 }
  0xf1   : > { %v809_v35 = vpop.f32.mrf.mxu0  ;;  %v928_v36 = vpop.f32.mrf.mxu1 }
  0xf2   : > { %v1095_v39 = vmax.f32 %v808_v33, 0.0  ;;  %v810_v40 = vadd.f32 %v809_v35, %v10041_v26 }
  0xf3   : > { %v813_v42 = vpop.f32.mrf.mxu0  ;;  %v964_v43 = vpop.f32.mrf.mxu1 }
  0xf4   : > { %v1096_v44 = vmax.f32 %v810_v40, 0.0  ;;  %v814_v46 = vadd.f32 %v813_v42, %v10038_v12  ;;  %v1255_v50 = vpack.c.bf16 %v1095_v39, %v1091_v38  ;;  %v965_v60 = vadd.f32 %v964_v43, %v10058_v47  ;;  %v8732_v43 = vld [vmem:[%s13197_s6 + $0x10] sm:$0xff]  }
  0xf5   : > { %v815_v48 = vpop.f32.mrf.mxu0  ;;  %v966_v49 = vpop.f32.mrf.mxu1 }
  0xf6   : > { %v816_v51 = vadd.f32 %v815_v48, %v10041_v26  ;;  %v1256_v54 = vpack.c.bf16 %v1096_v44, %v1092_v41  ;;  %v967_v56 = vadd.f32 %v966_v49, %v10054_v45  ;;  %v1099_v59 = vmax.f32 %v814_v46, 0.0 }
  0xf7   : > { %v817_v52 = vpop.f32.mrf.mxu0  ;;  %v968_v53 = vpop.f32.mrf.mxu1  ;;  %v1093_v11 = vmax.f32 %v965_v60, 0.0 }
  0xf8   : > { %v818_v57 = vadd.f32 %v817_v52, %v10038_v12  ;;  %v969_v58 = vadd.f32 %v968_v53, %v10058_v47  ;;  %1538 = vmatprep.mubr.bf16.mxu0 %v1256_v54  ;;  %v1100_v63 = vmax.f32 %v816_v51, 0.0  ;;  %v1094_v8 = vmax.f32 %v967_v56, 0.0 }
  0xf9   : > { %v819_v61 = vpop.f32.mrf.mxu0  ;;  %v970_v62 = vpop.f32.mrf.mxu1  ;;  %1539 = vmatmul.mubr.bf16.vlgmr.msra.gmra.mxu0 %v1255_v50 }
  0xfa   : > { %v1103_v0 = vmax.f32 %v818_v57, 0.0  ;;  %v820_v1 = vadd.f32 %v819_v61, %v10041_v26  ;;  %v971_v2 = vadd.f32 %v970_v62, %v10054_v45  ;;  %v1097_v4 = vmax.f32 %v969_v58, 0.0  ;;  %8183 = vmatpush3.bf16.msra.mxu0 %v8728_v55 }
  0xfb   : > { %v823_v5 = vpop.f32.mrf.mxu0  ;;  %v974_v6 = vpop.f32.mrf.mxu1  ;;  %8184 = vmatprep.subr.bf16.mxu0 %v13220_v18 }
  0xfc   : > { %v1104_v9 = vmax.f32 %v820_v1, 0.0  ;;  %v1098_v10 = vmax.f32 %v971_v2, 0.0  ;;  %v824_v13 = vadd.f32 %v823_v5, %v10038_v12  ;;  %v1259_v16 = vpack.c.bf16 %v1103_v0, %v1099_v59 }
  0xfd   : > { %v825_v14 = vpop.f32.mrf.mxu0  ;;  %v976_v15 = vpop.f32.mrf.mxu1  ;;  %v1257_v24 = vpack.c.bf16 %v1097_v4, %v1093_v11  ;;  %v975_v35 = vadd.f32 %v974_v6, %v10058_v47 }
  0xfe   : > { %v826_v17 = vadd.f32 %v825_v14, %v10041_v26  ;;  %v1260_v19 = vpack.c.bf16 %v1104_v9, %v1100_v63  ;;  %v1258_v20 = vpack.c.bf16 %v1098_v10, %v1094_v8  ;;  %8185 = vmatpush3.bf16.msra.mxu0 %v8730_v7  ;;  %v977_v30 = vadd.f32 %v976_v15, %v10054_v45 }
  0xff   : > { %v827_v27 = vpop.f32.mrf.mxu0  ;;  %v978_v29 = vpop.f32.mrf.mxu1  ;;  %v1107_v33 = vmax.f32 %v824_v13, 0.0  ;;  %8198 = vmatprep.subr.bf16.mxu0 %v13220_v18  ;;  %v1101_v52 = vmax.f32 %v975_v35, 0.0 }
 0x100   : > { %v828_v31 = vadd.f32 %v827_v27, %v10038_v12  ;;  %v979_v32 = vadd.f32 %v978_v29, %v10058_v47  ;;  %1546 = vmatprep.mubr.bf16.mxu0 %v1260_v19  ;;  %1674 = vmatprep.mubr.bf16.mxu1 %v1258_v20  ;;  %v1108_v39 = vmax.f32 %v826_v17, 0.0  ;;  %v1102_v49 = vmax.f32 %v977_v30, 0.0 }
 0x101   : > { %v829_v36 = vpop.f32.mrf.mxu0  ;;  %v980_v38 = vpop.f32.mrf.mxu1  ;;  %1675 = vmatmul.mubr.bf16.vlgmr.msra.gmra.mxu1 %v1257_v24  ;;  %1547 = vmatmul.mubr.bf16.gmra.mxu0 %v1259_v16 }
 0x102   : > { %v1111_v40 = vmax.f32 %v828_v31, 0.0  ;;  %v830_v41 = vadd.f32 %v829_v36, %v10041_v26  ;;  %v981_v42 = vadd.f32 %v980_v38, %v10054_v45  ;;  %8191 = vmatpush3.bf16.msra.mxu1 %v8729_v22  ;;  %v1105_v44 = vmax.f32 %v979_v32, 0.0 }
 0x103   : > { %v833_v46 = vpop.f32.mrf.mxu0  ;;  %v984_v48 = vpop.f32.mrf.mxu1  ;;  %8192 = vmatprep.subr.bf16.mxu1 %v13220_v18 }
 0x104   : > { %v1112_v50 = vmax.f32 %v830_v41, 0.0  ;;  %v1106_v51 = vmax.f32 %v981_v42, 0.0  ;;  %v834_v53 = vadd.f32 %v833_v46, %v10038_v12  ;;  %v1263_v56 = vpack.c.bf16 %v1111_v40, %v1107_v33 }
 0x105   : > { %v835_v54 = vpop.f32.mrf.mxu0  ;;  %v986_v55 = vpop.f32.mrf.mxu1  ;;  %v1261_v60 = vpack.c.bf16 %v1105_v44, %v1101_v52  ;;  %v985_v4 = vadd.f32 %v984_v48, %v10058_v47 }
 0x106   : > { %v836_v57 = vadd.f32 %v835_v54, %v10041_v26  ;;  %v1264_v58 = vpack.c.bf16 %v1112_v50, %v1108_v39  ;;  %v1262_v59 = vpack.c.bf16 %v1106_v51, %v1102_v49  ;;  %8193 = vmatpush3.bf16.msra.mxu1 %v8732_v43  ;;  %v987_v63 = vadd.f32 %v986_v55, %v10054_v45 }
 0x107   : > { %v837_v61 = vpop.f32.mrf.mxu0  ;;  %v988_v62 = vpop.f32.mrf.mxu1  ;;  %8206 = vmatprep.subr.bf16.mxu1 %v13220_v18  ;;  %v1115_v2 = vmax.f32 %v834_v53, 0.0  ;;  %v1109_v19 = vmax.f32 %v985_v4, 0.0 }
 0x108   : > { %v838_v0 = vadd.f32 %v837_v61, %v10038_v12  ;;  %v989_v1 = vadd.f32 %v988_v62, %v10058_v47  ;;  %1554 = vmatprep.mubr.bf16.mxu0 %v1264_v58  ;;  %1682 = vmatprep.mubr.bf16.mxu1 %v1262_v59  ;;  %v1116_v7 = vmax.f32 %v836_v57, 0.0  ;;  %v1110_v15 = vmax.f32 %v987_v63, 0.0 }
 0x109   : > { %v839_v5 = vpop.f32.mrf.mxu0  ;;  %v990_v6 = vpop.f32.mrf.mxu1  ;;  %1683 = vmatmul.mubr.bf16.gmra.mxu1 %v1261_v60  ;;  %1555 = vmatmul.mubr.bf16.gmra.mxu0 %v1263_v56 }
 0x10a   : > { %v1119_v8 = vmax.f32 %v838_v0, 0.0  ;;  %v840_v9 = vadd.f32 %v839_v5, %v10041_v26  ;;  %v991_v10 = vadd.f32 %v990_v6, %v10054_v45  ;;  %v1113_v11 = vmax.f32 %v989_v1, 0.0 }
 0x10b   : > { %v843_v13 = vpop.f32.mrf.mxu0  ;;  %v994_v14 = vpop.f32.mrf.mxu1 }
 0x10c   : > { %v1120_v16 = vmax.f32 %v840_v9, 0.0  ;;  %v1114_v17 = vmax.f32 %v991_v10, 0.0  ;;  %v844_v20 = vadd.f32 %v843_v13, %v10038_v12  ;;  %v1267_v27 = vpack.c.bf16 %v1119_v8, %v1115_v2 }
 0x10d   : > { %v845_v22 = vpop.f32.mrf.mxu0  ;;  %v996_v24 = vpop.f32.mrf.mxu1  ;;  %v1265_v32 = vpack.c.bf16 %v1113_v11, %v1109_v19  ;;  %v995_v41 = vadd.f32 %v994_v14, %v10058_v47 }
 0x10e   : > { %v846_v29 = vadd.f32 %v845_v22, %v10041_v26  ;;  %v1268_v30 = vpack.c.bf16 %v1120_v16, %v1116_v7  ;;  %v1266_v31 = vpack.c.bf16 %v1114_v17, %v1110_v15  ;;  %v997_v36 = vadd.f32 %v996_v24, %v10054_v45 }
 0x10f   : > { %v847_v33 = vpop.f32.mrf.mxu0  ;;  %v998_v35 = vpop.f32.mrf.mxu1  ;;  %v1123_v40 = vmax.f32 %v844_v20, 0.0  ;;  %v1117_v56 = vmax.f32 %v995_v41, 0.0 }
 0x110   : > { %v848_v38 = vadd.f32 %v847_v33, %v10038_v12  ;;  %v999_v39 = vadd.f32 %v998_v35, %v10058_v47  ;;  %1562 = vmatprep.mubr.bf16.mxu0 %v1268_v30  ;;  %1690 = vmatprep.mubr.bf16.mxu1 %v1266_v31  ;;  %v1124_v44 = vmax.f32 %v846_v29, 0.0  ;;  %v1118_v53 = vmax.f32 %v997_v36, 0.0 }
 0x111   : > { %v849_v42 = vpop.f32.mrf.mxu0  ;;  %v1000_v43 = vpop.f32.mrf.mxu1  ;;  %1691 = vmatmul.mubr.bf16.gmra.mxu1 %v1265_v32  ;;  %1563 = vmatmul.mubr.bf16.gmra.mxu0 %v1267_v27 }
 0x112   : > { %v1127_v46 = vmax.f32 %v848_v38, 0.0  ;;  %v850_v48 = vadd.f32 %v849_v42, %v10041_v26  ;;  %v1001_v49 = vadd.f32 %v1000_v43, %v10054_v45  ;;  %v1121_v50 = vmax.f32 %v999_v39, 0.0 }
 0x113   : > { %v853_v51 = vpop.f32.mrf.mxu0  ;;  %v1004_v52 = vpop.f32.mrf.mxu1 }
 0x114   : > { %v1128_v54 = vmax.f32 %v850_v48, 0.0  ;;  %v1122_v55 = vmax.f32 %v1001_v49, 0.0  ;;  %v854_v57 = vadd.f32 %v853_v51, %v10038_v12  ;;  %v1271_v60 = vpack.c.bf16 %v1127_v46, %v1123_v40 }
 0x115   : > { %v855_v58 = vpop.f32.mrf.mxu0  ;;  %v1006_v59 = vpop.f32.mrf.mxu1  ;;  %v1269_v0 = vpack.c.bf16 %v1121_v50, %v1117_v56  ;;  %v1005_v8 = vadd.f32 %v1004_v52, %v10058_v47 }
 0x116   : > { %v856_v61 = vadd.f32 %v855_v58, %v10041_v26  ;;  %v1272_v62 = vpack.c.bf16 %v1128_v54, %v1124_v44  ;;  %v1270_v63 = vpack.c.bf16 %v1122_v55, %v1118_v53  ;;  %v1007_v4 = vadd.f32 %v1006_v59, %v10054_v45 }
 0x117   : > { %v857_v1 = vpop.f32.mrf.mxu0  ;;  %v1008_v2 = vpop.f32.mrf.mxu1  ;;  %v1131_v7 = vmax.f32 %v854_v57, 0.0  ;;  %v1125_v27 = vmax.f32 %v1005_v8, 0.0 }
 0x118   : > { %v858_v5 = vadd.f32 %v857_v1, %v10038_v12  ;;  %v1009_v6 = vadd.f32 %v1008_v2, %v10058_v47  ;;  %1570 = vmatprep.mubr.bf16.mxu0 %v1272_v62  ;;  %1698 = vmatprep.mubr.bf16.mxu1 %v1270_v63  ;;  %v1132_v11 = vmax.f32 %v856_v61, 0.0  ;;  %v1126_v20 = vmax.f32 %v1007_v4, 0.0 }
 0x119   : > { %v859_v9 = vpop.f32.mrf.mxu0  ;;  %v1010_v10 = vpop.f32.mrf.mxu1  ;;  %1699 = vmatmul.mubr.bf16.gmra.mxu1 %v1269_v0  ;;  %1571 = vmatmul.mubr.bf16.gmra.mxu0 %v1271_v60 }
 0x11a   : > { %v1135_v13 = vmax.f32 %v858_v5, 0.0  ;;  %v860_v14 = vadd.f32 %v859_v9, %v10041_v26  ;;  %v1011_v15 = vadd.f32 %v1010_v10, %v10054_v45  ;;  %v1129_v16 = vmax.f32 %v1009_v6, 0.0 }
 0x11b   : > { %v863_v17 = vpop.f32.mrf.mxu0  ;;  %v1014_v19 = vpop.f32.mrf.mxu1 }
 0x11c   : > { %v1136_v22 = vmax.f32 %v860_v14, 0.0  ;;  %v1130_v24 = vmax.f32 %v1011_v15, 0.0  ;;  %v864_v29 = vadd.f32 %v863_v17, %v10038_v12  ;;  %v1275_v32 = vpack.c.bf16 %v1135_v13, %v1131_v7 }
 0x11d   : > { %v865_v30 = vpop.f32.mrf.mxu0  ;;  %v1016_v31 = vpop.f32.mrf.mxu1  ;;  %v1273_v38 = vpack.c.bf16 %v1129_v16, %v1125_v27  ;;  %v1015_v46 = vadd.f32 %v1014_v19, %v10058_v47 }
 0x11e   : > { %v866_v33 = vadd.f32 %v865_v30, %v10041_v26  ;;  %v1276_v35 = vpack.c.bf16 %v1136_v22, %v1132_v11  ;;  %v1274_v36 = vpack.c.bf16 %v1130_v24, %v1126_v20  ;;  %v1017_v41 = vadd.f32 %v1016_v31, %v10054_v45 }
 0x11f   : > { %v867_v39 = vpop.f32.mrf.mxu0  ;;  %v1018_v40 = vpop.f32.mrf.mxu1  ;;  %v1139_v44 = vmax.f32 %v864_v29, 0.0  ;;  %v1133_v60 = vmax.f32 %v1015_v46, 0.0 }
 0x120   : > { %v868_v42 = vadd.f32 %v867_v39, %v10038_v12  ;;  %v1019_v43 = vadd.f32 %v1018_v40, %v10058_v47  ;;  %1578 = vmatprep.mubr.bf16.mxu0 %v1276_v35  ;;  %1706 = vmatprep.mubr.bf16.mxu1 %v1274_v36  ;;  %v1140_v50 = vmax.f32 %v866_v33, 0.0  ;;  %v1134_v57 = vmax.f32 %v1017_v41, 0.0 }
 0x121   : > { %v869_v48 = vpop.f32.mrf.mxu0  ;;  %v1020_v49 = vpop.f32.mrf.mxu1  ;;  %1707 = vmatmul.mubr.bf16.gmra.mxu1 %v1273_v38  ;;  %1579 = vmatmul.mubr.bf16.gmra.mxu0 %v1275_v32 }
 0x122   : > { %v1143_v51 = vmax.f32 %v868_v42, 0.0  ;;  %v870_v52 = vadd.f32 %v869_v48, %v10041_v26  ;;  %v1021_v53 = vadd.f32 %v1020_v49, %v10054_v45  ;;  %v1137_v54 = vmax.f32 %v1019_v43, 0.0 }
 0x123   : > { %v873_v55 = vpop.f32.mrf.mxu0  ;;  %v1024_v56 = vpop.f32.mrf.mxu1 }
 0x124   : > { %v1144_v58 = vmax.f32 %v870_v52, 0.0  ;;  %v1138_v59 = vmax.f32 %v1021_v53, 0.0  ;;  %v874_v61 = vadd.f32 %v873_v55, %v10038_v12  ;;  %v1279_v0 = vpack.c.bf16 %v1143_v51, %v1139_v44 }
 0x125   : > { %v875_v62 = vpop.f32.mrf.mxu0  ;;  %v1026_v63 = vpop.f32.mrf.mxu1  ;;  %v1277_v5 = vpack.c.bf16 %v1137_v54, %v1133_v60  ;;  %v1025_v13 = vadd.f32 %v1024_v56, %v10058_v47 }
 0x126   : > { %v876_v1 = vadd.f32 %v875_v62, %v10041_v26  ;;  %v1280_v2 = vpack.c.bf16 %v1144_v58, %v1140_v50  ;;  %v1278_v4 = vpack.c.bf16 %v1138_v59, %v1134_v57  ;;  %v1027_v8 = vadd.f32 %v1026_v63, %v10054_v45 }
 0x127   : > { %v877_v6 = vpop.f32.mrf.mxu0  ;;  %v1028_v7 = vpop.f32.mrf.mxu1  ;;  %v1147_v11 = vmax.f32 %v874_v61, 0.0  ;;  %v1141_v32 = vmax.f32 %v1025_v13, 0.0 }
 0x128   : > { %v878_v9 = vadd.f32 %v877_v6, %v10038_v12  ;;  %v1029_v10 = vadd.f32 %v1028_v7, %v10058_v47  ;;  %1586 = vmatprep.mubr.bf16.mxu0 %v1280_v2  ;;  %1714 = vmatprep.mubr.bf16.mxu1 %v1278_v4  ;;  %v1148_v16 = vmax.f32 %v876_v1, 0.0  ;;  %v1142_v29 = vmax.f32 %v1027_v8, 0.0 }
 0x129   : > { %v879_v14 = vpop.f32.mrf.mxu0  ;;  %v1030_v15 = vpop.f32.mrf.mxu1  ;;  %1715 = vmatmul.mubr.bf16.gmra.mxu1 %v1277_v5  ;;  %1587 = vmatmul.mubr.bf16.gmra.mxu0 %v1279_v0 }
 0x12a   : > { %v1151_v17 = vmax.f32 %v878_v9, 0.0  ;;  %v880_v19 = vadd.f32 %v879_v14, %v10041_v26  ;;  %v1031_v20 = vadd.f32 %v1030_v15, %v10054_v45  ;;  %v1145_v22 = vmax.f32 %v1029_v10, 0.0 }
 0x12b   : > { %v883_v24 = vpop.f32.mrf.mxu0  ;;  %v1034_v27 = vpop.f32.mrf.mxu1 }
 0x12c   : > { %v1152_v30 = vmax.f32 %v880_v19, 0.0  ;;  %v1146_v31 = vmax.f32 %v1031_v20, 0.0  ;;  %v884_v33 = vadd.f32 %v883_v24, %v10038_v12  ;;  %v1283_v38 = vpack.c.bf16 %v1151_v17, %v1147_v11 }
 0x12d   : > { %v885_v35 = vpop.f32.mrf.mxu0  ;;  %v1036_v36 = vpop.f32.mrf.mxu1  ;;  %v1281_v42 = vpack.c.bf16 %v1145_v22, %v1141_v32  ;;  %v1035_v51 = vadd.f32 %v1034_v27, %v10058_v47 }
 0x12e   : > { %v886_v39 = vadd.f32 %v885_v35, %v10041_v26  ;;  %v1284_v40 = vpack.c.bf16 %v1152_v30, %v1148_v16  ;;  %v1282_v41 = vpack.c.bf16 %v1146_v31, %v1142_v29  ;;  %v1037_v46 = vadd.f32 %v1036_v36, %v10054_v45 }
 0x12f   : > { %v887_v43 = vpop.f32.mrf.mxu0  ;;  %v1038_v44 = vpop.f32.mrf.mxu1  ;;  %v1155_v50 = vmax.f32 %v884_v33, 0.0  ;;  %v1149_v0 = vmax.f32 %v1035_v51, 0.0 }
 0x130   : > { %v888_v48 = vadd.f32 %v887_v43, %v10038_v12  ;;  %v1039_v49 = vadd.f32 %v1038_v44, %v10058_v47  ;;  %1594 = vmatprep.mubr.bf16.mxu0 %v1284_v40  ;;  %1722 = vmatprep.mubr.bf16.mxu1 %v1282_v41  ;;  %v1156_v54 = vmax.f32 %v886_v39, 0.0  ;;  %v1150_v61 = vmax.f32 %v1037_v46, 0.0 }
 0x131   : > { %v889_v52 = vpop.f32.mrf.mxu0  ;;  %v1040_v53 = vpop.f32.mrf.mxu1  ;;  %1723 = vmatmul.mubr.bf16.gmra.mxu1 %v1281_v42  ;;  %1595 = vmatmul.mubr.bf16.gmra.mxu0 %v1283_v38 }
 0x132   : > { %v1159_v55 = vmax.f32 %v888_v48, 0.0  ;;  %v890_v56 = vadd.f32 %v889_v52, %v10041_v26  ;;  %v1041_v57 = vadd.f32 %v1040_v53, %v10054_v45  ;;  %v1153_v58 = vmax.f32 %v1039_v49, 0.0 }
 0x133   : > { %v893_v59 = vpop.f32.mrf.mxu0  ;;  %v1044_v60 = vpop.f32.mrf.mxu1 }
 0x134   : > { %v1160_v62 = vmax.f32 %v890_v56, 0.0  ;;  %v1154_v63 = vmax.f32 %v1041_v57, 0.0  ;;  %v894_v1 = vadd.f32 %v893_v59, %v10038_v12  ;;  %v1287_v5 = vpack.c.bf16 %v1159_v55, %v1155_v50 }
 0x135   : > { %v895_v2 = vpop.f32.mrf.mxu0  ;;  %v1046_v4 = vpop.f32.mrf.mxu1  ;;  %v1285_v9 = vpack.c.bf16 %v1153_v58, %v1149_v0  ;;  %v1045_v17 = vadd.f32 %v1044_v60, %v10058_v47 }
 0x136   : > { %v896_v6 = vadd.f32 %v895_v2, %v10041_v26  ;;  %v1288_v7 = vpack.c.bf16 %v1160_v62, %v1156_v54  ;;  %v1286_v8 = vpack.c.bf16 %v1154_v63, %v1150_v61  ;;  %v1047_v13 = vadd.f32 %v1046_v4, %v10054_v45 }
 0x137   : > { %v897_v10 = vpop.f32.mrf.mxu0  ;;  %v1048_v11 = vpop.f32.mrf.mxu1  ;;  %v1163_v16 = vmax.f32 %v894_v1, 0.0  ;;  %v1157_v38 = vmax.f32 %v1045_v17, 0.0 }
 0x138   : > { %v898_v14 = vadd.f32 %v897_v10, %v10038_v12  ;;  %v1049_v15 = vadd.f32 %v1048_v11, %v10058_v47  ;;  %1602 = vmatprep.mubr.bf16.mxu0 %v1288_v7  ;;  %1730 = vmatprep.mubr.bf16.mxu1 %v1286_v8  ;;  %v1164_v22 = vmax.f32 %v896_v6, 0.0  ;;  %v1158_v33 = vmax.f32 %v1047_v13, 0.0 }
 0x139   : > { %v899_v19 = vpop.f32.mrf.mxu0  ;;  %v1050_v20 = vpop.f32.mrf.mxu1  ;;  %1731 = vmatmul.mubr.bf16.gmra.mxu1 %v1285_v9  ;;  %1603 = vmatmul.mubr.bf16.gmra.mxu0 %v1287_v5 }
 0x13a   : > { %v1167_v24 = vmax.f32 %v898_v14, 0.0  ;;  %v900_v27 = vadd.f32 %v899_v19, %v10041_v26  ;;  %v1051_v29 = vadd.f32 %v1050_v20, %v10054_v45  ;;  %v1161_v30 = vmax.f32 %v1049_v15, 0.0 }
 0x13b   : > { %v903_v31 = vpop.f32.mrf.mxu0  ;;  %v1054_v32 = vpop.f32.mrf.mxu1 }
 0x13c   : > { %v1168_v35 = vmax.f32 %v900_v27, 0.0  ;;  %v1162_v36 = vmax.f32 %v1051_v29, 0.0  ;;  %v904_v39 = vadd.f32 %v903_v31, %v10038_v12  ;;  %v1291_v42 = vpack.c.bf16 %v1167_v24, %v1163_v16 }
 0x13d   : > { %v905_v40 = vpop.f32.mrf.mxu0  ;;  %v1056_v41 = vpop.f32.mrf.mxu1  ;;  %v1289_v48 = vpack.c.bf16 %v1161_v30, %v1157_v38  ;;  %v1055_v55 = vadd.f32 %v1054_v32, %v10058_v47 }
 0x13e   : > { %v906_v43 = vadd.f32 %v905_v40, %v10041_v26  ;;  %v1292_v44 = vpack.c.bf16 %v1168_v35, %v1164_v22  ;;  %v1290_v46 = vpack.c.bf16 %v1162_v36, %v1158_v33  ;;  %v1057_v51 = vadd.f32 %v1056_v41, %v10054_v45 }
 0x13f   : > { %v907_v49 = vpop.f32.mrf.mxu0  ;;  %v1058_v50 = vpop.f32.mrf.mxu1  ;;  %v1171_v54 = vmax.f32 %v904_v39, 0.0  ;;  %v1165_v5 = vmax.f32 %v1055_v55, 0.0  ;;  %v926_v22 = vadd.f32 %v10043_v28, %v10041_v26  ;;  %v1803_v39 = vld [vmem:[%s618_s28] sm:$0xff]  ;;  %s9599_s28 = sshll.u32 %s9661_s16, 4  ;;  %s9600_s28 = int_to_ptr.vmem [resolvable:$false] %s9599_s28 }
 0x140   : > { %v908_v52 = vadd.f32 %v907_v49, %v10038_v12  ;;  %v1059_v53 = vadd.f32 %v1058_v50, %v10058_v47  ;;  %1610 = vmatprep.mubr.bf16.mxu0 %v1292_v44  ;;  %1738 = vmatprep.mubr.bf16.mxu1 %v1290_v46  ;;  %v1172_v58 = vmax.f32 %v906_v43, 0.0  ;;  %v1166_v1 = vmax.f32 %v1057_v51, 0.0  ;;  %s9601_s20 = scalar_lea.vmem %s9600_s28, 32  ;;  %p9602_p0 = scmp.lt.s32.totalorder %s13152_s30, %s9600_s28 }
 0x141   : > { %v909_v56 = vpop.f32.mrf.mxu0  ;;  %v1060_v57 = vpop.f32.mrf.mxu1  ;;  %1739 = vmatmul.mubr.bf16.gmra.mxu1 %v1289_v48  ;;  %1611 = vmatmul.mubr.bf16.gmra.mxu0 %v1291_v42  ;;  %v1188_v28 = vmax.f32 %v926_v22, 0.0  ;;  %8844 = vtanh.f32 %v1803_v39  ;;  %v10235_v22 = vld [vmem:[%s13199_s8 + $0x30] sm:$0xff]   ;;  %v10323_v39 = vld [vmem:[%s13199_s8 + $0x60] sm:$0xff]   ;;  %p9603_p1 = scmp.lt.s32.totalorder %s9601_s20, %s9595_s1 }
 0x142   : > { %v1175_v59 = vmax.f32 %v908_v52, 0.0  ;;  %v910_v60 = vadd.f32 %v909_v56, %v10041_v26  ;;  %v1061_v61 = vadd.f32 %v1060_v57, %v10054_v45  ;;  %v1169_v62 = vmax.f32 %v1059_v53, 0.0 }
 0x143   : > { %v913_v63 = vpop.f32.mrf.mxu0  ;;  %v1064_v0 = vpop.f32.mrf.mxu1  ;;  %p9604_p2 = por %p9603_p1, %p9602_p0 }
 0x144   : > { %v1176_v2 = vmax.f32 %v910_v60, 0.0  ;;  %v1170_v4 = vmax.f32 %v1061_v61, 0.0  ;;  %v914_v6 = vadd.f32 %v913_v63, %v10038_v12  ;;  %v1295_v9 = vpack.c.bf16 %v1175_v59, %v1171_v54 }
 0x145   : > { %v915_v7 = vpop.f32.mrf.mxu0  ;;  %v1066_v8 = vpop.f32.mrf.mxu1  ;;  %v1293_v14 = vpack.c.bf16 %v1169_v62, %v1165_v5  ;;  %v1065_v27 = vadd.f32 %v1064_v0, %v10058_v47  ;;  %v1304_v54 = vpack.c.bf16 %v1188_v28, %v1188_v28  ;;  %p9605_p3 = pnand %p9604_p2, %p9598_p13 }
 0x146   : > { %v916_v10 = vadd.f32 %v915_v7, %v10041_v26  ;;  %v1296_v11 = vpack.c.bf16 %v1176_v2, %v1172_v58  ;;  %v1294_v13 = vpack.c.bf16 %v1170_v4, %v1166_v1  ;;  %v1067_v17 = vadd.f32 %v1066_v8, %v10054_v45 }
 0x147   : > { %v917_v15 = vpop.f32.mrf.mxu0  ;;  %v1068_v16 = vpop.f32.mrf.mxu1  ;;  %v1179_v24 = vmax.f32 %v914_v6, 0.0  ;;  %v1173_v43 = vmax.f32 %v1065_v27, 0.0  ;;  %v10251_v27 = vld [vmem:[%s13199_s8 + $0x28] sm:$0xff]  }
 0x148   : > { %v918_v19 = vadd.f32 %v917_v15, %v10038_v12  ;;  %v1069_v20 = vadd.f32 %v1068_v16, %v10058_v47  ;;  %1618 = vmatprep.mubr.bf16.mxu0 %v1296_v11  ;;  %1746 = vmatprep.mubr.bf16.mxu1 %v1294_v13  ;;  %v1180_v31 = vmax.f32 %v916_v10, 0.0  ;;  %v1174_v40 = vmax.f32 %v1067_v17, 0.0  ;;  %v8733_v13 = vld [vmem:[%s13197_s6 + $0x20] sm:$0xff]   ;;  %v10197_v15 = vld [vmem:[%s13199_s8 + $0x18] sm:$0xff]   ;;  %v8736_v16 = vld [vmem:[%s13197_s6 + $0x30] sm:$0xff]  }
 0x149   : > { %v919_v29 = vpop.f32.mrf.mxu0  ;;  %v1070_v30 = vpop.f32.mrf.mxu1  ;;  %1747 = vmatmul.mubr.bf16.gmra.mxu1 %v1293_v14  ;;  %1619 = vmatmul.mubr.bf16.gmra.mxu0 %v1295_v9  ;;  %v8734_v14 = vld [vmem:[%s13197_s6 + $0x38] sm:$0xff]   ;;  %v10210_v17 = vld [vmem:[%s13199_s8 + $0x10] sm:$0xff]  }
 0x14a   : > { %v1183_v32 = vmax.f32 %v918_v19, 0.0  ;;  %v920_v33 = vadd.f32 %v919_v29, %v10041_v26  ;;  %v1071_v35 = vadd.f32 %v1070_v30, %v10054_v45  ;;  %v1177_v36 = vmax.f32 %v1069_v20, 0.0  ;;  %v10220_v19 = vld [vmem:[%s13199_s8 + $0x38] sm:$0xff]   ;;  %v10227_v20 = vld [vmem:[%s13199_s8 + $0x8] sm:$0xff]   ;;  %v10266_v30 = vld [vmem:[%s13199_s8 + $0x20] sm:$0xff]  }
 0x14b   : > { %v1074_v38 = vpop.f32.mrf.mxu1  ;;  %v924_v26 = vadd.f32 %v10035_v25, %v10038_v12  ;;  %v10258_v29 = vld [vmem:[%s13199_s8 + $0x58] sm:$0xff]  }
 0x14c   : > { %v1184_v41 = vmax.f32 %v920_v33, 0.0  ;;  %v1178_v42 = vmax.f32 %v1071_v35, 0.0  ;;  %v1299_v46 = vpack.c.bf16 %v1183_v32, %v1179_v24  ;;  %v1297_v50 = vpack.c.bf16 %v1177_v36, %v1173_v43  ;;  %v10244_v24 = vld [vmem:[%s13199_s8] sm:$0xff]   ;;  %v10282_v32 = vld [vmem:[%s13199_s8 + $0x78] sm:$0xff]   ;;  %v10289_v33 = vld [vmem:[%s13199_s8 + $0x48] sm:$0xff]  }
 0x14d   : > { %v1076_v44 = vpop.f32.mrf.mxu1  ;;  %v1075_v55 = vadd.f32 %v1074_v38, %v10058_v47  ;;  %v1187_v60 = vmax.f32 %v924_v26, 0.0  ;;  %v10297_v35 = vld [vmem:[%s13199_s8 + $0x70] sm:$0xff]   ;;  %v10306_v36 = vld [vmem:[%s13199_s8 + $0x40] sm:$0xff]   ;;  %v10313_v38 = vld [vmem:[%s13199_s8 + $0x68] sm:$0xff]  }
 0x14e   : > { %v1300_v48 = vpack.c.bf16 %v1184_v41, %v1180_v31  ;;  %v1298_v49 = vpack.c.bf16 %v1178_v42, %v1174_v40  ;;  %v1077_v52 = vadd.f32 %v1076_v44, %v10054_v45  ;;  %v8845_v9 = vpop.eup %8844  ;;  %v10273_v31 = vld [vmem:[%s13199_s8 + $0x50] sm:$0xff]   ;;  %v10352_v44 = vld [vmem:[%s13196_s5] ss:$0 sm:$0xff] }
 0x14f   : > { %v1078_v51 = vpop.f32.mrf.mxu1  ;;  %v1181_v12 = vmax.f32 %v1075_v55, 0.0  ;;  %v1303_v5 = vpack.c.bf16 %v1187_v60, %v1187_v60 }
 0x150   : > { %v1079_v53 = vadd.f32 %v1078_v51, %v10058_v47  ;;  %1626 = vmatprep.mubr.bf16.mxu0 %v1300_v48  ;;  %1754 = vmatprep.mubr.bf16.mxu1 %v1298_v49  ;;  %v1182_v61 = vmax.f32 %v1077_v52, 0.0 }
 0x151   : > { %v1080_v56 = vpop.f32.mrf.mxu1  ;;  %1755 = vmatmul.mubr.bf16.gmra.mxu1 %v1297_v50  ;;  %1627 = vmatmul.mubr.bf16.gmra.mxu0 %v1299_v46 }
 0x152   : > { %v1081_v57 = vadd.f32 %v1080_v56, %v10054_v45  ;;  %v1185_v58 = vmax.f32 %v1079_v53, 0.0  ;;  %1634 = vmatprep.mubr.bf16.mxu0 %v1304_v54 }
 0x153   : > { %v1084_v59 = vpop.f32.mrf.mxu1 }
 0x154   : > { %v1186_v25 = vmax.f32 %v1081_v57, 0.0  ;;  %v1301_v1 = vpack.c.bf16 %v1185_v58, %v1181_v12  ;;  %v1085_v2 = vadd.f32 %v1084_v59, %v10058_v47  ;;  %v8731_v47 = vld [vmem:[%s13197_s6 + $0x28] sm:$0xff]  }
 0x155   : > { %v1086_v62 = vpop.f32.mrf.mxu1 }
 0x156   : > { %v1087_v63 = vadd.f32 %v1086_v62, %v10054_v45  ;;  %v1302_v0 = vpack.c.bf16 %v1186_v25, %v1182_v61  ;;  %v1189_v10 = vmax.f32 %v1085_v2, 0.0  ;;  %v1805_v45 = vpack.c.bf16 %v8845_v9, %v8845_v9 }
 0x157   : > { %v1088_v4 = vpop.f32.mrf.mxu1 }
 0x158   : > { %v1190_v6 = vmax.f32 %v1087_v63, 0.0  ;;  %1762 = vmatprep.mubr.bf16.mxu1 %v1302_v0  ;;  %v1305_v11 = vpack.c.bf16 %v1189_v10, %v1189_v10 }
 0x159   : > { %v1089_v7 = vpop.f32.mrf.mxu1  ;;  %1763 = vmatmul.mubr.bf16.gmra.mxu1 %v1301_v1  ;;  %1635 = vmatmul.mubr.bf16.gmra.mxu0 %v1303_v5 }
 0x15a   : > { %v1306_v8 = vpack.c.bf16 %v1190_v6, %v1190_v6  ;;  %8186 = vmatprep.mubr.msk.bf16.mxu0 %vm9659_vm1, %v13220_v18 }
 0x15c   : > { %1770 = vmatprep.mubr.bf16.mxu1 %v1306_v8 }
 0x161   : > { %1771 = vmatmul.mubr.bf16.gmra.mxu1 %v1305_v11  ;;  %8187 = vmatmul.mubr.msk.bf16.vlgmr.msra.gmra.mxu0 %vm729_vm0, %v1805_v45 }
 0x162   : > { %8194 = vmatprep.mubr.msk.bf16.mxu1 %vm9659_vm1, %v13220_v18  ;;  %8199 = vmatpush3.bf16.msra.mxu0 %v8731_v47 }
 0x163   : > { %8202 = vmatprep.mubr.msk.bf16.mxu0 %vm9659_vm1, %v13220_v18  ;;  %8200 = vmatprep.subr.bf16.mxu0 %v13220_v18 }
 0x166   : > { %8201 = vmatpush3.bf16.msra.mxu0 %v8733_v13 }
 0x167   : > { %8214 = vmatprep.subr.bf16.mxu0 %v13220_v18 }
 0x169   : > { %8195 = vmatmul.mubr.msk.bf16.vlgmr.msra.gmra.mxu1 %vm729_vm0, %v1805_v45  ;;  %8203 = vmatmul.mubr.msk.bf16.vlgmr.msra.gmra.mxu0 %vm729_vm0, %v1805_v45 }
 0x16a   : > { %8207 = vmatpush3.bf16.msra.mxu1 %v8734_v14  ;;  %8215 = vmatpush3.bf16.msra.mxu0 %v10197_v15 }
 0x16b   : > { %8208 = vmatprep.subr.bf16.mxu1 %v13220_v18  ;;  %8216 = vmatprep.subr.bf16.mxu0 %v13220_v18 }
 0x16c   : > { %8210 = vmatprep.mubr.msk.bf16.mxu1 %vm9659_vm1, %v13220_v18  ;;  %8222 = vmatprep.mubr.msk.bf16.mxu0 %vm9659_vm1, %v13220_v18 }
 0x16e   : > { %8209 = vmatpush3.bf16.msra.mxu1 %v8736_v16  ;;  %8217 = vmatpush3.bf16.msra.mxu0 %v10210_v17 }
 0x16f   : > { %8226 = vmatprep.subr.bf16.mxu1 %v13220_v18  ;;  %8218 = vmatprep.subr.bf16.mxu0 %v13220_v18 }
 0x171   : > { %8211 = vmatmul.mubr.msk.bf16.vlgmr.msra.gmra.mxu1 %vm729_vm0, %v1805_v45 }
 0x172   : > { %8227 = vmatpush3.bf16.msra.mxu1 %v10220_v19  ;;  %8234 = vmatprep.mubr.msk.bf16.mxu1 %vm9659_vm1, %v13220_v18 }
 0x173   : > { %8219 = vmatpush3.bf16.msra.mxu0 %v10227_v20  ;;  %8228 = vmatprep.subr.bf16.mxu1 %v13220_v18 }
 0x174   : > { %8220 = vmatprep.subr.bf16.mxu0 %v13220_v18 }
 0x176   : > { %8229 = vmatpush3.bf16.msra.mxu1 %v10235_v22 }
 0x177   : > { %8221 = vmatpush3.bf16.msra.mxu0 %v10244_v24  ;;  %8230 = vmatprep.subr.bf16.mxu1 %v13220_v18 }
 0x178   : > { %8238 = vmatprep.subr.bf16.mxu0 %v13220_v18 }
 0x17a   : > { %8223 = vmatmul.mubr.bf16.vlgmr.msra.gmra.mxu0 %v13218_v3  ;;  %8231 = vmatpush3.bf16.msra.mxu1 %v10251_v27 }
 0x17b   : > { %8239 = vmatpush3.bf16.msra.mxu0 %v10258_v29  ;;  %8232 = vmatprep.subr.bf16.mxu1 %v13220_v18 }
 0x17c   : > { %8240 = vmatprep.subr.bf16.mxu0 %v13220_v18  ;;  %8246 = vmatprep.mubr.msk.bf16.mxu0 %vm9659_vm1, %v13220_v18 }
 0x17e   : > { %8233 = vmatpush3.bf16.msra.mxu1 %v10266_v30 }
 0x17f   : > { %8241 = vmatpush3.bf16.msra.mxu0 %v10273_v31  ;;  %8250 = vmatprep.subr.bf16.mxu1 %v13220_v18 }
 0x180   : > { %8242 = vmatprep.subr.bf16.mxu0 %v13220_v18 }
 0x181   : > { %8235 = vmatmul.mubr.bf16.vlgmr.msra.gmra.mxu1 %v13218_v3 }
 0x182   : > { %8251 = vmatpush3.bf16.msra.mxu1 %v10282_v32  ;;  %8258 = vmatprep.mubr.msk.bf16.mxu1 %vm9659_vm1, %v13220_v18 }
 0x183   : > { %8243 = vmatpush3.bf16.msra.mxu0 %v10289_v33  ;;  %8252 = vmatprep.subr.bf16.mxu1 %v13220_v18 }
 0x184   : > { %8244 = vmatprep.subr.bf16.mxu0 %v13220_v18 }
 0x186   : > { %8253 = vmatpush3.bf16.msra.mxu1 %v10297_v35 }
 0x187   : > { %8245 = vmatpush3.bf16.msra.mxu0 %v10306_v36  ;;  %8254 = vmatprep.subr.bf16.mxu1 %v13220_v18 }
 0x188   : > { %8262 = vmatprep.subr.bf16.mxu0 %v13220_v18 }
 0x18a   : > { %8247 = vmatmul.mubr.bf16.vlgmr.msra.gmra.mxu0 %v13218_v3  ;;  %8255 = vmatpush3.bf16.msra.mxu1 %v10313_v38 }
 0x18b   : > { %8256 = vmatprep.subr.bf16.mxu1 %v13220_v18  ;;  %8263 = vmatpush3.bf16.msra.mxu0 %v10197_v15 }
 0x18c   : > { %8264 = vmatprep.subr.bf16.mxu0 %v13220_v18  ;;  %8270 = vmatprep.mubr.msk.bf16.mxu0 %vm9659_vm1, %v13220_v18 }
 0x18e   : > { %8257 = vmatpush3.bf16.msra.mxu1 %v10323_v39 }
 0x18f   : > { %8274 = vmatprep.subr.bf16.mxu1 %v13220_v18  ;;  %8265 = vmatpush3.bf16.msra.mxu0 %v10210_v17 }
 0x190   : > { %8266 = vmatprep.subr.bf16.mxu0 %v13220_v18 }
 0x191   : > { %8259 = vmatmul.mubr.bf16.vlgmr.msra.gmra.mxu1 %v13218_v3 }
 0x192   : > { %8275 = vmatpush3.bf16.msra.mxu1 %v10220_v19  ;;  %8282 = vmatprep.mubr.msk.bf16.mxu1 %vm9659_vm1, %v13220_v18 }
 0x193   : > { %8276 = vmatprep.subr.bf16.mxu1 %v13220_v18  ;;  %8267 = vmatpush3.bf16.msra.mxu0 %v10227_v20 }
 0x194   : > { %8268 = vmatprep.subr.bf16.mxu0 %v13220_v18 }
 0x196   : > { %8277 = vmatpush3.bf16.msra.mxu1 %v10235_v22 }
 0x197   : > { %8278 = vmatprep.subr.bf16.mxu1 %v13220_v18  ;;  %8269 = vmatpush3.bf16.msra.mxu0 %v10244_v24 }
 0x198   : > { %8286 = vmatprep.subr.bf16.mxu0 %v13220_v18 }
 0x19a   : > { %8279 = vmatpush3.bf16.msra.mxu1 %v10251_v27 }
 0x19b   : > { %8280 = vmatprep.subr.bf16.mxu1 %v13220_v18 }
 0x19e   : > { %8281 = vmatpush3.bf16.msra.mxu1 %v10266_v30 }
 0x19f   : > { %8298 = vmatprep.subr.bf16.mxu1 %v13220_v18 }
 0x1b9   : > { %v7447_v40 = vpop.f32.mrf.mxu0 }
 0x1bb   : > { %v7448_v41 = vpop.f32.mrf.mxu0 }
 0x1bc   : > { %v7449_v42 = vadd.f32 %v7448_v41, %v7447_v40 }
 0x1bd   : > { %v7450_v28 = vpop.f32.mrf.mxu0 }
 0x1be   : > { %v1541_v50 = vadd.f32 %v7449_v42, %v10352_v44 }
 0x1bf   : > { %v7451_v43 = vpop.f32.mrf.mxu0 }
 0x1c0   : > { %v7452_v51 = vadd.f32 %v7451_v43, %v7450_v28 }
 0x1c1   : > { %v7541_v46 = vpop.f32.mrf.mxu1  ;;  %v7453_v48 = vpop.f32.mrf.mxu0 }
 0x1c2   : > { %v1544_v58 = vadd.f32 %v7452_v51, %v10352_v44 }
 0x1c3   : > { %v7542_v49 = vpop.f32.mrf.mxu1  ;;  %v7454_v26 = vpop.f32.mrf.mxu0 }
 0x1c4   : > { %v7543_v52 = vadd.f32 %v7542_v49, %v7541_v46  ;;  %v7455_v53 = vadd.f32 %v7454_v26, %v7453_v48 }
 0x1c5   : > { %v7544_v54 = vpop.f32.mrf.mxu1  ;;  %v7456_v56 = vpop.f32.mrf.mxu0 }
 0x1c6   : > { %v10355_v55 = vadd.f32 %v7543_v52, %v1541_v50  ;;  %v1549_v63 = vadd.f32 %v7455_v53, %v10352_v44 }
 0x1c7   : > { %v7545_v57 = vpop.f32.mrf.mxu1  ;;  %v7457_v59 = vpop.f32.mrf.mxu0 }
 0x1c8   : > { %v7546_v60 = vadd.f32 %v7545_v57, %v7544_v54  ;;  %v7458_v0 = vadd.f32 %v7457_v59, %v7456_v56 }
 0x1c9   : > { %v7547_v61 = vpop.f32.mrf.mxu1  ;;  %v7459_v12 = vpop.f32.mrf.mxu0 }
 0x1ca   : > { %v10358_v25 = vadd.f32 %v7546_v60, %v1544_v58  ;;  %v1552_v9 = vadd.f32 %v7458_v0, %v10352_v44 }
 0x1cb   : > { %v7548_v62 = vpop.f32.mrf.mxu1  ;;  %v7460_v1 = vpop.f32.mrf.mxu0 }
 0x1cc   : > { %v7549_v2 = vadd.f32 %v7548_v62, %v7547_v61  ;;  %v7461_v4 = vadd.f32 %v7460_v1, %v7459_v12 }
 0x1cd   : > { %v7550_v5 = vpop.f32.mrf.mxu1  ;;  %v7462_v7 = vpop.f32.mrf.mxu0 }
 0x1ce   : > { %v10361_v6 = vadd.f32 %v7549_v2, %v1549_v63  ;;  %v1557_v16 = vadd.f32 %v7461_v4, %v10352_v44 }
 0x1cf   : > { %v7551_v8 = vpop.f32.mrf.mxu1  ;;  %v7463_v10 = vpop.f32.mrf.mxu0 }
 0x1d0   : > { %v7552_v45 = vadd.f32 %v7551_v8, %v7550_v5  ;;  %v7464_v40 = vadd.f32 %v7463_v10, %v7462_v7 }
 0x1d1   : > { %v7553_v11 = vpop.f32.mrf.mxu1  ;;  %v7465_v13 = vpop.f32.mrf.mxu0 }
 0x1d2   : > { %v10364_v47 = vadd.f32 %v7552_v45, %v1552_v9  ;;  %v1560_v50 = vadd.f32 %v7464_v40, %v10352_v44 }
 0x1d3   : > { %v7554_v14 = vpop.f32.mrf.mxu1  ;;  %v7466_v41 = vpop.f32.mrf.mxu0 }
 0x1d4   : > { %v7555_v42 = vadd.f32 %v7554_v14, %v7553_v11  ;;  %v7467_v28 = vadd.f32 %v7466_v41, %v7465_v13 }
 0x1d5   : > { %v7556_v43 = vpop.f32.mrf.mxu1  ;;  %v7468_v48 = vpop.f32.mrf.mxu0 }
 0x1d6   : > { %v10367_v46 = vadd.f32 %v7555_v42, %v1557_v16  ;;  %v1565_v57 = vadd.f32 %v7467_v28, %v10352_v44 }
 0x1d7   : > { %v7557_v49 = vpop.f32.mrf.mxu1  ;;  %v7469_v51 = vpop.f32.mrf.mxu0 }
 0x1d8   : > { %v7558_v26 = vadd.f32 %v7557_v49, %v7556_v43  ;;  %v7470_v58 = vadd.f32 %v7469_v51, %v7468_v48 }
 0x1d9   : > { %v7559_v52 = vpop.f32.mrf.mxu1  ;;  %v7471_v54 = vpop.f32.mrf.mxu0 }
 0x1da   : > { %v10370_v53 = vadd.f32 %v7558_v26, %v1560_v50  ;;  %v1568_v1 = vadd.f32 %v7470_v58, %v10352_v44 }
 0x1db   : > { %v7560_v56 = vpop.f32.mrf.mxu1  ;;  %v7472_v59 = vpop.f32.mrf.mxu0 }
 0x1dc   : > { %v7561_v60 = vadd.f32 %v7560_v56, %v7559_v52  ;;  %v7473_v61 = vadd.f32 %v7472_v59, %v7471_v54 }
 0x1dd   : > { %v7562_v12 = vpop.f32.mrf.mxu1  ;;  %v7474_v63 = vpop.f32.mrf.mxu0 }
 0x1de   : > { %v10373_v62 = vadd.f32 %v7561_v60, %v1565_v57  ;;  %v1573_v10 = vadd.f32 %v7473_v61, %v10352_v44 }
 0x1df   : > { %v7563_v0 = vpop.f32.mrf.mxu1  ;;  %v7475_v2 = vpop.f32.mrf.mxu0 }
 0x1e0   : > { %v7564_v4 = vadd.f32 %v7563_v0, %v7562_v12  ;;  %v7476_v45 = vadd.f32 %v7475_v2, %v7474_v63 }
 0x1e1   : > { %v7565_v5 = vpop.f32.mrf.mxu1  ;;  %v7477_v8 = vpop.f32.mrf.mxu0 }
 0x1e2   : > { %v10376_v7 = vadd.f32 %v7564_v4, %v1568_v1  ;;  %v1576_v28 = vadd.f32 %v7476_v45, %v10352_v44 }
 0x1e3   : > { %v7566_v9 = vpop.f32.mrf.mxu1  ;;  %v7478_v11 = vpop.f32.mrf.mxu0 }
 0x1e4   : > { %v7567_v13 = vadd.f32 %v7566_v9, %v7565_v5  ;;  %v7479_v14 = vadd.f32 %v7478_v11, %v7477_v8 }
 0x1e5   : > { %v7568_v16 = vpop.f32.mrf.mxu1  ;;  %v7480_v41 = vpop.f32.mrf.mxu0 }
 0x1e6   : > { %v10379_v40 = vadd.f32 %v7567_v13, %v1573_v10  ;;  %v1581_v52 = vadd.f32 %v7479_v14, %v10352_v44 }
 0x1e7   : > { %v7569_v42 = vpop.f32.mrf.mxu1  ;;  %v7481_v43 = vpop.f32.mrf.mxu0 }
 0x1e8   : > { %v7570_v48 = vadd.f32 %v7569_v42, %v7568_v16  ;;  %v7482_v54 = vadd.f32 %v7481_v43, %v7480_v41 }
 0x1e9   : > { %v7571_v49 = vpop.f32.mrf.mxu1  ;;  %v7483_v51 = vpop.f32.mrf.mxu0 }
 0x1ea   : > { %v10382_v50 = vadd.f32 %v7570_v48, %v1576_v28  ;;  %v1584_v63 = vadd.f32 %v7482_v54, %v10352_v44 }
 0x1eb   : > { %v7572_v26 = vpop.f32.mrf.mxu1  ;;  %v7484_v56 = vpop.f32.mrf.mxu0 }
 0x1ec   : > { %v7573_v57 = vadd.f32 %v7572_v26, %v7571_v49  ;;  %v7485_v58 = vadd.f32 %v7484_v56, %v7483_v51 }
 0x1ed   : > { %v7574_v59 = vpop.f32.mrf.mxu1  ;;  %v7486_v61 = vpop.f32.mrf.mxu0 }
 0x1ee   : > { %v10385_v60 = vadd.f32 %v7573_v57, %v1581_v52  ;;  %v1589_v9 = vadd.f32 %v7485_v58, %v10352_v44 }
 0x1ef   : > { %v7575_v12 = vpop.f32.mrf.mxu1  ;;  %v7487_v0 = vpop.f32.mrf.mxu0 }
 0x1f0   : > { %v7576_v1 = vadd.f32 %v7575_v12, %v7574_v59  ;;  %v7488_v10 = vadd.f32 %v7487_v0, %v7486_v61 }
 0x1f1   : > { %v7577_v2 = vpop.f32.mrf.mxu1  ;;  %v7489_v5 = vpop.f32.mrf.mxu0 }
 0x1f2   : > { %v10388_v4 = vadd.f32 %v7576_v1, %v1584_v63  ;;  %v1592_v28 = vadd.f32 %v7488_v10, %v10352_v44 }
 0x1f3   : > { %v7578_v8 = vpop.f32.mrf.mxu1  ;;  %v7490_v45 = vpop.f32.mrf.mxu0 }
 0x1f4   : > { %v7579_v11 = vadd.f32 %v7578_v8, %v7577_v2  ;;  %v7491_v13 = vadd.f32 %v7490_v45, %v7489_v5 }
 0x1f5   : > { %v7580_v14 = vpop.f32.mrf.mxu1  ;;  %v7492_v41 = vpop.f32.mrf.mxu0 }
 0x1f6   : > { %v10391_v16 = vadd.f32 %v7579_v11, %v1589_v9  ;;  %v1597_v54 = vadd.f32 %v7491_v13, %v10352_v44 }
 0x1f7   : > { %v7581_v42 = vpop.f32.mrf.mxu1  ;;  %v7493_v43 = vpop.f32.mrf.mxu0 }
 0x1f8   : > { %v7582_v48 = vadd.f32 %v7581_v42, %v7580_v14  ;;  %v7494_v56 = vadd.f32 %v7493_v43, %v7492_v41 }
 0x1f9   : > { %v7583_v49 = vpop.f32.mrf.mxu1  ;;  %v7495_v26 = vpop.f32.mrf.mxu0 }
 0x1fa   : > { %v10394_v51 = vadd.f32 %v7582_v48, %v1592_v28  ;;  %v1600_v1 = vadd.f32 %v7494_v56, %v10352_v44 }
 0x1fb   : > { %v7584_v52 = vpop.f32.mrf.mxu1  ;;  %v7496_v57 = vpop.f32.mrf.mxu0 }
 0x1fc   : > { %v7585_v58 = vadd.f32 %v7584_v52, %v7583_v49  ;;  %v7497_v59 = vadd.f32 %v7496_v57, %v7495_v26 }
 0x1fd   : > { %v7586_v61 = vpop.f32.mrf.mxu1  ;;  %v7498_v63 = vpop.f32.mrf.mxu0 }
 0x1fe   : > { %v10397_v12 = vadd.f32 %v7585_v58, %v1597_v54  ;;  %v1605_v11 = vadd.f32 %v7497_v59, %v10352_v44 }
 0x1ff   : > { %v7587_v0 = vpop.f32.mrf.mxu1  ;;  %v7499_v2 = vpop.f32.mrf.mxu0 }
 0x200   : > { %v7588_v5 = vadd.f32 %v7587_v0, %v7586_v61  ;;  %v7500_v13 = vadd.f32 %v7499_v2, %v7498_v63 }
 0x201   : > { %v7589_v8 = vpop.f32.mrf.mxu1  ;;  %v7501_v10 = vpop.f32.mrf.mxu0 }
 0x202   : > { %v10400_v9 = vadd.f32 %v7588_v5, %v1600_v1  ;;  %v1608_v26 = vadd.f32 %v7500_v13, %v10352_v44 }
 0x203   : > { %v7590_v45 = vpop.f32.mrf.mxu1  ;;  %v7502_v14 = vpop.f32.mrf.mxu0 }
 0x204   : > { %v7591_v41 = vadd.f32 %v7590_v45, %v7589_v8  ;;  %v7503_v42 = vadd.f32 %v7502_v14, %v7501_v10 }
 0x205   : > { %v7592_v28 = vpop.f32.mrf.mxu1  ;;  %v7504_v48 = vpop.f32.mrf.mxu0 }
 0x206   : > { %v10403_v43 = vadd.f32 %v7591_v41, %v1605_v11  ;;  %v1613_v59 = vadd.f32 %v7503_v42, %v10352_v44 }
 0x207   : > { %v7593_v49 = vpop.f32.mrf.mxu1  ;;  %v7505_v52 = vpop.f32.mrf.mxu0 }
 0x208   : > { %v7594_v54 = vadd.f32 %v7593_v49, %v7592_v28  ;;  %v7506_v63 = vadd.f32 %v7505_v52, %v7504_v48 }
 0x209   : > { %v7595_v56 = vpop.f32.mrf.mxu1  ;;  %v7507_v58 = vpop.f32.mrf.mxu0 }
 0x20a   : > { %v10406_v57 = vadd.f32 %v7594_v54, %v1608_v26  ;;  %v1616_v11 = vadd.f32 %v7506_v63, %v10352_v44 }
 0x20b   : > { %v7596_v61 = vpop.f32.mrf.mxu1  ;;  %v7508_v0 = vpop.f32.mrf.mxu0 }
 0x20c   : > { %v7597_v1 = vadd.f32 %v7596_v61, %v7595_v56  ;;  %v7509_v2 = vadd.f32 %v7508_v0, %v7507_v58 }
 0x20d   : > { %v7598_v5 = vpop.f32.mrf.mxu1  ;;  %v7510_v10 = vpop.f32.mrf.mxu0 }
 0x20e   : > { %v10409_v8 = vadd.f32 %v7597_v1, %v1613_v59  ;;  %v1621_v42 = vadd.f32 %v7509_v2, %v10352_v44 }
 0x20f   : > { %v7599_v45 = vpop.f32.mrf.mxu1  ;;  %v7511_v13 = vpop.f32.mrf.mxu0 }
 0x210   : > { %v7600_v14 = vadd.f32 %v7599_v45, %v7598_v5  ;;  %v7512_v48 = vadd.f32 %v7511_v13, %v7510_v10 }
 0x211   : > { %v7601_v41 = vpop.f32.mrf.mxu1  ;;  %v7513_v49 = vpop.f32.mrf.mxu0 }
 0x212   : > { %v10412_v28 = vadd.f32 %v7600_v14, %v1616_v11  ;;  %v1624_v63 = vadd.f32 %v7512_v48, %v10352_v44 }
 0x213   : > { %v7602_v26 = vpop.f32.mrf.mxu1  ;;  %v7514_v52 = vpop.f32.mrf.mxu0 }
 0x214   : > { %v7603_v54 = vadd.f32 %v7602_v26, %v7601_v41  ;;  %v7515_v56 = vadd.f32 %v7514_v52, %v7513_v49 }
 0x215   : > { %v7604_v58 = vpop.f32.mrf.mxu1  ;;  %v7516_v59 = vpop.f32.mrf.mxu0 }
 0x216   : > { %v10415_v61 = vadd.f32 %v7603_v54, %v1621_v42  ;;  %v1629_v2 = vadd.f32 %v7515_v56, %v10352_v44 }
 0x217   : > { %v7605_v0 = vpop.f32.mrf.mxu1  ;;  %v7517_v1 = vpop.f32.mrf.mxu0 }
 0x218   : > { %v7606_v5 = vadd.f32 %v7605_v0, %v7604_v58  ;;  %v7518_v10 = vadd.f32 %v7517_v1, %v7516_v59 }
 0x219   : > { %v7607_v45 = vpop.f32.mrf.mxu1  ;;  %v7519_v14 = vpop.f32.mrf.mxu0 }
 0x21a   : > { %v10418_v11 = vadd.f32 %v7606_v5, %v1624_v63  ;;  %v1632_v48 = vadd.f32 %v7518_v10, %v10352_v44 }
 0x21b   : > { %v7608_v3 = vpop.f32.mrf.mxu1  ;;  %v7520_v13 = vpop.f32.mrf.mxu0 }
 0x21c   : > { %v7609_v41 = vadd.f32 %v7608_v3, %v7607_v45  ;;  %v7521_v49 = vadd.f32 %v7520_v13, %v7519_v14 }
 0x21d   : > { %v7610_v26 = vpop.f32.mrf.mxu1  ;;  %v7522_v52 = vpop.f32.mrf.mxu0 }
 0x21e   : > { %v10421_v42 = vadd.f32 %v7609_v41, %v1629_v2  ;;  %v1637_v56 = vadd.f32 %v7521_v49, %v10352_v44 }
 0x21f   : > { %v7611_v54 = vpop.f32.mrf.mxu1  ;;  %v7523_v18 = vpop.f32.mrf.mxu0 }
 0x220   : > { %v7612_v58 = vadd.f32 %v7611_v54, %v7610_v26 }
 0x221   : > { %v7613_v0 = vpop.f32.mrf.mxu1  ;;  %v1866_v5 = vpop.f32.mrf.mxu0 }
 0x222   : > { %v10424_v63 = vadd.f32 %v7612_v58, %v1632_v48 }
 0x223   : > { %v7614_v34 = vpop.f32.mrf.mxu1  ;;  %v8188_v1 = vpop.f32.mrf.mxu0 }
 0x224   : > { %v7615_v59 = vadd.f32 %v7614_v34, %v7613_v0  ;;  %v7183_v34 = vld [vmem:[%s13198_s7] ss:$0 sm:$0xff]  ;;  %v7192_v1 = vld [vmem:[%s13198_s7 + $0x1] ss:$0 sm:$0xff] }
 0x225   : > { %v7616_v3 = vpop.f32.mrf.mxu1  ;;  %v1869_v14 = vpop.f32.mrf.mxu0  ;;  %v10432_v49 = vadd.f32 %v7183_v34, %v1866_v5 }
 0x226   : > { %v10427_v45 = vadd.f32 %v7615_v59, %v1637_v56 }
 0x227   : > { %v7617_v2 = vpop.f32.mrf.mxu1  ;;  %v8189_v13 = vpop.f32.mrf.mxu0 }
 0x228   : > { %13425 = vst [vmem:[#allocation16_spill] sm:$0xff] %v10427_v45 }
 0x229   : > { %v1931_v41 = vpop.f32.mrf.mxu1  ;;  %v1996_v52 = vpop.f32.mrf.mxu0 }
 0x22a   : > { %v10438_v2 = vadd.f32 %v7192_v1, %v1931_v41  ;;  %v7210_v41 = vld [vmem:[%s13198_s7 + $0x3] ss:$0 sm:$0xff] }
 0x22b   : > { %v8196_v10 = vpop.f32.mrf.mxu1  ;;  %v8204_v18 = vpop.f32.mrf.mxu0 }
 0x22d   : > { %v1934_v26 = vpop.f32.mrf.mxu1  ;;  %v1999_v54 = vpop.f32.mrf.mxu0 }
 0x22f   : > { %v8197_v48 = vpop.f32.mrf.mxu1  ;;  %v8205_v58 = vpop.f32.mrf.mxu0 }
 0x230   : > { %v7201_v48 = vld [vmem:[%s13198_s7 + $0x2] ss:$0 sm:$0xff] }
 0x231   : > { %v2061_v23 = vpop.f32.mrf.mxu1 }
 0x233   : > { %v8212_v37 = vpop.f32.mrf.mxu1 }
 0x235   : > { %v2064_v21 = vpop.f32.mrf.mxu1 }
 0x237   : > { %v8213_v44 = vpop.f32.mrf.mxu1 }
 0x23a   : > { %v2164_v0 = vpop.f32.mrf.mxu0 }
 0x23b   : > { %v2170_v56 = vadd.f32 %v2164_v0, %v10432_v49  ;;  %v10447_v0 = vadd.f32 %v7201_v48, %v1996_v52 }
 0x23c   : > { %v8224_v59 = vpop.f32.mrf.mxu0 }
 0x23d   : > { %v7254_v3 = vmul.f32 -1.442695, %v2170_v56  ;;  %v10449_v56 = vadd.f32 %v7210_v41, %v2061_v23 }
 0x23e   : > { %v2167_v14 = vpop.f32.mrf.mxu0 }
 0x23f   : > { %8846 = vpow2.f32 %v7254_v3 }
 0x240   : > { %v8225_v21 = vpop.f32.mrf.mxu0 }
 0x241   : > { %v2229_v37 = vpop.f32.mrf.mxu1 }
 0x242   : > { %v2235_v13 = vadd.f32 %v2229_v37, %v10438_v2 }
 0x243   : > { %v8236_v10 = vpop.f32.mrf.mxu1 }
 0x244   : > { %v7255_v5 = vmul.f32 -1.442695, %v2235_v13 }
 0x245   : > { %v2232_v18 = vpop.f32.mrf.mxu1 }
 0x246   : > { %8848 = vpow2.f32 %v7255_v5 }
 0x247   : > { %v8237_v26 = vpop.f32.mrf.mxu1 }
 0x24a   : > { %v2294_v54 = vpop.f32.mrf.mxu0 }
 0x24b   : > { %v2300_v3 = vadd.f32 %v2294_v54, %v10447_v0 }
 0x24c   : > { %v8248_v58 = vpop.f32.mrf.mxu0  ;;  %v8847_v34 = vpop.eup %8846 }
 0x24d   : > { %v2369_v59 = vadd.f32 1.0, %v8847_v34 }
 0x24e   : > { %v2297_v44 = vpop.f32.mrf.mxu0 }
 0x24f   : > { %8850 = vrcp.f32 %v2369_v59 }
 0x250   : > { %v8249_v1 = vpop.f32.mrf.mxu0  ;;  %8852 = vtanh.f32 %v2300_v3 }
 0x251   : > { %v2359_v14 = vpop.f32.mrf.mxu1 }
 0x252   : > { %v2365_v21 = vadd.f32 %v2359_v14, %v10449_v56 }
 0x253   : > { %v8849_v37 = vpop.eup %8848  ;;  %v8260_v13 = vpop.f32.mrf.mxu1 }
 0x254   : > { %v2375_v10 = vadd.f32 1.0, %v8849_v37  ;;  %v7256_v5 = vmul.f32 -1.442695, %v2365_v21  ;;  %v13426_v21 = vmov 0.0  }
 0x255   : > { %v2362_v18 = vpop.f32.mrf.mxu1 }
 0x256   : > { %8854 = vrcp.f32 %v2375_v10 }
 0x257   : > { %8856 = vpow2.f32 %v7256_v5  ;;  %v8261_v52 = vpop.f32.mrf.mxu1 }
 0x25c   : > { %v8851_v26 = vpop.eup %8850 }
 0x25d   : > { %v8853_v23 = vpop.eup %8852 }
 0x25e   : > { %v2386_v41 = vmul.f32 %v8853_v23, %v8851_v26 }
 0x263   : > { %v8855_v48 = vpop.eup %8854 }
 0x264   : > { %v8857_v58 = vpop.eup %8856  ;;  %v2385_v34 = vmul.f32 0.0, %v8855_v48 }
 0x265   : > { %v2382_v54 = vadd.f32 1.0, %v8857_v58 }
 0x266   : > { %v10453_v44 = vadd.f32 %v2386_v41, %v2385_v34 }
 0x267   : > { %8858 = vrcp.f32 %v2382_v54 }
 0x268   : > { %8860 = vtanh.f32 %v10453_v44 }
 0x274   : > { %v8859_v59 = vpop.eup %8858 }
 0x275   : > { %v8861_v1 = vpop.eup %8860 }
 0x276   : > { %v2389_v14 = vmul.f32 %v8861_v1, %v8859_v59 }
 0x278   : > { %v2390_v3 = vpack.c.bf16 %v2389_v14, %v2389_v14 }
 0x27a   : > { %8271 = vmatmul.mubr.msk.bf16.vlgmr.msra.gmra.mxu0 %vm2126_vm2, %v2390_v3  ;;  %8283 = vmatmul.mubr.msk.bf16.vlgmr.msra.gmra.mxu1 %vm2126_vm2, %v2390_v3 }
 0x27b   : > { %8287 = vmatpush3.bf16.msra.mxu0 %v10258_v29  ;;  %8299 = vmatpush3.bf16.msra.mxu1 %v10282_v32 }
 0x27c   : > { %8288 = vmatprep.subr.bf16.mxu0 %v13426_v21  ;;  %8300 = vmatprep.subr.bf16.mxu1 %v13426_v21 }
 0x27d   : > { %8294 = vmatprep.mubr.msk.bf16.mxu0 %vm9659_vm1, %v13426_v21  ;;  %8306 = vmatprep.mubr.msk.bf16.mxu1 %vm9659_vm1, %v13426_v21 }
 0x27f   : > { %8289 = vmatpush3.bf16.msra.mxu0 %v10273_v31  ;;  %8301 = vmatpush3.bf16.msra.mxu1 %v10297_v35 }
 0x280   : > { %8290 = vmatprep.subr.bf16.mxu0 %v13426_v21  ;;  %8302 = vmatprep.subr.bf16.mxu1 %v13426_v21 }
 0x283   : > { %8291 = vmatpush3.bf16.msra.mxu0 %v10289_v33  ;;  %8303 = vmatpush3.bf16.msra.mxu1 %v10313_v38 }
 0x284   : > { %8292 = vmatprep.subr.bf16.mxu0 %v13426_v21  ;;  %8304 = vmatprep.subr.bf16.mxu1 %v13426_v21 }
 0x287   : > { %8293 = vmatpush3.bf16.msra.mxu0 %v10306_v36  ;;  %8305 = vmatpush3.bf16.msra.mxu1 %v10323_v39 }
 0x288   : > { %8310 = vmatprep.subr.bf16.mxu0 %v13426_v21  ;;  %8322 = vmatprep.subr.bf16.mxu1 %v13426_v21 }
 0x28a   : > { %8295 = vmatmul.mubr.msk.bf16.vlgmr.msra.gmra.mxu0 %vm2126_vm2, %v2390_v3  ;;  %8307 = vmatmul.mubr.msk.bf16.vlgmr.msra.gmra.mxu1 %vm2126_vm2, %v2390_v3 }
 0x28b   : > { %8311 = vmatpush3.bf16.msra.mxu0 %v10197_v15  ;;  %8323 = vmatpush3.bf16.msra.mxu1 %v10220_v19 }
 0x28c   : > { %8312 = vmatprep.subr.bf16.mxu0 %v13426_v21  ;;  %8324 = vmatprep.subr.bf16.mxu1 %v13426_v21 }
 0x28d   : > { %8318 = vmatprep.mubr.msk.bf16.mxu0 %vm9659_vm1, %v13426_v21  ;;  %8330 = vmatprep.mubr.msk.bf16.mxu1 %vm9659_vm1, %v13426_v21 }
 0x28f   : > { %8313 = vmatpush3.bf16.msra.mxu0 %v10210_v17  ;;  %8325 = vmatpush3.bf16.msra.mxu1 %v10235_v22 }
 0x290   : > { %8314 = vmatprep.subr.bf16.mxu0 %v13426_v21  ;;  %8326 = vmatprep.subr.bf16.mxu1 %v13426_v21 }
 0x293   : > { %8315 = vmatpush3.bf16.msra.mxu0 %v10227_v20  ;;  %8327 = vmatpush3.bf16.msra.mxu1 %v10251_v27 }
 0x294   : > { %8316 = vmatprep.subr.bf16.mxu0 %v13426_v21  ;;  %8328 = vmatprep.subr.bf16.mxu1 %v13426_v21 }
 0x297   : > { %8317 = vmatpush3.bf16.msra.mxu0 %v10244_v24  ;;  %8329 = vmatpush3.bf16.msra.mxu1 %v10266_v30 }
 0x298   : > { %8334 = vmatprep.subr.bf16.mxu0 %v13426_v21  ;;  %8346 = vmatprep.subr.bf16.mxu1 %v13426_v21 }
 0x33a   : > { %v2428_v37 = vpop.f32.mrf.mxu0  ;;  %v2472_v13 = vpop.f32.mrf.mxu1 }
 0x33b   : > { %v2435_v10 = vrot.slane %v2428_v37, 7  ;;  %v2479_v5 = vrot.slane %v2472_v13, 7 }
 0x33c   : > { %v8272_v18 = vpop.f32.mrf.mxu0  ;;  %v8284_v52 = vpop.f32.mrf.mxu1 }
 0x33d   : > { %v2437_v26 = vadd.f32 %v2435_v10, %v10432_v49  ;;  %v2481_v23 = vadd.f32 %v2479_v5, %v10438_v2 }
 0x33e   : > { %v2431_v48 = vpop.f32.mrf.mxu0  ;;  %v2475_v58 = vpop.f32.mrf.mxu1 }
 0x33f   : > { %v7261_v34 = vmul.f32 -1.442695, %v2437_v26  ;;  %v7262_v41 = vmul.f32 -1.442695, %v2481_v23 }
 0x340   : > { %v8273_v54 = vpop.f32.mrf.mxu0  ;;  %v8285_v59 = vpop.f32.mrf.mxu1 }
 0x341   : > { %8862 = vpow2.f32 %v7261_v34 }
 0x342   : > { %8864 = vpow2.f32 %v7262_v41 }
 0x34a   : > { %v2516_v1 = vpop.f32.mrf.mxu0  ;;  %v2560_v14 = vpop.f32.mrf.mxu1 }
 0x34b   : > { %v2523_v3 = vrot.slane %v2516_v1, 7  ;;  %v2567_v45 = vrot.slane %v2560_v14, 7  ;;  %v2590_v14 = vrot.slane %v10453_v44, 7 }
 0x34c   : > { %v8296_v37 = vpop.f32.mrf.mxu0  ;;  %v8308_v13 = vpop.f32.mrf.mxu1 }
 0x34d   : > { %v2525_v18 = vadd.f32 %v2523_v3, %v10447_v0  ;;  %v2569_v10 = vadd.f32 %v2567_v45, %v10449_v56 }
 0x34e   : > { %v8863_v52 = vpop.eup %8862  ;;  %v2519_v5 = vpop.f32.mrf.mxu0 }
 0x34f   : > { %v2563_v48 = vpop.f32.mrf.mxu1  ;;  %v8865_v58 = vpop.eup %8864  ;;  %v2573_v26 = vadd.f32 1.0, %v8863_v52  ;;  %v7263_v23 = vmul.f32 -1.442695, %v2569_v10  ;;  %8866 = vtanh.f32 %v2525_v18 }
 0x350   : > { %v2579_v54 = vadd.f32 1.0, %v8865_v58  ;;  %v8297_v34 = vpop.f32.mrf.mxu0 }
 0x351   : > { %v8309_v41 = vpop.f32.mrf.mxu1  ;;  %8868 = vrcp.f32 %v2573_v26 }
 0x352   : > { %8870 = vrcp.f32 %v2579_v54 }
 0x353   : > { %8872 = vpow2.f32 %v7263_v23 }
 0x35c   : > { %v8867_v59 = vpop.eup %8866 }
 0x35e   : > { %v8869_v1 = vpop.eup %8868 }
 0x35f   : > { %v8871_v3 = vpop.eup %8870  ;;  %v2593_v37 = vmul.f32 %v8869_v1, %v8867_v59 }
 0x360   : > { %v8873_v45 = vpop.eup %8872  ;;  %v2592_v13 = vmul.f32 %v8871_v3, %v2590_v14 }
 0x361   : > { %v2586_v5 = vadd.f32 1.0, %v8873_v45 }
 0x362   : > { %v10505_v48 = vadd.f32 %v2593_v37, %v2592_v13 }
 0x363   : > { %8874 = vrcp.f32 %v2586_v5 }
 0x364   : > { %8876 = vtanh.f32 %v10505_v48 }
 0x370   : > { %v8875_v18 = vpop.eup %8874 }
 0x371   : > { %v8877_v10 = vpop.eup %8876 }
 0x372   : > { %v2596_v52 = vmul.f32 %v8877_v10, %v8875_v18 }
 0x374   : > { %v2597_v58 = vpack.c.bf16 %v2596_v52, %v2596_v52 }
 0x376   : > { %v2599_v26 = vshrl.u32 %v2597_v58, 16 }
 0x378   : > { %8319 = vmatmul.mubr.msk.bf16.vlgmr.msra.gmra.mxu0 %vm2126_vm2, %v2599_v26  ;;  %8331 = vmatmul.mubr.msk.bf16.vlgmr.msra.gmra.mxu1 %vm2126_vm2, %v2599_v26 }
 0x379   : > { %8335 = vmatpush3.bf16.msra.mxu0 %v10258_v29  ;;  %8347 = vmatpush3.bf16.msra.mxu1 %v10282_v32 }
 0x37a   : > { %8336 = vmatprep.subr.bf16.mxu0 %v13426_v21  ;;  %8348 = vmatprep.subr.bf16.mxu1 %v13426_v21 }
 0x37b   : > { %8342 = vmatprep.mubr.msk.bf16.mxu0 %vm9659_vm1, %v13426_v21  ;;  %8354 = vmatprep.mubr.msk.bf16.mxu1 %vm9659_vm1, %v13426_v21 }
 0x37d   : > { %8337 = vmatpush3.bf16.msra.mxu0 %v10273_v31  ;;  %8349 = vmatpush3.bf16.msra.mxu1 %v10297_v35 }
 0x37e   : > { %8338 = vmatprep.subr.bf16.mxu0 %v13426_v21  ;;  %8350 = vmatprep.subr.bf16.mxu1 %v13426_v21 }
 0x381   : > { %8339 = vmatpush3.bf16.msra.mxu0 %v10289_v33  ;;  %8351 = vmatpush3.bf16.msra.mxu1 %v10313_v38 }
 0x382   : > { %8340 = vmatprep.subr.bf16.mxu0 %v13426_v21  ;;  %8352 = vmatprep.subr.bf16.mxu1 %v13426_v21 }
 0x385   : > { %8341 = vmatpush3.bf16.msra.mxu0 %v10306_v36  ;;  %8353 = vmatpush3.bf16.msra.mxu1 %v10323_v39 }
 0x386   : > { %8358 = vmatprep.subr.bf16.mxu0 %v13426_v21  ;;  %8370 = vmatprep.subr.bf16.mxu1 %v13426_v21 }
 0x388   : > { %8343 = vmatmul.mubr.msk.bf16.vlgmr.msra.gmra.mxu0 %vm2126_vm2, %v2599_v26  ;;  %8355 = vmatmul.mubr.msk.bf16.vlgmr.msra.gmra.mxu1 %vm2126_vm2, %v2599_v26 }
 0x389   : > { %8359 = vmatpush3.bf16.msra.mxu0 %v10197_v15  ;;  %8371 = vmatpush3.bf16.msra.mxu1 %v10220_v19 }
 0x38a   : > { %8360 = vmatprep.subr.bf16.mxu0 %v13426_v21  ;;  %8372 = vmatprep.subr.bf16.mxu1 %v13426_v21 }
 0x38b   : > { %8366 = vmatprep.mubr.msk.bf16.mxu0 %vm9659_vm1, %v13426_v21  ;;  %8378 = vmatprep.mubr.msk.bf16.mxu1 %vm9659_vm1, %v13426_v21 }
 0x38d   : > { %8361 = vmatpush3.bf16.msra.mxu0 %v10210_v17  ;;  %8373 = vmatpush3.bf16.msra.mxu1 %v10235_v22 }
 0x38e   : > { %8362 = vmatprep.subr.bf16.mxu0 %v13426_v21  ;;  %8374 = vmatprep.subr.bf16.mxu1 %v13426_v21 }
 0x391   : > { %8363 = vmatpush3.bf16.msra.mxu0 %v10227_v20  ;;  %8375 = vmatpush3.bf16.msra.mxu1 %v10251_v27 }
 0x392   : > { %8364 = vmatprep.subr.bf16.mxu0 %v13426_v21  ;;  %8376 = vmatprep.subr.bf16.mxu1 %v13426_v21 }
 0x395   : > { %8365 = vmatpush3.bf16.msra.mxu0 %v10244_v24  ;;  %8377 = vmatpush3.bf16.msra.mxu1 %v10266_v30 }
 0x396   : > { %8382 = vmatprep.subr.bf16.mxu0 %v13426_v21  ;;  %8394 = vmatprep.subr.bf16.mxu1 %v13426_v21 }
 0x438   : > { %v2638_v15 = vpop.f32.mrf.mxu0  ;;  %v2682_v17 = vpop.f32.mrf.mxu1 }
 0x439   : > { %v2645_v19 = vrot.slane %v2638_v15, 6  ;;  %v2689_v22 = vrot.slane %v2682_v17, 6 }
 0x43a   : > { %v8320_v29 = vpop.f32.mrf.mxu0  ;;  %v8332_v20 = vpop.f32.mrf.mxu1 }
 0x43b   : > { %v2647_v27 = vadd.f32 %v2645_v19, %v10432_v49  ;;  %v2691_v31 = vadd.f32 %v2689_v22, %v10438_v2  ;;  %v2800_v29 = vrot.slane %v10505_v48, 7  ;;  %v10565_v48 = vld [vmem:[%s13199_s8 + $0x58] sm:$0xff]  }
 0x43c   : > { %v2641_v33 = vpop.f32.mrf.mxu0  ;;  %v2685_v44 = vpop.f32.mrf.mxu1 }
 0x43d   : > { %v7268_v23 = vmul.f32 -1.442695, %v2647_v27  ;;  %v7269_v24 = vmul.f32 -1.442695, %v2691_v31 }
 0x43e   : > { %v8321_v54 = vpop.f32.mrf.mxu0  ;;  %v8333_v30 = vpop.f32.mrf.mxu1 }
 0x43f   : > { %8878 = vpow2.f32 %v7268_v23 }
 0x440   : > { %8880 = vpow2.f32 %v7269_v24 }
 0x448   : > { %v2726_v34 = vpop.f32.mrf.mxu0  ;;  %v2770_v41 = vpop.f32.mrf.mxu1 }
 0x449   : > { %v2733_v59 = vrot.slane %v2726_v34, 6  ;;  %v2777_v1 = vrot.slane %v2770_v41, 6 }
 0x44a   : > { %v8344_v14 = vpop.f32.mrf.mxu0  ;;  %v8356_v3 = vpop.f32.mrf.mxu1 }
 0x44b   : > { %v2735_v37 = vadd.f32 %v2733_v59, %v10447_v0  ;;  %v2779_v45 = vadd.f32 %v2777_v1, %v10449_v56  ;;  %v10578_v59 = vld [vmem:[%s13199_s8 + $0x50] sm:$0xff]   ;;  %v10634_v1 = vld [vmem:[%s13199_s8 + $0x8] sm:$0xff]   ;;  %v10648_v3 = vld [vmem:[%s13199_s8] sm:$0xff]  }
 0x44c   : > { %v8879_v13 = vpop.eup %8878  ;;  %v2729_v5 = vpop.f32.mrf.mxu0  ;;  %v10640_v14 = vld [vmem:[%s13199_s8 + $0x28] sm:$0xff]  }
 0x44d   : > { %v2773_v18 = vpop.f32.mrf.mxu1  ;;  %v8881_v10 = vpop.eup %8880  ;;  %v2783_v52 = vadd.f32 1.0, %v8879_v13  ;;  %v7270_v58 = vmul.f32 -1.442695, %v2779_v45  ;;  %8882 = vtanh.f32 %v2735_v37  ;;  %v10654_v37 = vld [vmem:[%s13199_s8 + $0x20] sm:$0xff]  }
 0x44e   : > { %v2789_v26 = vadd.f32 1.0, %v8881_v10  ;;  %v8345_v15 = vpop.f32.mrf.mxu0 }
 0x44f   : > { %v8357_v17 = vpop.f32.mrf.mxu1  ;;  %8884 = vrcp.f32 %v2783_v52 }
 0x450   : > { %8886 = vrcp.f32 %v2789_v26 }
 0x451   : > { %8888 = vpow2.f32 %v7270_v58 }
 0x45a   : > { %v8883_v19 = vpop.eup %8882 }
 0x45c   : > { %v8885_v22 = vpop.eup %8884 }
 0x45d   : > { %v8887_v20 = vpop.eup %8886  ;;  %v2803_v27 = vmul.f32 %v8885_v22, %v8883_v19 }
 0x45e   : > { %v8889_v31 = vpop.eup %8888  ;;  %v2802_v33 = vmul.f32 %v8887_v20, %v2800_v29 }
 0x45f   : > { %v2796_v44 = vadd.f32 1.0, %v8889_v31 }
 0x460   : > { %v10557_v23 = vadd.f32 %v2803_v27, %v2802_v33 }
 0x461   : > { %8890 = vrcp.f32 %v2796_v44 }
 0x462   : > { %8892 = vtanh.f32 %v10557_v23 }
 0x46e   : > { %v8891_v24 = vpop.eup %8890 }
 0x46f   : > { %v8893_v54 = vpop.eup %8892 }
 0x470   : > { %v2806_v30 = vmul.f32 %v8893_v54, %v8891_v24 }
 0x472   : > { %v2807_v34 = vpack.c.bf16 %v2806_v30, %v2806_v30 }
 0x474   : > { %v2809_v41 = vrot.slane %v2807_v34, 1 }
 0x476   : > { %8367 = vmatmul.mubr.msk.bf16.vlgmr.msra.gmra.mxu0 %vm2126_vm2, %v2809_v41  ;;  %8379 = vmatmul.mubr.msk.bf16.vlgmr.msra.gmra.mxu1 %vm2126_vm2, %v2809_v41 }
 0x477   : > { %8383 = vmatpush3.bf16.msra.mxu0 %v10565_v48  ;;  %8395 = vmatpush3.bf16.msra.mxu1 %v10282_v32  ;;  %v10587_v32 = vld [vmem:[%s13199_s8 + $0x48] sm:$0xff]  }
 0x478   : > { %8384 = vmatprep.subr.bf16.mxu0 %v13426_v21  ;;  %8396 = vmatprep.subr.bf16.mxu1 %v13426_v21 }
 0x479   : > { %8390 = vmatprep.mubr.msk.bf16.mxu0 %vm9659_vm1, %v13426_v21  ;;  %8402 = vmatprep.mubr.msk.bf16.mxu1 %vm9659_vm1, %v13426_v21 }
 0x47b   : > { %8385 = vmatpush3.bf16.msra.mxu0 %v10578_v59  ;;  %8397 = vmatpush3.bf16.msra.mxu1 %v10297_v35  ;;  %v10602_v35 = vld [vmem:[%s13199_s8 + $0x18] sm:$0xff]  }
 0x47c   : > { %8386 = vmatprep.subr.bf16.mxu0 %v13426_v21  ;;  %8398 = vmatprep.subr.bf16.mxu1 %v13426_v21 }
 0x47f   : > { %8387 = vmatpush3.bf16.msra.mxu0 %v10587_v32  ;;  %8399 = vmatpush3.bf16.msra.mxu1 %v10313_v38  ;;  %v10620_v38 = vld [vmem:[%s13199_s8 + $0x10] sm:$0xff]  }
 0x480   : > { %8388 = vmatprep.subr.bf16.mxu0 %v13426_v21  ;;  %8400 = vmatprep.subr.bf16.mxu1 %v13426_v21 }
 0x483   : > { %8389 = vmatpush3.bf16.msra.mxu0 %v10306_v36  ;;  %8401 = vmatpush3.bf16.msra.mxu1 %v10323_v39  ;;  %v10608_v36 = vld [vmem:[%s13199_s8 + $0x38] sm:$0xff]   ;;  %v10626_v39 = vld [vmem:[%s13199_s8 + $0x30] sm:$0xff]  }
 0x484   : > { %8406 = vmatprep.subr.bf16.mxu0 %v13426_v21  ;;  %8418 = vmatprep.subr.bf16.mxu1 %v13426_v21 }
 0x486   : > { %8391 = vmatmul.mubr.msk.bf16.vlgmr.msra.gmra.mxu0 %vm2126_vm2, %v2809_v41  ;;  %8403 = vmatmul.mubr.msk.bf16.vlgmr.msra.gmra.mxu1 %vm2126_vm2, %v2809_v41 }
 0x487   : > { %8407 = vmatpush3.bf16.msra.mxu0 %v10602_v35  ;;  %8419 = vmatpush3.bf16.msra.mxu1 %v10608_v36 }
 0x488   : > { %8408 = vmatprep.subr.bf16.mxu0 %v13426_v21  ;;  %8420 = vmatprep.subr.bf16.mxu1 %v13426_v21 }
 0x489   : > { %8414 = vmatprep.mubr.msk.bf16.mxu0 %vm9659_vm1, %v13426_v21  ;;  %8426 = vmatprep.mubr.msk.bf16.mxu1 %vm9659_vm1, %v13426_v21 }
 0x48b   : > { %8409 = vmatpush3.bf16.msra.mxu0 %v10620_v38  ;;  %8421 = vmatpush3.bf16.msra.mxu1 %v10626_v39 }
 0x48c   : > { %8410 = vmatprep.subr.bf16.mxu0 %v13426_v21  ;;  %8422 = vmatprep.subr.bf16.mxu1 %v13426_v21 }
 0x48f   : > { %8411 = vmatpush3.bf16.msra.mxu0 %v10634_v1  ;;  %8423 = vmatpush3.bf16.msra.mxu1 %v10640_v14 }
 0x490   : > { %8412 = vmatprep.subr.bf16.mxu0 %v13426_v21  ;;  %8424 = vmatprep.subr.bf16.mxu1 %v13426_v21 }
 0x493   : > { %8413 = vmatpush3.bf16.msra.mxu0 %v10648_v3  ;;  %8425 = vmatpush3.bf16.msra.mxu1 %v10654_v37 }
 0x494   : > { %8430 = vmatprep.subr.bf16.mxu0 %v13426_v21  ;;  %8442 = vmatprep.subr.bf16.mxu1 %v13426_v21 }
 0x536   : > { %v2847_v45 = vpop.f32.mrf.mxu0  ;;  %v2891_v13 = vpop.f32.mrf.mxu1 }
 0x537   : > { %v2854_v5 = vrot.slane %v2847_v45, 5  ;;  %v2898_v18 = vrot.slane %v2891_v13, 5 }
 0x538   : > { %v8368_v10 = vpop.f32.mrf.mxu0  ;;  %v8380_v52 = vpop.f32.mrf.mxu1 }
 0x539   : > { %v2856_v58 = vadd.f32 %v2854_v5, %v10432_v49  ;;  %v2900_v26 = vadd.f32 %v2898_v18, %v10438_v2 }
 0x53a   : > { %v2850_v15 = vpop.f32.mrf.mxu0  ;;  %v2894_v17 = vpop.f32.mrf.mxu1 }
 0x53b   : > { %v7275_v19 = vmul.f32 -1.442695, %v2856_v58  ;;  %v7276_v22 = vmul.f32 -1.442695, %v2900_v26 }
 0x53c   : > { %v8369_v29 = vpop.f32.mrf.mxu0  ;;  %v8381_v20 = vpop.f32.mrf.mxu1 }
 0x53d   : > { %8894 = vpow2.f32 %v7275_v19  ;;  %v3009_v19 = vrot.slane %v10557_v23, 7  ;;  %v10673_v23 = vld [vmem:[%s13199_s8 + $0x78] sm:$0xff]  }
 0x53e   : > { %8896 = vpow2.f32 %v7276_v22 }
 0x546   : > { %v2935_v27 = vpop.f32.mrf.mxu0  ;;  %v2979_v31 = vpop.f32.mrf.mxu1 }
 0x547   : > { %v2942_v33 = vrot.slane %v2935_v27, 5  ;;  %v2986_v44 = vrot.slane %v2979_v31, 5 }
 0x548   : > { %v8392_v24 = vpop.f32.mrf.mxu0  ;;  %v8404_v54 = vpop.f32.mrf.mxu1 }
 0x549   : > { %v2944_v30 = vadd.f32 %v2942_v33, %v10447_v0  ;;  %v2988_v34 = vadd.f32 %v2986_v44, %v10449_v56 }
 0x54a   : > { %v8895_v41 = vpop.eup %8894  ;;  %v2938_v45 = vpop.f32.mrf.mxu0 }
 0x54b   : > { %v2982_v13 = vpop.f32.mrf.mxu1  ;;  %v8897_v5 = vpop.eup %8896  ;;  %v2992_v18 = vadd.f32 1.0, %v8895_v41  ;;  %v7277_v10 = vmul.f32 -1.442695, %v2988_v34  ;;  %8898 = vtanh.f32 %v2944_v30  ;;  %v10686_v45 = vld [vmem:[%s13199_s8 + $0x70] sm:$0xff]  }
 0x54c   : > { %v2998_v52 = vadd.f32 1.0, %v8897_v5  ;;  %v8393_v58 = vpop.f32.mrf.mxu0  ;;  %v10695_v13 = vld [vmem:[%s13199_s8 + $0x68] sm:$0xff]   ;;  %v10703_v5 = vld [vmem:[%s13199_s8 + $0x40] sm:$0xff]  }
 0x54d   : > { %v8405_v26 = vpop.f32.mrf.mxu1  ;;  %8900 = vrcp.f32 %v2992_v18  ;;  %v10709_v18 = vld [vmem:[%s13199_s8 + $0x60] sm:$0xff]  }
 0x54e   : > { %8902 = vrcp.f32 %v2998_v52 }
 0x54f   : > { %8904 = vpow2.f32 %v7277_v10 }
 0x558   : > { %v8899_v15 = vpop.eup %8898 }
 0x55a   : > { %v8901_v17 = vpop.eup %8900 }
 0x55b   : > { %v8903_v22 = vpop.eup %8902  ;;  %v3012_v29 = vmul.f32 %v8901_v17, %v8899_v15 }
 0x55c   : > { %v8905_v20 = vpop.eup %8904  ;;  %v3011_v27 = vmul.f32 %v8903_v22, %v3009_v19 }
 0x55d   : > { %v3005_v31 = vadd.f32 1.0, %v8905_v20 }
 0x55e   : > { %v10664_v33 = vadd.f32 %v3012_v29, %v3011_v27 }
 0x55f   : > { %8906 = vrcp.f32 %v3005_v31 }
 0x560   : > { %8908 = vtanh.f32 %v10664_v33 }
 0x56c   : > { %v8907_v44 = vpop.eup %8906 }
 0x56d   : > { %v8909_v24 = vpop.eup %8908 }
 0x56e   : > { %v3015_v54 = vmul.f32 %v8909_v24, %v8907_v44 }
 0x570   : > { %v3016_v30 = vpack.c.bf16 %v3015_v54, %v3015_v54 }
 0x572   : > { %v3018_v34 = vshrl.u32 %v3016_v30, 16 }
 0x574   : > { %v3020_v41 = vrot.slane %v3018_v34, 1 }
 0x576   : > { %8415 = vmatmul.mubr.msk.bf16.vlgmr.msra.gmra.mxu0 %vm2126_vm2, %v3020_v41  ;;  %8427 = vmatmul.mubr.msk.bf16.vlgmr.msra.gmra.mxu1 %vm2126_vm2, %v3020_v41 }
 0x577   : > { %8431 = vmatpush3.bf16.msra.mxu0 %v10565_v48  ;;  %8443 = vmatpush3.bf16.msra.mxu1 %v10673_v23 }
 0x578   : > { %8432 = vmatprep.subr.bf16.mxu0 %v13426_v21  ;;  %8444 = vmatprep.subr.bf16.mxu1 %v13426_v21 }
 0x579   : > { %8438 = vmatprep.mubr.msk.bf16.mxu0 %vm9659_vm1, %v13426_v21  ;;  %8450 = vmatprep.mubr.msk.bf16.mxu1 %vm9659_vm1, %v13426_v21 }
 0x57b   : > { %8433 = vmatpush3.bf16.msra.mxu0 %v10578_v59  ;;  %8445 = vmatpush3.bf16.msra.mxu1 %v10686_v45 }
 0x57c   : > { %8434 = vmatprep.subr.bf16.mxu0 %v13426_v21  ;;  %8446 = vmatprep.subr.bf16.mxu1 %v13426_v21 }
 0x57f   : > { %8435 = vmatpush3.bf16.msra.mxu0 %v10587_v32  ;;  %8447 = vmatpush3.bf16.msra.mxu1 %v10695_v13 }
 0x580   : > { %8436 = vmatprep.subr.bf16.mxu0 %v13426_v21  ;;  %8448 = vmatprep.subr.bf16.mxu1 %v13426_v21 }
 0x583   : > { %8437 = vmatpush3.bf16.msra.mxu0 %v10703_v5  ;;  %8449 = vmatpush3.bf16.msra.mxu1 %v10709_v18 }
 0x584   : > { %8454 = vmatprep.subr.bf16.mxu0 %v13426_v21  ;;  %8466 = vmatprep.subr.bf16.mxu1 %v13426_v21 }
 0x586   : > { %8439 = vmatmul.mubr.msk.bf16.vlgmr.msra.gmra.mxu0 %vm2126_vm2, %v3020_v41  ;;  %8451 = vmatmul.mubr.msk.bf16.vlgmr.msra.gmra.mxu1 %vm2126_vm2, %v3020_v41 }
 0x587   : > { %8455 = vmatpush3.bf16.msra.mxu0 %v10602_v35  ;;  %8467 = vmatpush3.bf16.msra.mxu1 %v10608_v36 }
 0x588   : > { %8456 = vmatprep.subr.bf16.mxu0 %v13426_v21  ;;  %8468 = vmatprep.subr.bf16.mxu1 %v13426_v21 }
 0x589   : > { %8462 = vmatprep.mubr.msk.bf16.mxu0 %vm9659_vm1, %v13426_v21  ;;  %8474 = vmatprep.mubr.msk.bf16.mxu1 %vm9659_vm1, %v13426_v21 }
 0x58b   : > { %8457 = vmatpush3.bf16.msra.mxu0 %v10620_v38  ;;  %8469 = vmatpush3.bf16.msra.mxu1 %v10626_v39 }
 0x58c   : > { %8458 = vmatprep.subr.bf16.mxu0 %v13426_v21  ;;  %8470 = vmatprep.subr.bf16.mxu1 %v13426_v21 }
 0x58f   : > { %8459 = vmatpush3.bf16.msra.mxu0 %v10634_v1  ;;  %8471 = vmatpush3.bf16.msra.mxu1 %v10640_v14 }
 0x590   : > { %8460 = vmatprep.subr.bf16.mxu0 %v13426_v21  ;;  %8472 = vmatprep.subr.bf16.mxu1 %v13426_v21 }
 0x593   : > { %8461 = vmatpush3.bf16.msra.mxu0 %v10648_v3  ;;  %8473 = vmatpush3.bf16.msra.mxu1 %v10654_v37 }
 0x594   : > { %8478 = vmatprep.subr.bf16.mxu0 %v13426_v21  ;;  %8490 = vmatprep.subr.bf16.mxu1 %v13426_v21 }
 0x636   : > { %v3058_v10 = vpop.f32.mrf.mxu0  ;;  %v3102_v52 = vpop.f32.mrf.mxu1 }
 0x637   : > { %v3065_v58 = vrot.slane %v3058_v10, 4  ;;  %v3109_v26 = vrot.slane %v3102_v52, 4 }
 0x638   : > { %v8416_v15 = vpop.f32.mrf.mxu0  ;;  %v8428_v17 = vpop.f32.mrf.mxu1 }
 0x639   : > { %v3067_v19 = vadd.f32 %v3065_v58, %v10432_v49  ;;  %v3111_v22 = vadd.f32 %v3109_v26, %v10438_v2 }
 0x63a   : > { %v3061_v29 = vpop.f32.mrf.mxu0  ;;  %v3105_v20 = vpop.f32.mrf.mxu1 }
 0x63b   : > { %v7282_v27 = vmul.f32 -1.442695, %v3067_v19  ;;  %v7283_v31 = vmul.f32 -1.442695, %v3111_v22 }
 0x63c   : > { %v8417_v44 = vpop.f32.mrf.mxu0  ;;  %v8429_v24 = vpop.f32.mrf.mxu1 }
 0x63d   : > { %8910 = vpow2.f32 %v7282_v27 }
 0x63e   : > { %8912 = vpow2.f32 %v7283_v31 }
 0x646   : > { %v3146_v54 = vpop.f32.mrf.mxu0  ;;  %v3190_v30 = vpop.f32.mrf.mxu1 }
 0x647   : > { %v3153_v34 = vrot.slane %v3146_v54, 4  ;;  %v3197_v41 = vrot.slane %v3190_v30, 4  ;;  %v3220_v30 = vrot.slane %v10664_v33, 7 }
 0x648   : > { %v8440_v10 = vpop.f32.mrf.mxu0  ;;  %v8452_v52 = vpop.f32.mrf.mxu1 }
 0x649   : > { %v3155_v15 = vadd.f32 %v3153_v34, %v10447_v0  ;;  %v3199_v58 = vadd.f32 %v3197_v41, %v10449_v56 }
 0x64a   : > { %v8911_v17 = vpop.eup %8910  ;;  %v3149_v26 = vpop.f32.mrf.mxu0 }
 0x64b   : > { %v3193_v29 = vpop.f32.mrf.mxu1  ;;  %v8913_v20 = vpop.eup %8912  ;;  %v3203_v19 = vadd.f32 1.0, %v8911_v17  ;;  %v7284_v22 = vmul.f32 -1.442695, %v3199_v58  ;;  %8914 = vtanh.f32 %v3155_v15 }
 0x64c   : > { %v3209_v44 = vadd.f32 1.0, %v8913_v20  ;;  %v8441_v27 = vpop.f32.mrf.mxu0 }
 0x64d   : > { %v8453_v31 = vpop.f32.mrf.mxu1  ;;  %8916 = vrcp.f32 %v3203_v19 }
 0x64e   : > { %8918 = vrcp.f32 %v3209_v44 }
 0x64f   : > { %8920 = vpow2.f32 %v7284_v22 }
 0x658   : > { %v8915_v24 = vpop.eup %8914 }
 0x65a   : > { %v8917_v54 = vpop.eup %8916 }
 0x65b   : > { %v8919_v34 = vpop.eup %8918  ;;  %v3223_v10 = vmul.f32 %v8917_v54, %v8915_v24 }
 0x65c   : > { %v8921_v41 = vpop.eup %8920  ;;  %v3222_v52 = vmul.f32 %v8919_v34, %v3220_v30 }
 0x65d   : > { %v3216_v26 = vadd.f32 1.0, %v8921_v41 }
 0x65e   : > { %v10741_v29 = vadd.f32 %v3223_v10, %v3222_v52 }
 0x65f   : > { %8922 = vrcp.f32 %v3216_v26 }
 0x660   : > { %8924 = vtanh.f32 %v10741_v29 }
 0x66c   : > { %v8923_v15 = vpop.eup %8922 }
 0x66d   : > { %v8925_v58 = vpop.eup %8924 }
 0x66e   : > { %v3226_v17 = vmul.f32 %v8925_v58, %v8923_v15 }
 0x670   : > { %v3227_v20 = vpack.c.bf16 %v3226_v17, %v3226_v17 }
 0x672   : > { %v3229_v19 = vrot.slane %v3227_v20, 2 }
 0x674   : > { %8463 = vmatmul.mubr.msk.bf16.vlgmr.msra.gmra.mxu0 %vm2126_vm2, %v3229_v19  ;;  %8475 = vmatmul.mubr.msk.bf16.vlgmr.msra.gmra.mxu1 %vm2126_vm2, %v3229_v19 }
 0x675   : > { %8479 = vmatpush3.bf16.msra.mxu0 %v10565_v48  ;;  %8491 = vmatpush3.bf16.msra.mxu1 %v10673_v23 }
 0x676   : > { %8480 = vmatprep.subr.bf16.mxu0 %v13426_v21  ;;  %8492 = vmatprep.subr.bf16.mxu1 %v13426_v21 }
 0x677   : > { %8486 = vmatprep.mubr.msk.bf16.mxu0 %vm9659_vm1, %v13426_v21  ;;  %8498 = vmatprep.mubr.msk.bf16.mxu1 %vm9659_vm1, %v13426_v21 }
 0x679   : > { %8481 = vmatpush3.bf16.msra.mxu0 %v10578_v59  ;;  %8493 = vmatpush3.bf16.msra.mxu1 %v10686_v45 }
 0x67a   : > { %8482 = vmatprep.subr.bf16.mxu0 %v13426_v21  ;;  %8494 = vmatprep.subr.bf16.mxu1 %v13426_v21 }
 0x67d   : > { %8483 = vmatpush3.bf16.msra.mxu0 %v10587_v32  ;;  %8495 = vmatpush3.bf16.msra.mxu1 %v10695_v13 }
 0x67e   : > { %8484 = vmatprep.subr.bf16.mxu0 %v13426_v21  ;;  %8496 = vmatprep.subr.bf16.mxu1 %v13426_v21 }
 0x681   : > { %8485 = vmatpush3.bf16.msra.mxu0 %v10703_v5  ;;  %8497 = vmatpush3.bf16.msra.mxu1 %v10709_v18 }
 0x682   : > { %8502 = vmatprep.subr.bf16.mxu0 %v13426_v21  ;;  %8514 = vmatprep.subr.bf16.mxu1 %v13426_v21 }
 0x684   : > { %8487 = vmatmul.mubr.msk.bf16.vlgmr.msra.gmra.mxu0 %vm2126_vm2, %v3229_v19  ;;  %8499 = vmatmul.mubr.msk.bf16.vlgmr.msra.gmra.mxu1 %vm2126_vm2, %v3229_v19 }
 0x685   : > { %8503 = vmatpush3.bf16.msra.mxu0 %v10602_v35  ;;  %8515 = vmatpush3.bf16.msra.mxu1 %v10608_v36 }
 0x686   : > { %8504 = vmatprep.subr.bf16.mxu0 %v13426_v21  ;;  %8516 = vmatprep.subr.bf16.mxu1 %v13426_v21 }
 0x687   : > { %8510 = vmatprep.mubr.msk.bf16.mxu0 %vm9659_vm1, %v13426_v21  ;;  %8522 = vmatprep.mubr.msk.bf16.mxu1 %vm9659_vm1, %v13426_v21 }
 0x689   : > { %8505 = vmatpush3.bf16.msra.mxu0 %v10620_v38  ;;  %8517 = vmatpush3.bf16.msra.mxu1 %v10626_v39 }
 0x68a   : > { %8506 = vmatprep.subr.bf16.mxu0 %v13426_v21  ;;  %8518 = vmatprep.subr.bf16.mxu1 %v13426_v21 }
 0x68d   : > { %8507 = vmatpush3.bf16.msra.mxu0 %v10634_v1  ;;  %8519 = vmatpush3.bf16.msra.mxu1 %v10640_v14 }
 0x68e   : > { %8508 = vmatprep.subr.bf16.mxu0 %v13426_v21  ;;  %8520 = vmatprep.subr.bf16.mxu1 %v13426_v21 }
 0x691   : > { %8509 = vmatpush3.bf16.msra.mxu0 %v10648_v3  ;;  %8521 = vmatpush3.bf16.msra.mxu1 %v10654_v37 }
 0x692   : > { %8526 = vmatprep.subr.bf16.mxu0 %v13426_v21  ;;  %8538 = vmatprep.subr.bf16.mxu1 %v13426_v21 }
 0x734   : > { %v3267_v33 = vpop.f32.mrf.mxu0  ;;  %v3311_v22 = vpop.f32.mrf.mxu1 }
 0x735   : > { %v3274_v44 = vrot.slane %v3267_v33, 3  ;;  %v3318_v27 = vrot.slane %v3311_v22, 3 }
 0x736   : > { %v8464_v31 = vpop.f32.mrf.mxu0  ;;  %v8476_v24 = vpop.f32.mrf.mxu1 }
 0x737   : > { %v3276_v54 = vadd.f32 %v3274_v44, %v10432_v49  ;;  %v3320_v30 = vadd.f32 %v3318_v27, %v10438_v2 }
 0x738   : > { %v3270_v34 = vpop.f32.mrf.mxu0  ;;  %v3314_v10 = vpop.f32.mrf.mxu1 }
 0x739   : > { %v7289_v41 = vmul.f32 -1.442695, %v3276_v54  ;;  %v7290_v52 = vmul.f32 -1.442695, %v3320_v30 }
 0x73a   : > { %v8465_v26 = vpop.f32.mrf.mxu0  ;;  %v8477_v15 = vpop.f32.mrf.mxu1 }
 0x73b   : > { %8926 = vpow2.f32 %v7289_v41 }
 0x73c   : > { %8928 = vpow2.f32 %v7290_v52 }
 0x744   : > { %v3355_v58 = vpop.f32.mrf.mxu0  ;;  %v3399_v17 = vpop.f32.mrf.mxu1 }
 0x745   : > { %v3362_v20 = vrot.slane %v3355_v58, 3  ;;  %v3406_v19 = vrot.slane %v3399_v17, 3  ;;  %v3429_v17 = vrot.slane %v10741_v29, 7 }
 0x746   : > { %v8488_v33 = vpop.f32.mrf.mxu0  ;;  %v8500_v22 = vpop.f32.mrf.mxu1 }
 0x747   : > { %v3364_v31 = vadd.f32 %v3362_v20, %v10447_v0  ;;  %v3408_v44 = vadd.f32 %v3406_v19, %v10449_v56 }
 0x748   : > { %v8927_v24 = vpop.eup %8926  ;;  %v3358_v27 = vpop.f32.mrf.mxu0 }
 0x749   : > { %v3402_v34 = vpop.f32.mrf.mxu1  ;;  %v8929_v10 = vpop.eup %8928  ;;  %v3412_v54 = vadd.f32 1.0, %v8927_v24  ;;  %v7291_v30 = vmul.f32 -1.442695, %v3408_v44  ;;  %8930 = vtanh.f32 %v3364_v31 }
 0x74a   : > { %v3418_v26 = vadd.f32 1.0, %v8929_v10  ;;  %v8489_v41 = vpop.f32.mrf.mxu0 }
 0x74b   : > { %v8501_v52 = vpop.f32.mrf.mxu1  ;;  %8932 = vrcp.f32 %v3412_v54 }
 0x74c   : > { %8934 = vrcp.f32 %v3418_v26 }
 0x74d   : > { %8936 = vpow2.f32 %v7291_v30 }
 0x756   : > { %v8931_v15 = vpop.eup %8930 }
 0x758   : > { %v8933_v58 = vpop.eup %8932 }
 0x759   : > { %v8935_v20 = vpop.eup %8934  ;;  %v3432_v33 = vmul.f32 %v8933_v58, %v8931_v15 }
 0x75a   : > { %v8937_v19 = vpop.eup %8936  ;;  %v3431_v22 = vmul.f32 %v8935_v20, %v3429_v17 }
 0x75b   : > { %v3425_v27 = vadd.f32 1.0, %v8937_v19 }
 0x75c   : > { %v10793_v34 = vadd.f32 %v3432_v33, %v3431_v22 }
 0x75d   : > { %8938 = vrcp.f32 %v3425_v27 }
 0x75e   : > { %8940 = vtanh.f32 %v10793_v34 }
 0x76a   : > { %v8939_v31 = vpop.eup %8938 }
 0x76b   : > { %v8941_v44 = vpop.eup %8940 }
 0x76c   : > { %v3435_v24 = vmul.f32 %v8941_v44, %v8939_v31 }
 0x76e   : > { %v3436_v10 = vpack.c.bf16 %v3435_v24, %v3435_v24 }
 0x770   : > { %v3438_v54 = vshrl.u32 %v3436_v10, 16 }
 0x772   : > { %v3440_v30 = vrot.slane %v3438_v54, 2 }
 0x774   : > { %8511 = vmatmul.mubr.msk.bf16.vlgmr.msra.gmra.mxu0 %vm2126_vm2, %v3440_v30  ;;  %8523 = vmatmul.mubr.msk.bf16.vlgmr.msra.gmra.mxu1 %vm2126_vm2, %v3440_v30 }
 0x775   : > { %8527 = vmatpush3.bf16.msra.mxu0 %v10565_v48  ;;  %8539 = vmatpush3.bf16.msra.mxu1 %v10673_v23 }
 0x776   : > { %8528 = vmatprep.subr.bf16.mxu0 %v13426_v21  ;;  %8540 = vmatprep.subr.bf16.mxu1 %v13426_v21 }
 0x777   : > { %8534 = vmatprep.mubr.msk.bf16.mxu0 %vm9659_vm1, %v13426_v21  ;;  %8546 = vmatprep.mubr.msk.bf16.mxu1 %vm9659_vm1, %v13426_v21 }
 0x779   : > { %8529 = vmatpush3.bf16.msra.mxu0 %v10578_v59  ;;  %8541 = vmatpush3.bf16.msra.mxu1 %v10686_v45 }
 0x77a   : > { %8530 = vmatprep.subr.bf16.mxu0 %v13426_v21  ;;  %8542 = vmatprep.subr.bf16.mxu1 %v13426_v21 }
 0x77d   : > { %8531 = vmatpush3.bf16.msra.mxu0 %v10587_v32  ;;  %8543 = vmatpush3.bf16.msra.mxu1 %v10695_v13 }
 0x77e   : > { %8532 = vmatprep.subr.bf16.mxu0 %v13426_v21  ;;  %8544 = vmatprep.subr.bf16.mxu1 %v13426_v21 }
 0x781   : > { %8533 = vmatpush3.bf16.msra.mxu0 %v10703_v5  ;;  %8545 = vmatpush3.bf16.msra.mxu1 %v10709_v18 }
 0x782   : > { %8550 = vmatprep.subr.bf16.mxu0 %v13426_v21  ;;  %8562 = vmatprep.subr.bf16.mxu1 %v13426_v21 }
 0x784   : > { %8535 = vmatmul.mubr.msk.bf16.vlgmr.msra.gmra.mxu0 %vm2126_vm2, %v3440_v30  ;;  %8547 = vmatmul.mubr.msk.bf16.vlgmr.msra.gmra.mxu1 %vm2126_vm2, %v3440_v30 }
 0x785   : > { %8551 = vmatpush3.bf16.msra.mxu0 %v10602_v35  ;;  %8563 = vmatpush3.bf16.msra.mxu1 %v10608_v36 }
 0x786   : > { %8552 = vmatprep.subr.bf16.mxu0 %v13426_v21  ;;  %8564 = vmatprep.subr.bf16.mxu1 %v13426_v21 }
 0x787   : > { %8558 = vmatprep.mubr.msk.bf16.mxu0 %vm9659_vm1, %v13426_v21  ;;  %8570 = vmatprep.mubr.msk.bf16.mxu1 %vm9659_vm1, %v13426_v21 }
 0x789   : > { %8553 = vmatpush3.bf16.msra.mxu0 %v10620_v38  ;;  %8565 = vmatpush3.bf16.msra.mxu1 %v10626_v39 }
 0x78a   : > { %8554 = vmatprep.subr.bf16.mxu0 %v13426_v21  ;;  %8566 = vmatprep.subr.bf16.mxu1 %v13426_v21 }
 0x78d   : > { %8555 = vmatpush3.bf16.msra.mxu0 %v10634_v1  ;;  %8567 = vmatpush3.bf16.msra.mxu1 %v10640_v14 }
 0x78e   : > { %8556 = vmatprep.subr.bf16.mxu0 %v13426_v21  ;;  %8568 = vmatprep.subr.bf16.mxu1 %v13426_v21 }
 0x791   : > { %8557 = vmatpush3.bf16.msra.mxu0 %v10648_v3  ;;  %8569 = vmatpush3.bf16.msra.mxu1 %v10654_v37 }
 0x792   : > { %8574 = vmatprep.subr.bf16.mxu0 %v13426_v21  ;;  %8586 = vmatprep.subr.bf16.mxu1 %v13426_v21 }
 0x834   : > { %v3478_v35 = vpop.f32.mrf.mxu0  ;;  %v3522_v36 = vpop.f32.mrf.mxu1 }
 0x835   : > { %v3485_v38 = vrot.slane %v3478_v35, 2  ;;  %v3529_v39 = vrot.slane %v3522_v36, 2 }
 0x836   : > { %v8512_v29 = vpop.f32.mrf.mxu0  ;;  %v8524_v1 = vpop.f32.mrf.mxu1 }
 0x837   : > { %v3487_v14 = vadd.f32 %v3485_v38, %v10432_v49  ;;  %v3531_v26 = vadd.f32 %v3529_v39, %v10438_v2 }
 0x838   : > { %v3481_v41 = vpop.f32.mrf.mxu0  ;;  %v3525_v52 = vpop.f32.mrf.mxu1 }
 0x839   : > { %v7296_v15 = vmul.f32 -1.442695, %v3487_v14  ;;  %v7297_v3 = vmul.f32 -1.442695, %v3531_v26  ;;  %v3640_v26 = vrot.slane %v10793_v34, 7  ;;  %v8771_v34 = vld [vmem:[%s13200_s9] sm:$0xff]  }
 0x83a   : > { %v8513_v58 = vpop.f32.mrf.mxu0  ;;  %v8525_v37 = vpop.f32.mrf.mxu1 }
 0x83b   : > { %8942 = vpow2.f32 %v7296_v15 }
 0x83c   : > { %8944 = vpow2.f32 %v7297_v3 }
 0x844   : > { %v3566_v17 = vpop.f32.mrf.mxu0  ;;  %v3610_v20 = vpop.f32.mrf.mxu1 }
 0x845   : > { %v3573_v33 = vrot.slane %v3566_v17, 2  ;;  %v3617_v19 = vrot.slane %v3610_v20, 2 }
 0x846   : > { %v8536_v22 = vpop.f32.mrf.mxu0  ;;  %v8548_v27 = vpop.f32.mrf.mxu1 }
 0x847   : > { %v3575_v31 = vadd.f32 %v3573_v33, %v10447_v0  ;;  %v3619_v44 = vadd.f32 %v3617_v19, %v10449_v56  ;;  %v8774_v27 = vld [vmem:[%s13202_s11 + $0x6c] ss:$16 sps:$4 sm:$0xff]  }
 0x848   : > { %v8943_v24 = vpop.eup %8942  ;;  %v3569_v10 = vpop.f32.mrf.mxu0 }
 0x849   : > { %v3613_v54 = vpop.f32.mrf.mxu1  ;;  %v8945_v30 = vpop.eup %8944  ;;  %v3623_v35 = vadd.f32 1.0, %v8943_v24  ;;  %v7298_v36 = vmul.f32 -1.442695, %v3619_v44  ;;  %8946 = vtanh.f32 %v3575_v31 }
 0x84a   : > { %v3629_v38 = vadd.f32 1.0, %v8945_v30  ;;  %v8537_v39 = vpop.f32.mrf.mxu0 }
 0x84b   : > { %v8549_v29 = vpop.f32.mrf.mxu1  ;;  %8948 = vrcp.f32 %v3623_v35 }
 0x84c   : > { %8950 = vrcp.f32 %v3629_v38 }
 0x84d   : > { %8952 = vpow2.f32 %v7298_v36 }
 0x856   : > { %v8947_v1 = vpop.eup %8946 }
 0x858   : > { %v8949_v14 = vpop.eup %8948 }
 0x859   : > { %v8951_v41 = vpop.eup %8950  ;;  %v3643_v52 = vmul.f32 %v8949_v14, %v8947_v1 }
 0x85a   : > { %v8953_v15 = vpop.eup %8952  ;;  %v3642_v3 = vmul.f32 %v8951_v41, %v3640_v26 }
 0x85b   : > { %v3636_v58 = vadd.f32 1.0, %v8953_v15 }
 0x85c   : > { %v10845_v37 = vadd.f32 %v3643_v52, %v3642_v3 }
 0x85d   : > { %8954 = vrcp.f32 %v3636_v58 }
 0x85e   : > { %8956 = vtanh.f32 %v10845_v37 }
 0x86a   : > { %v8955_v17 = vpop.eup %8954 }
 0x86b   : > { %v8957_v20 = vpop.eup %8956 }
 0x86c   : > { %v3646_v33 = vmul.f32 %v8957_v20, %v8955_v17 }
 0x86e   : > { %v3647_v19 = vpack.c.bf16 %v3646_v33, %v3646_v33 }
 0x870   : > { %v3649_v22 = vrot.slane %v3647_v19, 3 }
 0x872   : > { %8559 = vmatmul.mubr.msk.bf16.vlgmr.msra.gmra.mxu0 %vm2126_vm2, %v3649_v22  ;;  %8571 = vmatmul.mubr.msk.bf16.vlgmr.msra.gmra.mxu1 %vm2126_vm2, %v3649_v22 }
 0x873   : > { %8575 = vmatpush3.bf16.msra.mxu0 %v10565_v48  ;;  %8587 = vmatpush3.bf16.msra.mxu1 %v10673_v23  ;;  %v8752_v48 = vld [vmem:[%s13200_s9 + $0x38] sm:$0xff]   ;;  %v8755_v23 = vld [vmem:[%s13200_s9 + $0x20] sm:$0xff]  }
 0x874   : > { %8576 = vmatprep.subr.bf16.mxu0 %v13426_v21  ;;  %8588 = vmatprep.subr.bf16.mxu1 %v13426_v21 }
 0x875   : > { %8582 = vmatprep.mubr.msk.bf16.mxu0 %vm9659_vm1, %v13426_v21  ;;  %8594 = vmatprep.mubr.msk.bf16.mxu1 %vm9659_vm1, %v13426_v21 }
 0x877   : > { %8577 = vmatpush3.bf16.msra.mxu0 %v10578_v59  ;;  %8589 = vmatpush3.bf16.msra.mxu1 %v10686_v45  ;;  %v8753_v59 = vld [vmem:[%s13200_s9 + $0x30] sm:$0xff]  }
 0x878   : > { %8578 = vmatprep.subr.bf16.mxu0 %v13426_v21  ;;  %8590 = vmatprep.subr.bf16.mxu1 %v13426_v21  ;;  %v8758_v45 = vld [vmem:[%s13202_s11 + $0x64] ss:$16 sps:$4 sm:$0xff]  }
 0x87b   : > { %8579 = vmatpush3.bf16.msra.mxu0 %v10587_v32  ;;  %8591 = vmatpush3.bf16.msra.mxu1 %v10695_v13  ;;  %v8754_v32 = vld [vmem:[%s13200_s9 + $0x28] sm:$0xff]   ;;  %v8759_v13 = vld [vmem:[%s13200_s9 + $0x18] sm:$0xff]  }
 0x87c   : > { %8580 = vmatprep.subr.bf16.mxu0 %v13426_v21  ;;  %8592 = vmatprep.subr.bf16.mxu1 %v13426_v21 }
 0x87f   : > { %8581 = vmatpush3.bf16.msra.mxu0 %v10703_v5  ;;  %8593 = vmatpush3.bf16.msra.mxu1 %v10709_v18  ;;  %v8763_v5 = vld [vmem:[%s13200_s9 + $0x10] sm:$0xff]   ;;  %v8767_v18 = vld [vmem:[%s13200_s9 + $0x8] sm:$0xff]  }
 0x880   : > { %8598 = vmatprep.subr.bf16.mxu0 %v13426_v21  ;;  %8610 = vmatprep.subr.bf16.mxu1 %v13426_v21 }
 0x882   : > { %8583 = vmatmul.mubr.msk.bf16.vlgmr.msra.gmra.mxu0 %vm2126_vm2, %v3649_v22  ;;  %8595 = vmatmul.mubr.msk.bf16.vlgmr.msra.gmra.mxu1 %vm2126_vm2, %v3649_v22 }
 0x883   : > { %8606 = vmatprep.mubr.msk.bf16.mxu0 %vm9659_vm1, %v13426_v21  ;;  %8618 = vmatprep.mubr.msk.bf16.mxu1 %vm9659_vm1, %v13426_v21 }
 0x884   : > { %8599 = vmatpush3.bf16.msra.mxu0 %v8752_v48  ;;  %8611 = vmatpush3.bf16.msra.mxu1 %v8759_v13 }
 0x885   : > { %8600 = vmatprep.subr.bf16.mxu0 %v13426_v21  ;;  %8612 = vmatprep.subr.bf16.mxu1 %v13426_v21 }
 0x888   : > { %8601 = vmatpush3.bf16.msra.mxu0 %v8753_v59  ;;  %8613 = vmatpush3.bf16.msra.mxu1 %v8763_v5 }
 0x889   : > { %8602 = vmatprep.subr.bf16.mxu0 %v13426_v21  ;;  %8614 = vmatprep.subr.bf16.mxu1 %v13426_v21 }
 0x88c   : > { %8603 = vmatpush3.bf16.msra.mxu0 %v8754_v32  ;;  %8615 = vmatpush3.bf16.msra.mxu1 %v8767_v18  ;;  %v3849_v18 = vrot.slane %v10845_v37, 7 }
 0x88d   : > { %8604 = vmatprep.subr.bf16.mxu0 %v13426_v21  ;;  %8616 = vmatprep.subr.bf16.mxu1 %v13426_v21 }
 0x890   : > { %8605 = vmatpush3.bf16.msra.mxu0 %v8755_v23  ;;  %8617 = vmatpush3.bf16.msra.mxu1 %v8771_v34 }
 0x891   : > { %4198 = vmatprep.subr.bf16.mxu0 %v8758_v45  ;;  %4359 = vmatprep.subr.bf16.mxu1 %v8774_v27 }
 0x932   : > { %v3687_v31 = vpop.f32.mrf.mxu0  ;;  %v3731_v44 = vpop.f32.mrf.mxu1 }
 0x933   : > { %v3694_v24 = vrot.slane %v3687_v31, 1  ;;  %v3738_v10 = vrot.slane %v3731_v44, 1 }
 0x934   : > { %v8560_v54 = vpop.f32.mrf.mxu0  ;;  %v8572_v30 = vpop.f32.mrf.mxu1 }
 0x935   : > { %v3696_v35 = vadd.f32 %v3694_v24, %v10432_v49  ;;  %v3740_v36 = vadd.f32 %v3738_v10, %v10438_v2 }
 0x936   : > { %v3690_v38 = vpop.f32.mrf.mxu0  ;;  %v3734_v39 = vpop.f32.mrf.mxu1 }
 0x937   : > { %v7303_v29 = vmul.f32 -1.442695, %v3696_v35  ;;  %v7304_v1 = vmul.f32 -1.442695, %v3740_v36  ;;  %v8756_v36 = vld [vmem:[%s13202_s11 + $0x60] ss:$16 sps:$4 sm:$0xff]  }
 0x938   : > { %v8561_v14 = vpop.f32.mrf.mxu0  ;;  %v8573_v26 = vpop.f32.mrf.mxu1  ;;  %v8762_v38 = vld [vmem:[%s13202_s11 + $0x44] ss:$16 sps:$4 sm:$0xff]   ;;  %v8760_v39 = vld [vmem:[%s13202_s11 + $0x40] ss:$16 sps:$4 sm:$0xff]  }
 0x939   : > { %8958 = vpow2.f32 %v7303_v29  ;;  %v13427_v29 = vmov 0   ;;  %v8768_v26 = vld [vmem:[%s13202_s11] ss:$16 sps:$4 sm:$0xff]  }
 0x93a   : > { %8960 = vpow2.f32 %v7304_v1  ;;  %v8764_v1 = vld [vmem:[%s13202_s11 + $0x20] ss:$16 sps:$4 sm:$0xff]  }
 0x942   : > { %v3775_v41 = vpop.f32.mrf.mxu0  ;;  %v3819_v52 = vpop.f32.mrf.mxu1 }
 0x943   : > { %v3782_v15 = vrot.slane %v3775_v41, 1  ;;  %v3826_v3 = vrot.slane %v3819_v52, 1  ;;  %v8786_v52 = vld [vmem:[%s13204_s13 + $0x64] ss:$16 sps:$4 sm:$0xff]  }
 0x944   : > { %v8584_v58 = vpop.f32.mrf.mxu0  ;;  %v8596_v17 = vpop.f32.mrf.mxu1 }
 0x945   : > { %v3784_v20 = vadd.f32 %v3782_v15, %v10447_v0  ;;  %v3828_v49 = vadd.f32 %v3826_v3, %v10449_v56 }
 0x946   : > { %v8959_v33 = vpop.eup %8958  ;;  %v3778_v2 = vpop.f32.mrf.mxu0 }
 0x947   : > { %v3822_v19 = vpop.f32.mrf.mxu1  ;;  %v8961_v22 = vpop.eup %8960  ;;  %v3832_v48 = vadd.f32 1.0, %v8959_v33  ;;  %v7305_v59 = vmul.f32 -1.442695, %v3828_v49  ;;  %8962 = vtanh.f32 %v3784_v20  ;;  %v8777_v20 = vld [vmem:[%s13202_s11 + $0x4c] ss:$16 sps:$4 sm:$0xff]  }
 0x948   : > { %v3838_v32 = vadd.f32 1.0, %v8961_v22  ;;  %v8585_v23 = vpop.f32.mrf.mxu0  ;;  %v8784_v49 = vld [vmem:[%s13204_s13 + $0x60] ss:$16 sps:$4 sm:$0xff]   ;;  %v8775_v33 = vld [vmem:[%s13202_s11 + $0x48] ss:$16 sps:$4 sm:$0xff]  }
 0x949   : > { %v8597_v45 = vpop.f32.mrf.mxu1  ;;  %8964 = vrcp.f32 %v3832_v48  ;;  %v8790_v19 = vld [vmem:[%s13204_s13 + $0x40] ss:$16 sps:$4 sm:$0xff]   ;;  %v8778_v48 = vld [vmem:[%s13202_s11 + $0x28] ss:$16 sps:$4 sm:$0xff]  }
 0x94a   : > { %8966 = vrcp.f32 %v3838_v32  ;;  %v8783_v32 = vld [vmem:[%s13202_s11 + $0xc] ss:$16 sps:$4 sm:$0xff]   ;;  %v8781_v23 = vld [vmem:[%s13202_s11 + $0x8] ss:$16 sps:$4 sm:$0xff]  }
 0x94b   : > { %8968 = vpow2.f32 %v7305_v59 }
 0x954   : > { %v8963_v13 = vpop.eup %8962 }
 0x956   : > { %v8965_v5 = vpop.eup %8964 }
 0x957   : > { %v8967_v0 = vpop.eup %8966  ;;  %v3852_v34 = vmul.f32 %v8965_v5, %v8963_v13  ;;  %v8787_v5 = vld [vmem:[%s13204_s13 + $0x68] ss:$16 sps:$4 sm:$0xff]  }
 0x958   : > { %v8969_v56 = vpop.eup %8968  ;;  %v3851_v27 = vmul.f32 %v8967_v0, %v3849_v18  ;;  %v8795_v18 = vld [vmem:[%s13204_s13 + $0x4c] ss:$16 sps:$4 sm:$0xff]  }
 0x959   : > { %v3845_v31 = vadd.f32 1.0, %v8969_v56 }
 0x95a   : > { %v3853_v44 = vadd.f32 %v3852_v34, %v3851_v27 }
 0x95b   : > { %8970 = vrcp.f32 %v3845_v31 }
 0x95c   : > { %8972 = vtanh.f32 %v3853_v44 }
 0x968   : > { %v8971_v24 = vpop.eup %8970 }
 0x969   : > { %v8973_v10 = vpop.eup %8972 }
 0x96a   : > { %v3855_v54 = vmul.f32 %v8973_v10, %v8971_v24  ;;  %v3866_v30 = vpack.c.bf16 %v8973_v10, %v8973_v10 }
 0x96c   : > { %v3877_v35 = vshrl.u32 %v3866_v30, 16  ;;  %8974 = vtanh.f32 %v3855_v54  ;;  %v8801_v54 = vld [vmem:[%s13204_s13 + $0x2c] ss:$16 sps:$4 sm:$0xff]   ;;  %v8799_v30 = vld [vmem:[%s13204_s13 + $0x28] ss:$16 sps:$4 sm:$0xff]  }
 0x96d   : > { %8976 = vtanh.f32 %v10358_v25  ;;  %v8766_v25 = vld [vmem:[%s13202_s11 + $0x24] ss:$16 sps:$4 sm:$0xff]  }
 0x96e   : > { %v3879_v37 = vrot.slane %v3877_v35, 3  ;;  %8978 = vtanh.f32 %v10355_v55  ;;  %v8770_v55 = vld [vmem:[%s13202_s11 + $0x4] ss:$16 sps:$4 sm:$0xff]  }
 0x96f   : > { %8980 = vtanh.f32 %v10364_v47 }
 0x970   : > { %8607 = vmatmul.mubr.msk.bf16.vlgmr.msra.gmra.mxu0 %vm2126_vm2, %v3879_v37  ;;  %8982 = vtanh.f32 %v10361_v6  ;;  %v8772_v6 = vld [vmem:[%s13202_s11 + $0x68] ss:$16 sps:$4 sm:$0xff]   ;;  %v8802_v37 = vld [vmem:[%s13204_s13] ss:$16 sps:$4 sm:$0xff]  }
 0x971   : > { %4199 = vmatpush1.bf16.msra.mxu0 %v8756_v36  ;;  %4222 = vmatprep.mubr.bf16.mxu0 %v13427_v29  ;;  %8984 = vtanh.f32 %v10370_v53  ;;  %v8792_v53 = vld [vmem:[%s13204_s13 + $0x44] ss:$16 sps:$4 sm:$0xff]   ;;  %v8807_v36 = vld [vmem:[%s13204_s13 + $0xc] ss:$16 sps:$4 sm:$0xff]  }
 0x972   : > { %4200 = vmatprep.subr.bf16.mxu0 %v8762_v38  ;;  %8986 = vtanh.f32 %v10367_v46  ;;  %v8780_v46 = vld [vmem:[%s13202_s11 + $0x2c] ss:$16 sps:$4 sm:$0xff]   ;;  %v8805_v38 = vld [vmem:[%s13204_s13 + $0x8] ss:$16 sps:$4 sm:$0xff]  }
 0x973   : > { %8988 = vtanh.f32 %v10376_v7  ;;  %v8789_v7 = vld [vmem:[%s13204_s13 + $0x6c] ss:$16 sps:$4 sm:$0xff]  }
 0x974   : > { %8990 = vtanh.f32 %v10373_v62 }
 0x975   : > { %4201 = vmatpush1.bf16.msra.mxu0 %v8760_v39  ;;  %8992 = vtanh.f32 %v10382_v50  ;;  %v8793_v50 = vld [vmem:[%s13204_s13 + $0x48] ss:$16 sps:$4 sm:$0xff]  }
 0x976   : > { %4202 = vmatprep.subr.bf16.mxu0 %v8766_v25  ;;  %8994 = vtanh.f32 %v10379_v40 }
 0x977   : > { %8996 = vtanh.f32 %v10388_v4 }
 0x978   : > { %8998 = vtanh.f32 %v10385_v60 }
 0x979   : > { %v8975_v14 = vpop.eup %8974  ;;  %4203 = vmatpush1.bf16.msra.mxu0 %v8764_v1  ;;  %9000 = vtanh.f32 %v10394_v51 }
 0x97a   : > { %4204 = vmatprep.subr.bf16.mxu0 %v8770_v55  ;;  %v3857_v41 = vpack.c.bf16 %v8975_v14, %v8975_v14  ;;  %v10947_v47 = vpop.eup %8976  ;;  %9002 = vtanh.f32 %v10391_v16 }
 0x97b   : > { %13428 = vst [vmem:[#allocation17_spill] sm:$0xff] %v10947_v47  ;;  %v10949_v3 = vpop.eup %8978  ;;  %9004 = vtanh.f32 %v10400_v9 }
 0x97c   : > { %v3948_v15 = vshrl.u32 %v3857_v41, 16  ;;  %13429 = vst [vmem:[#allocation18_spill] sm:$0xff] %v10949_v3  ;;  %v4036_v58 = vpack.c.bf16 %v10947_v47, %v10949_v3  ;;  %v10977_v2 = vpop.eup %8980  ;;  %9006 = vtanh.f32 %v10397_v12 }
 0x97d   : > { %4205 = vmatpush1.bf16.msra.mxu0 %v8768_v26  ;;  %13430 = vst [vmem:[#allocation19_spill] sm:$0xff] %v10977_v2  ;;  %v10982_v22 = vpop.eup %8982  ;;  %9008 = vtanh.f32 %v10406_v57 }
 0x97e   : > { %v3950_v17 = vrot.slane %v3948_v15, 3  ;;  %4642 = vmatprep.subr.bf16.mxu0 %v8786_v52  ;;  %13431 = vst [vmem:[#allocation20_spill] sm:$0xff] %v10982_v22  ;;  %v4037_v59 = vpack.c.bf16 %v10977_v2, %v10982_v22  ;;  %v11002_v45 = vpop.eup %8984  ;;  %9010 = vtanh.f32 %v10403_v43 }
 0x97f   : > { %13432 = vst [vmem:[#allocation21_spill] sm:$0xff] %v11002_v45  ;;  %v11004_v13 = vpop.eup %8986  ;;  %9012 = vtanh.f32 %v10412_v28 }
 0x980   : > { %7340 = vmatmul.mubr.msk.bf16.vlgmr.msra.gmra.mxu0 %vm2126_vm2, %v4036_v58  ;;  %8619 = vmatmul.mubr.msk.bf16.vlgmr.msra.gmra.mxu1 %vm2126_vm2, %v3950_v17  ;;  %13433 = vst [vmem:[#allocation22_spill] sm:$0xff] %v11004_v13  ;;  %v4038_v62 = vpack.c.bf16 %v11002_v45, %v11004_v13  ;;  %v11023_v0 = vpop.eup %8988  ;;  %9014 = vtanh.f32 %v10409_v8  ;;  %v8798_v8 = vld [vmem:[%s13204_s13 + $0x24] ss:$16 sps:$4 sm:$0xff]  }
 0x981   : > { %4360 = vmatpush1.bf16.msra.mxu1 %v8772_v6  ;;  %4232 = vmatprep.mubr.bf16.mxu0 %v13427_v29  ;;  %13434 = vst [vmem:[#allocation23_spill] sm:$0xff] %v11023_v0  ;;  %v11025_v34 = vpop.eup %8990  ;;  %9016 = vtanh.f32 %v10418_v11  ;;  %v8796_v11 = vld [vmem:[%s13204_s13 + $0x20] ss:$16 sps:$4 sm:$0xff]  }
 0x982   : > { %4361 = vmatprep.subr.bf16.mxu1 %v8777_v20  ;;  %4383 = vmatprep.mubr.bf16.mxu1 %v13427_v29  ;;  %13435 = vst [vmem:[#allocation24_spill] sm:$0xff] %v11025_v34  ;;  %v4039_v40 = vpack.c.bf16 %v11023_v0, %v11025_v34  ;;  %v11035_v56 = vpop.eup %8992  ;;  %9018 = vtanh.f32 %v10415_v61  ;;  %v8804_v61 = vld [vmem:[%s13204_s13 + $0x4] ss:$16 sps:$4 sm:$0xff]  }
 0x983   : > { %4643 = vmatpush1.bf16.msra.mxu0 %v8784_v49  ;;  %13436 = vst [vmem:[#allocation25_spill] sm:$0xff] %v11035_v56  ;;  %v11037_v27 = vpop.eup %8994  ;;  %9020 = vtanh.f32 %v10424_v63  ;;  %v13450_v63 = vld [vmem:[#allocation16_spill] sm:$0xff]  ;;  %v8808_v49 = vld [vmem:[%s13206_s15 + $0x78] sm:$0xff]  }
 0x984   : > { %4644 = vmatprep.subr.bf16.mxu0 %v8792_v53  ;;  %13437 = vst [vmem:[#allocation26_spill] sm:$0xff] %v11037_v27  ;;  %v4040_v4 = vpack.c.bf16 %v11035_v56, %v11037_v27  ;;  %v11047_v60 = vpop.eup %8996  ;;  %9022 = vtanh.f32 %v10421_v42  ;;  %v8809_v53 = vld [vmem:[%s13206_s15 + $0xf8] sm:$0xff]  }
 0x985   : > { %4362 = vmatpush1.bf16.msra.mxu1 %v8775_v33  ;;  %13438 = vst [vmem:[#allocation27_spill] sm:$0xff] %v11047_v60  ;;  %v11049_v31 = vpop.eup %8998  ;;  %9024 = vtanh.f32 %v13450_v63 }
 0x986   : > { %4363 = vmatprep.subr.bf16.mxu1 %v8780_v46  ;;  %13439 = vst [vmem:[#allocation28_spill] sm:$0xff] %v11049_v31  ;;  %v4041_v51 = vpack.c.bf16 %v11047_v60, %v11049_v31  ;;  %v11059_v16 = vpop.eup %9000 }
 0x987   : > { %4645 = vmatpush1.bf16.msra.mxu0 %v8790_v19  ;;  %13440 = vst [vmem:[#allocation29_spill] sm:$0xff] %v11059_v16  ;;  %v11061_v44 = vpop.eup %9002  ;;  %v4018_v19 = vld [vmem:[%s13201_s10] sm:$0x1] }
 0x988   : > { %7341 = vmatmul.mubr.msk.bf16.gmra.mxu0 %vm2126_vm2, %v4037_v59  ;;  %13441 = vst [vmem:[#allocation30_spill] sm:$0xff] %v11061_v44  ;;  %v4042_v9 = vpack.c.bf16 %v11059_v16, %v11061_v44  ;;  %v11071_v12 = vpop.eup %9004  ;;  %4646 = vmatprep.subr.bf16.mxu0 %v8798_v8  ;;  %v8815_v8 = vld [vmem:[%s13206_s15 + $0xb0] sm:$0xff]  }
 0x989   : > { %4364 = vmatpush1.bf16.msra.mxu1 %v8778_v48  ;;  %4242 = vmatprep.mubr.bf16.mxu0 %v13427_v29  ;;  %13442 = vst [vmem:[#allocation31_spill] sm:$0xff] %v11071_v12  ;;  %v11073_v24 = vpop.eup %9006 }
 0x98a   : > { %4365 = vmatprep.subr.bf16.mxu1 %v8783_v32  ;;  %13443 = vst [vmem:[#allocation32_spill] sm:$0xff] %v11073_v24  ;;  %v4043_v57 = vpack.c.bf16 %v11071_v12, %v11073_v24  ;;  %v11083_v43 = vpop.eup %9008 }
 0x98b   : > { %13444 = vst [vmem:[#allocation33_spill] sm:$0xff] %v11083_v43  ;;  %v11085_v10 = vpop.eup %9010  ;;  %4647 = vmatpush1.bf16.msra.mxu0 %v8796_v11 }
 0x98c   : > { %13445 = vst [vmem:[#allocation34_spill] sm:$0xff] %v11085_v10  ;;  %v4044_v28 = vpack.c.bf16 %v11083_v43, %v11085_v10  ;;  %v11107_v35 = vpop.eup %9012  ;;  %4648 = vmatprep.subr.bf16.mxu0 %v8804_v61 }
 0x98d   : > { %4366 = vmatpush1.bf16.msra.mxu1 %v8781_v23  ;;  %13446 = vst [vmem:[#allocation35_spill] sm:$0xff] %v11107_v35  ;;  %v11121_v39 = vpop.eup %9014 }
 0x98e   : > { %4683 = vmatprep.subr.bf16.mxu1 %v8789_v7  ;;  %13447 = vst [vmem:[#allocation36_spill] sm:$0xff] %v11121_v39  ;;  %v4045_v25 = vpack.c.bf16 %v11107_v35, %v11121_v39  ;;  %v11131_v1 = vpop.eup %9016 }
 0x98f   : > { %4649 = vmatpush1.bf16.msra.mxu0 %v8802_v37  ;;  %13448 = vst [vmem:[#allocation37_spill] sm:$0xff] %v11131_v1  ;;  %v11133_v55 = vpop.eup %9018 }
 0x990   : > { %7342 = vmatmul.mubr.msk.bf16.gmra.mxu0 %vm2126_vm2, %v4038_v62  ;;  %7353 = vmatmul.mubr.msk.bf16.vlgmr.msra.gmra.mxu1 %vm2126_vm2, %v4036_v58  ;;  %13449 = vst [vmem:[#allocation38_spill] sm:$0xff] %v11133_v55  ;;  %v4046_v14 = vpack.c.bf16 %v11131_v1, %v11133_v55  ;;  %v11142_v42 = vpop.eup %9020 }
 0x991   : > { %4252 = vmatprep.mubr.bf16.mxu0 %v13427_v29  ;;  %4393 = vmatprep.mubr.bf16.mxu1 %v13427_v29  ;;  %13451 = vst [vmem:[#allocation16_spill] sm:$0xff] %v11142_v42  ;;  %v11144_v26 = vpop.eup %9022 }
 0x992   : > { %4684 = vmatpush1.bf16.msra.mxu1 %v8787_v5  ;;  %13452 = vst [vmem:[#allocation39_spill] sm:$0xff] %v11144_v26  ;;  %v4047_v41 = vpack.c.bf16 %v11142_v42, %v11144_v26  ;;  %v11152_v52 = vpop.eup %9024  ;;  %7801 = vmatprep.subr.bf16.mxu0 %v8808_v49  ;;  %v8810_v5 = vld [vmem:[%s13206_s15 + $0x38] sm:$0xff]  }
 0x993   : > { %4685 = vmatprep.subr.bf16.mxu1 %v8795_v18  ;;  %13453 = vst [vmem:[#allocation40_spill] sm:$0xff] %v11152_v52  ;;  %v4048_v15 = vpack.c.bf16 %v11152_v52, %v11152_v52  ;;  %v8811_v18 = vld [vmem:[%s13206_s15 + $0xb8] sm:$0xff]  }
 0x996   : > { %4686 = vmatpush1.bf16.msra.mxu1 %v8793_v50 }
 0x997   : > { %4687 = vmatprep.subr.bf16.mxu1 %v8801_v54 }
 0x998   : > { %7343 = vmatmul.mubr.msk.bf16.gmra.mxu0 %vm2126_vm2, %v4039_v40  ;;  %7354 = vmatmul.mubr.msk.bf16.gmra.mxu1 %vm2126_vm2, %v4037_v59 }
 0x999   : > { %4262 = vmatprep.mubr.bf16.mxu0 %v13427_v29  ;;  %4403 = vmatprep.mubr.bf16.mxu1 %v13427_v29 }
 0x99a   : > { %4688 = vmatpush1.bf16.msra.mxu1 %v8799_v30 }
 0x99b   : > { %4689 = vmatprep.subr.bf16.mxu1 %v8807_v36 }
 0x99e   : > { %4690 = vmatpush1.bf16.msra.mxu1 %v8805_v38 }
 0x99f   : > { %7895 = vmatprep.subr.bf16.mxu1 %v8809_v53 }
 0x9a0   : > { %7344 = vmatmul.mubr.msk.bf16.gmra.mxu0 %vm2126_vm2, %v4040_v4  ;;  %7355 = vmatmul.mubr.msk.bf16.gmra.mxu1 %vm2126_vm2, %v4038_v62 }
 0x9a1   : > { %4272 = vmatprep.mubr.bf16.mxu0 %v13427_v29  ;;  %4413 = vmatprep.mubr.bf16.mxu1 %v13427_v29 }
 0x9a8   : > { %7345 = vmatmul.mubr.msk.bf16.gmra.mxu0 %vm2126_vm2, %v4041_v51  ;;  %7356 = vmatmul.mubr.msk.bf16.gmra.mxu1 %vm2126_vm2, %v4039_v40  ;;  %v8812_v40 = vld [vmem:[%s13206_s15 + $0x70] sm:$0xff]  }
 0x9a9   : > { %4282 = vmatprep.mubr.bf16.mxu0 %v13427_v29  ;;  %4423 = vmatprep.mubr.bf16.mxu1 %v13427_v29 }
 0x9b0   : > { %7346 = vmatmul.mubr.msk.bf16.gmra.mxu0 %vm2126_vm2, %v4042_v9  ;;  %7357 = vmatmul.mubr.msk.bf16.gmra.mxu1 %vm2126_vm2, %v4040_v4  ;;  %v8813_v4 = vld [vmem:[%s13206_s15 + $0xf0] sm:$0xff]  }
 0x9b1   : > { %4292 = vmatprep.mubr.bf16.mxu0 %v13427_v29  ;;  %4433 = vmatprep.mubr.bf16.mxu1 %v13427_v29 }
 0x9b8   : > { %7347 = vmatmul.mubr.msk.bf16.gmra.mxu0 %vm2126_vm2, %v4043_v57  ;;  %7358 = vmatmul.mubr.msk.bf16.gmra.mxu1 %vm2126_vm2, %v4041_v51 }
 0x9b9   : > { %4302 = vmatprep.mubr.bf16.mxu0 %v13427_v29  ;;  %4443 = vmatprep.mubr.bf16.mxu1 %v13427_v29 }
 0x9c0   : > { %7348 = vmatmul.mubr.msk.bf16.gmra.mxu0 %vm2126_vm2, %v4044_v28  ;;  %7359 = vmatmul.mubr.msk.bf16.gmra.mxu1 %vm2126_vm2, %v4042_v9 }
 0x9c1   : > { %4312 = vmatprep.mubr.bf16.mxu0 %v13427_v29  ;;  %4453 = vmatprep.mubr.bf16.mxu1 %v13427_v29 }
 0x9c8   : > { %7349 = vmatmul.mubr.msk.bf16.gmra.mxu0 %vm2126_vm2, %v4045_v25  ;;  %7360 = vmatmul.mubr.msk.bf16.gmra.mxu1 %vm2126_vm2, %v4043_v57 }
 0x9c9   : > { %4322 = vmatprep.mubr.bf16.mxu0 %v13427_v29  ;;  %4463 = vmatprep.mubr.bf16.mxu1 %v13427_v29 }
 0x9d0   : > { %7350 = vmatmul.mubr.msk.bf16.gmra.mxu0 %vm2126_vm2, %v4046_v14  ;;  %7361 = vmatmul.mubr.msk.bf16.gmra.mxu1 %vm2126_vm2, %v4044_v28  ;;  %v8814_v28 = vld [vmem:[%s13206_s15 + $0x30] sm:$0xff]  }
 0x9d1   : > { %4332 = vmatprep.mubr.bf16.mxu0 %v13427_v29  ;;  %4473 = vmatprep.mubr.bf16.mxu1 %v13427_v29 }
 0x9d8   : > { %7351 = vmatmul.mubr.msk.bf16.gmra.mxu0 %vm2126_vm2, %v4047_v41  ;;  %7362 = vmatmul.mubr.msk.bf16.gmra.mxu1 %vm2126_vm2, %v4045_v25 }
 0x9d9   : > { %4342 = vmatprep.mubr.bf16.mxu0 %v13427_v29  ;;  %4483 = vmatprep.mubr.bf16.mxu1 %v13427_v29 }
 0x9e0   : > { %7352 = vmatmul.mubr.msk.bf16.gmra.mxu0 %vm2126_vm2, %v4048_v15  ;;  %7363 = vmatmul.mubr.msk.bf16.gmra.mxu1 %vm2126_vm2, %v4046_v14 }
 0x9e1   : > { %4493 = vmatprep.mubr.bf16.mxu1 %v13427_v29  ;;  %4666 = vmatprep.mubr.bf16.mxu0 %v13427_v29 }
 0x9e8   : > { %7364 = vmatmul.mubr.msk.bf16.gmra.mxu1 %vm2126_vm2, %v4047_v41 }
 0x9e9   : > { %4503 = vmatprep.mubr.bf16.mxu1 %v13427_v29 }
 0x9f0   : > { %7365 = vmatmul.mubr.msk.bf16.gmra.mxu1 %vm2126_vm2, %v4048_v15 }
 0x9f1   : > { %4707 = vmatprep.mubr.bf16.mxu1 %v13427_v29 }
 0xa30   : > { %v3941_v6 = vpop.f32.mrf.mxu0 }
 0xa32   : > { %v8608_v58 = vpop.f32.mrf.mxu0 }
 0xa34   : > { %v3944_v17 = vpop.f32.mrf.mxu0 }
 0xa36   : > { %v8609_v20 = vpop.f32.mrf.mxu0 }
 0xa40   : > { %v11170_v33 = vpop.f32.mrf.mxu0  ;;  %v4012_v46 = vpop.f32.mrf.mxu1 }
 0xa41   : > { %v4013_v48 = vadd.f32 %v4012_v46, %v3941_v6 }
 0xa42   : > { %v11175_v59 = vpop.f32.mrf.mxu0  ;;  %v8620_v32 = vpop.f32.mrf.mxu1 }
 0xa43   : > { %v11177_v23 = vadd.f32 %v4018_v19, %v4013_v48 }
 0xa44   : > { %v11179_v7 = vpop.f32.mrf.mxu0  ;;  %v4015_v62 = vpop.f32.mrf.mxu1 }
 0xa45   : > { %13454 = vst [vmem:[#allocation41_spill] sm:$0xff] %v11177_v23  ;;  %v4528_v50 = vpack.c.bf16 %v11177_v23, %v11177_v23 }
 0xa46   : > { %v11195_v51 = vpop.f32.mrf.mxu0  ;;  %v8621_v9 = vpop.f32.mrf.mxu1 }
 0xa47   : > { %7382 = vmatmul.mubr.msk.bf16.vlgmr.msra.gmra.mxu0 %vm2126_vm2, %v4528_v50  ;;  %7383 = vmatmul.mubr.msk.bf16.vlgmr.msra.gmra.mxu1 %vm2126_vm2, %v4528_v50 }
 0xa48   : > { %v11199_v57 = vpop.f32.mrf.mxu0  ;;  %7802 = vmatpush3.bf16.msra.mxu0 %v8810_v5  ;;  %7896 = vmatpush3.bf16.msra.mxu1 %v8811_v18 }
 0xa49   : > { %7803 = vmatprep.subr.bf16.mxu0 %v8812_v40  ;;  %7897 = vmatprep.subr.bf16.mxu1 %v8813_v4 }
 0xa4a   : > { %v11207_v54 = vpop.f32.mrf.mxu0 }
 0xa4c   : > { %v11209_v11 = vpop.f32.mrf.mxu0  ;;  %7804 = vmatpush3.bf16.msra.mxu0 %v8814_v28  ;;  %7898 = vmatpush3.bf16.msra.mxu1 %v8815_v8 }
 0xa4e   : > { %v11211_v30 = vpop.f32.mrf.mxu0 }
 0xa50   : > { %v11213_v61 = vpop.f32.mrf.mxu0  ;;  %v11215_v36 = vpop.f32.mrf.mxu1 }
 0xa52   : > { %v11217_v37 = vpop.f32.mrf.mxu0  ;;  %v11219_v38 = vpop.f32.mrf.mxu1 }
 0xa54   : > { %v11221_v25 = vpop.f32.mrf.mxu0  ;;  %v11223_v63 = vpop.f32.mrf.mxu1 }
 0xa56   : > { %v11225_v14 = vpop.f32.mrf.mxu0  ;;  %v11227_v41 = vpop.f32.mrf.mxu1 }
 0xa58   : > { %v11229_v15 = vpop.f32.mrf.mxu0  ;;  %v11231_v6 = vpop.f32.mrf.mxu1 }
 0xa5a   : > { %v11233_v58 = vpop.f32.mrf.mxu0  ;;  %v11235_v17 = vpop.f32.mrf.mxu1 }
 0xa5c   : > { %v11237_v20 = vpop.f32.mrf.mxu0  ;;  %v11239_v49 = vpop.f32.mrf.mxu1 }
 0xa5e   : > { %v11241_v53 = vpop.f32.mrf.mxu0  ;;  %v11243_v46 = vpop.f32.mrf.mxu1 }
 0xa60   : > { %v11245_v19 = vpop.f32.mrf.mxu0  ;;  %v11247_v48 = vpop.f32.mrf.mxu1 }
 0xa62   : > { %v11249_v32 = vpop.f32.mrf.mxu0  ;;  %v11251_v62 = vpop.f32.mrf.mxu1 }
 0xa64   : > { %v11253_v5 = vpop.f32.mrf.mxu0  ;;  %v11255_v18 = vpop.f32.mrf.mxu1 }
 0xa66   : > { %v11257_v50 = vpop.f32.mrf.mxu0  ;;  %v11259_v40 = vpop.f32.mrf.mxu1 }
 0xa68   : > { %v11261_v4 = vpop.f32.mrf.mxu0  ;;  %v11263_v9 = vpop.f32.mrf.mxu1 }
 0xa69   : > { %13455 = vst [vmem:[#allocation42_spill] sm:$0xff] %v11261_v4 }
 0xa6a   : > { %v11265_v28 = vpop.f32.mrf.mxu0  ;;  %v11267_v8 = vpop.f32.mrf.mxu1 }
 0xa6c   : > { %v11269_v21 = vpop.f32.mrf.mxu0  ;;  %v11271_v23 = vpop.f32.mrf.mxu1 }
 0xa6d   : > { %13456 = vst [vmem:[#allocation43_spill] sm:$0xff] %v11269_v21 }
 0xa6e   : > { %v11273_v10 = vpop.f32.mrf.mxu0  ;;  %v11275_v43 = vpop.f32.mrf.mxu1 }
 0xa70   : > { %v11277_v39 = vpop.f32.mrf.mxu0  ;;  %v11279_v35 = vpop.f32.mrf.mxu1 }
 0xa71   : > { %13457 = vst [vmem:[#allocation44_spill] sm:$0xff] %v11277_v39 }
 0xa72   : > { %v11281_v55 = vpop.f32.mrf.mxu0  ;;  %v11283_v1 = vpop.f32.mrf.mxu1 }
 0xa73   : > { %13458 = vst [vmem:[#allocation45_spill] sm:$0xff] %v11281_v55 }
 0xa74   : > { %v11285_v26 = vpop.f32.mrf.mxu0  ;;  %v11287_v42 = vpop.f32.mrf.mxu1 }
 0xa75   : > { %13459 = vst [vmem:[#allocation46_spill] sm:$0xff] %v11285_v26 }
 0xa76   : > { %v11289_v52 = vpop.f32.mrf.mxu0  ;;  %v11291_v3 = vpop.f32.mrf.mxu1 }
 0xa77   : > { %13460 = vst [vmem:[#allocation47_spill] sm:$0xff] %v11289_v52 }
 0xa78   : > { %v11293_v47 = vpop.f32.mrf.mxu0  ;;  %v11295_v22 = vpop.f32.mrf.mxu1 }
 0xa79   : > { %13461 = vst [vmem:[#allocation48_spill] sm:$0xff] %v11293_v47  ;;  %13462 = vst [vmem:[#allocation49_spill] sm:$0xff] %v11295_v22 }
 0xa7a   : > { %v11297_v2 = vpop.f32.mrf.mxu0  ;;  %v11299_v13 = vpop.f32.mrf.mxu1 }
 0xa7b   : > { %13463 = vst [vmem:[#allocation50_spill] sm:$0xff] %v11297_v2 }
 0xa7c   : > { %v11301_v45 = vpop.f32.mrf.mxu0  ;;  %v11303_v34 = vpop.f32.mrf.mxu1 }
 0xa7d   : > { %13464 = vst [vmem:[#allocation51_spill] sm:$0xff] %v11301_v45  ;;  %13465 = vst [vmem:[#allocation52_spill] sm:$0xff] %v11303_v34 }
 0xa7e   : > { %v11305_v0 = vpop.f32.mrf.mxu0  ;;  %v11307_v27 = vpop.f32.mrf.mxu1 }
 0xa7f   : > { %13466 = vst [vmem:[#allocation53_spill] sm:$0xff] %v11305_v0  ;;  %13467 = vst [vmem:[#allocation54_spill] sm:$0xff] %v11307_v27 }
 0xa80   : > { %v11309_v56 = vpop.f32.mrf.mxu0  ;;  %v11311_v31 = vpop.f32.mrf.mxu1 }
 0xa81   : > { %13468 = vst [vmem:[#allocation55_spill] sm:$0xff] %v11309_v56  ;;  %13469 = vst [vmem:[#allocation56_spill] sm:$0xff] %v11311_v31  ;;  %v8816_v56 = vld [vmem:[%s13206_s15 + $0x68] sm:$0xff]   ;;  %v8822_v31 = vld [vmem:[%s13206_s15 + $0x20] sm:$0xff]  }
 0xa82   : > { %v11313_v60 = vpop.f32.mrf.mxu0  ;;  %v11315_v44 = vpop.f32.mrf.mxu1  ;;  %7805 = vmatprep.subr.bf16.mxu0 %v8816_v56 }
 0xa83   : > { %13470 = vst [vmem:[#allocation57_spill] sm:$0xff] %v11313_v60  ;;  %13471 = vst [vmem:[#allocation58_spill] sm:$0xff] %v11315_v44  ;;  %v8817_v60 = vld [vmem:[%s13206_s15 + $0xe8] sm:$0xff]  }
 0xa84   : > { %v11317_v16 = vpop.f32.mrf.mxu0  ;;  %v11319_v12 = vpop.f32.mrf.mxu1  ;;  %7899 = vmatprep.subr.bf16.mxu1 %v8817_v60 }
 0xa85   : > { %13472 = vst [vmem:[#allocation59_spill] sm:$0xff] %v11317_v16  ;;  %13473 = vst [vmem:[#allocation60_spill] sm:$0xff] %v11319_v12 }
 0xa86   : > { %v11321_v24 = vpop.f32.mrf.mxu0  ;;  %v11323_v45 = vpop.f32.mrf.mxu1 }
 0xa87   : > { %13474 = vst [vmem:[#allocation61_spill] sm:$0xff] %v11321_v24  ;;  %13475 = vst [vmem:[#allocation62_spill] sm:$0xff] %v11323_v45  ;;  %v8818_v24 = vld [vmem:[%s13206_s15 + $0x28] sm:$0xff]  }
 0xa88   : > { %v11325_v47 = vpop.f32.mrf.mxu0  ;;  %v11327_v0 = vpop.f32.mrf.mxu1  ;;  %7806 = vmatpush3.bf16.msra.mxu0 %v8818_v24  ;;  %v8824_v24 = vld [vmem:[%s13206_s15 + $0x58] sm:$0xff]  }
 0xa89   : > { %13476 = vst [vmem:[#allocation63_spill] sm:$0xff] %v11325_v47  ;;  %13477 = vst [vmem:[#allocation64_spill] sm:$0xff] %v11327_v0  ;;  %v8819_v47 = vld [vmem:[%s13206_s15 + $0xa8] sm:$0xff]  }
 0xa8a   : > { %v11335_v2 = vpop.f32.mrf.mxu0  ;;  %v11337_v16 = vpop.f32.mrf.mxu1  ;;  %7900 = vmatpush3.bf16.msra.mxu1 %v8819_v47  ;;  %v8823_v47 = vld [vmem:[%s13206_s15 + $0xa0] sm:$0xff]  }
 0xa8b   : > { %13478 = vst [vmem:[#allocation65_spill] sm:$0xff] %v11335_v2  ;;  %13479 = vst [vmem:[#allocation66_spill] sm:$0xff] %v11337_v16  ;;  %v8820_v2 = vld [vmem:[%s13206_s15 + $0x60] sm:$0xff]  }
 0xa8c   : > { %v11345_v0 = vpop.f32.mrf.mxu0  ;;  %v11347_v12 = vpop.f32.mrf.mxu1  ;;  %v8821_v16 = vld [vmem:[%s13206_s15 + $0xe0] sm:$0xff]   ;;  %7807 = vmatprep.subr.bf16.mxu0 %v8820_v2  ;;  %v8828_v2 = vld [vmem:[%s13206_s15 + $0x50] sm:$0xff]  }
 0xa8d   : > { %13480 = vst [vmem:[#allocation67_spill] sm:$0xff] %v11345_v0  ;;  %13481 = vst [vmem:[#allocation68_spill] sm:$0xff] %v11347_v12  ;;  %v8825_v0 = vld [vmem:[%s13206_s15 + $0xd8] sm:$0xff]   ;;  %7901 = vmatprep.subr.bf16.mxu1 %v8821_v16  ;;  %7808 = vmatpush3.bf16.msra.mxu0 %v8822_v31  ;;  %v8829_v16 = vld [vmem:[%s13206_s15 + $0xd0] sm:$0xff]  }
 0xa8e   : > { %v11358_v56 = vpop.f32.mrf.mxu0  ;;  %v11360_v60 = vpop.f32.mrf.mxu1  ;;  %7902 = vmatpush3.bf16.msra.mxu1 %v8823_v47  ;;  %7809 = vmatprep.subr.bf16.mxu0 %v8824_v24  ;;  %v8831_v24 = vld [vmem:[%s13206_s15 + $0x90] sm:$0xff]  }
 0xa8f   : > { %13482 = vst [vmem:[#allocation69_spill] sm:$0xff] %v11358_v56  ;;  %13483 = vst [vmem:[#allocation70_spill] sm:$0xff] %v11360_v60  ;;  %v8826_v56 = vld [vmem:[%s13206_s15 + $0x18] sm:$0xff]   ;;  %7903 = vmatprep.subr.bf16.mxu1 %v8825_v0  ;;  %v8830_v0 = vld [vmem:[%s13206_s15 + $0x10] sm:$0xff]  }
 0xa90   : > { %v11371_v12 = vpop.f32.mrf.mxu0  ;;  %v11373_v26 = vpop.f32.mrf.mxu1  ;;  %v8827_v60 = vld [vmem:[%s13206_s15 + $0x98] sm:$0xff]  }
 0xa91   : > { %13484 = vst [vmem:[#allocation71_spill] sm:$0xff] %v11371_v12  ;;  %13485 = vst [vmem:[#allocation72_spill] sm:$0xff] %v11373_v26  ;;  %7810 = vmatpush3.bf16.msra.mxu0 %v8826_v56 }
 0xa92   : > { %v11387_v31 = vpop.f32.mrf.mxu0  ;;  %v11389_v47 = vpop.f32.mrf.mxu1  ;;  %7904 = vmatpush3.bf16.msra.mxu1 %v8827_v60  ;;  %7811 = vmatprep.subr.bf16.mxu0 %v8828_v2  ;;  %v8834_v2 = vld [vmem:[%s13206_s15 + $0x8] sm:$0xff]  }
 0xa93   : > { %13486 = vst [vmem:[#allocation73_spill] sm:$0xff] %v11387_v31  ;;  %13487 = vst [vmem:[#allocation74_spill] sm:$0xff] %v11389_v47  ;;  %7905 = vmatprep.subr.bf16.mxu1 %v8829_v16  ;;  %v8832_v31 = vld [vmem:[%s13206_s15 + $0x48] sm:$0xff]  }
 0xa94   : > { %v11391_v12 = vpop.f32.mrf.mxu0  ;;  %v11393_v26 = vpop.f32.mrf.mxu1  ;;  %v8835_v16 = vld [vmem:[%s13206_s15 + $0x88] sm:$0xff]  }
 0xa95   : > { %13488 = vst [vmem:[#allocation75_spill] sm:$0xff] %v11391_v12  ;;  %13489 = vst [vmem:[#allocation76_spill] sm:$0xff] %v11393_v26  ;;  %v8833_v12 = vld [vmem:[%s13206_s15 + $0xc8] sm:$0xff]   ;;  %7812 = vmatpush3.bf16.msra.mxu0 %v8830_v0 }
 0xa96   : > { %v11407_v56 = vpop.f32.mrf.mxu0  ;;  %v11409_v60 = vpop.f32.mrf.mxu1  ;;  %7906 = vmatpush3.bf16.msra.mxu1 %v8831_v24  ;;  %7813 = vmatprep.subr.bf16.mxu0 %v8832_v31  ;;  %v8839_v31 = vld [vmem:[%s13206_s15 + $0x80] sm:$0xff]  }
 0xa97   : > { %13490 = vst [vmem:[#allocation77_spill] sm:$0xff] %v11407_v56  ;;  %13491 = vst [vmem:[#allocation78_spill] sm:$0xff] %v11409_v60  ;;  %7907 = vmatprep.subr.bf16.mxu1 %v8833_v12  ;;  %v8836_v56 = vld [vmem:[%s13206_s15 + $0x40] sm:$0xff]  }
 0xa98   : > { %v11411_v26 = vpop.f32.mrf.mxu0  ;;  %v11413_v47 = vpop.f32.mrf.mxu1  ;;  %v8838_v12 = vld [vmem:[%s13206_s15] sm:$0xff]  }
 0xa99   : > { %13492 = vst [vmem:[#allocation79_spill] sm:$0xff] %v11411_v26  ;;  %13493 = vst [vmem:[#allocation80_spill] sm:$0xff] %v11413_v47  ;;  %v8837_v26 = vld [vmem:[%s13206_s15 + $0xc0] sm:$0xff]   ;;  %7814 = vmatpush3.bf16.msra.mxu0 %v8834_v2 }
 0xa9a   : > { %v11427_v0 = vpop.f32.mrf.mxu0  ;;  %v11429_v24 = vpop.f32.mrf.mxu1  ;;  %7908 = vmatpush3.bf16.msra.mxu1 %v8835_v16  ;;  %7815 = vmatprep.subr.bf16.mxu0 %v8836_v56 }
 0xa9b   : > { %13494 = vst [vmem:[#allocation81_spill] sm:$0xff] %v11427_v0  ;;  %13495 = vst [vmem:[#allocation82_spill] sm:$0xff] %v11429_v24  ;;  %7909 = vmatprep.subr.bf16.mxu1 %v8837_v26 }
 0xa9c   : > { %v11431_v47 = vpop.f32.mrf.mxu0  ;;  %v11433_v60 = vpop.f32.mrf.mxu1 }
 0xa9d   : > { %13496 = vst [vmem:[#allocation83_spill] sm:$0xff] %v11431_v47  ;;  %13497 = vst [vmem:[#allocation84_spill] sm:$0xff] %v11433_v60  ;;  %7816 = vmatpush3.bf16.msra.mxu0 %v8838_v12 }
 0xa9e   : > { %v11441_v39 = vpop.f32.mrf.mxu0  ;;  %v11443_v0 = vpop.f32.mrf.mxu1  ;;  %7910 = vmatpush3.bf16.msra.mxu1 %v8839_v31  ;;  %5822 = vmatprep.subr.bf16.mxu0 %v13427_v29 }
 0xa9f   : > { %13498 = vst [vmem:[#allocation85_spill] sm:$0xff] %v11441_v39  ;;  %13499 = vst [vmem:[#allocation86_spill] sm:$0xff] %v11443_v0  ;;  %5878 = vmatprep.subr.bf16.mxu1 %v13427_v29 }
 0xaa0   : > { %v11445_v24 = vpop.f32.mrf.mxu0  ;;  %v11447_v47 = vpop.f32.mrf.mxu1 }
 0xaa1   : > { %13500 = vst [vmem:[#allocation87_spill] sm:$0xff] %v11445_v24  ;;  %13501 = vst [vmem:[#allocation88_spill] sm:$0xff] %v11447_v47 }
 0xaa2   : > { %v11451_v2 = vpop.f32.mrf.mxu0  ;;  %v11453_v16 = vpop.f32.mrf.mxu1 }
 0xaa3   : > { %13502 = vst [vmem:[#allocation89_spill] sm:$0xff] %v11451_v2  ;;  %13503 = vst [vmem:[#allocation90_spill] sm:$0xff] %v11453_v16 }
 0xaa4   : > { %v4348_v56 = vpop.f32.mrf.mxu0  ;;  %v11455_v26 = vpop.f32.mrf.mxu1 }
 0xaa5   : > { %13504 = vst [vmem:[#allocation91_spill] sm:$0xff] %v11455_v26  ;;  %v4049_v56 = vld [vmem:[%s13203_s12] sm:$0xf] }
 0xaa6   : > { %v4349_v39 = vpop.f32.mrf.mxu0  ;;  %v11457_v60 = vpop.f32.mrf.mxu1 }
 0xaa7   : > { %13505 = vst [vmem:[#allocation92_spill] sm:$0xff] %v11457_v60  ;;  %v4529_v39 = vld [vmem:[%s13205_s14] sm:$0xf] }
 0xaa8   : > { %v11459_v0 = vpop.f32.mrf.mxu1 }
 0xaa9   : > { %13506 = vst [vmem:[#allocation93_spill] sm:$0xff] %v11459_v0  ;;  %v13512_v0 = vld [vmem:[#allocation12_spill] sm:$0xff] }
 0xaaa   : > { %v11461_v24 = vpop.f32.mrf.mxu1 }
 0xaab   : > { %13507 = vst [vmem:[#allocation94_spill] sm:$0xff] %v11461_v24  ;;  %v11478_v24 = vrot.slane %v4529_v39, %v13512_v0 }
 0xaac   : > { %v11463_v12 = vpop.f32.mrf.mxu1 }
 0xaad   : > { %13508 = vst [vmem:[#allocation95_spill] sm:$0xff] %v11463_v12  ;;  %13513 = vst [vmem:[#allocation99_spill] sm:$0xff] %v11478_v24  ;;  %v13514_v12 = vld [vmem:[#allocation15_spill] sm:$0xff] }
 0xaae   : > { %v11465_v31 = vpop.f32.mrf.mxu1  ;;  %v11481_v26 = vrot.slane %v4529_v39, %v13514_v12 }
 0xaaf   : > { %13509 = vst [vmem:[#allocation96_spill] sm:$0xff] %v11465_v31 }
 0xab0   : > { %v11467_v47 = vpop.f32.mrf.mxu1  ;;  %13515 = vst [vmem:[#allocation15_spill] sm:$0xff] %v11481_v26 }
 0xab1   : > { %13510 = vst [vmem:[#allocation97_spill] sm:$0xff] %v11467_v47  ;;  %v11484_v47 = vrot.slane %v4049_v56, %v13512_v0 }
 0xab2   : > { %v11469_v29 = vpop.f32.mrf.mxu1 }
 0xab3   : > { %13511 = vst [vmem:[#allocation98_spill] sm:$0xff] %v11469_v29  ;;  %v13516_v29 = vld [vmem:[#allocation13_spill] sm:$0xff]  ;;  %v11502_v4 = vadd.f32 %v11170_v33, %v11484_v47 }
 0xab4   : > { %v4509_v2 = vpop.f32.mrf.mxu1  ;;  %v11493_v60 = vrot.slane %v4049_v56, %v13516_v29 }
 0xab5   : > { %v11487_v2 = vrot.slane %v4529_v39, %v13516_v29  ;;  %13520 = vst [vmem:[#allocation100_spill] sm:$0xff] %v11502_v4 }
 0xab6   : > { %v4510_v16 = vpop.f32.mrf.mxu1 }
 0xab7   : > { %13517 = vst [vmem:[#allocation13_spill] sm:$0xff] %v11487_v2  ;;  %v13518_v16 = vld [vmem:[#allocation14_spill] sm:$0xff] }
 0xab8   : > { %v11490_v31 = vrot.slane %v4529_v39, %v13518_v16  ;;  %v11496_v52 = vrot.slane %v4049_v56, %v13518_v16  ;;  %v11511_v16 = vadd.f32 %v11175_v59, %v11493_v60 }
 0xaba   : > { %13519 = vst [vmem:[#allocation14_spill] sm:$0xff] %v11490_v31  ;;  %13521 = vst [vmem:[#allocation101_spill] sm:$0xff] %v11511_v16 }
 0xb07   : > { %v4668_v45 = vpop.f32.mrf.mxu0  ;;  %v4709_v44 = vpop.f32.mrf.mxu1 }
 0xb08   : > { %v4669_v55 = vadd.f32 %v4668_v45, %v11478_v24  ;;  %v4710_v34 = vadd.f32 %v4709_v44, %v11481_v26  ;;  %v11515_v45 = vadd.f32 %v11195_v51, %v11493_v60  ;;  %v11518_v44 = vrot.slane %v4049_v56, %v13514_v12 }
 0xb09   : > { %v4670_v22 = vpop.f32.mrf.mxu0  ;;  %v4711_v21 = vpop.f32.mrf.mxu1  ;;  %v11534_v51 = vadd.f32 %v11227_v41, %v11496_v52 }
 0xb0a   : > { %v11505_v39 = vrot.slane %v4669_v55, %v13512_v0  ;;  %v4671_v29 = vadd.f32 %v4670_v22, %v11487_v2  ;;  %v4712_v27 = vadd.f32 %v4711_v21, %v11490_v31  ;;  %13522 = vst [vmem:[#allocation102_spill] sm:$0xff] %v11515_v45  ;;  %v11522_v55 = vadd.f32 %v11219_v38, %v11496_v52 }
 0xb0b   : > { %v4672_v33 = vpop.f32.mrf.mxu0  ;;  %v4713_v26 = vpop.f32.mrf.mxu1  ;;  %13524 = vst [vmem:[#allocation104_spill] sm:$0xff] %v11534_v51  ;;  %v11537_v12 = vrot.slane %v4710_v34, %v13512_v0  ;;  %v11541_v38 = vadd.f32 %v11179_v7, %v11484_v47  ;;  %v11551_v41 = vadd.f32 %v11215_v36, %v11518_v44  ;;  %v11557_v7 = vadd.f32 %v11223_v63, %v11518_v44 }
 0xb0c   : > { %13523 = vst [vmem:[#allocation103_spill] sm:$0xff] %v11522_v55  ;;  %v11525_v22 = vrot.slane %v4671_v29, %v13512_v0  ;;  %v11528_v21 = vrot.slane %v4712_v27, %v13512_v0  ;;  %v4732_v59 = vadd.f32 %v11505_v39, %v11502_v4 }
 0xb0d   : > { %v4673_v26 = vpop.f32.mrf.mxu0  ;;  %v4714_v56 = vpop.f32.mrf.mxu1  ;;  %13525 = vst [vmem:[#allocation105_spill] sm:$0xff] %v11541_v38  ;;  %13526 = vst [vmem:[#allocation106_spill] sm:$0xff] %v11551_v41  ;;  %v4734_v36 = vadd.f32 %v11537_v12, %v11551_v41  ;;  %v4738_v63 = vadd.f32 %v11537_v12, %v11557_v7 }
 0xb0e   : > { %v4733_v27 = vadd.f32 %v11525_v22, %v11511_v16  ;;  %v4737_v29 = vadd.f32 %v11525_v22, %v11515_v45  ;;  %v4735_v33 = vadd.f32 %v11528_v21, %v11522_v55  ;;  %v4739_v34 = vadd.f32 %v11528_v21, %v11534_v51  ;;  %13527 = vst [vmem:[#allocation107_spill] sm:$0xff] %v11557_v7 }
 0xb0f   : > { %9026 = vtanh.f32 %v4732_v59  ;;  %v4736_v26 = vadd.f32 %v11505_v39, %v11541_v38  ;;  %v11563_v56 = vadd.f32 %v11207_v54, %v11493_v60  ;;  %v11569_v51 = vadd.f32 %v11211_v30, %v11493_v60 }
 0xb10   : > { %9028 = vtanh.f32 %v4733_v27  ;;  %v11575_v59 = vadd.f32 %v11235_v17, %v11496_v52  ;;  %v11581_v27 = vadd.f32 %v11243_v46, %v11496_v52  ;;  %v13394_v38 = vmov 1065369472  }
 0xb11   : > { %13528 = vst [vmem:[#allocation108_spill] sm:$0xff] %v11563_v56  ;;  %9030 = vtanh.f32 %v4737_v29  ;;  %13529 = vst [vmem:[#allocation109_spill] sm:$0xff] %v11569_v51  ;;  %v4741_v54 = vadd.f32 %v11525_v22, %v11563_v56  ;;  %v4745_v30 = vadd.f32 %v11525_v22, %v11569_v51  ;;  %v11587_v29 = vadd.f32 %v11199_v57, %v11484_v47 }
 0xb12   : > { %9032 = vtanh.f32 %v4735_v33  ;;  %13530 = vst [vmem:[#allocation110_spill] sm:$0xff] %v11575_v59  ;;  %13531 = vst [vmem:[#allocation111_spill] sm:$0xff] %v11581_v27  ;;  %v4743_v17 = vadd.f32 %v11528_v21, %v11575_v59  ;;  %v11593_v33 = vadd.f32 %v11209_v11, %v11484_v47  ;;  %v4747_v46 = vadd.f32 %v11528_v21, %v11581_v27 }
 0xb13   : > { %9034 = vtanh.f32 %v4739_v34  ;;  %13532 = vst [vmem:[#allocation112_spill] sm:$0xff] %v11587_v29  ;;  %v11599_v34 = vadd.f32 %v11231_v6, %v11518_v44  ;;  %v4740_v57 = vadd.f32 %v11505_v39, %v11587_v29 }
 0xb14   : > { %9036 = vtanh.f32 %v4736_v26  ;;  %13533 = vst [vmem:[#allocation113_spill] sm:$0xff] %v11593_v33  ;;  %v11605_v26 = vadd.f32 %v11239_v49, %v11518_v44  ;;  %v4744_v11 = vadd.f32 %v11505_v39, %v11593_v33 }
 0xb15   : > { %9038 = vtanh.f32 %v4734_v36  ;;  %13534 = vst [vmem:[#allocation114_spill] sm:$0xff] %v11599_v34  ;;  %v11611_v36 = vadd.f32 %v11217_v37, %v11493_v60  ;;  %v4742_v6 = vadd.f32 %v11537_v12, %v11599_v34  ;;  %v11653_v34 = vadd.f32 %v11255_v18, %v11518_v44 }
 0xb16   : > { %9040 = vtanh.f32 %v4738_v63  ;;  %13535 = vst [vmem:[#allocation115_spill] sm:$0xff] %v11605_v26  ;;  %v11617_v63 = vadd.f32 %v11225_v14, %v11493_v60  ;;  %v4746_v49 = vadd.f32 %v11537_v12, %v11605_v26  ;;  %v11635_v26 = vadd.f32 %v11213_v61, %v11484_v47 }
 0xb17   : > { %9042 = vtanh.f32 %v4741_v54  ;;  %13536 = vst [vmem:[#allocation116_spill] sm:$0xff] %v11611_v36  ;;  %v11623_v54 = vadd.f32 %v11251_v62, %v11496_v52  ;;  %v4749_v37 = vadd.f32 %v11525_v22, %v11611_v36  ;;  %v11641_v36 = vadd.f32 %v11221_v25, %v11484_v47  ;;  %13543 = vst [vmem:[#allocation123_spill] sm:$0xff] %v11653_v34 }
 0xb18   : > { %9044 = vtanh.f32 %v4745_v30  ;;  %13537 = vst [vmem:[#allocation117_spill] sm:$0xff] %v11617_v63  ;;  %v4753_v14 = vadd.f32 %v11525_v22, %v11617_v63  ;;  %13540 = vst [vmem:[#allocation120_spill] sm:$0xff] %v11635_v26  ;;  %v11647_v63 = vadd.f32 %v11247_v48, %v11518_v44  ;;  %v11665_v18 = vadd.f32 %v11241_v53, %v11493_v60 }
 0xb19   : > { %9046 = vtanh.f32 %v4743_v17  ;;  %13538 = vst [vmem:[#allocation118_spill] sm:$0xff] %v11623_v54  ;;  %v11629_v17 = vadd.f32 %v11259_v40, %v11496_v52  ;;  %v4751_v62 = vadd.f32 %v11528_v21, %v11623_v54  ;;  %13541 = vst [vmem:[#allocation121_spill] sm:$0xff] %v11641_v36  ;;  %v4752_v25 = vadd.f32 %v11505_v39, %v11641_v36 }
 0xb1a   : > { %9048 = vtanh.f32 %v4747_v46  ;;  %13542 = vst [vmem:[#allocation122_spill] sm:$0xff] %v11647_v63  ;;  %13545 = vst [vmem:[#allocation125_spill] sm:$0xff] %v11665_v18  ;;  %v11677_v53 = vadd.f32 %v11275_v43, %v11496_v52  ;;  %v11689_v43 = vadd.f32 %v11237_v20, %v11484_v47  ;;  %v11701_v20 = vadd.f32 %v11271_v23, %v11518_v44 }
 0xb1b   : > { %9050 = vtanh.f32 %v4740_v57  ;;  %13539 = vst [vmem:[#allocation119_spill] sm:$0xff] %v11629_v17  ;;  %v4755_v40 = vadd.f32 %v11528_v21, %v11629_v17  ;;  %v11659_v17 = vadd.f32 %v11233_v58, %v11493_v60  ;;  %v11671_v58 = vadd.f32 %v11267_v8, %v11496_v52 }
 0xb1c   : > { %v9027_v30 = vpop.eup %9026  ;;  %9052 = vtanh.f32 %v4744_v11  ;;  %13547 = vst [vmem:[#allocation127_spill] sm:$0xff] %v11677_v53  ;;  %v11683_v8 = vadd.f32 %v11229_v15, %v11484_v47  ;;  %13549 = vst [vmem:[#allocation129_spill] sm:$0xff] %v11689_v43  ;;  %v11695_v15 = vadd.f32 %v11263_v9, %v11518_v44  ;;  %v11707_v9 = vadd.f32 %v11249_v32, %v11493_v60 }
 0xb1d   : > { %v9029_v46 = vpop.eup %9028  ;;  %9054 = vtanh.f32 %v4742_v6  ;;  %v4748_v6 = vadd.f32 %v11505_v39, %v11635_v26  ;;  %13544 = vst [vmem:[#allocation124_spill] sm:$0xff] %v11659_v17  ;;  %13546 = vst [vmem:[#allocation126_spill] sm:$0xff] %v11671_v58  ;;  %v11713_v23 = vadd.f32 %v11257_v50, %v11493_v60  ;;  %v11719_v32 = vadd.f32 %v11283_v1, %v11496_v52 }
 0xb1e   : > { %v9031_v57 = vpop.eup %9030  ;;  %9056 = vtanh.f32 %v4746_v49  ;;  %13548 = vst [vmem:[#allocation128_spill] sm:$0xff] %v11683_v8  ;;  %13550 = vst [vmem:[#allocation130_spill] sm:$0xff] %v11695_v15  ;;  %v11725_v50 = vadd.f32 %v11291_v3, %v11496_v52  ;;  %v11731_v1 = vadd.f32 %v11245_v19, %v11484_v47  ;;  %v11737_v3 = vadd.f32 %v11253_v5, %v11484_v47 }
 0xb1f   : > { %v9033_v11 = vpop.eup %9032  ;;  %v4997_v61 = vpack.c.bf16 %v9031_v57, %v9029_v46  ;;  %9058 = vtanh.f32 %v4749_v37  ;;  %v4750_v37 = vadd.f32 %v11537_v12, %v11647_v63  ;;  %v4754_v57 = vadd.f32 %v11537_v12, %v11653_v34  ;;  %13551 = vst [vmem:[#allocation131_spill] sm:$0xff] %v11701_v20  ;;  %13552 = vst [vmem:[#allocation132_spill] sm:$0xff] %v11707_v9 }
 0xb20   : > { %v9035_v54 = vpop.eup %9034  ;;  %9060 = vtanh.f32 %v4753_v14  ;;  %13553 = vst [vmem:[#allocation133_spill] sm:$0xff] %v11713_v23  ;;  %13554 = vst [vmem:[#allocation134_spill] sm:$0xff] %v11719_v32  ;;  %v11743_v19 = vadd.f32 %v11279_v35, %v11518_v44  ;;  %v11749_v5 = vadd.f32 %v11287_v42, %v11518_v44  ;;  %v11755_v35 = vadd.f32 %v11265_v28, %v11493_v60 }
 0xb21   : > { %v9037_v49 = vpop.eup %9036  ;;  %5279 = vmatprep.mubr.bf16.mxu0 %v4997_v61  ;;  %v4999_v48 = vpack.c.bf16 %v9035_v54, %v9033_v11  ;;  %9062 = vtanh.f32 %v4751_v62  ;;  %v4757_v54 = vadd.f32 %v11525_v22, %v11659_v17  ;;  %v4759_v61 = vadd.f32 %v11528_v21, %v11671_v58  ;;  %13555 = vst [vmem:[#allocation135_spill] sm:$0xff] %v11725_v50 }
 0xb22   : > { %v9039_v46 = vpop.eup %9038  ;;  %v4996_v14 = vpack.c.bf16 %v9037_v49, %v9027_v30  ;;  %9064 = vtanh.f32 %v4755_v40  ;;  %v4761_v40 = vadd.f32 %v11525_v22, %v11665_v18  ;;  %13556 = vst [vmem:[#allocation136_spill] sm:$0xff] %v11731_v1  ;;  %13557 = vst [vmem:[#allocation137_spill] sm:$0xff] %v11737_v3  ;;  %v11761_v42 = vadd.f32 %v11273_v10, %v11493_v60 }
 0xb23   : > { %v9041_v36 = vpop.eup %9040  ;;  %5415 = vmatprep.mubr.bf16.mxu1 %v4999_v48  ;;  %9066 = vtanh.f32 %v4748_v6  ;;  %v4756_v48 = vadd.f32 %v11505_v39, %v11683_v8  ;;  %13558 = vst [vmem:[#allocation138_spill] sm:$0xff] %v11743_v19  ;;  %13559 = vst [vmem:[#allocation139_spill] sm:$0xff] %v11749_v5  ;;  %v11767_v28 = vadd.f32 %v11299_v13, %v11496_v52 }
 0xb24   : > { %v9043_v62 = vpop.eup %9042  ;;  %5280 = vmatmul.mubr.bf16.vlgmr.msra.gmra.mxu0 %v4996_v14  ;;  %v4998_v30 = vpack.c.bf16 %v9041_v36, %v9039_v46  ;;  %9068 = vtanh.f32 %v4752_v25  ;;  %v4763_v25 = vadd.f32 %v11528_v21, %v11677_v53  ;;  %v4760_v14 = vadd.f32 %v11505_v39, %v11689_v43  ;;  %13560 = vst [vmem:[#allocation140_spill] sm:$0xff] %v11755_v35 }
 0xb25   : > { %v9045_v11 = vpop.eup %9044  ;;  %9070 = vtanh.f32 %v4750_v37  ;;  %13561 = vst [vmem:[#allocation141_spill] sm:$0xff] %v11761_v42  ;;  %13562 = vst [vmem:[#allocation142_spill] sm:$0xff] %v11767_v28 }
 0xb26   : > { %v9047_v6 = vpop.eup %9046  ;;  %5416 = vmatmul.mubr.bf16.vlgmr.msra.gmra.mxu1 %v4998_v30  ;;  %v5001_v36 = vpack.c.bf16 %v9045_v11, %v9043_v62  ;;  %9072 = vtanh.f32 %v4754_v57 }
 0xb27   : > { %v9049_v49 = vpop.eup %9048  ;;  %9074 = vtanh.f32 %v4757_v54  ;;  %v4758_v54 = vadd.f32 %v11537_v12, %v11695_v15 }
 0xb28   : > { %v9051_v37 = vpop.eup %9050  ;;  %5287 = vmatprep.mubr.bf16.mxu0 %v5001_v36  ;;  %v5003_v46 = vpack.c.bf16 %v9049_v49, %v9047_v6  ;;  %9076 = vtanh.f32 %v4761_v40  ;;  %v4762_v40 = vadd.f32 %v11537_v12, %v11701_v20 }
 0xb29   : > { %v9053_v57 = vpop.eup %9052  ;;  %9078 = vtanh.f32 %v4759_v61  ;;  %v4765_v61 = vadd.f32 %v11525_v22, %v11707_v9 }
 0xb2a   : > { %v9055_v62 = vpop.eup %9054  ;;  %5423 = vmatprep.mubr.bf16.mxu1 %v5003_v46  ;;  %v5000_v30 = vpack.c.bf16 %v9053_v57, %v9051_v37  ;;  %9080 = vtanh.f32 %v4763_v25  ;;  %v4769_v25 = vadd.f32 %v11525_v22, %v11713_v23 }
 0xb2b   : > { %v9057_v11 = vpop.eup %9056  ;;  %9082 = vtanh.f32 %v4756_v48  ;;  %v4767_v48 = vadd.f32 %v11528_v21, %v11719_v32 }
 0xb2c   : > { %v9059_v6 = vpop.eup %9058  ;;  %5288 = vmatmul.mubr.bf16.gmra.mxu0 %v5000_v30  ;;  %v5002_v36 = vpack.c.bf16 %v9057_v11, %v9055_v62  ;;  %9084 = vtanh.f32 %v4760_v14  ;;  %v4771_v14 = vadd.f32 %v11528_v21, %v11725_v50 }
 0xb2d   : > { %v9061_v49 = vpop.eup %9060  ;;  %9086 = vtanh.f32 %v4758_v54  ;;  %v4764_v54 = vadd.f32 %v11505_v39, %v11731_v1 }
 0xb2e   : > { %v9063_v37 = vpop.eup %9062  ;;  %5424 = vmatmul.mubr.bf16.gmra.mxu1 %v5002_v36  ;;  %v5005_v46 = vpack.c.bf16 %v9061_v49, %v9059_v6  ;;  %9088 = vtanh.f32 %v4762_v40  ;;  %v4768_v40 = vadd.f32 %v11505_v39, %v11737_v3 }
 0xb2f   : > { %v9065_v57 = vpop.eup %9064  ;;  %9090 = vtanh.f32 %v4765_v61  ;;  %v4766_v61 = vadd.f32 %v11537_v12, %v11743_v19 }
 0xb30   : > { %v9067_v62 = vpop.eup %9066  ;;  %5295 = vmatprep.mubr.bf16.mxu0 %v5005_v46  ;;  %v5007_v30 = vpack.c.bf16 %v9065_v57, %v9063_v37  ;;  %9092 = vtanh.f32 %v4769_v25  ;;  %v4770_v25 = vadd.f32 %v11537_v12, %v11749_v5  ;;  %v13563_v46 = vld [vmem:[#allocation54_spill] sm:$0xff] }
 0xb31   : > { %v9069_v11 = vpop.eup %9068  ;;  %9094 = vtanh.f32 %v4767_v48  ;;  %v4773_v48 = vadd.f32 %v11525_v22, %v11755_v35  ;;  %v11773_v10 = vadd.f32 %v13563_v46, %v11496_v52  ;;  %v13567_v35 = vld [vmem:[#allocation43_spill] sm:$0xff] }
 0xb32   : > { %v9071_v6 = vpop.eup %9070  ;;  %5431 = vmatprep.mubr.bf16.mxu1 %v5007_v30  ;;  %v5004_v36 = vpack.c.bf16 %v9069_v11, %v9067_v62  ;;  %9096 = vtanh.f32 %v4771_v14  ;;  %v4777_v14 = vadd.f32 %v11525_v22, %v11761_v42  ;;  %v13565_v30 = vld [vmem:[#allocation42_spill] sm:$0xff]  ;;  %v11785_v46 = vadd.f32 %v13567_v35, %v11484_v47  ;;  %v13571_v42 = vld [vmem:[#allocation52_spill] sm:$0xff] }
 0xb33   : > { %v9073_v49 = vpop.eup %9072  ;;  %9098 = vtanh.f32 %v4764_v54  ;;  %13564 = vst [vmem:[#allocation54_spill] sm:$0xff] %v11773_v10  ;;  %v11779_v13 = vadd.f32 %v13565_v30, %v11484_v47  ;;  %v4775_v54 = vadd.f32 %v11528_v21, %v11767_v28  ;;  %v11797_v35 = vadd.f32 %v13571_v42, %v11518_v44 }
 0xb34   : > { %v9075_v37 = vpop.eup %9074  ;;  %5296 = vmatmul.mubr.bf16.gmra.mxu0 %v5004_v36  ;;  %v5006_v57 = vpack.c.bf16 %v9073_v49, %v9071_v6  ;;  %9100 = vtanh.f32 %v4768_v40  ;;  %13568 = vst [vmem:[#allocation43_spill] sm:$0xff] %v11785_v46  ;;  %v4779_v40 = vadd.f32 %v11528_v21, %v11773_v10  ;;  %v13569_v49 = vld [vmem:[#allocation49_spill] sm:$0xff]  ;;  %v13575_v10 = vld [vmem:[#allocation47_spill] sm:$0xff] }
 0xb35   : > { %v9077_v62 = vpop.eup %9076  ;;  %13566 = vst [vmem:[#allocation42_spill] sm:$0xff] %v11779_v13  ;;  %9102 = vtanh.f32 %v4766_v61  ;;  %v11791_v30 = vadd.f32 %v13569_v49, %v11518_v44  ;;  %v4772_v61 = vadd.f32 %v11505_v39, %v11779_v13  ;;  %13572 = vst [vmem:[#allocation52_spill] sm:$0xff] %v11797_v35  ;;  %v11809_v42 = vadd.f32 %v13575_v10, %v11493_v60 }
 0xb36   : > { %v9079_v11 = vpop.eup %9078  ;;  %5432 = vmatmul.mubr.bf16.gmra.mxu1 %v5006_v57  ;;  %v5009_v6 = vpack.c.bf16 %v9077_v62, %v9075_v37  ;;  %9104 = vtanh.f32 %v4770_v25  ;;  %v4776_v25 = vadd.f32 %v11505_v39, %v11785_v46  ;;  %v13573_v62 = vld [vmem:[#allocation45_spill] sm:$0xff]  ;;  %v13579_v46 = vld [vmem:[#allocation62_spill] sm:$0xff] }
 0xb37   : > { %v9081_v36 = vpop.eup %9080  ;;  %13570 = vst [vmem:[#allocation49_spill] sm:$0xff] %v11791_v30  ;;  %9106 = vtanh.f32 %v4773_v48  ;;  %v11803_v49 = vadd.f32 %v13573_v62, %v11493_v60  ;;  %v4774_v48 = vadd.f32 %v11537_v12, %v11791_v30  ;;  %13576 = vst [vmem:[#allocation47_spill] sm:$0xff] %v11809_v42  ;;  %v11821_v10 = vadd.f32 %v13579_v46, %v11496_v52 }
 0xb38   : > { %v9083_v28 = vpop.eup %9082  ;;  %5303 = vmatprep.mubr.bf16.mxu0 %v5009_v6  ;;  %v5011_v37 = vpack.c.bf16 %v9081_v36, %v9079_v11  ;;  %9108 = vtanh.f32 %v4777_v14  ;;  %v4778_v14 = vadd.f32 %v11537_v12, %v11797_v35  ;;  %v13577_v36 = vld [vmem:[#allocation58_spill] sm:$0xff] }
 0xb39   : > { %v9085_v57 = vpop.eup %9084  ;;  %13574 = vst [vmem:[#allocation45_spill] sm:$0xff] %v11803_v49  ;;  %9110 = vtanh.f32 %v4775_v54  ;;  %v11815_v62 = vadd.f32 %v13577_v36, %v11496_v52  ;;  %v4781_v54 = vadd.f32 %v11525_v22, %v11803_v49  ;;  %13580 = vst [vmem:[#allocation62_spill] sm:$0xff] %v11821_v10  ;;  %v13583_v35 = vld [vmem:[#allocation46_spill] sm:$0xff] }
 0xb3a   : > { %v9087_v13 = vpop.eup %9086  ;;  %5439 = vmatprep.mubr.bf16.mxu1 %v5011_v37  ;;  %v5008_v11 = vpack.c.bf16 %v9085_v57, %v9083_v28  ;;  %9112 = vtanh.f32 %v4779_v40  ;;  %v4785_v40 = vadd.f32 %v11525_v22, %v11809_v42  ;;  %v13581_v57 = vld [vmem:[#allocation44_spill] sm:$0xff]  ;;  %v11833_v46 = vadd.f32 %v13583_v35, %v11484_v47 }
 0xb3b   : > { %v9089_v6 = vpop.eup %9088  ;;  %13578 = vst [vmem:[#allocation58_spill] sm:$0xff] %v11815_v62  ;;  %9114 = vtanh.f32 %v4772_v61  ;;  %v11827_v36 = vadd.f32 %v13581_v57, %v11484_v47  ;;  %v4783_v61 = vadd.f32 %v11528_v21, %v11815_v62  ;;  %v13587_v42 = vld [vmem:[#allocation60_spill] sm:$0xff] }
 0xb3c   : > { %v9091_v30 = vpop.eup %9090  ;;  %5304 = vmatmul.mubr.bf16.gmra.mxu0 %v5008_v11  ;;  %v5010_v28 = vpack.c.bf16 %v9089_v6, %v9087_v13  ;;  %9116 = vtanh.f32 %v4776_v25  ;;  %13584 = vst [vmem:[#allocation46_spill] sm:$0xff] %v11833_v46  ;;  %v4787_v25 = vadd.f32 %v11528_v21, %v11821_v10  ;;  %v13585_v6 = vld [vmem:[#allocation56_spill] sm:$0xff]  ;;  %v11845_v35 = vadd.f32 %v13587_v42, %v11518_v44  ;;  %v13591_v10 = vld [vmem:[#allocation53_spill] sm:$0xff] }
 0xb3d   : > { %v9093_v37 = vpop.eup %9092  ;;  %13582 = vst [vmem:[#allocation44_spill] sm:$0xff] %v11827_v36  ;;  %9118 = vtanh.f32 %v4774_v48  ;;  %v11839_v57 = vadd.f32 %v13585_v6, %v11518_v44  ;;  %v4780_v48 = vadd.f32 %v11505_v39, %v11827_v36  ;;  %v11857_v42 = vadd.f32 %v13591_v10, %v11493_v60 }
 0xb3e   : > { %v9095_v49 = vpop.eup %9094  ;;  %5440 = vmatmul.mubr.bf16.gmra.mxu1 %v5010_v28  ;;  %v5013_v13 = vpack.c.bf16 %v9093_v37, %v9091_v30  ;;  %9120 = vtanh.f32 %v4778_v14  ;;  %13588 = vst [vmem:[#allocation60_spill] sm:$0xff] %v11845_v35  ;;  %v4784_v14 = vadd.f32 %v11505_v39, %v11833_v46  ;;  %v13589_v37 = vld [vmem:[#allocation50_spill] sm:$0xff] }
 0xb3f   : > { %v9097_v11 = vpop.eup %9096  ;;  %13586 = vst [vmem:[#allocation56_spill] sm:$0xff] %v11839_v57  ;;  %9122 = vtanh.f32 %v4781_v54  ;;  %v11851_v6 = vadd.f32 %v13589_v37, %v11493_v60  ;;  %v4782_v54 = vadd.f32 %v11537_v12, %v11839_v57  ;;  %13592 = vst [vmem:[#allocation53_spill] sm:$0xff] %v11857_v42  ;;  %v13595_v46 = vld [vmem:[#allocation70_spill] sm:$0xff] }
 0xb40   : > { %v9099_v62 = vpop.eup %9098  ;;  %5311 = vmatprep.mubr.bf16.mxu0 %v5013_v13  ;;  %v5015_v30 = vpack.c.bf16 %v9097_v11, %v9095_v49  ;;  %9124 = vtanh.f32 %v4785_v40  ;;  %v4786_v40 = vadd.f32 %v11537_v12, %v11845_v35  ;;  %v13593_v11 = vld [vmem:[#allocation66_spill] sm:$0xff]  ;;  %v11869_v10 = vadd.f32 %v13595_v46, %v11496_v52  ;;  %v13599_v35 = vld [vmem:[#allocation51_spill] sm:$0xff] }
 0xb41   : > { %v9101_v28 = vpop.eup %9100  ;;  %13590 = vst [vmem:[#allocation50_spill] sm:$0xff] %v11851_v6  ;;  %9126 = vtanh.f32 %v4783_v61  ;;  %v11863_v37 = vadd.f32 %v13593_v11, %v11496_v52  ;;  %v4789_v61 = vadd.f32 %v11525_v22, %v11851_v6  ;;  %v11881_v46 = vadd.f32 %v13599_v35, %v11484_v47 }
 0xb42   : > { %v9103_v36 = vpop.eup %9102  ;;  %5447 = vmatprep.mubr.bf16.mxu1 %v5015_v30  ;;  %v5012_v49 = vpack.c.bf16 %v9101_v28, %v9099_v62  ;;  %9128 = vtanh.f32 %v4787_v25  ;;  %13596 = vst [vmem:[#allocation70_spill] sm:$0xff] %v11869_v10  ;;  %v4793_v25 = vadd.f32 %v11525_v22, %v11857_v42  ;;  %v13597_v28 = vld [vmem:[#allocation48_spill] sm:$0xff] }
 0xb43   : > { %v9105_v13 = vpop.eup %9104  ;;  %13594 = vst [vmem:[#allocation66_spill] sm:$0xff] %v11863_v37  ;;  %9130 = vtanh.f32 %v4780_v48  ;;  %v11875_v11 = vadd.f32 %v13597_v28, %v11484_v47  ;;  %v4791_v48 = vadd.f32 %v11528_v21, %v11863_v37  ;;  %13600 = vst [vmem:[#allocation51_spill] sm:$0xff] %v11881_v46  ;;  %v13603_v42 = vld [vmem:[#allocation68_spill] sm:$0xff] }
 0xb44   : > { %v9107_v57 = vpop.eup %9106  ;;  %5312 = vmatmul.mubr.bf16.gmra.mxu0 %v5012_v49  ;;  %v5014_v62 = vpack.c.bf16 %v9105_v13, %v9103_v36  ;;  %9132 = vtanh.f32 %v4784_v14  ;;  %v4795_v14 = vadd.f32 %v11528_v21, %v11869_v10  ;;  %v13601_v13 = vld [vmem:[#allocation64_spill] sm:$0xff]  ;;  %v11893_v35 = vadd.f32 %v13603_v42, %v11518_v44  ;;  %v13607_v10 = vld [vmem:[#allocation61_spill] sm:$0xff] }
 0xb45   : > { %v9109_v30 = vpop.eup %9108  ;;  %13598 = vst [vmem:[#allocation48_spill] sm:$0xff] %v11875_v11  ;;  %9134 = vtanh.f32 %v4782_v54  ;;  %v11887_v28 = vadd.f32 %v13601_v13, %v11518_v44  ;;  %v4788_v54 = vadd.f32 %v11505_v39, %v11875_v11  ;;  %v11905_v42 = vadd.f32 %v13607_v10, %v11493_v60 }
 0xb46   : > { %v9111_v6 = vpop.eup %9110  ;;  %5448 = vmatmul.mubr.bf16.gmra.mxu1 %v5014_v62  ;;  %v5017_v36 = vpack.c.bf16 %v9109_v30, %v9107_v57  ;;  %9136 = vtanh.f32 %v4786_v40  ;;  %13604 = vst [vmem:[#allocation68_spill] sm:$0xff] %v11893_v35  ;;  %v4792_v40 = vadd.f32 %v11505_v39, %v11881_v46  ;;  %v13605_v30 = vld [vmem:[#allocation57_spill] sm:$0xff]  ;;  %v13611_v46 = vld [vmem:[#allocation78_spill] sm:$0xff] }
 0xb47   : > { %v9113_v49 = vpop.eup %9112  ;;  %13602 = vst [vmem:[#allocation64_spill] sm:$0xff] %v11887_v28  ;;  %9138 = vtanh.f32 %v4789_v61  ;;  %v11899_v13 = vadd.f32 %v13605_v30, %v11493_v60  ;;  %v4790_v61 = vadd.f32 %v11537_v12, %v11887_v28  ;;  %13608 = vst [vmem:[#allocation61_spill] sm:$0xff] %v11905_v42  ;;  %v11917_v10 = vadd.f32 %v13611_v46, %v11496_v52 }
 0xb48   : > { %v9115_v37 = vpop.eup %9114  ;;  %5319 = vmatprep.mubr.bf16.mxu0 %v5017_v36  ;;  %v5019_v57 = vpack.c.bf16 %v9113_v49, %v9111_v6  ;;  %9140 = vtanh.f32 %v4793_v25  ;;  %v4794_v25 = vadd.f32 %v11537_v12, %v11893_v35  ;;  %v13609_v49 = vld [vmem:[#allocation74_spill] sm:$0xff]  ;;  %v13615_v35 = vld [vmem:[#allocation59_spill] sm:$0xff] }
 0xb49   : > { %v9117_v62 = vpop.eup %9116  ;;  %13606 = vst [vmem:[#allocation57_spill] sm:$0xff] %v11899_v13  ;;  %9142 = vtanh.f32 %v4791_v48  ;;  %v11911_v30 = vadd.f32 %v13609_v49, %v11496_v52  ;;  %v4797_v48 = vadd.f32 %v11525_v22, %v11899_v13  ;;  %13612 = vst [vmem:[#allocation78_spill] sm:$0xff] %v11917_v10  ;;  %v11929_v46 = vadd.f32 %v13615_v35, %v11484_v47 }
 0xb4a   : > { %v9119_v11 = vpop.eup %9118  ;;  %5455 = vmatprep.mubr.bf16.mxu1 %v5019_v57  ;;  %v5016_v6 = vpack.c.bf16 %v9117_v62, %v9115_v37  ;;  %9144 = vtanh.f32 %v4795_v14  ;;  %v4801_v14 = vadd.f32 %v11525_v22, %v11905_v42  ;;  %v13613_v62 = vld [vmem:[#allocation55_spill] sm:$0xff]  ;;  %v13619_v42 = vld [vmem:[#allocation76_spill] sm:$0xff] }
 0xb4b   : > { %v9121_v36 = vpop.eup %9120  ;;  %13610 = vst [vmem:[#allocation74_spill] sm:$0xff] %v11911_v30  ;;  %9146 = vtanh.f32 %v4788_v54  ;;  %v11923_v49 = vadd.f32 %v13613_v62, %v11484_v47  ;;  %v4799_v54 = vadd.f32 %v11528_v21, %v11911_v30  ;;  %13616 = vst [vmem:[#allocation59_spill] sm:$0xff] %v11929_v46  ;;  %v11941_v35 = vadd.f32 %v13619_v42, %v11518_v44 }
 0xb4c   : > { %v9123_v28 = vpop.eup %9122  ;;  %5320 = vmatmul.mubr.bf16.gmra.mxu0 %v5016_v6  ;;  %v5018_v37 = vpack.c.bf16 %v9121_v36, %v9119_v11  ;;  %9148 = vtanh.f32 %v4792_v40  ;;  %v4803_v40 = vadd.f32 %v11528_v21, %v11917_v10  ;;  %v13617_v36 = vld [vmem:[#allocation72_spill] sm:$0xff]  ;;  %v13623_v10 = vld [vmem:[#allocation69_spill] sm:$0xff] }
 0xb4d   : > { %v9125_v57 = vpop.eup %9124  ;;  %13614 = vst [vmem:[#allocation55_spill] sm:$0xff] %v11923_v49  ;;  %9150 = vtanh.f32 %v4790_v61  ;;  %v11935_v62 = vadd.f32 %v13617_v36, %v11518_v44  ;;  %v4796_v61 = vadd.f32 %v11505_v39, %v11923_v49  ;;  %13620 = vst [vmem:[#allocation76_spill] sm:$0xff] %v11941_v35  ;;  %v11953_v42 = vadd.f32 %v13623_v10, %v11493_v60 }
 0xb4e   : > { %v9127_v13 = vpop.eup %9126  ;;  %5456 = vmatmul.mubr.bf16.gmra.mxu1 %v5018_v37  ;;  %v5021_v11 = vpack.c.bf16 %v9125_v57, %v9123_v28  ;;  %9152 = vtanh.f32 %v4794_v25  ;;  %v4800_v25 = vadd.f32 %v11505_v39, %v11929_v46  ;;  %v13621_v57 = vld [vmem:[#allocation65_spill] sm:$0xff]  ;;  %v13627_v46 = vld [vmem:[#allocation86_spill] sm:$0xff] }
 0xb4f   : > { %v9129_v6 = vpop.eup %9128  ;;  %13618 = vst [vmem:[#allocation72_spill] sm:$0xff] %v11935_v62  ;;  %9154 = vtanh.f32 %v4797_v48  ;;  %v11947_v36 = vadd.f32 %v13621_v57, %v11493_v60  ;;  %v4798_v48 = vadd.f32 %v11537_v12, %v11935_v62  ;;  %13624 = vst [vmem:[#allocation69_spill] sm:$0xff] %v11953_v42  ;;  %v11965_v10 = vadd.f32 %v13627_v46, %v11496_v52 }
 0xb50   : > { %v9131_v30 = vpop.eup %9130  ;;  %5327 = vmatprep.mubr.bf16.mxu0 %v5021_v11  ;;  %v5023_v28 = vpack.c.bf16 %v9129_v6, %v9127_v13  ;;  %9156 = vtanh.f32 %v4801_v14  ;;  %v4802_v14 = vadd.f32 %v11537_v12, %v11941_v35  ;;  %v13625_v6 = vld [vmem:[#allocation82_spill] sm:$0xff]  ;;  %v13631_v35 = vld [vmem:[#allocation67_spill] sm:$0xff] }
 0xb51   : > { %v9133_v37 = vpop.eup %9132  ;;  %13622 = vst [vmem:[#allocation65_spill] sm:$0xff] %v11947_v36  ;;  %9158 = vtanh.f32 %v4799_v54  ;;  %v11959_v57 = vadd.f32 %v13625_v6, %v11496_v52  ;;  %v4805_v54 = vadd.f32 %v11525_v22, %v11947_v36  ;;  %13628 = vst [vmem:[#allocation86_spill] sm:$0xff] %v11965_v10  ;;  %v11977_v46 = vadd.f32 %v13631_v35, %v11484_v47 }
 0xb52   : > { %v9135_v49 = vpop.eup %9134  ;;  %5463 = vmatprep.mubr.bf16.mxu1 %v5023_v28  ;;  %v5020_v13 = vpack.c.bf16 %v9133_v37, %v9131_v30  ;;  %9160 = vtanh.f32 %v4803_v40  ;;  %v4809_v40 = vadd.f32 %v11525_v22, %v11953_v42  ;;  %v13629_v37 = vld [vmem:[#allocation63_spill] sm:$0xff]  ;;  %v13635_v42 = vld [vmem:[#allocation84_spill] sm:$0xff] }
 0xb53   : > { %v9137_v11 = vpop.eup %9136  ;;  %13626 = vst [vmem:[#allocation82_spill] sm:$0xff] %v11959_v57  ;;  %9162 = vtanh.f32 %v4796_v61  ;;  %v11971_v6 = vadd.f32 %v13629_v37, %v11484_v47  ;;  %v4807_v61 = vadd.f32 %v11528_v21, %v11959_v57  ;;  %13632 = vst [vmem:[#allocation67_spill] sm:$0xff] %v11977_v46  ;;  %v11989_v35 = vadd.f32 %v13635_v42, %v11518_v44 }
 0xb54   : > { %v9139_v62 = vpop.eup %9138  ;;  %5328 = vmatmul.mubr.bf16.gmra.mxu0 %v5020_v13  ;;  %v5022_v30 = vpack.c.bf16 %v9137_v11, %v9135_v49  ;;  %9164 = vtanh.f32 %v4800_v25  ;;  %v4811_v25 = vadd.f32 %v11528_v21, %v11965_v10  ;;  %v13633_v11 = vld [vmem:[#allocation80_spill] sm:$0xff]  ;;  %v13639_v10 = vld [vmem:[#allocation77_spill] sm:$0xff] }
 0xb55   : > { %v9141_v28 = vpop.eup %9140  ;;  %13630 = vst [vmem:[#allocation63_spill] sm:$0xff] %v11971_v6  ;;  %9166 = vtanh.f32 %v4798_v48  ;;  %v11983_v37 = vadd.f32 %v13633_v11, %v11518_v44  ;;  %v4804_v48 = vadd.f32 %v11505_v39, %v11971_v6  ;;  %13636 = vst [vmem:[#allocation84_spill] sm:$0xff] %v11989_v35  ;;  %v12001_v42 = vadd.f32 %v13639_v10, %v11493_v60 }
 0xb56   : > { %v9143_v36 = vpop.eup %9142  ;;  %5464 = vmatmul.mubr.bf16.gmra.mxu1 %v5022_v30  ;;  %v5025_v49 = vpack.c.bf16 %v9141_v28, %v9139_v62  ;;  %9168 = vtanh.f32 %v4802_v14  ;;  %v4808_v14 = vadd.f32 %v11505_v39, %v11977_v46  ;;  %v13637_v28 = vld [vmem:[#allocation73_spill] sm:$0xff]  ;;  %v13643_v46 = vld [vmem:[#allocation92_spill] sm:$0xff] }
 0xb57   : > { %v9145_v13 = vpop.eup %9144  ;;  %13634 = vst [vmem:[#allocation80_spill] sm:$0xff] %v11983_v37  ;;  %9170 = vtanh.f32 %v4805_v54  ;;  %v11995_v11 = vadd.f32 %v13637_v28, %v11493_v60  ;;  %v4806_v54 = vadd.f32 %v11537_v12, %v11983_v37  ;;  %13640 = vst [vmem:[#allocation77_spill] sm:$0xff] %v12001_v42  ;;  %v12013_v10 = vadd.f32 %v13643_v46, %v11496_v52 }
 0xb58   : > { %v9147_v57 = vpop.eup %9146  ;;  %5335 = vmatprep.mubr.bf16.mxu0 %v5025_v49  ;;  %v5027_v62 = vpack.c.bf16 %v9145_v13, %v9143_v36  ;;  %9172 = vtanh.f32 %v4809_v40  ;;  %v4810_v40 = vadd.f32 %v11537_v12, %v11989_v35  ;;  %v13641_v13 = vld [vmem:[#allocation90_spill] sm:$0xff]  ;;  %v13647_v35 = vld [vmem:[#allocation75_spill] sm:$0xff] }
 0xb59   : > { %v9149_v30 = vpop.eup %9148  ;;  %13638 = vst [vmem:[#allocation73_spill] sm:$0xff] %v11995_v11  ;;  %9174 = vtanh.f32 %v4807_v61  ;;  %v12007_v28 = vadd.f32 %v13641_v13, %v11496_v52  ;;  %v4813_v61 = vadd.f32 %v11525_v22, %v11995_v11  ;;  %13644 = vst [vmem:[#allocation92_spill] sm:$0xff] %v12013_v10  ;;  %v12025_v46 = vadd.f32 %v13647_v35, %v11484_v47 }
 0xb5a   : > { %v9151_v6 = vpop.eup %9150  ;;  %5471 = vmatprep.mubr.bf16.mxu1 %v5027_v62  ;;  %v5024_v36 = vpack.c.bf16 %v9149_v30, %v9147_v57  ;;  %9176 = vtanh.f32 %v4811_v25  ;;  %v4817_v25 = vadd.f32 %v11525_v22, %v12001_v42  ;;  %v13645_v30 = vld [vmem:[#allocation71_spill] sm:$0xff] }
 0xb5b   : > { %v9153_v49 = vpop.eup %9152  ;;  %13642 = vst [vmem:[#allocation90_spill] sm:$0xff] %v12007_v28  ;;  %9178 = vtanh.f32 %v4804_v48  ;;  %v12019_v13 = vadd.f32 %v13645_v30, %v11484_v47  ;;  %v4815_v48 = vadd.f32 %v11528_v21, %v12007_v28  ;;  %13648 = vst [vmem:[#allocation75_spill] sm:$0xff] %v12025_v46  ;;  %v13651_v42 = vld [vmem:[#allocation91_spill] sm:$0xff] }
 0xb5c   : > { %v9155_v37 = vpop.eup %9154  ;;  %5336 = vmatmul.mubr.bf16.gmra.mxu0 %v5024_v36  ;;  %v5026_v57 = vpack.c.bf16 %v9153_v49, %v9151_v6  ;;  %9180 = vtanh.f32 %v4808_v14  ;;  %v4819_v14 = vadd.f32 %v11528_v21, %v12013_v10  ;;  %v13649_v49 = vld [vmem:[#allocation88_spill] sm:$0xff]  ;;  %v12037_v35 = vadd.f32 %v13651_v42, %v11518_v44  ;;  %v13655_v10 = vld [vmem:[#allocation85_spill] sm:$0xff] }
 0xb5d   : > { %v9157_v62 = vpop.eup %9156  ;;  %13646 = vst [vmem:[#allocation71_spill] sm:$0xff] %v12019_v13  ;;  %9182 = vtanh.f32 %v4806_v54  ;;  %v12031_v30 = vadd.f32 %v13649_v49, %v11518_v44  ;;  %v4812_v54 = vadd.f32 %v11505_v39, %v12019_v13  ;;  %v12049_v42 = vadd.f32 %v13655_v10, %v11493_v60 }
 0xb5e   : > { %v9159_v11 = vpop.eup %9158  ;;  %5472 = vmatmul.mubr.bf16.gmra.mxu1 %v5026_v57  ;;  %v5029_v6 = vpack.c.bf16 %v9157_v62, %v9155_v37  ;;  %9184 = vtanh.f32 %v4810_v40  ;;  %13652 = vst [vmem:[#allocation91_spill] sm:$0xff] %v12037_v35  ;;  %v4816_v40 = vadd.f32 %v11505_v39, %v12025_v46  ;;  %v13653_v62 = vld [vmem:[#allocation81_spill] sm:$0xff]  ;;  %v13659_v46 = vld [vmem:[#allocation96_spill] sm:$0xff] }
 0xb5f   : > { %v9161_v36 = vpop.eup %9160  ;;  %13650 = vst [vmem:[#allocation88_spill] sm:$0xff] %v12031_v30  ;;  %9186 = vtanh.f32 %v4813_v61  ;;  %v12043_v49 = vadd.f32 %v13653_v62, %v11493_v60  ;;  %v4814_v61 = vadd.f32 %v11537_v12, %v12031_v30  ;;  %13656 = vst [vmem:[#allocation85_spill] sm:$0xff] %v12049_v42  ;;  %v12061_v10 = vadd.f32 %v13659_v46, %v11496_v52 }
 0xb60   : > { %v9163_v28 = vpop.eup %9162  ;;  %5343 = vmatprep.mubr.bf16.mxu0 %v5029_v6  ;;  %v5031_v37 = vpack.c.bf16 %v9161_v36, %v9159_v11  ;;  %9188 = vtanh.f32 %v4817_v25  ;;  %v4818_v25 = vadd.f32 %v11537_v12, %v12037_v35  ;;  %v13657_v36 = vld [vmem:[#allocation94_spill] sm:$0xff]  ;;  %v13663_v35 = vld [vmem:[#allocation83_spill] sm:$0xff] }
 0xb61   : > { %v9165_v57 = vpop.eup %9164  ;;  %13654 = vst [vmem:[#allocation81_spill] sm:$0xff] %v12043_v49  ;;  %9190 = vtanh.f32 %v4815_v48  ;;  %v12055_v62 = vadd.f32 %v13657_v36, %v11496_v52  ;;  %v4821_v48 = vadd.f32 %v11525_v22, %v12043_v49  ;;  %13660 = vst [vmem:[#allocation96_spill] sm:$0xff] %v12061_v10  ;;  %v12073_v46 = vadd.f32 %v13663_v35, %v11484_v47 }
 0xb62   : > { %v9167_v13 = vpop.eup %9166  ;;  %5479 = vmatprep.mubr.bf16.mxu1 %v5031_v37  ;;  %v5028_v11 = vpack.c.bf16 %v9165_v57, %v9163_v28  ;;  %9192 = vtanh.f32 %v4819_v14  ;;  %v4825_v14 = vadd.f32 %v11525_v22, %v12049_v42  ;;  %v13661_v57 = vld [vmem:[#allocation79_spill] sm:$0xff] }
 0xb63   : > { %v9169_v6 = vpop.eup %9168  ;;  %13658 = vst [vmem:[#allocation94_spill] sm:$0xff] %v12055_v62  ;;  %9194 = vtanh.f32 %v4812_v54  ;;  %v12067_v36 = vadd.f32 %v13661_v57, %v11484_v47  ;;  %v4823_v54 = vadd.f32 %v11528_v21, %v12055_v62  ;;  %13664 = vst [vmem:[#allocation83_spill] sm:$0xff] %v12073_v46  ;;  %v13667_v42 = vld [vmem:[#allocation95_spill] sm:$0xff] }
 0xb64   : > { %v9171_v30 = vpop.eup %9170  ;;  %5344 = vmatmul.mubr.bf16.gmra.mxu0 %v5028_v11  ;;  %v5030_v28 = vpack.c.bf16 %v9169_v6, %v9167_v13  ;;  %9196 = vtanh.f32 %v4816_v40  ;;  %v4827_v40 = vadd.f32 %v11528_v21, %v12061_v10  ;;  %v13665_v6 = vld [vmem:[#allocation93_spill] sm:$0xff]  ;;  %v12085_v35 = vadd.f32 %v13667_v42, %v11518_v44  ;;  %v13671_v10 = vld [vmem:[#allocation98_spill] sm:$0xff] }
 0xb65   : > { %v9173_v37 = vpop.eup %9172  ;;  %13662 = vst [vmem:[#allocation79_spill] sm:$0xff] %v12067_v36  ;;  %9198 = vtanh.f32 %v4814_v61  ;;  %v12079_v57 = vadd.f32 %v13665_v6, %v11518_v44  ;;  %v4820_v61 = vadd.f32 %v11505_v39, %v12067_v36  ;;  %v12097_v42 = vadd.f32 %v13671_v10, %v11496_v52 }
 0xb66   : > { %v9175_v49 = vpop.eup %9174  ;;  %5480 = vmatmul.mubr.bf16.gmra.mxu1 %v5030_v28  ;;  %v5033_v13 = vpack.c.bf16 %v9173_v37, %v9171_v30  ;;  %9200 = vtanh.f32 %v4818_v25  ;;  %13668 = vst [vmem:[#allocation95_spill] sm:$0xff] %v12085_v35  ;;  %v4824_v25 = vadd.f32 %v11505_v39, %v12073_v46  ;;  %v13669_v37 = vld [vmem:[#allocation89_spill] sm:$0xff] }
 0xb67   : > { %v9177_v11 = vpop.eup %9176  ;;  %13666 = vst [vmem:[#allocation93_spill] sm:$0xff] %v12079_v57  ;;  %9202 = vtanh.f32 %v4821_v48  ;;  %v12091_v6 = vadd.f32 %v13669_v37, %v11493_v60  ;;  %v4822_v48 = vadd.f32 %v11537_v12, %v12079_v57  ;;  %13672 = vst [vmem:[#allocation98_spill] sm:$0xff] %v12097_v42  ;;  %v4831_v52 = vadd.f32 %v11528_v21, %v12097_v42 }
 0xb68   : > { %v9179_v62 = vpop.eup %9178  ;;  %5351 = vmatprep.mubr.bf16.mxu0 %v5033_v13  ;;  %v5035_v30 = vpack.c.bf16 %v9177_v11, %v9175_v49  ;;  %9204 = vtanh.f32 %v4825_v14  ;;  %v4826_v14 = vadd.f32 %v11537_v12, %v12085_v35  ;;  %v13673_v11 = vld [vmem:[#allocation87_spill] sm:$0xff] }
 0xb69   : > { %v9181_v28 = vpop.eup %9180  ;;  %13670 = vst [vmem:[#allocation89_spill] sm:$0xff] %v12091_v6  ;;  %9206 = vtanh.f32 %v4823_v54  ;;  %v4829_v60 = vadd.f32 %v11525_v22, %v12091_v6  ;;  %v12105_v37 = vadd.f32 %v13673_v11, %v11484_v47 }
 0xb6a   : > { %v9183_v36 = vpop.eup %9182  ;;  %5487 = vmatprep.mubr.bf16.mxu1 %v5035_v30  ;;  %v5032_v49 = vpack.c.bf16 %v9181_v28, %v9179_v62  ;;  %9208 = vtanh.f32 %v4827_v40  ;;  %v13675_v40 = vld [vmem:[#allocation97_spill] sm:$0xff] }
 0xb6b   : > { %v9185_v13 = vpop.eup %9184  ;;  %9210 = vtanh.f32 %v4820_v61  ;;  %13674 = vst [vmem:[#allocation87_spill] sm:$0xff] %v12105_v37  ;;  %v12111_v61 = vadd.f32 %v13675_v40, %v11518_v44  ;;  %v4828_v47 = vadd.f32 %v11505_v39, %v12105_v37 }
 0xb6c   : > { %v9187_v54 = vpop.eup %9186  ;;  %5352 = vmatmul.mubr.bf16.gmra.mxu0 %v5032_v49  ;;  %v5034_v57 = vpack.c.bf16 %v9185_v13, %v9183_v36  ;;  %9212 = vtanh.f32 %v4824_v25 }
 0xb6d   : > { %v9189_v62 = vpop.eup %9188  ;;  %9214 = vtanh.f32 %v4822_v48  ;;  %13676 = vst [vmem:[#allocation97_spill] sm:$0xff] %v12111_v61  ;;  %v4830_v21 = vadd.f32 %v11537_v12, %v12111_v61 }
 0xb6e   : > { %v9191_v10 = vpop.eup %9190  ;;  %5488 = vmatmul.mubr.bf16.gmra.mxu1 %v5034_v57  ;;  %v5037_v22 = vpack.c.bf16 %v9189_v62, %v9187_v54  ;;  %9216 = vtanh.f32 %v4826_v14 }
 0xb6f   : > { %v9193_v30 = vpop.eup %9192  ;;  %9218 = vtanh.f32 %v4829_v60 }
 0xb70   : > { %v9195_v36 = vpop.eup %9194  ;;  %5359 = vmatprep.mubr.bf16.mxu0 %v5037_v22  ;;  %v5039_v25 = vpack.c.bf16 %v9193_v30, %v9191_v10  ;;  %9220 = vtanh.f32 %v4831_v52 }
 0xb71   : > { %v9197_v28 = vpop.eup %9196  ;;  %9222 = vtanh.f32 %v4828_v47 }
 0xb72   : > { %v9199_v48 = vpop.eup %9198  ;;  %5495 = vmatprep.mubr.bf16.mxu1 %v5039_v25  ;;  %v5036_v44 = vpack.c.bf16 %v9197_v28, %v9195_v36  ;;  %9224 = vtanh.f32 %v4830_v21 }
 0xb73   : > { %v9201_v57 = vpop.eup %9200 }
 0xb74   : > { %v9203_v49 = vpop.eup %9202  ;;  %5360 = vmatmul.mubr.bf16.gmra.mxu0 %v5036_v44  ;;  %v5038_v14 = vpack.c.bf16 %v9201_v57, %v9199_v48 }
 0xb75   : > { %v9205_v39 = vpop.eup %9204 }
 0xb76   : > { %v9207_v13 = vpop.eup %9206  ;;  %5496 = vmatmul.mubr.bf16.gmra.mxu1 %v5038_v14  ;;  %v5041_v60 = vpack.c.bf16 %v9205_v39, %v9203_v49  ;;  %v12117_v14 = vld [vmem:[#allocation2] ss:$0 sm:$0xff] }
 0xb77   : > { %v9209_v54 = vpop.eup %9208 }
 0xb78   : > { %v9211_v11 = vpop.eup %9210  ;;  %5367 = vmatprep.mubr.bf16.mxu0 %v5041_v60  ;;  %v5043_v52 = vpack.c.bf16 %v9209_v54, %v9207_v13 }
 0xb79   : > { %v9213_v62 = vpop.eup %9212 }
 0xb7a   : > { %v9215_v12 = vpop.eup %9214  ;;  %5503 = vmatprep.mubr.bf16.mxu1 %v5043_v52  ;;  %v5040_v10 = vpack.c.bf16 %v9213_v62, %v9211_v11 }
 0xb7b   : > { %v9217_v40 = vpop.eup %9216 }
 0xb7c   : > { %v9219_v22 = vpop.eup %9218  ;;  %5368 = vmatmul.mubr.bf16.gmra.mxu0 %v5040_v10  ;;  %v5042_v47 = vpack.c.bf16 %v9217_v40, %v9215_v12 }
 0xb7d   : > { %v9221_v30 = vpop.eup %9220  ;;  %v5045_v36 = vpack.c.bf16 %v9219_v22, %v9219_v22 }
 0xb7e   : > { %5504 = vmatmul.mubr.bf16.gmra.mxu1 %v5042_v47  ;;  %v5047_v25 = vpack.c.bf16 %v9221_v30, %v9221_v30  ;;  %v9223_v21 = vpop.eup %9222 }
 0xb7f   : > { %5375 = vmatprep.mubr.bf16.mxu0 %v5045_v36  ;;  %v9225_v28 = vpop.eup %9224  ;;  %v5044_v48 = vpack.c.bf16 %v9223_v21, %v9223_v21 }
 0xb80   : > { %5511 = vmatprep.mubr.bf16.mxu1 %v5047_v25  ;;  %v5046_v44 = vpack.c.bf16 %v9225_v28, %v9225_v28 }
 0xb84   : > { %5376 = vmatmul.mubr.bf16.gmra.mxu0 %v5044_v48 }
 0xb85   : > { %7417 = vmatprep.mubr.msk.bf16.mxu0 %vm5814_vm4, %v13394_v38 }
 0xb86   : > { %5512 = vmatmul.mubr.bf16.gmra.mxu1 %v5046_v44 }
 0xb87   : > { %7418 = vmatprep.mubr.msk.bf16.mxu1 %vm5814_vm4, %v13394_v38 }
 0xbe4   : > { %v7817_v57 = vpop.f32.mrf.mxu0 }
 0xbe6   : > { %v7911_v49 = vpop.f32.mrf.mxu1  ;;  %v7818_v39 = vpop.f32.mrf.mxu0 }
 0xbe7   : > { %v7819_v13 = vadd.f32 %v7818_v39, %v7817_v57 }
 0xbe8   : > { %v7912_v60 = vpop.f32.mrf.mxu1  ;;  %v7820_v54 = vpop.f32.mrf.mxu0 }
 0xbe9   : > { %v5282_v11 = vadd.f32 %v7819_v13, %v12117_v14  ;;  %v7913_v52 = vadd.f32 %v7912_v60, %v7911_v49 }
 0xbea   : > { %v7914_v62 = vpop.f32.mrf.mxu1  ;;  %v7821_v12 = vpop.f32.mrf.mxu0 }
 0xbeb   : > { %v12120_v10 = vadd.f32 %v7913_v52, %v5282_v11  ;;  %v7822_v40 = vadd.f32 %v7821_v12, %v7820_v54 }
 0xbec   : > { %v7915_v22 = vpop.f32.mrf.mxu1  ;;  %v7823_v47 = vpop.f32.mrf.mxu0 }
 0xbed   : > { %13677 = vst [vmem:[#allocation143_spill] sm:$0xff] %v12120_v10  ;;  %v5285_v30 = vadd.f32 %v7822_v40, %v12117_v14  ;;  %v7916_v36 = vadd.f32 %v7915_v22, %v7914_v62 }
 0xbee   : > { %v7917_v25 = vpop.f32.mrf.mxu1  ;;  %v7824_v21 = vpop.f32.mrf.mxu0 }
 0xbef   : > { %v12123_v28 = vadd.f32 %v7916_v36, %v5285_v30  ;;  %v7825_v48 = vadd.f32 %v7824_v21, %v7823_v47 }
 0xbf0   : > { %v7918_v44 = vpop.f32.mrf.mxu1  ;;  %v7826_v57 = vpop.f32.mrf.mxu0 }
 0xbf1   : > { %13678 = vst [vmem:[#allocation144_spill] sm:$0xff] %v12123_v28  ;;  %v5290_v39 = vadd.f32 %v7825_v48, %v12117_v14  ;;  %v7919_v49 = vadd.f32 %v7918_v44, %v7917_v25 }
 0xbf2   : > { %v7920_v13 = vpop.f32.mrf.mxu1  ;;  %v7827_v60 = vpop.f32.mrf.mxu0 }
 0xbf3   : > { %v12126_v11 = vadd.f32 %v7919_v49, %v5290_v39  ;;  %v7828_v54 = vadd.f32 %v7827_v60, %v7826_v57 }
 0xbf4   : > { %v7921_v52 = vpop.f32.mrf.mxu1  ;;  %v7829_v12 = vpop.f32.mrf.mxu0 }
 0xbf5   : > { %13679 = vst [vmem:[#allocation145_spill] sm:$0xff] %v12126_v11  ;;  %v5293_v40 = vadd.f32 %v7828_v54, %v12117_v14  ;;  %v7922_v62 = vadd.f32 %v7921_v52, %v7920_v13  ;;  %v12136_v13 = vsel %vm5519_vm3, %v12120_v10, -inf }
 0xbf6   : > { %v7923_v22 = vpop.f32.mrf.mxu1  ;;  %v7830_v61 = vpop.f32.mrf.mxu0 }
 0xbf7   : > { %v12129_v30 = vadd.f32 %v7922_v62, %v5293_v40  ;;  %v7831_v47 = vadd.f32 %v7830_v61, %v7829_v12  ;;  %v12162_v12 = vsel %vm5519_vm3, %v12126_v11, -inf }
 0xbf8   : > { %v7924_v36 = vpop.f32.mrf.mxu1  ;;  %v7832_v21 = vpop.f32.mrf.mxu0 }
 0xbf9   : > { %v5298_v48 = vadd.f32 %v7831_v47, %v12117_v14  ;;  %v7925_v25 = vadd.f32 %v7924_v36, %v7923_v22 }
 0xbfa   : > { %v7926_v44 = vpop.f32.mrf.mxu1  ;;  %v7833_v39 = vpop.f32.mrf.mxu0 }
 0xbfb   : > { %v12132_v49 = vadd.f32 %v7925_v25, %v5298_v48  ;;  %v7834_v57 = vadd.f32 %v7833_v39, %v7832_v21  ;;  %v12149_v48 = vsel %vm5519_vm3, %v12123_v28, -inf }
 0xbfc   : > { %v7927_v60 = vpop.f32.mrf.mxu1  ;;  %v7835_v37 = vpop.f32.mrf.mxu0 }
 0xbfd   : > { %13680 = vst [vmem:[#allocation146_spill] sm:$0xff] %v12132_v49  ;;  %v12140_v61 = vsel %vm5519_vm3, %v12132_v49, -inf  ;;  %v5301_v54 = vadd.f32 %v7834_v57, %v12117_v14  ;;  %v7928_v52 = vadd.f32 %v7927_v60, %v7926_v44 }
 0xbfe   : > { %v7929_v40 = vpop.f32.mrf.mxu1  ;;  %v7836_v62 = vpop.f32.mrf.mxu0 }
 0xbff   : > { %v12145_v22 = vadd.f32 %v7928_v52, %v5301_v54  ;;  %v7837_v47 = vadd.f32 %v7836_v62, %v7835_v37 }
 0xc00   : > { %v7930_v36 = vpop.f32.mrf.mxu1  ;;  %v7838_v21 = vpop.f32.mrf.mxu0 }
 0xc01   : > { %13681 = vst [vmem:[#allocation147_spill] sm:$0xff] %v12145_v22  ;;  %v12153_v25 = vsel %vm5519_vm3, %v12145_v22, -inf  ;;  %v5306_v44 = vadd.f32 %v7837_v47, %v12117_v14  ;;  %v7931_v39 = vadd.f32 %v7930_v36, %v7929_v40 }
 0xc02   : > { %v7932_v60 = vpop.f32.mrf.mxu1  ;;  %v7839_v54 = vpop.f32.mrf.mxu0 }
 0xc03   : > { %v12158_v52 = vadd.f32 %v7931_v39, %v5306_v44  ;;  %v7840_v55 = vadd.f32 %v7839_v54, %v7838_v21 }
 0xc04   : > { %v7933_v37 = vpop.f32.mrf.mxu1  ;;  %v7841_v62 = vpop.f32.mrf.mxu0 }
 0xc05   : > { %13682 = vst [vmem:[#allocation148_spill] sm:$0xff] %v12158_v52  ;;  %v12166_v42 = vsel %vm5519_vm3, %v12158_v52, -inf  ;;  %v5309_v10 = vadd.f32 %v7840_v55, %v12117_v14  ;;  %v7934_v38 = vadd.f32 %v7933_v37, %v7932_v60 }
 0xc06   : > { %v7935_v47 = vpop.f32.mrf.mxu1  ;;  %v7842_v36 = vpop.f32.mrf.mxu0 }
 0xc07   : > { %v7843_v45 = vadd.f32 %v7842_v36, %v7841_v62 }
 0xc08   : > { %v7936_v57 = vpop.f32.mrf.mxu1  ;;  %v7844_v6 = vpop.f32.mrf.mxu0 }
 0xc09   : > { %v5314_v28 = vadd.f32 %v7843_v45, %v12117_v14  ;;  %v7937_v21 = vadd.f32 %v7936_v57, %v7935_v47 }
 0xc0a   : > { %v7938_v35 = vpop.f32.mrf.mxu1  ;;  %v7845_v44 = vpop.f32.mrf.mxu0 }
 0xc0b   : > { %v7846_v31 = vadd.f32 %v7845_v44, %v7844_v6 }
 0xc0c   : > { %v7939_v39 = vpop.f32.mrf.mxu1  ;;  %v7847_v46 = vpop.f32.mrf.mxu0 }
 0xc0d   : > { %v5317_v52 = vadd.f32 %v7846_v31, %v12117_v14  ;;  %v7940_v6 = vadd.f32 %v7939_v39, %v7938_v35 }
 0xc0e   : > { %v7941_v5 = vpop.f32.mrf.mxu1  ;;  %v7848_v19 = vpop.f32.mrf.mxu0 }
 0xc0f   : > { %v7849_v2 = vadd.f32 %v7848_v19, %v7847_v46  ;;  %v12210_v19 = vadd.f32 %v7934_v38, %v5309_v10  ;;  %v12212_v46 = vadd.f32 %v7937_v21, %v5314_v28 }
 0xc10   : > { %v7942_v3 = vpop.f32.mrf.mxu1  ;;  %v7850_v1 = vpop.f32.mrf.mxu0 }
 0xc11   : > { %v5322_v54 = vadd.f32 %v7849_v2, %v12117_v14  ;;  %v7943_v44 = vadd.f32 %v7942_v3, %v7941_v5  ;;  %v5530_v35 = vsel %vm5519_vm3, %v12210_v19, -inf  ;;  %v5532_v38 = vsel %vm5519_vm3, %v12212_v46, -inf }
 0xc12   : > { %v7944_v50 = vpop.f32.mrf.mxu1  ;;  %v7851_v32 = vpop.f32.mrf.mxu0 }
 0xc13   : > { %v7852_v11 = vadd.f32 %v7851_v32, %v7850_v1  ;;  %v12215_v1 = vadd.f32 %v7940_v6, %v5317_v52 }
 0xc14   : > { %v7945_v23 = vpop.f32.mrf.mxu1  ;;  %v12170_v9 = vpop.f32.mrf.mxu0 }
 0xc15   : > { %v5325_v55 = vadd.f32 %v7852_v11, %v12117_v14  ;;  %v7946_v31 = vadd.f32 %v7945_v23, %v7944_v50  ;;  %v5534_v11 = vsel %vm5519_vm3, %v12215_v1, -inf  ;;  %v5523_v23 = vsel %vm5519_vm3, %v12129_v30, -inf }
 0xc16   : > { %v12172_v20 = vpop.f32.mrf.mxu1  ;;  %v7854_v40 = vpop.f32.mrf.mxu0  ;;  %v5531_v39 = vmax.f32 %v5523_v23, %v5530_v35 }
 0xc17   : > { %v12223_v10 = vadd.f32 %v7946_v31, %v5325_v55  ;;  %v7855_v52 = vadd.f32 %v7854_v40, %v12170_v9  ;;  %v13685_v40 = vmax.f32 %v12149_v48, %v12153_v25 }
 0xc18   : > { %v12174_v15 = vpop.f32.mrf.mxu1  ;;  %v12176_v43 = vpop.f32.mrf.mxu0 }
 0xc1a   : > { %v12178_v8 = vpop.f32.mrf.mxu1  ;;  %v12180_v53 = vpop.f32.mrf.mxu0 }
 0xc1b   : > { %v7858_v21 = vadd.f32 %v12180_v53, %v12176_v43  ;;  %v5330_v53 = vadd.f32 %v7855_v52, %v12117_v14  ;;  %v7949_v43 = vadd.f32 %v12174_v15, %v12172_v20 }
 0xc1c   : > { %v12182_v58 = vpop.f32.mrf.mxu1  ;;  %v7859_v18 = vpop.f32.mrf.mxu0 }
 0xc1d   : > { %v5333_v31 = vadd.f32 %v7858_v21, %v12117_v14  ;;  %v7952_v35 = vadd.f32 %v12182_v58, %v12178_v8 }
 0xc1e   : > { %v12184_v17 = vpop.f32.mrf.mxu1  ;;  %v7860_v34 = vpop.f32.mrf.mxu0 }
 0xc1f   : > { %v7861_v2 = vadd.f32 %v7860_v34, %v7859_v18 }
 0xc20   : > { %v12186_v63 = vpop.f32.mrf.mxu1  ;;  %v7862_v26 = vpop.f32.mrf.mxu0 }
 0xc21   : > { %v5338_v9 = vadd.f32 %v7861_v2, %v12117_v14  ;;  %v7955_v48 = vadd.f32 %v12186_v63, %v12184_v17 }
 0xc22   : > { %v12188_v33 = vpop.f32.mrf.mxu1  ;;  %v7863_v29 = vpop.f32.mrf.mxu0 }
 0xc23   : > { %v7864_v3 = vadd.f32 %v7863_v29, %v7862_v26  ;;  %v13684_v29 = vmax.f32 %v12136_v13, %v12140_v61  ;;  %v13686_v61 = vmax.f32 %v12162_v12, %v12166_v42  ;;  %v12264_v2 = vadd.f32 %v7955_v48, %v5338_v9 }
 0xc24   : > { %v12190_v27 = vpop.f32.mrf.mxu1  ;;  %v7865_v59 = vpop.f32.mrf.mxu0 }
 0xc25   : > { %v12235_v26 = vmax.f32 %v13684_v29, %v5532_v38  ;;  %v7958_v25 = vadd.f32 %v12190_v27, %v12188_v33  ;;  %v5544_v8 = vsel %vm5519_vm3, %v12264_v2, -inf }
 0xc26   : > { %v12192_v51 = vpop.f32.mrf.mxu1  ;;  %v7866_v56 = vpop.f32.mrf.mxu0 }
 0xc28   : > { %v12194_v7 = vpop.f32.mrf.mxu1  ;;  %v12196_v41 = vpop.f32.mrf.mxu0 }
 0xc2a   : > { %v12202_v16 = vpop.f32.mrf.mxu1  ;;  %v7869_v4 = vpop.f32.mrf.mxu0 }
 0xc2c   : > { %v12204_v0 = vpop.f32.mrf.mxu1  ;;  %v7871_v24 = vpop.f32.mrf.mxu0 }
 0xc2d   : > { %13683 = vst [vmem:[#allocation149_spill] sm:$0xff] %v12204_v0  ;;  %v12217_v0 = vadd.f32 %v7943_v44, %v5322_v54  ;;  %v12243_v54 = vmax.f32 %v13685_v40, %v5534_v11  ;;  %v7961_v11 = vadd.f32 %v12194_v7, %v12192_v51 }
 0xc2e   : > { %v7965_v49 = vpop.f32.mrf.mxu1  ;;  %v7872_v22 = vpop.f32.mrf.mxu0 }
 0xc2f   : > { %v5536_v34 = vsel %vm5519_vm3, %v12217_v0, -inf  ;;  %v7873_v18 = vadd.f32 %v7872_v22, %v7871_v24  ;;  %v5538_v24 = vsel %vm5519_vm3, %v12223_v10, -inf  ;;  %v5341_v22 = vadd.f32 %v7864_v3, %v12117_v14 }
 0xc30   : > { %v7966_v62 = vpop.f32.mrf.mxu1  ;;  %v7874_v36 = vpop.f32.mrf.mxu0  ;;  %v12251_v44 = vmax.f32 %v13686_v61, %v5536_v34 }
 0xc31   : > { %v12266_v20 = vadd.f32 %v7958_v25, %v5341_v22  ;;  %v7967_v17 = vadd.f32 %v7966_v62, %v7965_v49 }
 0xc32   : > { %v7968_v45 = vpop.f32.mrf.mxu1  ;;  %v7875_v32 = vpop.f32.mrf.mxu0  ;;  %v5545_v48 = vmax.f32 %v12251_v44, %v5544_v8 }
 0xc33   : > { %v7876_v50 = vadd.f32 %v7875_v32, %v7874_v36  ;;  %v7867_v36 = vadd.f32 %v7866_v56, %v7865_v59  ;;  %v7870_v56 = vadd.f32 %v7869_v4, %v12196_v41  ;;  %v5354_v59 = vadd.f32 %v7873_v18, %v12117_v14 }
 0xc34   : > { %v7969_v57 = vpop.f32.mrf.mxu1  ;;  %v7877_v60 = vpop.f32.mrf.mxu0  ;;  %v5539_v32 = vmax.f32 %v5531_v39, %v5538_v24  ;;  %v12269_v41 = vadd.f32 %v7949_v43, %v5330_v53  ;;  %v5546_v51 = vsel %vm5519_vm3, %v12266_v20, -inf  ;;  %v13687_v34 = vld [vmem:[#allocation149_spill] sm:$0xff] }
 0xc35   : > { %v5357_v55 = vadd.f32 %v7876_v50, %v12117_v14  ;;  %v5346_v63 = vadd.f32 %v7867_v36, %v12117_v14  ;;  %v7970_v27 = vadd.f32 %v7969_v57, %v7968_v45  ;;  %v12280_v45 = vadd.f32 %v7952_v35, %v5333_v31 }
 0xc36   : > { %v7971_v5 = vpop.f32.mrf.mxu1  ;;  %v7878_v28 = vpop.f32.mrf.mxu0  ;;  %v7964_v18 = vadd.f32 %v13687_v34, %v12202_v16  ;;  %v5540_v40 = vsel %vm5519_vm3, %v12269_v41, -inf  ;;  %v5547_v25 = vmax.f32 %v5539_v32, %v5546_v51 }
 0xc37   : > { %v7879_v15 = vadd.f32 %v7878_v28, %v7877_v60  ;;  %v5349_v60 = vadd.f32 %v7870_v56, %v12117_v14  ;;  %v12276_v28 = vadd.f32 %v7967_v17, %v5354_v59  ;;  %v12278_v52 = vadd.f32 %v7970_v27, %v5357_v55 }
 0xc38   : > { %v7972_v37 = vpop.f32.mrf.mxu1  ;;  %v7880_v47 = vpop.f32.mrf.mxu0  ;;  %v12288_v7 = vadd.f32 %v7961_v11, %v5346_v63  ;;  %v5542_v43 = vsel %vm5519_vm3, %v12280_v45, -inf }
 0xc39   : > { %v5362_v57 = vadd.f32 %v7879_v15, %v12117_v14  ;;  %v7973_v39 = vadd.f32 %v7972_v37, %v7971_v5  ;;  %v12297_v24 = vadd.f32 %v7964_v18, %v5349_v60  ;;  %v5552_v22 = vsel %vm5519_vm3, %v12276_v28, -inf }
 0xc3a   : > { %v7974_v6 = vpop.f32.mrf.mxu1  ;;  %v7881_v13 = vpop.f32.mrf.mxu0  ;;  %v5554_v16 = vsel %vm5519_vm3, %v12278_v52, -inf  ;;  %v5548_v56 = vsel %vm5519_vm3, %v12288_v7, -inf  ;;  %v5541_v15 = vmax.f32 %v12235_v26, %v5540_v40  ;;  %v5553_v44 = vmax.f32 %v5545_v48, %v5552_v22 }
 0xc3b   : > { %v7882_v38 = vadd.f32 %v7881_v13, %v7880_v47  ;;  %v12303_v61 = vadd.f32 %v7973_v39, %v5362_v57  ;;  %v5550_v63 = vsel %vm5519_vm3, %v12297_v24, -inf  ;;  %v5555_v32 = vmax.f32 %v5547_v25, %v5554_v16 }
 0xc3c   : > { %v7975_v42 = vpop.f32.mrf.mxu1  ;;  %v7883_v12 = vpop.f32.mrf.mxu0  ;;  %v5549_v11 = vmax.f32 %v5541_v15, %v5548_v56  ;;  %v13690_v15 = vld [vmem:[#allocation146_spill] sm:$0xff] }
 0xc3d   : > { %v5365_v29 = vadd.f32 %v7882_v38, %v12117_v14  ;;  %v7976_v5 = vadd.f32 %v7975_v42, %v7974_v6 }
 0xc3e   : > { %v7977_v33 = vpop.f32.mrf.mxu1  ;;  %v7884_v4 = vpop.f32.mrf.mxu0 }
 0xc3f   : > { %v7885_v3 = vadd.f32 %v7884_v4, %v7883_v12  ;;  %v12311_v12 = vadd.f32 %v7976_v5, %v5365_v29 }
 0xc40   : > { %v7978_v49 = vpop.f32.mrf.mxu1  ;;  %v7886_v62 = vpop.f32.mrf.mxu0 }
 0xc41   : > { %v5370_v23 = vadd.f32 %v7885_v3, %v12117_v14  ;;  %v7979_v58 = vadd.f32 %v7978_v49, %v7977_v33  ;;  %v5556_v33 = vsel %vm5519_vm3, %v12303_v61, -inf  ;;  %v5543_v3 = vmax.f32 %v12243_v54, %v5542_v43 }
 0xc42   : > { %v7980_v50 = vpop.f32.mrf.mxu1  ;;  %v7887_v47 = vpop.f32.mrf.mxu0  ;;  %v5558_v57 = vsel %vm5519_vm3, %v12311_v12, -inf  ;;  %v5557_v8 = vmax.f32 %v5549_v11, %v5556_v33 }
 0xc43   : > { %v12293_v21 = vadd.f32 %v7979_v58, %v5370_v23  ;;  %v7888_v9 = vadd.f32 %v7887_v47, %v7886_v62  ;;  %v5551_v58 = vmax.f32 %v5543_v3, %v5550_v63 }
 0xc44   : > { %v7981_v36 = vpop.f32.mrf.mxu1  ;;  %v7889_v13 = vpop.f32.mrf.mxu0 }
 0xc45   : > { %v5373_v37 = vadd.f32 %v7888_v9, %v12117_v14  ;;  %v7982_v53 = vadd.f32 %v7981_v36, %v7980_v50  ;;  %v5560_v31 = vsel %vm5519_vm3, %v12293_v21, -inf  ;;  %v5559_v18 = vmax.f32 %v5551_v58, %v5558_v57 }
 0xc46   : > { %v7983_v59 = vpop.f32.mrf.mxu1  ;;  %v7890_v55 = vpop.f32.mrf.mxu0  ;;  %v5561_v26 = vmax.f32 %v5553_v44, %v5560_v31 }
 0xc47   : > { %v12315_v6 = vadd.f32 %v7982_v53, %v5373_v37  ;;  %v7891_v42 = vadd.f32 %v7890_v55, %v7889_v13 }
 0xc48   : > { %v7984_v17 = vpop.f32.mrf.mxu1  ;;  %v7892_v27 = vpop.f32.mrf.mxu0 }
 0xc49   : > { %v5562_v4 = vsel %vm5519_vm3, %v12315_v6, -inf  ;;  %v5378_v35 = vadd.f32 %v7891_v42, %v12117_v14  ;;  %v7985_v38 = vadd.f32 %v7984_v17, %v7983_v59 }
 0xc4a   : > { %v5563_v60 = vmax.f32 %v5555_v32, %v5562_v4  ;;  %v7986_v49 = vpop.f32.mrf.mxu1  ;;  %v7893_v62 = vpop.f32.mrf.mxu0  ;;  %v13692_v32 = vld [vmem:[#allocation144_spill] sm:$0xff]  ;;  %v13693_v4 = vld [vmem:[#allocation143_spill] sm:$0xff] }
 0xc4b   : > { %v12328_v23 = vadd.f32 %v7985_v38, %v5378_v35 }
 0xc4c   : > { %v5568_v51 = vmax.f32 %v5561_v26, %v5563_v60  ;;  %v7987_v34 = vpop.f32.mrf.mxu1 }
 0xc4d   : > { %v5565_v14 = vsel %vm5564_vm5, %v12328_v23, -inf }
 0xc4e   : > { %v5566_v50 = vmax.f32 %v5557_v8, %v5565_v14 }
 0xc50   : > { %v5567_v54 = vmax.f32 %v5566_v50, %v5559_v18 }
 0xc52   : > { %v5569_v47 = vmax.f32 %v5567_v54, %v5568_v51 }
 0xc54   : > { %v5570_v39 = vrot.slane %v5569_v47, 4 }
 0xc56   : > { %v5571_v29 = vmax.f32 %v5569_v47, %v5570_v39 }
 0xc58   : > { %v5572_v9 = vrot.slane %v5571_v29, 2 }
 0xc5a   : > { %v5573_v40 = vmax.f32 %v5571_v29, %v5572_v9 }
 0xc5c   : > { %v5574_v22 = vrot.slane %v5573_v40, 1 }
 0xc5e   : > { %v12332_v16 = vmax.f32 %v5573_v40, %v5574_v22 }
 0xc60   : > { %v5590_v36 = vsub.f32 %v12264_v2, %v12332_v16  ;;  %v5588_v13 = vsub.f32 %v12269_v41, %v12332_v16  ;;  %v5591_v5 = vsub.f32 %v12266_v20, %v12332_v16  ;;  %v5589_v37 = vsub.f32 %v12280_v45, %v12332_v16 }
 0xc61   : > { %v5587_v53 = vsub.f32 %v12223_v10, %v12332_v16  ;;  %v5586_v43 = vsub.f32 %v12217_v0, %v12332_v16  ;;  %v5585_v2 = vsub.f32 %v12215_v1, %v12332_v16  ;;  %v5584_v20 = vsub.f32 %v12212_v46, %v12332_v16  ;;  %v13688_v10 = vld [vmem:[#allocation148_spill] sm:$0xff]  ;;  %v13689_v0 = vld [vmem:[#allocation147_spill] sm:$0xff]  ;;  %v13691_v46 = vld [vmem:[#allocation145_spill] sm:$0xff] }
 0xc62   : > { %v5629_v48 = vmul.f32 1.442695, %v5590_v36  ;;  %v5625_v25 = vmul.f32 1.442695, %v5588_v13  ;;  %v5631_v56 = vmul.f32 1.442695, %v5591_v5  ;;  %v5583_v45 = vsub.f32 %v12210_v19, %v12332_v16 }
 0xc63   : > { %v5627_v59 = vmul.f32 1.442695, %v5589_v37  ;;  %v5623_v41 = vmul.f32 1.442695, %v5587_v53  ;;  %v5621_v55 = vmul.f32 1.442695, %v5586_v43  ;;  %v5582_v31 = vsub.f32 %v13688_v10, %v12332_v16 }
 0xc64   : > { %9226 = vpow2.f32 %v5629_v48  ;;  %v5581_v42 = vsub.f32 %v13689_v0, %v12332_v16  ;;  %v5580_v1 = vsub.f32 %v13690_v15, %v12332_v16  ;;  %v5579_v63 = vsub.f32 %v12129_v30, %v12332_v16 }
 0xc65   : > { %9228 = vpow2.f32 %v5625_v25  ;;  %v5578_v44 = vsub.f32 %v13691_v46, %v12332_v16  ;;  %v5619_v19 = vmul.f32 1.442695, %v5585_v2  ;;  %v5577_v17 = vsub.f32 %v13692_v32, %v12332_v16 }
 0xc66   : > { %9230 = vpow2.f32 %v5631_v56  ;;  %v5617_v27 = vmul.f32 1.442695, %v5584_v20  ;;  %v5615_v33 = vmul.f32 1.442695, %v5583_v45  ;;  %v5576_v35 = vsub.f32 %v13693_v4, %v12332_v16 }
 0xc67   : > { %9232 = vpow2.f32 %v5627_v59  ;;  %v5613_v38 = vmul.f32 1.442695, %v5582_v31  ;;  %v5611_v3 = vmul.f32 1.442695, %v5581_v42  ;;  %v5609_v30 = vmul.f32 1.442695, %v5580_v1 }
 0xc68   : > { %9234 = vpow2.f32 %v5623_v41  ;;  %v5607_v11 = vmul.f32 1.442695, %v5579_v63  ;;  %v5592_v26 = vsub.f32 %v12288_v7, %v12332_v16  ;;  %v5595_v60 = vsub.f32 %v12278_v52, %v12332_v16 }
 0xc69   : > { %9236 = vpow2.f32 %v5621_v55  ;;  %v5605_v49 = vmul.f32 1.442695, %v5578_v44  ;;  %v5593_v62 = vsub.f32 %v12297_v24, %v12332_v16  ;;  %v5603_v57 = vmul.f32 1.442695, %v5577_v17 }
 0xc6a   : > { %9238 = vpow2.f32 %v5619_v19  ;;  %v5601_v58 = vmul.f32 1.442695, %v5576_v35  ;;  %v5594_v8 = vsub.f32 %v12276_v28, %v12332_v16  ;;  %v5633_v50 = vmul.f32 1.442695, %v5592_v26  ;;  %v9548_v26 = vld [vmem:[%s13204_s13 + $0x4c] ss:$16 sps:$4 sm:$0xff]  }
 0xc6b   : > { %9240 = vpow2.f32 %v5617_v27  ;;  %v5639_v47 = vmul.f32 1.442695, %v5595_v60  ;;  %v13694_v28 = vmov 0   ;;  %v5635_v29 = vmul.f32 1.442695, %v5593_v62 }
 0xc6c   : > { %9242 = vpow2.f32 %v5615_v33  ;;  %v5637_v18 = vmul.f32 1.442695, %v5594_v8  ;;  %v5600_v36 = vsub.f32 %v12328_v23, %v12332_v16  ;;  %v5598_v2 = vsub.f32 %v12293_v21, %v12332_v16  ;;  %v9549_v60 = vld [vmem:[%s13204_s13 + $0x48] ss:$16 sps:$4 sm:$0xff]  }
 0xc6d   : > { %9244 = vpow2.f32 %v5613_v38  ;;  %v5599_v55 = vsub.f32 %v12315_v6, %v12332_v16  ;;  %v5596_v0 = vsub.f32 %v12303_v61, %v12332_v16  ;;  %v5597_v42 = vsub.f32 %v12311_v12, %v12332_v16  ;;  %v9551_v62 = vld [vmem:[%s13204_s13 + $0x28] ss:$16 sps:$4 sm:$0xff]  }
 0xc6e   : > { %9246 = vpow2.f32 %v5611_v3  ;;  %v5649_v25 = vmul.f32 1.442695, %v5600_v36  ;;  %v5645_v31 = vmul.f32 1.442695, %v5598_v2  ;;  %v9546_v3 = vld [vmem:[%s13204_s13 + $0x6c] ss:$16 sps:$4 sm:$0xff]  }
 0xc6f   : > { %9248 = vpow2.f32 %v5609_v30  ;;  %v5647_v21 = vmul.f32 1.442695, %v5599_v55  ;;  %v5641_v1 = vmul.f32 1.442695, %v5596_v0  ;;  %v5643_v46 = vmul.f32 1.442695, %v5597_v42 }
 0xc70   : > { %9250 = vpow2.f32 %v5607_v11  ;;  %v13695_v30 = vmov 1065369472   ;;  %v9547_v11 = vld [vmem:[%s13204_s13 + $0x68] ss:$16 sps:$4 sm:$0xff]  }
 0xc71   : > { %v9227_v51 = vpop.eup %9226  ;;  %9252 = vpow2.f32 %v5605_v49  ;;  %v9550_v49 = vld [vmem:[%s13204_s13 + $0x2c] ss:$16 sps:$4 sm:$0xff]  }
 0xc72   : > { %v9229_v34 = vpop.eup %9228  ;;  %5723 = vperm.xlu0 %8682, %v9227_v51   ;;  %9254 = vpow2.f32 %v5603_v57  ;;  %v9552_v57 = vld [vmem:[%s13204_s13 + $0xc] ss:$16 sps:$4 sm:$0xff]  }
 0xc73   : > { %v9231_v7 = vpop.eup %9230  ;;  %5713 = vperm.xlu1 %8683, %v9229_v34   ;;  %9256 = vpow2.f32 %v5601_v58  ;;  %v9553_v58 = vld [vmem:[%s13204_s13 + $0x8] ss:$16 sps:$4 sm:$0xff]  }
 0xc74   : > { %v9233_v52 = vpop.eup %9232  ;;  %v5869_v14 = vpack.c.bf16 %v9231_v7, %v9227_v51  ;;  %9258 = vpow2.f32 %v5637_v18  ;;  %v9554_v8 = vld [vmem:[%s13206_s15 + $0xf8] sm:$0xff]  }
 0xc75   : > { %v9235_v24 = vpop.eup %9234  ;;  %v5868_v40 = vpack.c.bf16 %v9233_v52, %v9229_v34  ;;  %9260 = vpow2.f32 %v5633_v50  ;;  %v13697_v18 = vld [vmem:[#allocation31_spill] sm:$0xff] }
 0xc76   : > { %v9237_v54 = vpop.eup %9236  ;;  %5879 = vmatpush1.bf16.msra.mxu1 %v5869_v14  ;;  %5728 = vperm.xlu0 %8682, %v9231_v7   ;;  %9262 = vpow2.f32 %v5639_v47  ;;  %v13698_v47 = vld [vmem:[#allocation29_spill] sm:$0xff]  ;;  %v13704_v55 = vld [vmem:[#allocation23_spill] sm:$0xff] }
 0xc77   : > { %v9239_v39 = vpop.eup %9238  ;;  %5718 = vperm.xlu1 %8683, %v9233_v52   ;;  %5880 = vmatprep.subr.bf16.mxu1 %v13694_v28  ;;  %9264 = vpow2.f32 %v5635_v29  ;;  %v5867_v43 = vpack.c.bf16 %v9235_v24, %v9237_v54  ;;  %v13696_v52 = vld [vmem:[#allocation32_spill] sm:$0xff] }
 0xc78   : > { %v9241_v9 = vpop.eup %9240  ;;  %9266 = vpow2.f32 %v5649_v25 }
 0xc79   : > { %v9243_v22 = vpop.eup %9242  ;;  %v5866_v45 = vpack.c.bf16 %v9239_v39, %v9241_v9  ;;  %9268 = vpow2.f32 %v5645_v31  ;;  %v13705_v31 = vld [vmem:[#allocation24_spill] sm:$0xff] }
 0xc7a   : > { %v9245_v13 = vpop.eup %9244  ;;  %5881 = vmatpush1.bf16.msra.mxu1 %v5868_v40  ;;  %5703 = vperm.xlu0 %8682, %v9237_v54   ;;  %9270 = vpow2.f32 %v5647_v21 }
 0xc7b   : > { %v9247_v5 = vpop.eup %9246  ;;  %5708 = vperm.xlu1 %8683, %v9235_v24   ;;  %5882 = vmatprep.subr.bf16.mxu1 %v13694_v28  ;;  %v5865_v37 = vpack.c.bf16 %v9243_v22, %v9245_v13  ;;  %9272 = vpow2.f32 %v5641_v1  ;;  %v13706_v1 = vld [vmem:[#allocation21_spill] sm:$0xff] }
 0xc7c   : > { %v9249_v53 = vpop.eup %9248  ;;  %9274 = vpow2.f32 %v5643_v46 }
 0xc7d   : > { %v9251_v48 = vpop.eup %9250  ;;  %v5864_v56 = vpack.c.bf16 %v9247_v5, %v9249_v53 }
 0xc7e   : > { %v9253_v23 = vpop.eup %9252  ;;  %5883 = vmatpush1.bf16.msra.mxu1 %v5867_v43  ;;  %5693 = vperm.xlu0 %8682, %v9241_v9   ;;  %v13699_v9 = vld [vmem:[#allocation30_spill] sm:$0xff] }
 0xc7f   : > { %v9255_v59 = vpop.eup %9254  ;;  %5698 = vperm.xlu1 %8683, %v9239_v39   ;;  %5884 = vmatprep.subr.bf16.mxu1 %v13694_v28  ;;  %v5863_v41 = vpack.c.bf16 %v9251_v48, %v9253_v23 }
 0xc80   : > { %v9257_v20 = vpop.eup %9256 }
 0xc81   : > { %v5862_v10 = vpack.c.bf16 %v9255_v59, %v9257_v20  ;;  %v9259_v15 = vpop.eup %9258 }
 0xc82   : > { %5885 = vmatpush1.bf16.msra.mxu1 %v5866_v45  ;;  %5683 = vperm.xlu0 %8682, %v9245_v13   ;;  %v9261_v63 = vpop.eup %9260  ;;  %v13700_v13 = vld [vmem:[#allocation27_spill] sm:$0xff] }
 0xc83   : > { %5688 = vperm.xlu1 %8683, %v9243_v22   ;;  %5886 = vmatprep.subr.bf16.mxu1 %v13694_v28  ;;  %v9263_v6 = vpop.eup %9262 }
 0xc84   : > { %v9265_v61 = vpop.eup %9264  ;;  %v5871_v44 = vpack.c.bf16 %v9263_v6, %v9259_v15 }
 0xc85   : > { %v5870_v19 = vpack.c.bf16 %v9265_v61, %v9261_v63  ;;  %v9267_v12 = vpop.eup %9266 }
 0xc86   : > { %5887 = vmatpush1.bf16.msra.mxu1 %v5865_v37  ;;  %5673 = vperm.xlu0 %8682, %v9249_v53   ;;  %v5874_v16 = vpack.c.bf16 %v9267_v12, %v9267_v12  ;;  %v9269_v32 = vpop.eup %9268  ;;  %v13701_v37 = vld [vmem:[#allocation28_spill] sm:$0xff] }
 0xc87   : > { %5678 = vperm.xlu1 %8683, %v9247_v5   ;;  %5888 = vmatprep.subr.bf16.mxu1 %v13694_v28  ;;  %v9271_v17 = vpop.eup %9270 }
 0xc88   : > { %v5876_v27 = vsel %vm5818_vm6, %v5874_v16, 0  ;;  %v9273_v33 = vpop.eup %9272  ;;  %v5873_v4 = vpack.c.bf16 %v9271_v17, %v9269_v32 }
 0xc89   : > { %v9275_v35 = vpop.eup %9274 }
 0xc8a   : > { %5889 = vmatpush1.bf16.msra.mxu1 %v5864_v56  ;;  %5663 = vperm.xlu0 %8682, %v9253_v23   ;;  %v5872_v38 = vpack.c.bf16 %v9275_v35, %v9273_v33  ;;  %v13702_v56 = vld [vmem:[#allocation25_spill] sm:$0xff]  ;;  %v13703_v23 = vld [vmem:[#allocation26_spill] sm:$0xff] }
 0xc8b   : > { %5668 = vperm.xlu1 %8683, %v9251_v48   ;;  %5890 = vmatprep.subr.bf16.mxu1 %v13694_v28 }
 0xc8e   : > { %5891 = vmatpush1.bf16.msra.mxu1 %v5863_v41  ;;  %5653 = vperm.xlu0 %8682, %v9257_v20  }
 0xc8f   : > { %5658 = vperm.xlu1 %8683, %v9255_v59   ;;  %5892 = vmatprep.subr.bf16.mxu1 %v13694_v28 }
 0xc92   : > { %5893 = vmatpush1.bf16.msra.mxu1 %v5862_v10  ;;  %5773 = vperm.xlu0 %8682, %v9267_v12   ;;  %v13708_v12 = vld [vmem:[#allocation19_spill] sm:$0xff] }
 0xc93   : > { %5763 = vperm.xlu1 %8683, %v9269_v32   ;;  %5900 = vmatprep.subr.bf16.mxu1 %v13694_v28  ;;  %v13709_v32 = vld [vmem:[#allocation20_spill] sm:$0xff] }
 0xc96   : > { %5901 = vmatpush2.bf16.msra.mxu1 %v5876_v27  ;;  %5768 = vperm.xlu0 %8682, %v9271_v17  }
 0xc97   : > { %5753 = vperm.xlu1 %8683, %v9273_v33   ;;  %5902 = vmatprep.subr.bf16.mxu1 %v13694_v28 }
 0xc9a   : > { %5903 = vmatpush2.bf16.msra.mxu1 %v5873_v4  ;;  %5758 = vperm.xlu0 %8682, %v9275_v35   ;;  %v13710_v35 = vld [vmem:[#allocation17_spill] sm:$0xff] }
 0xc9b   : > { %5743 = vperm.xlu1 %8683, %v9259_v15   ;;  %5904 = vmatprep.subr.bf16.mxu1 %v13694_v28 }
 0xc9e   : > { %5905 = vmatpush2.bf16.msra.mxu1 %v5872_v38  ;;  %5748 = vperm.xlu0 %8682, %v9263_v6   ;;  %v13707_v6 = vld [vmem:[#allocation22_spill] sm:$0xff] }
 0xc9f   : > { %5733 = vperm.xlu1 %8683, %v9261_v63   ;;  %5906 = vmatprep.subr.bf16.mxu1 %v13694_v28 }
 0xca2   : > { %5907 = vmatpush2.bf16.msra.mxu1 %v5871_v44  ;;  %5738 = vperm.xlu0 %8682, %v9265_v61  }
 0xca3   : > { %5908 = vmatprep.subr.bf16.mxu1 %v13694_v28 }
 0xca6   : > { %5909 = vmatpush2.bf16.msra.mxu1 %v5870_v19 }
 0xca7   : > { %5979 = vmatprep.subr.bf16.mxu1 %v9546_v3  ;;  %v13711_v3 = vld [vmem:[#allocation18_spill] sm:$0xff] }
 0xca9   : > { %5911 = vmatmul.mubr.bf16.vlgmr.msra.gmra.mxu1 %v13695_v30 }
 0xcaa   : > { %5980 = vmatpush1.bf16.msra.mxu1 %v9547_v11  ;;  %6003 = vmatprep.mubr.bf16.mxu1 %v13694_v28 }
 0xcab   : > { %5981 = vmatprep.subr.bf16.mxu1 %v9548_v26 }
 0xcae   : > { %5982 = vmatpush1.bf16.msra.mxu1 %v9549_v60 }
 0xcaf   : > { %5983 = vmatprep.subr.bf16.mxu1 %v9550_v49  ;;  %v13712_v49 = vld [vmem:[#allocation40_spill] sm:$0xff] }
 0xcb2   : > { %5984 = vmatpush1.bf16.msra.mxu1 %v9551_v62 }
 0xcb3   : > { %5985 = vmatprep.subr.bf16.mxu1 %v9552_v57 }
 0xcb6   : > { %5986 = vmatpush1.bf16.msra.mxu1 %v9553_v58 }
 0xcb7   : > { %8083 = vmatprep.subr.bf16.mxu1 %v9554_v8 }
 0xced   : > { %v5724_v51 = vpop.permute.xlu0 %5723 }
 0xcee   : > { %v5714_v34 = vpop.permute.xlu1 %5713  ;;  %v5790_v14 = vmul.f32 %v13696_v52, %v5724_v51 }
 0xcef   : > { %v5788_v40 = vmul.f32 %v13699_v9, %v5714_v34  ;;  %v13713_v34 = vld [vmem:[#allocation16_spill] sm:$0xff] }
 0xcf1   : > { %v5729_v7 = vpop.permute.xlu0 %5728 }
 0xcf2   : > { %v5791_v24 = vmul.f32 %v13697_v18, %v5729_v7  ;;  %v5719_v50 = vpop.permute.xlu1 %5718 }
 0xcf3   : > { %v5789_v39 = vmul.f32 %v13698_v47, %v5719_v50  ;;  %v13714_v50 = vld [vmem:[#allocation39_spill] sm:$0xff] }
 0xcf4   : > { %v5808_v54 = vpack.c.bf16 %v5791_v24, %v5790_v14 }
 0xcf5   : > { %v5704_v29 = vpop.permute.xlu0 %5703  ;;  %v5807_v36 = vpack.c.bf16 %v5789_v39, %v5788_v40 }
 0xcf6   : > { %v5709_v22 = vpop.permute.xlu1 %5708  ;;  %5823 = vmatpush1.bf16.msra.mxu0 %v5808_v54  ;;  %v5786_v53 = vmul.f32 %v13701_v37, %v5704_v29  ;;  %v13715_v29 = vld [vmem:[#allocation37_spill] sm:$0xff] }
 0xcf7   : > { %5824 = vmatprep.subr.bf16.mxu0 %v13694_v28  ;;  %v5787_v5 = vmul.f32 %v13700_v13, %v5709_v22 }
 0xcf9   : > { %v5694_v43 = vpop.permute.xlu0 %5693  ;;  %v5806_v25 = vpack.c.bf16 %v5787_v5, %v5786_v53  ;;  %v13716_v5 = vld [vmem:[#allocation38_spill] sm:$0xff] }
 0xcfa   : > { %v5699_v48 = vpop.permute.xlu1 %5698  ;;  %5825 = vmatpush1.bf16.msra.mxu0 %v5807_v36  ;;  %v5784_v59 = vmul.f32 %v13703_v23, %v5694_v43 }
 0xcfb   : > { %5826 = vmatprep.subr.bf16.mxu0 %v13694_v28  ;;  %v5785_v2 = vmul.f32 %v13702_v56, %v5699_v48  ;;  %v13717_v48 = vld [vmem:[#allocation35_spill] sm:$0xff] }
 0xcfd   : > { %v5684_v41 = vpop.permute.xlu0 %5683  ;;  %v5805_v45 = vpack.c.bf16 %v5785_v2, %v5784_v59  ;;  %v13718_v59 = vld [vmem:[#allocation36_spill] sm:$0xff] }
 0xcfe   : > { %v5689_v20 = vpop.permute.xlu1 %5688  ;;  %5827 = vmatpush1.bf16.msra.mxu0 %v5806_v25  ;;  %v5782_v0 = vmul.f32 %v13705_v31, %v5684_v41 }
 0xcff   : > { %5828 = vmatprep.subr.bf16.mxu0 %v13694_v28  ;;  %v5783_v10 = vmul.f32 %v13704_v55, %v5689_v20 }
 0xd01   : > { %v5674_v21 = vpop.permute.xlu0 %5673  ;;  %v5804_v15 = vpack.c.bf16 %v5783_v10, %v5782_v0  ;;  %v13719_v10 = vld [vmem:[#allocation33_spill] sm:$0xff] }
 0xd02   : > { %v5679_v42 = vpop.permute.xlu1 %5678  ;;  %5829 = vmatpush1.bf16.msra.mxu0 %v5805_v45  ;;  %v5780_v61 = vmul.f32 %v13707_v6, %v5674_v21  ;;  %v13720_v21 = vld [vmem:[#allocation34_spill] sm:$0xff] }
 0xd03   : > { %5830 = vmatprep.subr.bf16.mxu0 %v13694_v28  ;;  %v5781_v63 = vmul.f32 %v13706_v1, %v5679_v42 }
 0xd05   : > { %v5664_v46 = vpop.permute.xlu0 %5663  ;;  %v5803_v19 = vpack.c.bf16 %v5781_v63, %v5780_v61  ;;  %v9555_v63 = vld [vmem:[%s13204_s13 + $0x64] ss:$16 sps:$4 sm:$0xff]   ;;  %v9556_v61 = vld [vmem:[%s13204_s13 + $0x60] ss:$16 sps:$4 sm:$0xff]  }
 0xd06   : > { %v5669_v44 = vpop.permute.xlu1 %5668  ;;  %5831 = vmatpush1.bf16.msra.mxu0 %v5804_v15  ;;  %v5778_v17 = vmul.f32 %v13709_v32, %v5664_v46  ;;  %v9557_v46 = vld [vmem:[%s13204_s13 + $0x44] ss:$16 sps:$4 sm:$0xff]  }
 0xd07   : > { %5832 = vmatprep.subr.bf16.mxu0 %v13694_v28  ;;  %v5779_v16 = vmul.f32 %v13708_v12, %v5669_v44  ;;  %v9558_v44 = vld [vmem:[%s13204_s13 + $0x40] ss:$16 sps:$4 sm:$0xff]  }
 0xd09   : > { %v5654_v27 = vpop.permute.xlu0 %5653  ;;  %v5802_v4 = vpack.c.bf16 %v5779_v16, %v5778_v17  ;;  %v9560_v16 = vld [vmem:[%s13204_s13 + $0x20] ss:$16 sps:$4 sm:$0xff]   ;;  %v9561_v17 = vld [vmem:[%s13204_s13 + $0x4] ss:$16 sps:$4 sm:$0xff]  }
 0xd0a   : > { %v5659_v33 = vpop.permute.xlu1 %5658  ;;  %5833 = vmatpush1.bf16.msra.mxu0 %v5803_v19  ;;  %v5776_v11 = vmul.f32 %v13711_v3, %v5654_v27  ;;  %v9559_v19 = vld [vmem:[%s13204_s13 + $0x24] ss:$16 sps:$4 sm:$0xff]   ;;  %v9562_v27 = vld [vmem:[%s13204_s13] ss:$16 sps:$4 sm:$0xff]  }
 0xd0b   : > { %5834 = vmatprep.subr.bf16.mxu0 %v13694_v28  ;;  %v5777_v38 = vmul.f32 %v13710_v35, %v5659_v33  ;;  %v9563_v33 = vld [vmem:[%s13206_s15 + $0x78] sm:$0xff]  }
 0xd0d   : > { %v5774_v26 = vpop.permute.xlu0 %5773  ;;  %v5801_v57 = vpack.c.bf16 %v5777_v38, %v5776_v11 }
 0xd0e   : > { %v5764_v60 = vpop.permute.xlu1 %5763  ;;  %v5800_v62 = vmul.f32 %v13712_v49, %v5774_v26  ;;  %5835 = vmatpush1.bf16.msra.mxu0 %v5802_v4 }
 0xd0f   : > { %5836 = vmatprep.subr.bf16.mxu0 %v13694_v28  ;;  %v5798_v54 = vmul.f32 %v13714_v50, %v5764_v60 }
 0xd10   : > { %v5813_v58 = vpack.c.bf16 %v5800_v62, %v5800_v62 }
 0xd11   : > { %v5769_v8 = vpop.permute.xlu0 %5768 }
 0xd12   : > { %5837 = vmatpush1.bf16.msra.mxu0 %v5801_v57  ;;  %v5754_v51 = vpop.permute.xlu1 %5753  ;;  %v5799_v7 = vmul.f32 %v13713_v34, %v5769_v8  ;;  %v5820_v14 = vsel %vm5818_vm6, %v5813_v58, 0 }
 0xd13   : > { %5844 = vmatprep.subr.bf16.mxu0 %v13694_v28  ;;  %v5796_v53 = vmul.f32 %v13716_v5, %v5754_v51 }
 0xd14   : > { %v5812_v39 = vpack.c.bf16 %v5799_v7, %v5798_v54 }
 0xd15   : > { %v5759_v24 = vpop.permute.xlu0 %5758 }
 0xd16   : > { %5845 = vmatpush2.bf16.msra.mxu0 %v5820_v14  ;;  %v5797_v40 = vmul.f32 %v13715_v29, %v5759_v24  ;;  %v5744_v22 = vpop.permute.xlu1 %5743  ;;  %v13721_v14 = vld [vmem:[#allocation41_spill] sm:$0xff] }
 0xd17   : > { %5846 = vmatprep.subr.bf16.mxu0 %v13694_v28  ;;  %v5794_v41 = vmul.f32 %v13718_v59, %v5744_v22  ;;  %v9566_v22 = vld [vmem:[%s13206_s15 + $0x70] sm:$0xff]  }
 0xd18   : > { %v5811_v43 = vpack.c.bf16 %v5797_v40, %v5796_v53  ;;  %v9565_v40 = vld [vmem:[%s13206_s15 + $0xb8] sm:$0xff]   ;;  %v9568_v53 = vld [vmem:[%s13206_s15 + $0x30] sm:$0xff]  }
 0xd19   : > { %v5749_v36 = vpop.permute.xlu0 %5748 }
 0xd1a   : > { %5847 = vmatpush2.bf16.msra.mxu0 %v5812_v39  ;;  %v5795_v25 = vmul.f32 %v13717_v48, %v5749_v36  ;;  %v5734_v20 = vpop.permute.xlu1 %5733  ;;  %v9564_v39 = vld [vmem:[%s13206_s15 + $0x38] sm:$0xff]   ;;  %v9567_v36 = vld [vmem:[%s13206_s15 + $0xf0] sm:$0xff]  }
 0xd1b   : > { %5848 = vmatprep.subr.bf16.mxu0 %v13694_v28  ;;  %v5792_v42 = vmul.f32 %v13720_v21, %v5734_v20  ;;  %v9573_v20 = vld [vmem:[%s13206_s15 + $0xa8] sm:$0xff]  }
 0xd1c   : > { %v5810_v45 = vpack.c.bf16 %v5795_v25, %v5794_v41  ;;  %v9570_v25 = vld [vmem:[%s13206_s15 + $0x68] sm:$0xff]  }
 0xd1d   : > { %v5739_v2 = vpop.permute.xlu0 %5738  ;;  %v9572_v41 = vld [vmem:[%s13206_s15 + $0x28] sm:$0xff]  }
 0xd1e   : > { %5849 = vmatpush2.bf16.msra.mxu0 %v5811_v43  ;;  %v5793_v0 = vmul.f32 %v13719_v10, %v5739_v2  ;;  %v9569_v43 = vld [vmem:[%s13206_s15 + $0xb0] sm:$0xff]   ;;  %v9571_v2 = vld [vmem:[%s13206_s15 + $0xe8] sm:$0xff]  }
 0xd1f   : > { %5850 = vmatprep.subr.bf16.mxu0 %v13694_v28 }
 0xd20   : > { %v5809_v15 = vpack.c.bf16 %v5793_v0, %v5792_v42  ;;  %v9575_v0 = vld [vmem:[%s13206_s15 + $0xe0] sm:$0xff]  }
 0xd21   : > { %v9576_v42 = vld [vmem:[%s13206_s15 + $0x20] sm:$0xff]  }
 0xd22   : > { %5851 = vmatpush2.bf16.msra.mxu0 %v5810_v45  ;;  %v9574_v45 = vld [vmem:[%s13206_s15 + $0x60] sm:$0xff]  }
 0xd23   : > { %5852 = vmatprep.subr.bf16.mxu0 %v13694_v28 }
 0xd26   : > { %5853 = vmatpush2.bf16.msra.mxu0 %v5809_v15  ;;  %v9577_v15 = vld [vmem:[%s13206_s15 + $0xa0] sm:$0xff]  }
 0xd27   : > { %5938 = vmatprep.subr.bf16.mxu0 %v9555_v63  ;;  %v9578_v63 = vld [vmem:[%s13206_s15 + $0x58] sm:$0xff]  }
 0xd29   : > { %5855 = vmatmul.mubr.bf16.vlgmr.msra.gmra.mxu0 %v13695_v30 }
 0xd2a   : > { %5939 = vmatpush1.bf16.msra.mxu0 %v9556_v61  ;;  %5962 = vmatprep.mubr.bf16.mxu0 %v13694_v28  ;;  %v9579_v61 = vld [vmem:[%s13206_s15 + $0xd8] sm:$0xff]  }
 0xd2b   : > { %5940 = vmatprep.subr.bf16.mxu0 %v9557_v46  ;;  %v9580_v46 = vld [vmem:[%s13206_s15 + $0x18] sm:$0xff]  }
 0xd2e   : > { %5941 = vmatpush1.bf16.msra.mxu0 %v9558_v44  ;;  %v9581_v44 = vld [vmem:[%s13206_s15 + $0x98] sm:$0xff]  }
 0xd2f   : > { %5942 = vmatprep.subr.bf16.mxu0 %v9559_v19  ;;  %v9582_v19 = vld [vmem:[%s13206_s15 + $0x50] sm:$0xff]  }
 0xd32   : > { %5943 = vmatpush1.bf16.msra.mxu0 %v9560_v16  ;;  %v9583_v16 = vld [vmem:[%s13206_s15 + $0xd0] sm:$0xff]  }
 0xd33   : > { %5944 = vmatprep.subr.bf16.mxu0 %v9561_v17  ;;  %v9584_v17 = vld [vmem:[%s13206_s15 + $0x10] sm:$0xff]  }
 0xd36   : > { %5945 = vmatpush1.bf16.msra.mxu0 %v9562_v27  ;;  %v9585_v27 = vld [vmem:[%s13206_s15 + $0x90] sm:$0xff]  }
 0xd37   : > { %7989 = vmatprep.subr.bf16.mxu0 %v9563_v33  ;;  %v9586_v33 = vld [vmem:[%s13206_s15 + $0x48] sm:$0xff]  }
 0xd69   : > { %v5912_v4 = vpop.f32.mrf.mxu1 }
 0xd6a   : > { %5920 = vperm.xlu1 %8683, %v5912_v4   ;;  %v9587_v4 = vld [vmem:[%s13206_s15 + $0xc8] sm:$0xff]  }
 0xd6b   : > { %v5914_v38 = vpop.f32.mrf.mxu1 }
 0xd6c   : > { %v9588_v38 = vld [vmem:[%s13206_s15 + $0x8] sm:$0xff]  }
 0xd6d   : > { %v5915_v11 = vpop.f32.mrf.mxu1 }
 0xd6e   : > { %v9589_v11 = vld [vmem:[%s13206_s15 + $0x88] sm:$0xff]  }
 0xd6f   : > { %v5916_v26 = vpop.f32.mrf.mxu1 }
 0xd70   : > { %v9590_v26 = vld [vmem:[%s13206_s15 + $0x40] sm:$0xff]  }
 0xde5   : > { %v5921_v60 = vpop.permute.xlu1 %5920 }
 0xde6   : > { %9276 = vrcp.f32 %v5921_v60  ;;  %v9591_v60 = vld [vmem:[%s13206_s15 + $0xc0] sm:$0xff]  }
 0xde9   : > { %v5856_v62 = vpop.f32.mrf.mxu0 }
 0xdeb   : > { %v5858_v57 = vpop.f32.mrf.mxu0 }
 0xdec   : > { %v9593_v57 = vld [vmem:[%s13206_s15 + $0x80] sm:$0xff]  }
 0xded   : > { %v5859_v58 = vpop.f32.mrf.mxu0 }
 0xdef   : > { %v5860_v8 = vpop.f32.mrf.mxu0 }
 0xdf3   : > { %v9277_v51 = vpop.eup %9276 }
 0xdf4   : > { %v5924_v7 = vmul.f32 %v9277_v51, %v5856_v62  ;;  %v9592_v62 = vld [vmem:[%s13206_s15] sm:$0xff]  }
 0xdf5   : > { %v13723_v51 = vld [vmem:[#allocation99_spill] sm:$0xff] }
 0xdf6   : > { %v12494_v24 = vadd.f32 %v5924_v7, %v13721_v14  ;;  %v13724_v14 = vld [vmem:[#allocation15_spill] sm:$0xff] }
 0xdf8   : > { %13722 = vst [vmem:[#allocation149_spill] sm:$0xff] %v12494_v24  ;;  %v5926_v54 = vpack.c.bf16 %v12494_v24, %v12494_v24 }
 0xdfa   : > { %7419 = vmatmul.mubr.msk.bf16.vlgmr.msra.gmra.mxu0 %vm2126_vm2, %v5926_v54  ;;  %7420 = vmatmul.mubr.msk.bf16.vlgmr.msra.gmra.mxu1 %vm2126_vm2, %v5926_v54 }
 0xdfb   : > { %7990 = vmatpush3.bf16.msra.mxu0 %v9564_v39  ;;  %8084 = vmatpush3.bf16.msra.mxu1 %v9565_v40 }
 0xdfc   : > { %7991 = vmatprep.subr.bf16.mxu0 %v9566_v22  ;;  %8085 = vmatprep.subr.bf16.mxu1 %v9567_v36  ;;  %v13725_v22 = vld [vmem:[#allocation12_spill] sm:$0xff] }
 0xdff   : > { %7992 = vmatpush3.bf16.msra.mxu0 %v9568_v53  ;;  %8086 = vmatpush3.bf16.msra.mxu1 %v9569_v43  ;;  %v13726_v53 = vld [vmem:[#allocation13_spill] sm:$0xff] }
 0xe00   : > { %7993 = vmatprep.subr.bf16.mxu0 %v9570_v25  ;;  %8087 = vmatprep.subr.bf16.mxu1 %v9571_v2  ;;  %v13727_v25 = vld [vmem:[#allocation14_spill] sm:$0xff] }
 0xe03   : > { %7994 = vmatpush3.bf16.msra.mxu0 %v9572_v41  ;;  %8088 = vmatpush3.bf16.msra.mxu1 %v9573_v20 }
 0xe04   : > { %7995 = vmatprep.subr.bf16.mxu0 %v9574_v45  ;;  %8089 = vmatprep.subr.bf16.mxu1 %v9575_v0 }
 0xe07   : > { %7996 = vmatpush3.bf16.msra.mxu0 %v9576_v42  ;;  %8090 = vmatpush3.bf16.msra.mxu1 %v9577_v15  ;;  %v13728_v42 = vld [vmem:[#allocation100_spill] sm:$0xff] }
 0xe08   : > { %7997 = vmatprep.subr.bf16.mxu0 %v9578_v63  ;;  %8091 = vmatprep.subr.bf16.mxu1 %v9579_v61 }
 0xe0b   : > { %7998 = vmatpush3.bf16.msra.mxu0 %v9580_v46  ;;  %8092 = vmatpush3.bf16.msra.mxu1 %v9581_v44  ;;  %v13729_v44 = vld [vmem:[#allocation101_spill] sm:$0xff] }
 0xe0c   : > { %7999 = vmatprep.subr.bf16.mxu0 %v9582_v19  ;;  %8093 = vmatprep.subr.bf16.mxu1 %v9583_v16  ;;  %v13730_v16 = vld [vmem:[#allocation102_spill] sm:$0xff] }
 0xe0f   : > { %8000 = vmatpush3.bf16.msra.mxu0 %v9584_v17  ;;  %8094 = vmatpush3.bf16.msra.mxu1 %v9585_v27  ;;  %v13731_v27 = vld [vmem:[#allocation103_spill] sm:$0xff] }
 0xe10   : > { %8001 = vmatprep.subr.bf16.mxu0 %v9586_v33  ;;  %8095 = vmatprep.subr.bf16.mxu1 %v9587_v4  ;;  %v13732_v4 = vld [vmem:[#allocation104_spill] sm:$0xff] }
 0xe13   : > { %8002 = vmatpush3.bf16.msra.mxu0 %v9588_v38  ;;  %8096 = vmatpush3.bf16.msra.mxu1 %v9589_v11  ;;  %v13733_v11 = vld [vmem:[#allocation105_spill] sm:$0xff] }
 0xe14   : > { %8003 = vmatprep.subr.bf16.mxu0 %v9590_v26  ;;  %8097 = vmatprep.subr.bf16.mxu1 %v9591_v60  ;;  %v13734_v60 = vld [vmem:[#allocation106_spill] sm:$0xff] }
 0xe17   : > { %8004 = vmatpush3.bf16.msra.mxu0 %v9592_v62  ;;  %8098 = vmatpush3.bf16.msra.mxu1 %v9593_v57  ;;  %v13735_v57 = vld [vmem:[#allocation107_spill] sm:$0xff] }
 0xe18   : > { %6904 = vmatprep.subr.bf16.mxu1 %v13694_v28  ;;  %6848 = vmatprep.subr.bf16.mxu0 %v13694_v28 }
 0xeba   : > { %v5964_v58 = vpop.f32.mrf.mxu0  ;;  %v6005_v8 = vpop.f32.mrf.mxu1 }
 0xebb   : > { %v5965_v7 = vadd.f32 %v5964_v58, %v13723_v51  ;;  %v6006_v54 = vadd.f32 %v6005_v8, %v13724_v14  ;;  %v13736_v8 = vld [vmem:[#allocation108_spill] sm:$0xff] }
 0xebc   : > { %v5966_v39 = vpop.f32.mrf.mxu0  ;;  %v6007_v40 = vpop.f32.mrf.mxu1 }
 0xebd   : > { %v12595_v36 = vrot.slane %v5965_v7, %v13725_v22  ;;  %v5967_v43 = vadd.f32 %v5966_v39, %v13726_v53  ;;  %v6008_v2 = vadd.f32 %v6007_v40, %v13727_v25  ;;  %v12608_v63 = vrot.slane %v6006_v54, %v13725_v22  ;;  %v13737_v7 = vld [vmem:[#allocation109_spill] sm:$0xff]  ;;  %v13738_v54 = vld [vmem:[#allocation110_spill] sm:$0xff]  ;;  %v13739_v40 = vld [vmem:[#allocation111_spill] sm:$0xff] }
 0xebe   : > { %v5968_v41 = vpop.f32.mrf.mxu0  ;;  %v6009_v20 = vpop.f32.mrf.mxu1  ;;  %v13740_v53 = vld [vmem:[#allocation112_spill] sm:$0xff]  ;;  %v13741_v25 = vld [vmem:[#allocation113_spill] sm:$0xff] }
 0xebf   : > { %v12600_v45 = vrot.slane %v5967_v43, %v13725_v22  ;;  %v12603_v0 = vrot.slane %v6008_v2, %v13725_v22  ;;  %v6028_v15 = vadd.f32 %v12595_v36, %v13728_v42  ;;  %v6032_v26 = vadd.f32 %v12595_v36, %v13733_v11  ;;  %v13742_v41 = vld [vmem:[#allocation114_spill] sm:$0xff]  ;;  %v13743_v42 = vld [vmem:[#allocation115_spill] sm:$0xff] }
 0xec0   : > { %v5969_v61 = vpop.f32.mrf.mxu0  ;;  %v6010_v46 = vpop.f32.mrf.mxu1  ;;  %v6030_v62 = vadd.f32 %v12608_v63, %v13734_v60  ;;  %v6034_v58 = vadd.f32 %v12608_v63, %v13735_v57  ;;  %v6036_v43 = vadd.f32 %v12595_v36, %v13740_v53  ;;  %v6040_v2 = vadd.f32 %v12595_v36, %v13741_v25  ;;  %v13751_v53 = vld [vmem:[#allocation123_spill] sm:$0xff] }
 0xec1   : > { %v6029_v19 = vadd.f32 %v12600_v45, %v13729_v44  ;;  %v6033_v17 = vadd.f32 %v12600_v45, %v13730_v16  ;;  %v6031_v33 = vadd.f32 %v12603_v0, %v13731_v27  ;;  %v6035_v38 = vadd.f32 %v12603_v0, %v13732_v4  ;;  %v13744_v61 = vld [vmem:[#allocation116_spill] sm:$0xff]  ;;  %v13746_v27 = vld [vmem:[#allocation118_spill] sm:$0xff] }
 0xec2   : > { %9278 = vtanh.f32 %v6028_v15  ;;  %v6037_v51 = vadd.f32 %v12600_v45, %v13736_v8  ;;  %v6041_v14 = vadd.f32 %v12600_v45, %v13737_v7  ;;  %v6039_v39 = vadd.f32 %v12603_v0, %v13738_v54  ;;  %v13749_v8 = vld [vmem:[#allocation121_spill] sm:$0xff]  ;;  %v13750_v54 = vld [vmem:[#allocation122_spill] sm:$0xff] }
 0xec3   : > { %9280 = vtanh.f32 %v6029_v19  ;;  %v6043_v22 = vadd.f32 %v12603_v0, %v13739_v40  ;;  %v6038_v20 = vadd.f32 %v12608_v63, %v13742_v41  ;;  %v6042_v15 = vadd.f32 %v12608_v63, %v13743_v42  ;;  %v13745_v19 = vld [vmem:[#allocation117_spill] sm:$0xff] }
 0xec4   : > { %9282 = vtanh.f32 %v6033_v17  ;;  %v6045_v46 = vadd.f32 %v12600_v45, %v13744_v61  ;;  %v6049_v16 = vadd.f32 %v12600_v45, %v13745_v19 }
 0xec5   : > { %9284 = vtanh.f32 %v6031_v33  ;;  %v6047_v33 = vadd.f32 %v12603_v0, %v13746_v27  ;;  %v13755_v27 = vld [vmem:[#allocation127_spill] sm:$0xff] }
 0xec6   : > { %9286 = vtanh.f32 %v6035_v38  ;;  %v13747_v38 = vld [vmem:[#allocation119_spill] sm:$0xff] }
 0xec7   : > { %9288 = vtanh.f32 %v6032_v26  ;;  %v6051_v11 = vadd.f32 %v12603_v0, %v13747_v38  ;;  %v13756_v38 = vld [vmem:[#allocation128_spill] sm:$0xff] }
 0xec8   : > { %9290 = vtanh.f32 %v6030_v62  ;;  %v13748_v62 = vld [vmem:[#allocation120_spill] sm:$0xff] }
 0xec9   : > { %9292 = vtanh.f32 %v6034_v58  ;;  %v6044_v57 = vadd.f32 %v12595_v36, %v13748_v62  ;;  %v13757_v62 = vld [vmem:[#allocation129_spill] sm:$0xff] }
 0xeca   : > { %9294 = vtanh.f32 %v6037_v51  ;;  %v6048_v51 = vadd.f32 %v12595_v36, %v13749_v8  ;;  %v13758_v8 = vld [vmem:[#allocation130_spill] sm:$0xff] }
 0xecb   : > { %9296 = vtanh.f32 %v6041_v14 }
 0xecc   : > { %9298 = vtanh.f32 %v6039_v39  ;;  %v6046_v39 = vadd.f32 %v12608_v63, %v13750_v54  ;;  %v13759_v54 = vld [vmem:[#allocation131_spill] sm:$0xff] }
 0xecd   : > { %9300 = vtanh.f32 %v6043_v22 }
 0xece   : > { %9302 = vtanh.f32 %v6036_v43  ;;  %v6050_v43 = vadd.f32 %v12608_v63, %v13751_v53 }
 0xecf   : > { %v9279_v44 = vpop.eup %9278  ;;  %9304 = vtanh.f32 %v6040_v2  ;;  %v13752_v2 = vld [vmem:[#allocation124_spill] sm:$0xff] }
 0xed0   : > { %v9281_v17 = vpop.eup %9280  ;;  %9306 = vtanh.f32 %v6038_v20  ;;  %v6053_v41 = vadd.f32 %v12600_v45, %v13752_v2  ;;  %v13761_v2 = vld [vmem:[#allocation133_spill] sm:$0xff] }
 0xed1   : > { %v9283_v4 = vpop.eup %9282  ;;  %9308 = vtanh.f32 %v6042_v15  ;;  %v13753_v15 = vld [vmem:[#allocation125_spill] sm:$0xff] }
 0xed2   : > { %v9285_v26 = vpop.eup %9284  ;;  %v6229_v60 = vpack.c.bf16 %v9283_v4, %v9281_v17  ;;  %9310 = vtanh.f32 %v6045_v46  ;;  %v6057_v61 = vadd.f32 %v12600_v45, %v13753_v15 }
 0xed3   : > { %v9287_v58 = vpop.eup %9286  ;;  %9312 = vtanh.f32 %v6049_v16 }
 0xed4   : > { %v9289_v7 = vpop.eup %9288  ;;  %6312 = vmatprep.mubr.bf16.mxu0 %v6229_v60  ;;  %v6231_v14 = vpack.c.bf16 %v9287_v58, %v9285_v26  ;;  %9314 = vtanh.f32 %v6047_v33  ;;  %v6059_v33 = vadd.f32 %v12603_v0, %v13755_v27 }
 0xed5   : > { %v9291_v40 = vpop.eup %9290  ;;  %v6228_v22 = vpack.c.bf16 %v9289_v7, %v9279_v44  ;;  %9316 = vtanh.f32 %v6051_v11  ;;  %v13754_v44 = vld [vmem:[#allocation126_spill] sm:$0xff]  ;;  %v6052_v11 = vadd.f32 %v12595_v36, %v13756_v38  ;;  %v13765_v38 = vld [vmem:[#allocation137_spill] sm:$0xff] }
 0xed6   : > { %v9293_v25 = vpop.eup %9292  ;;  %6448 = vmatprep.mubr.bf16.mxu1 %v6231_v14  ;;  %9318 = vtanh.f32 %v6044_v57  ;;  %v6055_v19 = vadd.f32 %v12603_v0, %v13754_v44  ;;  %v6056_v57 = vadd.f32 %v12595_v36, %v13757_v62  ;;  %v13763_v44 = vld [vmem:[#allocation135_spill] sm:$0xff] }
 0xed7   : > { %v9295_v20 = vpop.eup %9294  ;;  %6313 = vmatmul.mubr.bf16.vlgmr.msra.gmra.mxu0 %v6228_v22  ;;  %v6230_v42 = vpack.c.bf16 %v9293_v25, %v9291_v40  ;;  %9320 = vtanh.f32 %v6048_v51  ;;  %v6054_v51 = vadd.f32 %v12608_v63, %v13758_v8  ;;  %v13760_v22 = vld [vmem:[#allocation132_spill] sm:$0xff]  ;;  %v13767_v8 = vld [vmem:[#allocation139_spill] sm:$0xff] }
 0xed8   : > { %v9297_v46 = vpop.eup %9296  ;;  %9322 = vtanh.f32 %v6046_v39  ;;  %v6058_v39 = vadd.f32 %v12608_v63, %v13759_v54  ;;  %v6061_v53 = vadd.f32 %v12600_v45, %v13760_v22  ;;  %v13769_v22 = vld [vmem:[#allocation141_spill] sm:$0xff] }
 0xed9   : > { %v9299_v16 = vpop.eup %9298  ;;  %6449 = vmatmul.mubr.bf16.vlgmr.msra.gmra.mxu1 %v6230_v42  ;;  %v6233_v17 = vpack.c.bf16 %v9297_v46, %v9295_v20  ;;  %9324 = vtanh.f32 %v6050_v43  ;;  %v13762_v42 = vld [vmem:[#allocation134_spill] sm:$0xff] }
 0xeda   : > { %v9301_v4 = vpop.eup %9300  ;;  %9326 = vtanh.f32 %v6053_v41  ;;  %v6065_v41 = vadd.f32 %v12600_v45, %v13761_v2  ;;  %v6063_v15 = vadd.f32 %v12603_v0, %v13762_v42  ;;  %v13771_v42 = vld [vmem:[#allocation54_spill] sm:$0xff] }
 0xedb   : > { %v9303_v26 = vpop.eup %9302  ;;  %6320 = vmatprep.mubr.bf16.mxu0 %v6233_v17  ;;  %v6235_v60 = vpack.c.bf16 %v9301_v4, %v9299_v16  ;;  %9328 = vtanh.f32 %v6057_v61  ;;  %v13764_v17 = vld [vmem:[#allocation136_spill] sm:$0xff] }
 0xedc   : > { %v9305_v58 = vpop.eup %9304  ;;  %9330 = vtanh.f32 %v6055_v19  ;;  %v6067_v19 = vadd.f32 %v12603_v0, %v13763_v44  ;;  %v6060_v27 = vadd.f32 %v12595_v36, %v13764_v17  ;;  %v13773_v17 = vld [vmem:[#allocation43_spill] sm:$0xff] }
 0xedd   : > { %v9307_v7 = vpop.eup %9306  ;;  %6456 = vmatprep.mubr.bf16.mxu1 %v6235_v60  ;;  %v6232_v14 = vpack.c.bf16 %v9305_v58, %v9303_v26  ;;  %9332 = vtanh.f32 %v6059_v33  ;;  %v13766_v60 = vld [vmem:[#allocation138_spill] sm:$0xff] }
 0xede   : > { %v9309_v40 = vpop.eup %9308  ;;  %9334 = vtanh.f32 %v6052_v11  ;;  %v6064_v11 = vadd.f32 %v12595_v36, %v13765_v38  ;;  %v6062_v62 = vadd.f32 %v12608_v63, %v13766_v60  ;;  %v13775_v60 = vld [vmem:[#allocation52_spill] sm:$0xff] }
 0xedf   : > { %v9311_v43 = vpop.eup %9310  ;;  %6321 = vmatmul.mubr.bf16.gmra.mxu0 %v6232_v14  ;;  %v6234_v25 = vpack.c.bf16 %v9309_v40, %v9307_v7  ;;  %9336 = vtanh.f32 %v6056_v57  ;;  %v13768_v14 = vld [vmem:[#allocation140_spill] sm:$0xff] }
 0xee0   : > { %v9313_v20 = vpop.eup %9312  ;;  %9338 = vtanh.f32 %v6054_v51  ;;  %v6066_v51 = vadd.f32 %v12608_v63, %v13767_v8  ;;  %v6069_v54 = vadd.f32 %v12600_v45, %v13768_v14  ;;  %v13777_v14 = vld [vmem:[#allocation47_spill] sm:$0xff] }
 0xee1   : > { %v9315_v61 = vpop.eup %9314  ;;  %6457 = vmatmul.mubr.bf16.gmra.mxu1 %v6234_v25  ;;  %v6237_v46 = vpack.c.bf16 %v9313_v20, %v9311_v43  ;;  %9340 = vtanh.f32 %v6058_v39  ;;  %v13770_v25 = vld [vmem:[#allocation142_spill] sm:$0xff] }
 0xee2   : > { %v9317_v16 = vpop.eup %9316  ;;  %9342 = vtanh.f32 %v6061_v53  ;;  %v6073_v53 = vadd.f32 %v12600_v45, %v13769_v22  ;;  %v6071_v2 = vadd.f32 %v12603_v0, %v13770_v25  ;;  %v13779_v25 = vld [vmem:[#allocation62_spill] sm:$0xff] }
 0xee3   : > { %v9319_v33 = vpop.eup %9318  ;;  %6328 = vmatprep.mubr.bf16.mxu0 %v6237_v46  ;;  %v6239_v4 = vpack.c.bf16 %v9317_v16, %v9315_v61  ;;  %9344 = vtanh.f32 %v6065_v41  ;;  %v13772_v46 = vld [vmem:[#allocation42_spill] sm:$0xff] }
 0xee4   : > { %v9321_v26 = vpop.eup %9320  ;;  %9346 = vtanh.f32 %v6063_v15  ;;  %v6075_v15 = vadd.f32 %v12603_v0, %v13771_v42  ;;  %v6068_v44 = vadd.f32 %v12595_v36, %v13772_v46  ;;  %v13781_v46 = vld [vmem:[#allocation46_spill] sm:$0xff] }
 0xee5   : > { %v9323_v57 = vpop.eup %9322  ;;  %6464 = vmatprep.mubr.bf16.mxu1 %v6239_v4  ;;  %v6236_v58 = vpack.c.bf16 %v9321_v26, %v9319_v33  ;;  %9348 = vtanh.f32 %v6067_v19  ;;  %v13774_v4 = vld [vmem:[#allocation49_spill] sm:$0xff] }
 0xee6   : > { %v9325_v7 = vpop.eup %9324  ;;  %9350 = vtanh.f32 %v6060_v27  ;;  %v6072_v27 = vadd.f32 %v12595_v36, %v13773_v17  ;;  %v6070_v38 = vadd.f32 %v12608_v63, %v13774_v4  ;;  %v13783_v4 = vld [vmem:[#allocation60_spill] sm:$0xff] }
 0xee7   : > { %v9327_v39 = vpop.eup %9326  ;;  %6329 = vmatmul.mubr.bf16.gmra.mxu0 %v6236_v58  ;;  %v6238_v40 = vpack.c.bf16 %v9325_v7, %v9323_v57  ;;  %9352 = vtanh.f32 %v6064_v11  ;;  %v13776_v58 = vld [vmem:[#allocation45_spill] sm:$0xff] }
 0xee8   : > { %v9329_v43 = vpop.eup %9328  ;;  %9354 = vtanh.f32 %v6062_v62  ;;  %v6074_v62 = vadd.f32 %v12608_v63, %v13775_v60  ;;  %v6077_v8 = vadd.f32 %v12600_v45, %v13776_v58  ;;  %v13785_v58 = vld [vmem:[#allocation53_spill] sm:$0xff] }
 0xee9   : > { %v9331_v41 = vpop.eup %9330  ;;  %6465 = vmatmul.mubr.bf16.gmra.mxu1 %v6238_v40  ;;  %v6241_v20 = vpack.c.bf16 %v9329_v43, %v9327_v39  ;;  %9356 = vtanh.f32 %v6066_v51  ;;  %v13778_v40 = vld [vmem:[#allocation58_spill] sm:$0xff] }
 0xeea   : > { %v9333_v61 = vpop.eup %9332  ;;  %9358 = vtanh.f32 %v6069_v54  ;;  %v6081_v54 = vadd.f32 %v12600_v45, %v13777_v14  ;;  %v6079_v22 = vadd.f32 %v12603_v0, %v13778_v40  ;;  %v13787_v40 = vld [vmem:[#allocation70_spill] sm:$0xff] }
 0xeeb   : > { %v9335_v19 = vpop.eup %9334  ;;  %6336 = vmatprep.mubr.bf16.mxu0 %v6241_v20  ;;  %v6243_v16 = vpack.c.bf16 %v9333_v61, %v9331_v41  ;;  %9360 = vtanh.f32 %v6073_v53  ;;  %v13780_v20 = vld [vmem:[#allocation44_spill] sm:$0xff] }
 0xeec   : > { %v9337_v33 = vpop.eup %9336  ;;  %9362 = vtanh.f32 %v6071_v2  ;;  %v6083_v2 = vadd.f32 %v12603_v0, %v13779_v25  ;;  %v6076_v42 = vadd.f32 %v12595_v36, %v13780_v20  ;;  %v13789_v20 = vld [vmem:[#allocation51_spill] sm:$0xff] }
 0xeed   : > { %v9339_v11 = vpop.eup %9338  ;;  %6472 = vmatprep.mubr.bf16.mxu1 %v6243_v16  ;;  %v6240_v26 = vpack.c.bf16 %v9337_v33, %v9335_v19  ;;  %9364 = vtanh.f32 %v6075_v15  ;;  %v13782_v16 = vld [vmem:[#allocation56_spill] sm:$0xff] }
 0xeee   : > { %v9341_v57 = vpop.eup %9340  ;;  %9366 = vtanh.f32 %v6068_v44  ;;  %v6080_v44 = vadd.f32 %v12595_v36, %v13781_v46  ;;  %v6078_v17 = vadd.f32 %v12608_v63, %v13782_v16  ;;  %v13791_v16 = vld [vmem:[#allocation68_spill] sm:$0xff] }
 0xeef   : > { %v9343_v51 = vpop.eup %9342  ;;  %6337 = vmatmul.mubr.bf16.gmra.mxu0 %v6240_v26  ;;  %v6242_v7 = vpack.c.bf16 %v9341_v57, %v9339_v11  ;;  %9368 = vtanh.f32 %v6072_v27  ;;  %v13784_v26 = vld [vmem:[#allocation50_spill] sm:$0xff] }
 0xef0   : > { %v9345_v39 = vpop.eup %9344  ;;  %9370 = vtanh.f32 %v6070_v38  ;;  %v6082_v38 = vadd.f32 %v12608_v63, %v13783_v4  ;;  %v6085_v60 = vadd.f32 %v12600_v45, %v13784_v26  ;;  %v13793_v26 = vld [vmem:[#allocation61_spill] sm:$0xff] }
 0xef1   : > { %v9347_v53 = vpop.eup %9346  ;;  %6473 = vmatmul.mubr.bf16.gmra.mxu1 %v6242_v7  ;;  %v6245_v43 = vpack.c.bf16 %v9345_v39, %v9343_v51  ;;  %9372 = vtanh.f32 %v6074_v62  ;;  %v13786_v7 = vld [vmem:[#allocation66_spill] sm:$0xff] }
 0xef2   : > { %v9349_v41 = vpop.eup %9348  ;;  %9374 = vtanh.f32 %v6077_v8  ;;  %v6089_v8 = vadd.f32 %v12600_v45, %v13785_v58  ;;  %v6087_v14 = vadd.f32 %v12603_v0, %v13786_v7  ;;  %v13795_v7 = vld [vmem:[#allocation78_spill] sm:$0xff] }
 0xef3   : > { %v9351_v15 = vpop.eup %9350  ;;  %6344 = vmatprep.mubr.bf16.mxu0 %v6245_v43  ;;  %v6247_v61 = vpack.c.bf16 %v9349_v41, %v9347_v53  ;;  %9376 = vtanh.f32 %v6081_v54  ;;  %v13788_v43 = vld [vmem:[#allocation48_spill] sm:$0xff] }
 0xef4   : > { %v9353_v19 = vpop.eup %9352  ;;  %9378 = vtanh.f32 %v6079_v22  ;;  %v6091_v22 = vadd.f32 %v12603_v0, %v13787_v40  ;;  %v6084_v25 = vadd.f32 %v12595_v36, %v13788_v43  ;;  %v13797_v43 = vld [vmem:[#allocation59_spill] sm:$0xff] }
 0xef5   : > { %v9355_v27 = vpop.eup %9354  ;;  %6480 = vmatprep.mubr.bf16.mxu1 %v6247_v61  ;;  %v6244_v33 = vpack.c.bf16 %v9353_v19, %v9351_v15  ;;  %9380 = vtanh.f32 %v6083_v2  ;;  %v13790_v61 = vld [vmem:[#allocation64_spill] sm:$0xff] }
 0xef6   : > { %v9357_v11 = vpop.eup %9356  ;;  %9382 = vtanh.f32 %v6076_v42  ;;  %v6088_v42 = vadd.f32 %v12595_v36, %v13789_v20  ;;  %v6086_v46 = vadd.f32 %v12608_v63, %v13790_v61  ;;  %v13799_v61 = vld [vmem:[#allocation76_spill] sm:$0xff] }
 0xef7   : > { %v9359_v62 = vpop.eup %9358  ;;  %6345 = vmatmul.mubr.bf16.gmra.mxu0 %v6244_v33  ;;  %v6246_v57 = vpack.c.bf16 %v9357_v11, %v9355_v27  ;;  %9384 = vtanh.f32 %v6080_v44  ;;  %v13792_v33 = vld [vmem:[#allocation57_spill] sm:$0xff] }
 0xef8   : > { %v9361_v51 = vpop.eup %9360  ;;  %9386 = vtanh.f32 %v6078_v17  ;;  %v6090_v17 = vadd.f32 %v12608_v63, %v13791_v16  ;;  %v6093_v4 = vadd.f32 %v12600_v45, %v13792_v33  ;;  %v13801_v33 = vld [vmem:[#allocation69_spill] sm:$0xff] }
 0xef9   : > { %v9363_v54 = vpop.eup %9362  ;;  %6481 = vmatmul.mubr.bf16.gmra.mxu1 %v6246_v57  ;;  %v6249_v39 = vpack.c.bf16 %v9361_v51, %v9359_v62  ;;  %9388 = vtanh.f32 %v6082_v38  ;;  %v13794_v57 = vld [vmem:[#allocation74_spill] sm:$0xff] }
 0xefa   : > { %v9365_v53 = vpop.eup %9364  ;;  %9390 = vtanh.f32 %v6085_v60  ;;  %v6097_v60 = vadd.f32 %v12600_v45, %v13793_v26  ;;  %v6095_v58 = vadd.f32 %v12603_v0, %v13794_v57  ;;  %v13803_v57 = vld [vmem:[#allocation86_spill] sm:$0xff] }
 0xefb   : > { %v9367_v2 = vpop.eup %9366  ;;  %6352 = vmatprep.mubr.bf16.mxu0 %v6249_v39  ;;  %v6251_v41 = vpack.c.bf16 %v9365_v53, %v9363_v54  ;;  %9392 = vtanh.f32 %v6089_v8  ;;  %v13796_v39 = vld [vmem:[#allocation55_spill] sm:$0xff] }
 0xefc   : > { %v9369_v15 = vpop.eup %9368  ;;  %9394 = vtanh.f32 %v6087_v14  ;;  %v6099_v14 = vadd.f32 %v12603_v0, %v13795_v7  ;;  %v6092_v40 = vadd.f32 %v12595_v36, %v13796_v39  ;;  %v13805_v39 = vld [vmem:[#allocation67_spill] sm:$0xff] }
 0xefd   : > { %v9371_v44 = vpop.eup %9370  ;;  %6488 = vmatprep.mubr.bf16.mxu1 %v6251_v41  ;;  %v6248_v19 = vpack.c.bf16 %v9369_v15, %v9367_v2  ;;  %9396 = vtanh.f32 %v6091_v22  ;;  %v13798_v41 = vld [vmem:[#allocation72_spill] sm:$0xff] }
 0xefe   : > { %v9373_v27 = vpop.eup %9372  ;;  %9398 = vtanh.f32 %v6084_v25  ;;  %v6096_v25 = vadd.f32 %v12595_v36, %v13797_v43  ;;  %v6094_v20 = vadd.f32 %v12608_v63, %v13798_v41  ;;  %v13807_v41 = vld [vmem:[#allocation84_spill] sm:$0xff] }
 0xeff   : > { %v9375_v38 = vpop.eup %9374  ;;  %6353 = vmatmul.mubr.bf16.gmra.mxu0 %v6248_v19  ;;  %v6250_v11 = vpack.c.bf16 %v9373_v27, %v9371_v44  ;;  %9400 = vtanh.f32 %v6088_v42  ;;  %v13800_v19 = vld [vmem:[#allocation65_spill] sm:$0xff] }
 0xf00   : > { %v9377_v62 = vpop.eup %9376  ;;  %9402 = vtanh.f32 %v6086_v46  ;;  %v6098_v46 = vadd.f32 %v12608_v63, %v13799_v61  ;;  %v6101_v16 = vadd.f32 %v12600_v45, %v13800_v19  ;;  %v13809_v19 = vld [vmem:[#allocation77_spill] sm:$0xff] }
 0xf01   : > { %v9379_v8 = vpop.eup %9378  ;;  %6489 = vmatmul.mubr.bf16.gmra.mxu1 %v6250_v11  ;;  %v6253_v51 = vpack.c.bf16 %v9377_v62, %v9375_v38  ;;  %9404 = vtanh.f32 %v6090_v17  ;;  %v13802_v11 = vld [vmem:[#allocation82_spill] sm:$0xff] }
 0xf02   : > { %v9381_v54 = vpop.eup %9380  ;;  %9406 = vtanh.f32 %v6093_v4  ;;  %v6105_v4 = vadd.f32 %v12600_v45, %v13801_v33  ;;  %v6103_v26 = vadd.f32 %v12603_v0, %v13802_v11  ;;  %v13811_v11 = vld [vmem:[#allocation92_spill] sm:$0xff] }
 0xf03   : > { %v9383_v22 = vpop.eup %9382  ;;  %6360 = vmatprep.mubr.bf16.mxu0 %v6253_v51  ;;  %v6255_v53 = vpack.c.bf16 %v9381_v54, %v9379_v8  ;;  %9408 = vtanh.f32 %v6097_v60  ;;  %v13804_v51 = vld [vmem:[#allocation63_spill] sm:$0xff] }
 0xf04   : > { %v9385_v2 = vpop.eup %9384  ;;  %9410 = vtanh.f32 %v6095_v58  ;;  %v6107_v58 = vadd.f32 %v12603_v0, %v13803_v57  ;;  %v6100_v7 = vadd.f32 %v12595_v36, %v13804_v51  ;;  %v13813_v51 = vld [vmem:[#allocation75_spill] sm:$0xff] }
 0xf05   : > { %v9387_v42 = vpop.eup %9386  ;;  %6496 = vmatprep.mubr.bf16.mxu1 %v6255_v53  ;;  %v6252_v15 = vpack.c.bf16 %v9385_v2, %v9383_v22  ;;  %9412 = vtanh.f32 %v6099_v14  ;;  %v13806_v53 = vld [vmem:[#allocation80_spill] sm:$0xff] }
 0xf06   : > { %v9389_v44 = vpop.eup %9388  ;;  %9414 = vtanh.f32 %v6092_v40  ;;  %v6104_v40 = vadd.f32 %v12595_v36, %v13805_v39  ;;  %v6102_v43 = vadd.f32 %v12608_v63, %v13806_v53  ;;  %v13815_v53 = vld [vmem:[#allocation91_spill] sm:$0xff] }
 0xf07   : > { %v9391_v17 = vpop.eup %9390  ;;  %6361 = vmatmul.mubr.bf16.gmra.mxu0 %v6252_v15  ;;  %v6254_v27 = vpack.c.bf16 %v9389_v44, %v9387_v42  ;;  %9416 = vtanh.f32 %v6096_v25  ;;  %v13808_v15 = vld [vmem:[#allocation73_spill] sm:$0xff] }
 0xf08   : > { %v9393_v38 = vpop.eup %9392  ;;  %9418 = vtanh.f32 %v6094_v20  ;;  %v6106_v20 = vadd.f32 %v12608_v63, %v13807_v41  ;;  %v6109_v61 = vadd.f32 %v12600_v45, %v13808_v15  ;;  %v13817_v15 = vld [vmem:[#allocation85_spill] sm:$0xff] }
 0xf09   : > { %v9395_v60 = vpop.eup %9394  ;;  %6497 = vmatmul.mubr.bf16.gmra.mxu1 %v6254_v27  ;;  %v6257_v62 = vpack.c.bf16 %v9393_v38, %v9391_v17  ;;  %9420 = vtanh.f32 %v6098_v46  ;;  %v13810_v27 = vld [vmem:[#allocation90_spill] sm:$0xff] }
 0xf0a   : > { %v9397_v8 = vpop.eup %9396  ;;  %9422 = vtanh.f32 %v6101_v16  ;;  %v6113_v16 = vadd.f32 %v12600_v45, %v13809_v19  ;;  %v6111_v33 = vadd.f32 %v12603_v0, %v13810_v27  ;;  %v13819_v27 = vld [vmem:[#allocation96_spill] sm:$0xff] }
 0xf0b   : > { %v9399_v14 = vpop.eup %9398  ;;  %6368 = vmatprep.mubr.bf16.mxu0 %v6257_v62  ;;  %v6259_v54 = vpack.c.bf16 %v9397_v8, %v9395_v60  ;;  %9424 = vtanh.f32 %v6105_v4  ;;  %v13812_v62 = vld [vmem:[#allocation71_spill] sm:$0xff] }
 0xf0c   : > { %v9401_v22 = vpop.eup %9400  ;;  %9426 = vtanh.f32 %v6103_v26  ;;  %v6115_v26 = vadd.f32 %v12603_v0, %v13811_v11  ;;  %v6108_v57 = vadd.f32 %v12595_v36, %v13812_v62  ;;  %v13821_v62 = vld [vmem:[#allocation83_spill] sm:$0xff] }
 0xf0d   : > { %v9403_v25 = vpop.eup %9402  ;;  %6504 = vmatprep.mubr.bf16.mxu1 %v6259_v54  ;;  %v6256_v2 = vpack.c.bf16 %v9401_v22, %v9399_v14  ;;  %9428 = vtanh.f32 %v6107_v58  ;;  %v13814_v54 = vld [vmem:[#allocation88_spill] sm:$0xff] }
 0xf0e   : > { %v9405_v42 = vpop.eup %9404  ;;  %9430 = vtanh.f32 %v6100_v7  ;;  %v6112_v7 = vadd.f32 %v12595_v36, %v13813_v51  ;;  %v6110_v39 = vadd.f32 %v12608_v63, %v13814_v54  ;;  %v13823_v54 = vld [vmem:[#allocation95_spill] sm:$0xff] }
 0xf0f   : > { %v9407_v46 = vpop.eup %9406  ;;  %6369 = vmatmul.mubr.bf16.gmra.mxu0 %v6256_v2  ;;  %v6258_v44 = vpack.c.bf16 %v9405_v42, %v9403_v25  ;;  %9432 = vtanh.f32 %v6104_v40  ;;  %v13816_v2 = vld [vmem:[#allocation81_spill] sm:$0xff] }
 0xf10   : > { %v9409_v17 = vpop.eup %9408  ;;  %9434 = vtanh.f32 %v6102_v43  ;;  %v6114_v43 = vadd.f32 %v12608_v63, %v13815_v53  ;;  %v6117_v41 = vadd.f32 %v12600_v45, %v13816_v2  ;;  %v13825_v2 = vld [vmem:[#allocation98_spill] sm:$0xff] }
 0xf11   : > { %v9411_v4 = vpop.eup %9410  ;;  %6505 = vmatmul.mubr.bf16.gmra.mxu1 %v6258_v44  ;;  %v6261_v38 = vpack.c.bf16 %v9409_v17, %v9407_v46  ;;  %9436 = vtanh.f32 %v6106_v20  ;;  %v13818_v44 = vld [vmem:[#allocation94_spill] sm:$0xff] }
 0xf12   : > { %v9413_v60 = vpop.eup %9412  ;;  %9438 = vtanh.f32 %v6109_v61  ;;  %v6121_v61 = vadd.f32 %v12600_v45, %v13817_v15  ;;  %v6119_v19 = vadd.f32 %v12603_v0, %v13818_v44 }
 0xf13   : > { %v9415_v58 = vpop.eup %9414  ;;  %6376 = vmatprep.mubr.bf16.mxu0 %v6261_v38  ;;  %v6263_v8 = vpack.c.bf16 %v9413_v60, %v9411_v4  ;;  %9440 = vtanh.f32 %v6113_v16  ;;  %v13820_v38 = vld [vmem:[#allocation79_spill] sm:$0xff] }
 0xf14   : > { %v9417_v14 = vpop.eup %9416  ;;  %9442 = vtanh.f32 %v6111_v33  ;;  %v6123_v33 = vadd.f32 %v12603_v0, %v13819_v27  ;;  %v6116_v11 = vadd.f32 %v12595_v36, %v13820_v38 }
 0xf15   : > { %v9419_v40 = vpop.eup %9418  ;;  %6512 = vmatprep.mubr.bf16.mxu1 %v6263_v8  ;;  %v6260_v22 = vpack.c.bf16 %v9417_v14, %v9415_v58  ;;  %9444 = vtanh.f32 %v6115_v26  ;;  %v13822_v8 = vld [vmem:[#allocation93_spill] sm:$0xff] }
 0xf16   : > { %v9421_v25 = vpop.eup %9420  ;;  %9446 = vtanh.f32 %v6108_v57  ;;  %v6120_v57 = vadd.f32 %v12595_v36, %v13821_v62  ;;  %v6118_v51 = vadd.f32 %v12608_v63, %v13822_v8 }
 0xf17   : > { %v9423_v20 = vpop.eup %9422  ;;  %6377 = vmatmul.mubr.bf16.gmra.mxu0 %v6260_v22  ;;  %v6262_v42 = vpack.c.bf16 %v9421_v25, %v9419_v40  ;;  %9448 = vtanh.f32 %v6112_v7  ;;  %v13824_v22 = vld [vmem:[#allocation89_spill] sm:$0xff] }
 0xf18   : > { %v9425_v46 = vpop.eup %9424  ;;  %9450 = vtanh.f32 %v6110_v39  ;;  %v6122_v39 = vadd.f32 %v12608_v63, %v13823_v54  ;;  %v6125_v53 = vadd.f32 %v12600_v45, %v13824_v22 }
 0xf19   : > { %v9427_v16 = vpop.eup %9426  ;;  %6513 = vmatmul.mubr.bf16.gmra.mxu1 %v6262_v42  ;;  %v6265_v17 = vpack.c.bf16 %v9425_v46, %v9423_v20  ;;  %9452 = vtanh.f32 %v6114_v43 }
 0xf1a   : > { %v9429_v4 = vpop.eup %9428  ;;  %9454 = vtanh.f32 %v6117_v41  ;;  %v6127_v41 = vadd.f32 %v12603_v0, %v13825_v2 }
 0xf1b   : > { %v9431_v26 = vpop.eup %9430  ;;  %6384 = vmatprep.mubr.bf16.mxu0 %v6265_v17  ;;  %v6267_v60 = vpack.c.bf16 %v9429_v4, %v9427_v16  ;;  %9456 = vtanh.f32 %v6121_v61  ;;  %v13826_v61 = vld [vmem:[#allocation87_spill] sm:$0xff]  ;;  %v13827_v16 = vld [vmem:[#allocation97_spill] sm:$0xff] }
 0xf1c   : > { %v9433_v58 = vpop.eup %9432  ;;  %9458 = vtanh.f32 %v6119_v19  ;;  %v6124_v46 = vadd.f32 %v12595_v36, %v13826_v61  ;;  %v6126_v17 = vadd.f32 %v12608_v63, %v13827_v16 }
 0xf1d   : > { %v9435_v7 = vpop.eup %9434  ;;  %6520 = vmatprep.mubr.bf16.mxu1 %v6267_v60  ;;  %v6264_v14 = vpack.c.bf16 %v9433_v58, %v9431_v26  ;;  %9460 = vtanh.f32 %v6123_v33 }
 0xf1e   : > { %v9437_v40 = vpop.eup %9436  ;;  %9462 = vtanh.f32 %v6116_v11 }
 0xf1f   : > { %v9439_v43 = vpop.eup %9438  ;;  %6385 = vmatmul.mubr.bf16.gmra.mxu0 %v6264_v14  ;;  %v6266_v25 = vpack.c.bf16 %v9437_v40, %v9435_v7  ;;  %9464 = vtanh.f32 %v6120_v57 }
 0xf20   : > { %v9441_v20 = vpop.eup %9440  ;;  %9466 = vtanh.f32 %v6118_v51 }
 0xf21   : > { %v9443_v42 = vpop.eup %9442  ;;  %6521 = vmatmul.mubr.bf16.gmra.mxu1 %v6266_v25  ;;  %v6269_v15 = vpack.c.bf16 %v9441_v20, %v9439_v43  ;;  %9468 = vtanh.f32 %v6122_v39 }
 0xf22   : > { %v9445_v44 = vpop.eup %9444  ;;  %9470 = vtanh.f32 %v6125_v53 }
 0xf23   : > { %v9447_v19 = vpop.eup %9446  ;;  %6392 = vmatprep.mubr.bf16.mxu0 %v6269_v15  ;;  %v6271_v45 = vpack.c.bf16 %v9445_v44, %v9443_v42  ;;  %9472 = vtanh.f32 %v6127_v41  ;;  %v12812_v44 = vld [vmem:[#allocation2] ss:$0 sm:$0xff] }
 0xf24   : > { %v9449_v27 = vpop.eup %9448  ;;  %9474 = vtanh.f32 %v6124_v46 }
 0xf25   : > { %v9451_v0 = vpop.eup %9450  ;;  %6528 = vmatprep.mubr.bf16.mxu1 %v6271_v45  ;;  %v6268_v33 = vpack.c.bf16 %v9449_v27, %v9447_v19  ;;  %9476 = vtanh.f32 %v6126_v17 }
 0xf26   : > { %v9453_v4 = vpop.eup %9452 }
 0xf27   : > { %v9455_v38 = vpop.eup %9454  ;;  %6393 = vmatmul.mubr.bf16.gmra.mxu0 %v6268_v33  ;;  %v6270_v11 = vpack.c.bf16 %v9453_v4, %v9451_v0 }
 0xf28   : > { %v9457_v36 = vpop.eup %9456 }
 0xf29   : > { %v9459_v26 = vpop.eup %9458  ;;  %6529 = vmatmul.mubr.bf16.gmra.mxu1 %v6270_v11  ;;  %v6273_v60 = vpack.c.bf16 %v9457_v36, %v9455_v38 }
 0xf2a   : > { %v9461_v62 = vpop.eup %9460 }
 0xf2b   : > { %v9463_v57 = vpop.eup %9462  ;;  %6400 = vmatprep.mubr.bf16.mxu0 %v6273_v60  ;;  %v6275_v58 = vpack.c.bf16 %v9461_v62, %v9459_v26 }
 0xf2c   : > { %v9465_v8 = vpop.eup %9464 }
 0xf2d   : > { %v9467_v63 = vpop.eup %9466  ;;  %6536 = vmatprep.mubr.bf16.mxu1 %v6275_v58  ;;  %v6272_v51 = vpack.c.bf16 %v9465_v8, %v9463_v57 }
 0xf2e   : > { %v9469_v7 = vpop.eup %9468 }
 0xf2f   : > { %v9471_v14 = vpop.eup %9470  ;;  %6401 = vmatmul.mubr.bf16.gmra.mxu0 %v6272_v51  ;;  %v6274_v54 = vpack.c.bf16 %v9469_v7, %v9467_v63 }
 0xf30   : > { %v9473_v39 = vpop.eup %9472  ;;  %v6277_v40 = vpack.c.bf16 %v9471_v14, %v9471_v14 }
 0xf31   : > { %6537 = vmatmul.mubr.bf16.gmra.mxu1 %v6274_v54  ;;  %v6279_v22 = vpack.c.bf16 %v9473_v39, %v9473_v39  ;;  %v9475_v53 = vpop.eup %9474 }
 0xf32   : > { %6408 = vmatprep.mubr.bf16.mxu0 %v6277_v40  ;;  %v9477_v43 = vpop.eup %9476  ;;  %v6276_v25 = vpack.c.bf16 %v9475_v53, %v9475_v53 }
 0xf33   : > { %6544 = vmatprep.mubr.bf16.mxu1 %v6279_v22  ;;  %v6278_v2 = vpack.c.bf16 %v9477_v43, %v9477_v43 }
 0xf37   : > { %6409 = vmatmul.mubr.bf16.gmra.mxu0 %v6276_v25 }
 0xf38   : > { %7421 = vmatprep.mubr.msk.bf16.mxu0 %vm5814_vm4, %v13695_v30 }
 0xf39   : > { %6545 = vmatmul.mubr.bf16.gmra.mxu1 %v6278_v2 }
 0xf3a   : > { %7422 = vmatprep.mubr.msk.bf16.mxu1 %vm5814_vm4, %v13695_v30 }
 0xf97   : > { %v8005_v41 = vpop.f32.mrf.mxu0 }
 0xf99   : > { %v8099_v20 = vpop.f32.mrf.mxu1  ;;  %v8006_v42 = vpop.f32.mrf.mxu0 }
 0xf9a   : > { %v8007_v15 = vadd.f32 %v8006_v42, %v8005_v41 }
 0xf9b   : > { %v8100_v61 = vpop.f32.mrf.mxu1  ;;  %v8008_v46 = vpop.f32.mrf.mxu0 }
 0xf9c   : > { %v6315_v19 = vadd.f32 %v12812_v44, %v8007_v15  ;;  %v8101_v45 = vadd.f32 %v8100_v61, %v8099_v20 }
 0xf9d   : > { %v8102_v16 = vpop.f32.mrf.mxu1  ;;  %v8009_v17 = vpop.f32.mrf.mxu0 }
 0xf9e   : > { %v12815_v27 = vadd.f32 %v8101_v45, %v6315_v19  ;;  %v8010_v0 = vadd.f32 %v8009_v17, %v8008_v46 }
 0xf9f   : > { %v8103_v33 = vpop.f32.mrf.mxu1  ;;  %v8011_v4 = vpop.f32.mrf.mxu0 }
 0xfa0   : > { %13828 = vst [vmem:[#allocation148_spill] sm:$0xff] %v12815_v27  ;;  %v6318_v38 = vadd.f32 %v12812_v44, %v8010_v0  ;;  %v8104_v11 = vadd.f32 %v8103_v33, %v8102_v16  ;;  %v12831_v33 = vsel %vm5519_vm3, %v12815_v27, -inf }
 0xfa1   : > { %v8105_v36 = vpop.f32.mrf.mxu1  ;;  %v8012_v26 = vpop.f32.mrf.mxu0 }
 0xfa2   : > { %v12818_v60 = vadd.f32 %v8104_v11, %v6318_v38  ;;  %v8013_v62 = vadd.f32 %v8012_v26, %v8011_v4 }
 0xfa3   : > { %v8106_v57 = vpop.f32.mrf.mxu1  ;;  %v8014_v58 = vpop.f32.mrf.mxu0 }
 0xfa4   : > { %13829 = vst [vmem:[#allocation147_spill] sm:$0xff] %v12818_v60  ;;  %v6323_v8 = vadd.f32 %v12812_v44, %v8013_v62  ;;  %v8107_v63 = vadd.f32 %v8106_v57, %v8105_v36 }
 0xfa5   : > { %v8108_v51 = vpop.f32.mrf.mxu1  ;;  %v8015_v7 = vpop.f32.mrf.mxu0 }
 0xfa6   : > { %v12821_v14 = vadd.f32 %v8107_v63, %v6323_v8  ;;  %v8016_v54 = vadd.f32 %v8015_v7, %v8014_v58 }
 0xfa7   : > { %v8109_v39 = vpop.f32.mrf.mxu1  ;;  %v8017_v40 = vpop.f32.mrf.mxu0 }
 0xfa8   : > { %13830 = vst [vmem:[#allocation146_spill] sm:$0xff] %v12821_v14  ;;  %v6326_v22 = vadd.f32 %v12812_v44, %v8016_v54  ;;  %v8110_v53 = vadd.f32 %v8109_v39, %v8108_v51  ;;  %v12844_v51 = vsel %vm5519_vm3, %v12818_v60, -inf }
 0xfa9   : > { %v8111_v43 = vpop.f32.mrf.mxu1  ;;  %v8018_v25 = vpop.f32.mrf.mxu0 }
 0xfaa   : > { %v12824_v2 = vadd.f32 %v8110_v53, %v6326_v22  ;;  %v8019_v41 = vadd.f32 %v8018_v25, %v8017_v40 }
 0xfab   : > { %v8112_v20 = vpop.f32.mrf.mxu1  ;;  %v8020_v42 = vpop.f32.mrf.mxu0 }
 0xfac   : > { %v6331_v15 = vadd.f32 %v12812_v44, %v8019_v41  ;;  %v8113_v61 = vadd.f32 %v8112_v20, %v8111_v43  ;;  %v12857_v20 = vsel %vm5519_vm3, %v12821_v14, -inf }
 0xfad   : > { %v8114_v46 = vpop.f32.mrf.mxu1  ;;  %v8021_v19 = vpop.f32.mrf.mxu0 }
 0xfae   : > { %v12827_v45 = vadd.f32 %v8113_v61, %v6331_v15  ;;  %v8022_v16 = vadd.f32 %v8021_v19, %v8020_v42 }
 0xfaf   : > { %v8115_v17 = vpop.f32.mrf.mxu1  ;;  %v8023_v0 = vpop.f32.mrf.mxu0 }
 0xfb0   : > { %13831 = vst [vmem:[#allocation145_spill] sm:$0xff] %v12827_v45  ;;  %v12835_v4 = vsel %vm5519_vm3, %v12827_v45, -inf  ;;  %v6334_v38 = vadd.f32 %v12812_v44, %v8022_v16  ;;  %v8116_v11 = vadd.f32 %v8115_v17, %v8114_v46 }
 0xfb1   : > { %v8117_v26 = vpop.f32.mrf.mxu1  ;;  %v8024_v62 = vpop.f32.mrf.mxu0 }
 0xfb2   : > { %v12840_v57 = vadd.f32 %v8116_v11, %v6334_v38  ;;  %v8025_v58 = vadd.f32 %v8024_v62, %v8023_v0 }
 0xfb3   : > { %v8118_v8 = vpop.f32.mrf.mxu1  ;;  %v8026_v63 = vpop.f32.mrf.mxu0 }
 0xfb4   : > { %13832 = vst [vmem:[#allocation144_spill] sm:$0xff] %v12840_v57  ;;  %v12848_v7 = vsel %vm5519_vm3, %v12840_v57, -inf  ;;  %v6339_v54 = vadd.f32 %v12812_v44, %v8025_v58  ;;  %v8119_v39 = vadd.f32 %v8118_v8, %v8117_v26 }
 0xfb5   : > { %v8120_v22 = vpop.f32.mrf.mxu1  ;;  %v8027_v53 = vpop.f32.mrf.mxu0 }
 0xfb6   : > { %v12853_v43 = vadd.f32 %v8119_v39, %v6339_v54  ;;  %v8028_v56 = vadd.f32 %v8027_v53, %v8026_v63 }
 0xfb7   : > { %v8121_v25 = vpop.f32.mrf.mxu1  ;;  %v8029_v41 = vpop.f32.mrf.mxu0 }
 0xfb8   : > { %13833 = vst [vmem:[#allocation143_spill] sm:$0xff] %v12853_v43  ;;  %v12861_v42 = vsel %vm5519_vm3, %v12853_v43, -inf  ;;  %v6342_v28 = vadd.f32 %v12812_v44, %v8028_v56  ;;  %v8122_v43 = vadd.f32 %v8121_v25, %v8120_v22 }
 0xfb9   : > { %v8123_v61 = vpop.f32.mrf.mxu1  ;;  %v8030_v46 = vpop.f32.mrf.mxu0 }
 0xfba   : > { %v8031_v37 = vadd.f32 %v8030_v46, %v8029_v41 }
 0xfbb   : > { %v8124_v19 = vpop.f32.mrf.mxu1  ;;  %v8032_v16 = vpop.f32.mrf.mxu0 }
 0xfbc   : > { %v6347_v27 = vadd.f32 %v12812_v44, %v8031_v37  ;;  %v8125_v63 = vadd.f32 %v8124_v19, %v8123_v61 }
 0xfbd   : > { %v8126_v17 = vpop.f32.mrf.mxu1  ;;  %v8033_v0 = vpop.f32.mrf.mxu0 }
 0xfbe   : > { %v8034_v47 = vadd.f32 %v8033_v0, %v8032_v16  ;;  %v12897_v0 = vadd.f32 %v8122_v43, %v6342_v28 }
 0xfbf   : > { %v8127_v38 = vpop.f32.mrf.mxu1  ;;  %v8035_v11 = vpop.f32.mrf.mxu0 }
 0xfc0   : > { %v6350_v57 = vadd.f32 %v12812_v44, %v8034_v47  ;;  %v8128_v16 = vadd.f32 %v8127_v38, %v8126_v17  ;;  %v6562_v61 = vsel %vm5519_vm3, %v12897_v0, -inf }
 0xfc1   : > { %v8129_v26 = vpop.f32.mrf.mxu1  ;;  %v8036_v62 = vpop.f32.mrf.mxu0 }
 0xfc2   : > { %v8037_v52 = vadd.f32 %v8036_v62, %v8035_v11  ;;  %v12899_v11 = vadd.f32 %v8125_v63, %v6347_v27 }
 0xfc3   : > { %v8130_v58 = vpop.f32.mrf.mxu1  ;;  %v8038_v8 = vpop.f32.mrf.mxu0 }
 0xfc4   : > { %v6355_v53 = vadd.f32 %v12812_v44, %v8037_v52  ;;  %v8131_v62 = vadd.f32 %v8130_v58, %v8129_v26  ;;  %v6564_v28 = vsel %vm5519_vm3, %v12899_v11, -inf }
 0xfc5   : > { %v8132_v54 = vpop.f32.mrf.mxu1  ;;  %v8039_v39 = vpop.f32.mrf.mxu0 }
 0xfc6   : > { %v8040_v60 = vadd.f32 %v8039_v39, %v8038_v8  ;;  %v12902_v39 = vadd.f32 %v8128_v16, %v6350_v57 }
 0xfc7   : > { %v8133_v40 = vpop.f32.mrf.mxu1  ;;  %v8041_v36 = vpop.f32.mrf.mxu0 }
 0xfc8   : > { %v6358_v56 = vadd.f32 %v12812_v44, %v8040_v60  ;;  %v8134_v47 = vadd.f32 %v8133_v40, %v8132_v54  ;;  %v6566_v57 = vsel %vm5519_vm3, %v12902_v39, -inf  ;;  %v6555_v40 = vsel %vm5519_vm3, %v12824_v2, -inf }
 0xfc9   : > { %v12865_v24 = vpop.f32.mrf.mxu1  ;;  %v8042_v10 = vpop.f32.mrf.mxu0  ;;  %v6563_v54 = vmax.f32 %v6555_v40, %v6562_v61 }
 0xfca   : > { %v12910_v27 = vadd.f32 %v8134_v47, %v6358_v56  ;;  %v8043_v17 = vadd.f32 %v8042_v10, %v8041_v36  ;;  %v13836_v36 = vmax.f32 %v12844_v51, %v12848_v7 }
 0xfcb   : > { %v12867_v15 = vpop.f32.mrf.mxu1  ;;  %v12869_v21 = vpop.f32.mrf.mxu0 }
 0xfcd   : > { %v12871_v48 = vpop.f32.mrf.mxu1  ;;  %v12873_v59 = vpop.f32.mrf.mxu0 }
 0xfce   : > { %v8046_v63 = vadd.f32 %v12873_v59, %v12869_v21  ;;  %v6363_v59 = vadd.f32 %v12812_v44, %v8043_v17  ;;  %v8137_v21 = vadd.f32 %v12867_v15, %v12865_v24 }
 0xfcf   : > { %v12875_v29 = vpop.f32.mrf.mxu1  ;;  %v8047_v5 = vpop.f32.mrf.mxu0 }
 0xfd0   : > { %v6366_v47 = vadd.f32 %v12812_v44, %v8046_v63 }
 0xfd1   : > { %v12877_v34 = vpop.f32.mrf.mxu1  ;;  %v8048_v50 = vpop.f32.mrf.mxu0 }
 0xfd2   : > { %v8049_v52 = vadd.f32 %v8048_v50, %v8047_v5 }
 0xfd3   : > { %v12879_v49 = vpop.f32.mrf.mxu1  ;;  %v8050_v3 = vpop.f32.mrf.mxu0 }
 0xfd4   : > { %v6371_v10 = vadd.f32 %v12812_v44, %v8049_v52  ;;  %v8143_v51 = vadd.f32 %v12879_v49, %v12877_v34 }
 0xfd5   : > { %v12881_v35 = vpop.f32.mrf.mxu1  ;;  %v8051_v32 = vpop.f32.mrf.mxu0 }
 0xfd6   : > { %v8052_v43 = vadd.f32 %v8051_v32, %v8050_v3  ;;  %v13835_v32 = vmax.f32 %v12831_v33, %v12835_v4  ;;  %v13837_v4 = vmax.f32 %v12857_v20, %v12861_v42  ;;  %v12949_v52 = vadd.f32 %v8143_v51, %v6371_v10 }
 0xfd7   : > { %v12883_v12 = vpop.f32.mrf.mxu1  ;;  %v8053_v6 = vpop.f32.mrf.mxu0 }
 0xfd8   : > { %v12921_v3 = vmax.f32 %v13835_v32, %v6564_v28  ;;  %v8146_v7 = vadd.f32 %v12883_v12, %v12881_v35  ;;  %v8140_v35 = vadd.f32 %v12875_v29, %v12871_v48  ;;  %v6576_v48 = vsel %vm5519_vm3, %v12949_v52, -inf }
 0xfd9   : > { %v12885_v1 = vpop.f32.mrf.mxu1  ;;  %v8054_v31 = vpop.f32.mrf.mxu0 }
 0xfdb   : > { %v12887_v55 = vpop.f32.mrf.mxu1  ;;  %v8056_v23 = vpop.f32.mrf.mxu0 }
 0xfdd   : > { %v12889_v13 = vpop.f32.mrf.mxu1  ;;  %v8057_v9 = vpop.f32.mrf.mxu0 }
 0xfde   : > { %v8058_v56 = vadd.f32 %v8057_v9, %v8056_v23  ;;  %v12954_v23 = vadd.f32 %v8137_v21, %v6363_v59 }
 0xfdf   : > { %v12891_v18 = vpop.f32.mrf.mxu1  ;;  %v8059_v30 = vpop.f32.mrf.mxu0 }
 0xfe0   : > { %13834 = vst [vmem:[#allocation41_spill] sm:$0xff] %v12891_v18  ;;  %v12904_v18 = vadd.f32 %v8131_v62, %v6355_v53  ;;  %v12929_v53 = vmax.f32 %v13836_v36, %v6566_v57  ;;  %v8149_v57 = vadd.f32 %v12887_v55, %v12885_v1  ;;  %v6572_v36 = vsel %vm5519_vm3, %v12954_v23, -inf }
 0xfe1   : > { %v8153_v14 = vpop.f32.mrf.mxu1  ;;  %v8060_v45 = vpop.f32.mrf.mxu0 }
 0xfe2   : > { %v6568_v50 = vsel %vm5519_vm3, %v12904_v18, -inf  ;;  %v8061_v5 = vadd.f32 %v8060_v45, %v8059_v30  ;;  %v6570_v30 = vsel %vm5519_vm3, %v12910_v27, -inf  ;;  %v6374_v45 = vadd.f32 %v12812_v44, %v8052_v43 }
 0xfe3   : > { %v8154_v41 = vpop.f32.mrf.mxu1  ;;  %v8062_v46 = vpop.f32.mrf.mxu0  ;;  %v12937_v62 = vmax.f32 %v13837_v4, %v6568_v50  ;;  %v6571_v42 = vmax.f32 %v6563_v54, %v6570_v30 }
 0xfe4   : > { %v12951_v24 = vadd.f32 %v8146_v7, %v6374_v45  ;;  %v8155_v34 = vadd.f32 %v8154_v41, %v8153_v14 }
 0xfe5   : > { %v8156_v37 = vpop.f32.mrf.mxu1  ;;  %v8063_v8 = vpop.f32.mrf.mxu0  ;;  %v6577_v51 = vmax.f32 %v12937_v62, %v6576_v48 }
 0xfe6   : > { %v8064_v38 = vadd.f32 %v8063_v8, %v8062_v46  ;;  %v8055_v46 = vadd.f32 %v8054_v31, %v8053_v6  ;;  %v6387_v31 = vadd.f32 %v12812_v44, %v8061_v5  ;;  %v6578_v55 = vsel %vm5519_vm3, %v12951_v24, -inf }
 0xfe7   : > { %v8157_v22 = vpop.f32.mrf.mxu1  ;;  %v8065_v25 = vpop.f32.mrf.mxu0  ;;  %v13838_v50 = vld [vmem:[#allocation41_spill] sm:$0xff]  ;;  %v6579_v7 = vmax.f32 %v6571_v42, %v6578_v55 }
 0xfe8   : > { %v6390_v6 = vadd.f32 %v12812_v44, %v8064_v38  ;;  %v6379_v49 = vadd.f32 %v12812_v44, %v8055_v46  ;;  %v8158_v15 = vadd.f32 %v8157_v22, %v8156_v37  ;;  %v12965_v37 = vadd.f32 %v8140_v35, %v6366_v47 }
 0xfe9   : > { %v8159_v60 = vpop.f32.mrf.mxu1  ;;  %v8066_v19 = vpop.f32.mrf.mxu0  ;;  %v8152_v5 = vadd.f32 %v13838_v50, %v12889_v13 }
 0xfea   : > { %v8067_v61 = vadd.f32 %v8066_v19, %v8065_v25  ;;  %v6382_v25 = vadd.f32 %v12812_v44, %v8058_v56  ;;  %v12961_v19 = vadd.f32 %v8155_v34, %v6387_v31  ;;  %v12963_v17 = vadd.f32 %v8158_v15, %v6390_v6 }
 0xfeb   : > { %v8160_v26 = vpop.f32.mrf.mxu1  ;;  %v8068_v58 = vpop.f32.mrf.mxu0  ;;  %v12973_v1 = vadd.f32 %v8149_v57, %v6379_v49  ;;  %v6574_v21 = vsel %vm5519_vm3, %v12965_v37, -inf }
 0xfec   : > { %v6395_v22 = vadd.f32 %v12812_v44, %v8067_v61  ;;  %v8161_v54 = vadd.f32 %v8160_v26, %v8159_v60  ;;  %v12982_v30 = vadd.f32 %v8152_v5, %v6382_v25  ;;  %v6584_v45 = vsel %vm5519_vm3, %v12961_v19, -inf }
 0xfed   : > { %v8162_v16 = vpop.f32.mrf.mxu1  ;;  %v8069_v33 = vpop.f32.mrf.mxu0  ;;  %v6586_v46 = vsel %vm5519_vm3, %v12963_v17, -inf  ;;  %v6580_v56 = vsel %vm5519_vm3, %v12973_v1, -inf  ;;  %v6573_v61 = vmax.f32 %v12921_v3, %v6572_v36  ;;  %v6585_v62 = vmax.f32 %v6577_v51, %v6584_v45 }
 0xfee   : > { %v8070_v28 = vadd.f32 %v8069_v33, %v8068_v58  ;;  %v12988_v4 = vadd.f32 %v8161_v54, %v6395_v22  ;;  %v6582_v49 = vsel %vm5519_vm3, %v12982_v30, -inf  ;;  %v6587_v42 = vmax.f32 %v6579_v7, %v6586_v46 }
 0xfef   : > { %v8163_v8 = vpop.f32.mrf.mxu1  ;;  %v8071_v20 = vpop.f32.mrf.mxu0  ;;  %v6581_v57 = vmax.f32 %v6573_v61, %v6580_v56  ;;  %v13841_v61 = vld [vmem:[#allocation145_spill] sm:$0xff] }
 0xff0   : > { %v6398_v32 = vadd.f32 %v12812_v44, %v8070_v28  ;;  %v8164_v60 = vadd.f32 %v8163_v8, %v8162_v16 }
 0xff1   : > { %v8165_v12 = vpop.f32.mrf.mxu1  ;;  %v8072_v9 = vpop.f32.mrf.mxu0 }
 0xff2   : > { %v8073_v43 = vadd.f32 %v8072_v9, %v8071_v20  ;;  %v12996_v20 = vadd.f32 %v8164_v60, %v6398_v32 }
 0xff3   : > { %v8166_v14 = vpop.f32.mrf.mxu1  ;;  %v8074_v41 = vpop.f32.mrf.mxu0 }
 0xff4   : > { %v6403_v40 = vadd.f32 %v12812_v44, %v8073_v43  ;;  %v8167_v29 = vadd.f32 %v8166_v14, %v8165_v12  ;;  %v6588_v12 = vsel %vm5519_vm3, %v12988_v4, -inf  ;;  %v6575_v43 = vmax.f32 %v12929_v53, %v6574_v21 }
 0xff5   : > { %v8168_v38 = vpop.f32.mrf.mxu1  ;;  %v8075_v58 = vpop.f32.mrf.mxu0  ;;  %v6590_v22 = vsel %vm5519_vm3, %v12996_v20, -inf  ;;  %v6589_v48 = vmax.f32 %v6581_v57, %v6588_v12 }
 0xff6   : > { %v12978_v63 = vadd.f32 %v8167_v29, %v6403_v40  ;;  %v8076_v10 = vadd.f32 %v8075_v58, %v8074_v41  ;;  %v6583_v29 = vmax.f32 %v6575_v43, %v6582_v49 }
 0xff7   : > { %v8169_v13 = vpop.f32.mrf.mxu1  ;;  %v8077_v33 = vpop.f32.mrf.mxu0 }
 0xff8   : > { %v6406_v26 = vadd.f32 %v12812_v44, %v8076_v10  ;;  %v8170_v59 = vadd.f32 %v8169_v13, %v8168_v38  ;;  %v6592_v47 = vsel %vm5519_vm3, %v12978_v63, -inf  ;;  %v6591_v5 = vmax.f32 %v6583_v29, %v6590_v22 }
 0xff9   : > { %v8171_v31 = vpop.f32.mrf.mxu1  ;;  %v8078_v6 = vpop.f32.mrf.mxu0  ;;  %v6593_v3 = vmax.f32 %v6585_v62, %v6592_v47 }
 0xffa   : > { %v13000_v16 = vadd.f32 %v8170_v59, %v6406_v26  ;;  %v8079_v8 = vadd.f32 %v8078_v6, %v8077_v33 }
 0xffb   : > { %v8172_v34 = vpop.f32.mrf.mxu1  ;;  %v8080_v15 = vpop.f32.mrf.mxu0 }
 0xffc   : > { %v6594_v9 = vsel %vm5519_vm3, %v13000_v16, -inf  ;;  %v6411_v35 = vadd.f32 %v12812_v44, %v8079_v8  ;;  %v8173_v28 = vadd.f32 %v8172_v34, %v8171_v31 }
 0xffd   : > { %v6595_v25 = vmax.f32 %v6587_v42, %v6594_v9  ;;  %v8174_v14 = vpop.f32.mrf.mxu1  ;;  %v8081_v41 = vpop.f32.mrf.mxu0  ;;  %v13843_v42 = vld [vmem:[#allocation147_spill] sm:$0xff]  ;;  %v13844_v9 = vld [vmem:[#allocation148_spill] sm:$0xff] }
 0xffe   : > { %v13013_v40 = vadd.f32 %v8173_v28, %v6411_v35 }
 0xfff   : > { %v6599_v55 = vmax.f32 %v6593_v3, %v6595_v25  ;;  %v8175_v50 = vpop.f32.mrf.mxu1 }
0x1000   : > { %v6596_v44 = vsel %vm5564_vm5, %v13013_v40, -inf }
0x1001   : > { %v6597_v38 = vmax.f32 %v6589_v48, %v6596_v44 }
0x1003   : > { %v6598_v53 = vmax.f32 %v6597_v38, %v6591_v5 }
0x1005   : > { %v6600_v58 = vmax.f32 %v6598_v53, %v6599_v55 }
0x1007   : > { %v6601_v54 = vrot.slane %v6600_v58, 4 }
0x1009   : > { %v6602_v32 = vmax.f32 %v6600_v58, %v6601_v54  ;;  %v13845_v58 = vmov 0  }
0x100b   : > { %v6603_v10 = vrot.slane %v6602_v32, 2 }
0x100d   : > { %v6604_v36 = vmax.f32 %v6602_v32, %v6603_v10 }
0x100f   : > { %v6605_v45 = vrot.slane %v6604_v36, 1 }
0x1011   : > { %v13017_v46 = vmax.f32 %v6604_v36, %v6605_v45 }
0x1013   : > { %v6622_v13 = vsub.f32 %v12951_v24, %v13017_v46  ;;  %v6621_v33 = vsub.f32 %v12949_v52, %v13017_v46  ;;  %v6620_v60 = vsub.f32 %v12965_v37, %v13017_v46  ;;  %v6619_v26 = vsub.f32 %v12954_v23, %v13017_v46 }
0x1014   : > { %v6618_v59 = vsub.f32 %v12910_v27, %v13017_v46  ;;  %v6617_v21 = vsub.f32 %v12904_v18, %v13017_v46  ;;  %v6616_v24 = vsub.f32 %v12902_v39, %v13017_v46  ;;  %v6615_v37 = vsub.f32 %v12899_v11, %v13017_v46  ;;  %v13839_v27 = vld [vmem:[#allocation143_spill] sm:$0xff]  ;;  %v13840_v18 = vld [vmem:[#allocation144_spill] sm:$0xff]  ;;  %v13842_v11 = vld [vmem:[#allocation146_spill] sm:$0xff] }
0x1015   : > { %v6662_v51 = vmul.f32 1.442695, %v6622_v13  ;;  %v6660_v7 = vmul.f32 1.442695, %v6621_v33  ;;  %v6658_v56 = vmul.f32 1.442695, %v6620_v60  ;;  %v6614_v23 = vsub.f32 %v12897_v0, %v13017_v46 }
0x1016   : > { %v6656_v31 = vmul.f32 1.442695, %v6619_v26  ;;  %v6654_v52 = vmul.f32 1.442695, %v6618_v59  ;;  %v6652_v6 = vmul.f32 1.442695, %v6617_v21  ;;  %v6613_v47 = vsub.f32 %v13839_v27, %v13017_v46 }
0x1017   : > { %9478 = vpow2.f32 %v6662_v51  ;;  %v6612_v8 = vsub.f32 %v13840_v18, %v13017_v46  ;;  %v6611_v39 = vsub.f32 %v13841_v61, %v13017_v46  ;;  %v6610_v49 = vsub.f32 %v12824_v2, %v13017_v46 }
0x1018   : > { %9480 = vpow2.f32 %v6660_v7  ;;  %v6609_v62 = vsub.f32 %v13842_v11, %v13017_v46  ;;  %v6650_v0 = vmul.f32 1.442695, %v6616_v24  ;;  %v6608_v34 = vsub.f32 %v13843_v42, %v13017_v46 }
0x1019   : > { %9482 = vpow2.f32 %v6658_v56  ;;  %v6648_v15 = vmul.f32 1.442695, %v6615_v37  ;;  %v6646_v12 = vmul.f32 1.442695, %v6614_v23  ;;  %v6607_v35 = vsub.f32 %v13844_v9, %v13017_v46 }
0x101a   : > { %9484 = vpow2.f32 %v6656_v31  ;;  %v6644_v28 = vmul.f32 1.442695, %v6613_v47  ;;  %v6642_v43 = vmul.f32 1.442695, %v6612_v8  ;;  %v6640_v2 = vmul.f32 1.442695, %v6611_v39 }
0x101b   : > { %9486 = vpow2.f32 %v6654_v52  ;;  %v6638_v57 = vmul.f32 1.442695, %v6610_v49  ;;  %v6623_v3 = vsub.f32 %v12973_v1, %v13017_v46  ;;  %v6626_v25 = vsub.f32 %v12963_v17, %v13017_v46 }
0x101c   : > { %9488 = vpow2.f32 %v6652_v6  ;;  %v6636_v14 = vmul.f32 1.442695, %v6609_v62  ;;  %v6624_v41 = vsub.f32 %v12982_v30, %v13017_v46  ;;  %v6634_v22 = vmul.f32 1.442695, %v6608_v34 }
0x101d   : > { %9490 = vpow2.f32 %v6650_v0  ;;  %v6632_v29 = vmul.f32 1.442695, %v6607_v35  ;;  %v6625_v48 = vsub.f32 %v12961_v19, %v13017_v46  ;;  %v6664_v38 = vmul.f32 1.442695, %v6623_v3 }
0x101e   : > { %9492 = vpow2.f32 %v6648_v15  ;;  %v6670_v54 = vmul.f32 1.442695, %v6626_v25  ;;  %v6666_v10 = vmul.f32 1.442695, %v6624_v41  ;;  %v6631_v45 = vsub.f32 %v13013_v40, %v13017_v46 }
0x101f   : > { %9494 = vpow2.f32 %v6646_v12  ;;  %v6668_v5 = vmul.f32 1.442695, %v6625_v48  ;;  %v6629_v7 = vsub.f32 %v12978_v63, %v13017_v46  ;;  %v6630_v23 = vsub.f32 %v13000_v16, %v13017_v46  ;;  %v13849_v48 = vld [vmem:[#allocation29_spill] sm:$0xff] }
0x1020   : > { %9496 = vpow2.f32 %v6644_v28  ;;  %v6680_v51 = vmul.f32 1.442695, %v6631_v45  ;;  %v6627_v63 = vsub.f32 %v12988_v4, %v13017_v46  ;;  %v6628_v8 = vsub.f32 %v12996_v20, %v13017_v46 }
0x1021   : > { %9498 = vpow2.f32 %v6642_v43  ;;  %v6676_v27 = vmul.f32 1.442695, %v6629_v7  ;;  %v6678_v18 = vmul.f32 1.442695, %v6630_v23  ;;  %v13846_v43 = vmov 1065369472  }
0x1022   : > { %9500 = vpow2.f32 %v6640_v2  ;;  %v6672_v61 = vmul.f32 1.442695, %v6627_v63  ;;  %v6674_v4 = vmul.f32 1.442695, %v6628_v8 }
0x1023   : > { %9502 = vpow2.f32 %v6638_v57  ;;  %v13847_v57 = vld [vmem:[#allocation31_spill] sm:$0xff] }
0x1024   : > { %v9479_v55 = vpop.eup %9478  ;;  %9504 = vpow2.f32 %v6636_v14  ;;  %v13848_v14 = vld [vmem:[#allocation32_spill] sm:$0xff] }
0x1025   : > { %v9481_v50 = vpop.eup %9480  ;;  %6759 = vperm.xlu1 %8683, %v9479_v55   ;;  %9506 = vpow2.f32 %v6634_v22 }
0x1026   : > { %v9483_v1 = vpop.eup %9482  ;;  %6754 = vperm.xlu0 %8682, %v9481_v50   ;;  %v6895_v17 = vpack.c.bf16 %v9479_v55, %v9481_v50  ;;  %9508 = vpow2.f32 %v6632_v29 }
0x1027   : > { %v9485_v44 = vpop.eup %9484  ;;  %9510 = vpow2.f32 %v6668_v5 }
0x1028   : > { %v9487_v30 = vpop.eup %9486  ;;  %6905 = vmatpush1.bf16.msra.mxu1 %v6895_v17  ;;  %v6894_v32 = vpack.c.bf16 %v9483_v1, %v9485_v44  ;;  %9512 = vpow2.f32 %v6664_v38 }
0x1029   : > { %v9489_v53 = vpop.eup %9488  ;;  %6749 = vperm.xlu1 %8683, %v9483_v1   ;;  %6906 = vmatprep.subr.bf16.mxu1 %v13845_v58  ;;  %9514 = vpow2.f32 %v6670_v54  ;;  %v13850_v1 = vld [vmem:[#allocation30_spill] sm:$0xff]  ;;  %v13852_v54 = vld [vmem:[#allocation28_spill] sm:$0xff] }
0x102a   : > { %v9491_v19 = vpop.eup %9490  ;;  %6744 = vperm.xlu0 %8682, %v9485_v44   ;;  %v6893_v26 = vpack.c.bf16 %v9487_v30, %v9489_v53  ;;  %9516 = vpow2.f32 %v6666_v10 }
0x102b   : > { %v9493_v36 = vpop.eup %9492  ;;  %9518 = vpow2.f32 %v6680_v51 }
0x102c   : > { %v9495_v13 = vpop.eup %9494  ;;  %6907 = vmatpush1.bf16.msra.mxu1 %v6894_v32  ;;  %v6892_v52 = vpack.c.bf16 %v9491_v19, %v9493_v36  ;;  %9520 = vpow2.f32 %v6676_v27 }
0x102d   : > { %v9497_v33 = vpop.eup %9496  ;;  %6739 = vperm.xlu1 %8683, %v9487_v30   ;;  %6908 = vmatprep.subr.bf16.mxu1 %v13845_v58  ;;  %9522 = vpow2.f32 %v6678_v18  ;;  %v13851_v30 = vld [vmem:[#allocation27_spill] sm:$0xff] }
0x102e   : > { %v9499_v60 = vpop.eup %9498  ;;  %6734 = vperm.xlu0 %8682, %v9489_v53   ;;  %v6891_v59 = vpack.c.bf16 %v9495_v13, %v9497_v33  ;;  %9524 = vpow2.f32 %v6672_v61  ;;  %v13859_v18 = vld [vmem:[#allocation19_spill] sm:$0xff] }
0x102f   : > { %v9501_v21 = vpop.eup %9500  ;;  %9526 = vpow2.f32 %v6674_v4 }
0x1030   : > { %v9503_v40 = vpop.eup %9502  ;;  %6909 = vmatpush1.bf16.msra.mxu1 %v6893_v26  ;;  %v6890_v56 = vpack.c.bf16 %v9499_v60, %v9501_v21 }
0x1031   : > { %v9505_v24 = vpop.eup %9504  ;;  %6729 = vperm.xlu1 %8683, %v9491_v19   ;;  %6910 = vmatprep.subr.bf16.mxu1 %v13845_v58 }
0x1032   : > { %v9507_v31 = vpop.eup %9506  ;;  %6724 = vperm.xlu0 %8682, %v9493_v36   ;;  %v6889_v37 = vpack.c.bf16 %v9503_v40, %v9505_v24  ;;  %v13853_v36 = vld [vmem:[#allocation25_spill] sm:$0xff] }
0x1033   : > { %v9509_v6 = vpop.eup %9508 }
0x1034   : > { %6911 = vmatpush1.bf16.msra.mxu1 %v6892_v52  ;;  %v6888_v47 = vpack.c.bf16 %v9507_v31, %v9509_v6  ;;  %v9511_v39 = vpop.eup %9510  ;;  %v13857_v52 = vld [vmem:[#allocation21_spill] sm:$0xff] }
0x1035   : > { %6719 = vperm.xlu1 %8683, %v9495_v13   ;;  %6912 = vmatprep.subr.bf16.mxu1 %v13845_v58  ;;  %v9513_v16 = vpop.eup %9512 }
0x1036   : > { %6714 = vperm.xlu0 %8682, %v9497_v33   ;;  %v9515_v49 = vpop.eup %9514  ;;  %v13854_v33 = vld [vmem:[#allocation26_spill] sm:$0xff] }
0x1037   : > { %v9517_v11 = vpop.eup %9516  ;;  %v6897_v62 = vpack.c.bf16 %v9515_v49, %v9511_v39 }
0x1038   : > { %6913 = vmatpush1.bf16.msra.mxu1 %v6891_v59  ;;  %v6896_v0 = vpack.c.bf16 %v9517_v11, %v9513_v16  ;;  %v9519_v20 = vpop.eup %9518 }
0x1039   : > { %6709 = vperm.xlu1 %8683, %v9499_v60   ;;  %6914 = vmatprep.subr.bf16.mxu1 %v13845_v58  ;;  %v6900_v46 = vpack.c.bf16 %v9519_v20, %v9519_v20  ;;  %v9521_v42 = vpop.eup %9520 }
0x103a   : > { %6704 = vperm.xlu0 %8682, %v9501_v21   ;;  %v9523_v34 = vpop.eup %9522  ;;  %v13855_v21 = vld [vmem:[#allocation23_spill] sm:$0xff] }
0x103b   : > { %v6902_v15 = vsel %vm5818_vm6, %v6900_v46, 0  ;;  %v9525_v12 = vpop.eup %9524  ;;  %v6899_v9 = vpack.c.bf16 %v9523_v34, %v9521_v42 }
0x103c   : > { %6915 = vmatpush1.bf16.msra.mxu1 %v6890_v56  ;;  %v9527_v35 = vpop.eup %9526 }
0x103d   : > { %6699 = vperm.xlu1 %8683, %v9503_v40   ;;  %6916 = vmatprep.subr.bf16.mxu1 %v13845_v58  ;;  %v6898_v28 = vpack.c.bf16 %v9527_v35, %v9525_v12  ;;  %v13856_v40 = vld [vmem:[#allocation24_spill] sm:$0xff] }
0x103e   : > { %6694 = vperm.xlu0 %8682, %v9505_v24  }
0x1040   : > { %6917 = vmatpush1.bf16.msra.mxu1 %v6889_v37 }
0x1041   : > { %6689 = vperm.xlu1 %8683, %v9507_v31   ;;  %6918 = vmatprep.subr.bf16.mxu1 %v13845_v58 }
0x1042   : > { %6684 = vperm.xlu0 %8682, %v9509_v6   ;;  %v13858_v6 = vld [vmem:[#allocation22_spill] sm:$0xff] }
0x1044   : > { %6919 = vmatpush1.bf16.msra.mxu1 %v6888_v47 }
0x1045   : > { %6794 = vperm.xlu1 %8683, %v9521_v42   ;;  %6926 = vmatprep.subr.bf16.mxu1 %v13845_v58 }
0x1046   : > { %6804 = vperm.xlu0 %8682, %v9519_v20   ;;  %v13862_v20 = vld [vmem:[#allocation18_spill] sm:$0xff] }
0x1048   : > { %6927 = vmatpush2.bf16.msra.mxu1 %v6902_v15 }
0x1049   : > { %6784 = vperm.xlu1 %8683, %v9525_v12   ;;  %6928 = vmatprep.subr.bf16.mxu1 %v13845_v58  ;;  %v13863_v12 = vld [vmem:[#allocation40_spill] sm:$0xff] }
0x104a   : > { %6799 = vperm.xlu0 %8682, %v9523_v34  }
0x104c   : > { %6929 = vmatpush2.bf16.msra.mxu1 %v6899_v9 }
0x104d   : > { %6774 = vperm.xlu1 %8683, %v9511_v39   ;;  %6930 = vmatprep.subr.bf16.mxu1 %v13845_v58  ;;  %v13860_v39 = vld [vmem:[#allocation20_spill] sm:$0xff] }
0x104e   : > { %6789 = vperm.xlu0 %8682, %v9527_v35  }
0x1050   : > { %6931 = vmatpush2.bf16.msra.mxu1 %v6898_v28 }
0x1051   : > { %6764 = vperm.xlu1 %8683, %v9513_v16   ;;  %6932 = vmatprep.subr.bf16.mxu1 %v13845_v58 }
0x1052   : > { %6779 = vperm.xlu0 %8682, %v9515_v49  }
0x1054   : > { %6933 = vmatpush2.bf16.msra.mxu1 %v6897_v62 }
0x1055   : > { %6934 = vmatprep.subr.bf16.mxu1 %v13845_v58 }
0x1056   : > { %6769 = vperm.xlu0 %8682, %v9517_v11   ;;  %v13861_v11 = vld [vmem:[#allocation17_spill] sm:$0xff] }
0x1058   : > { %6935 = vmatpush2.bf16.msra.mxu1 %v6896_v0 }
0x105b   : > { %6937 = vmatmul.mubr.bf16.vlgmr.msra.gmra.mxu1 %v13846_v43 }
0x10a0   : > { %v6760_v2 = vpop.permute.xlu1 %6759 }
0x10a1   : > { %v6822_v3 = vmul.f32 %v13847_v57, %v6760_v2  ;;  %v6755_v25 = vpop.permute.xlu0 %6754  ;;  %v13864_v57 = vld [vmem:[#allocation39_spill] sm:$0xff] }
0x10a2   : > { %v6821_v41 = vmul.f32 %v13848_v14, %v6755_v25  ;;  %v13865_v14 = vld [vmem:[#allocation16_spill] sm:$0xff] }
0x10a4   : > { %v6839_v22 = vpack.c.bf16 %v6822_v3, %v6821_v41  ;;  %v6750_v29 = vpop.permute.xlu1 %6749 }
0x10a5   : > { %v6820_v55 = vmul.f32 %v13849_v48, %v6750_v29  ;;  %v6745_v50 = vpop.permute.xlu0 %6744 }
0x10a6   : > { %v6819_v17 = vmul.f32 %v13850_v1, %v6745_v50  ;;  %6849 = vmatpush1.bf16.msra.mxu0 %v6839_v22  ;;  %v13867_v1 = vld [vmem:[#allocation37_spill] sm:$0xff] }
0x10a7   : > { %6850 = vmatprep.subr.bf16.mxu0 %v13845_v58 }
0x10a8   : > { %v6838_v44 = vpack.c.bf16 %v6820_v55, %v6819_v17  ;;  %v6740_v5 = vpop.permute.xlu1 %6739  ;;  %v13866_v55 = vld [vmem:[#allocation38_spill] sm:$0xff] }
0x10a9   : > { %v6818_v38 = vmul.f32 %v13851_v30, %v6740_v5  ;;  %v6735_v53 = vpop.permute.xlu0 %6734  ;;  %v13868_v30 = vld [vmem:[#allocation36_spill] sm:$0xff] }
0x10aa   : > { %v6817_v19 = vmul.f32 %v13852_v54, %v6735_v53  ;;  %6851 = vmatpush1.bf16.msra.mxu0 %v6838_v44  ;;  %v13869_v53 = vld [vmem:[#allocation35_spill] sm:$0xff] }
0x10ab   : > { %6852 = vmatprep.subr.bf16.mxu0 %v13845_v58 }
0x10ac   : > { %v6837_v32 = vpack.c.bf16 %v6818_v38, %v6817_v19  ;;  %v6730_v10 = vpop.permute.xlu1 %6729 }
0x10ad   : > { %v6816_v45 = vmul.f32 %v13853_v36, %v6730_v10  ;;  %v6725_v13 = vpop.permute.xlu0 %6724  ;;  %v13870_v36 = vld [vmem:[#allocation34_spill] sm:$0xff] }
0x10ae   : > { %v6815_v60 = vmul.f32 %v13854_v33, %v6725_v13  ;;  %6853 = vmatpush1.bf16.msra.mxu0 %v6837_v32  ;;  %v13871_v13 = vld [vmem:[#allocation33_spill] sm:$0xff] }
0x10af   : > { %6854 = vmatprep.subr.bf16.mxu0 %v13845_v58 }
0x10b0   : > { %v6836_v26 = vpack.c.bf16 %v6816_v45, %v6815_v60  ;;  %v6720_v59 = vpop.permute.xlu1 %6719 }
0x10b1   : > { %v6814_v51 = vmul.f32 %v13855_v21, %v6720_v59  ;;  %v6715_v7 = vpop.permute.xlu0 %6714  ;;  %v8840_v59 = vld [vmem:[%s13208_s17 + $0x18] sm:$0xff]   ;;  %v8841_v21 = vld [vmem:[%s13208_s17 + $0x10] sm:$0xff]  }
0x10b2   : > { %v6813_v56 = vmul.f32 %v13856_v40, %v6715_v7  ;;  %6855 = vmatpush1.bf16.msra.mxu0 %v6836_v26  ;;  %v13872_v26 = vmov 0.0   ;;  %v8842_v40 = vld [vmem:[%s13208_s17 + $0x8] sm:$0xff]  }
0x10b3   : > { %6856 = vmatprep.subr.bf16.mxu0 %v13845_v58 }
0x10b4   : > { %v6835_v24 = vpack.c.bf16 %v6814_v51, %v6813_v56  ;;  %v6710_v31 = vpop.permute.xlu1 %6709  ;;  %v8843_v56 = vld [vmem:[%s13208_s17] sm:$0xff]  }
0x10b5   : > { %v6812_v37 = vmul.f32 %v13857_v52, %v6710_v31  ;;  %v6705_v23 = vpop.permute.xlu0 %6704 }
0x10b6   : > { %v6811_v27 = vmul.f32 %v13858_v6, %v6705_v23  ;;  %6857 = vmatpush1.bf16.msra.mxu0 %v6835_v24 }
0x10b7   : > { %6858 = vmatprep.subr.bf16.mxu0 %v13845_v58 }
0x10b8   : > { %v6834_v63 = vpack.c.bf16 %v6812_v37, %v6811_v27  ;;  %v6700_v47 = vpop.permute.xlu1 %6699 }
0x10b9   : > { %v6810_v8 = vmul.f32 %v13859_v18, %v6700_v47  ;;  %v6695_v61 = vpop.permute.xlu0 %6694 }
0x10ba   : > { %v6809_v16 = vmul.f32 %v13860_v39, %v6695_v61  ;;  %6859 = vmatpush1.bf16.msra.mxu0 %v6834_v63  ;;  %v13873_v63 = vld [vmem:[#allocation149_spill] sm:$0xff] }
0x10bb   : > { %6860 = vmatprep.subr.bf16.mxu0 %v13845_v58 }
0x10bc   : > { %v6833_v49 = vpack.c.bf16 %v6810_v8, %v6809_v16  ;;  %v6690_v4 = vpop.permute.xlu1 %6689  ;;  %v6961_v8 = vld [vmem:[%s13209_s18] sm:$0x1] }
0x10bd   : > { %v6808_v62 = vmul.f32 %v13861_v11, %v6690_v4  ;;  %v6685_v0 = vpop.permute.xlu0 %6684 }
0x10be   : > { %v6807_v46 = vmul.f32 %v13862_v20, %v6685_v0  ;;  %6861 = vmatpush1.bf16.msra.mxu0 %v6833_v49 }
0x10bf   : > { %6862 = vmatprep.subr.bf16.mxu0 %v13845_v58 }
0x10c0   : > { %v6832_v42 = vpack.c.bf16 %v6808_v62, %v6807_v46  ;;  %v6795_v34 = vpop.permute.xlu1 %6794 }
0x10c1   : > { %v6805_v15 = vpop.permute.xlu0 %6804  ;;  %v6829_v3 = vmul.f32 %v13864_v57, %v6795_v34 }
0x10c2   : > { %v6831_v9 = vmul.f32 %v13863_v12, %v6805_v15  ;;  %6863 = vmatpush1.bf16.msra.mxu0 %v6832_v42 }
0x10c3   : > { %6870 = vmatprep.subr.bf16.mxu0 %v13845_v58 }
0x10c4   : > { %v6844_v35 = vpack.c.bf16 %v6831_v9, %v6831_v9  ;;  %v6785_v28 = vpop.permute.xlu1 %6784 }
0x10c5   : > { %v6800_v2 = vpop.permute.xlu0 %6799  ;;  %v6827_v50 = vmul.f32 %v13866_v55, %v6785_v28 }
0x10c6   : > { %v6846_v25 = vsel %vm5818_vm6, %v6844_v35, 0  ;;  %v6830_v41 = vmul.f32 %v13865_v14, %v6800_v2 }
0x10c7   : > { %6871 = vmatpush2.bf16.msra.mxu0 %v6846_v25 }
0x10c8   : > { %v6843_v22 = vpack.c.bf16 %v6830_v41, %v6829_v3  ;;  %6872 = vmatprep.subr.bf16.mxu0 %v13845_v58  ;;  %v6775_v29 = vpop.permute.xlu1 %6774 }
0x10c9   : > { %v6790_v48 = vpop.permute.xlu0 %6789  ;;  %v6825_v38 = vmul.f32 %v13868_v30, %v6775_v29 }
0x10ca   : > { %v6828_v17 = vmul.f32 %v13867_v1, %v6790_v48 }
0x10cb   : > { %6873 = vmatpush2.bf16.msra.mxu0 %v6843_v22 }
0x10cc   : > { %v6842_v44 = vpack.c.bf16 %v6828_v17, %v6827_v50  ;;  %6874 = vmatprep.subr.bf16.mxu0 %v13845_v58  ;;  %v6765_v19 = vpop.permute.xlu1 %6764 }
0x10cd   : > { %v6780_v5 = vpop.permute.xlu0 %6779  ;;  %v6823_v45 = vmul.f32 %v13870_v36, %v6765_v19 }
0x10ce   : > { %v6826_v54 = vmul.f32 %v13869_v53, %v6780_v5 }
0x10cf   : > { %6875 = vmatpush2.bf16.msra.mxu0 %v6842_v44 }
0x10d0   : > { %v6841_v32 = vpack.c.bf16 %v6826_v54, %v6825_v38  ;;  %6876 = vmatprep.subr.bf16.mxu0 %v13845_v58 }
0x10d1   : > { %v6770_v10 = vpop.permute.xlu0 %6769 }
0x10d2   : > { %v6824_v33 = vmul.f32 %v13871_v13, %v6770_v10 }
0x10d3   : > { %6877 = vmatpush2.bf16.msra.mxu0 %v6841_v32 }
0x10d4   : > { %v6840_v60 = vpack.c.bf16 %v6824_v33, %v6823_v45  ;;  %6878 = vmatprep.subr.bf16.mxu0 %v13845_v58 }
0x10d7   : > { %6879 = vmatpush2.bf16.msra.mxu0 %v6840_v60 }
0x10d8   : > { %8622 = vmatprep.subr.bf16.mxu0 %v13872_v26 }
0x10da   : > { %6881 = vmatmul.mubr.bf16.vlgmr.msra.gmra.mxu0 %v13846_v43 }
0x10db   : > { %8630 = vmatprep.mubr.msk.bf16.mxu0 %vm9659_vm1, %v13872_v26  ;;  %8623 = vmatpush3.bf16.msra.mxu0 %v8840_v59 }
0x10dc   : > { %8624 = vmatprep.subr.bf16.mxu0 %v13872_v26 }
0x10df   : > { %8625 = vmatpush3.bf16.msra.mxu0 %v8841_v21 }
0x10e0   : > { %8626 = vmatprep.subr.bf16.mxu0 %v13872_v26 }
0x10e3   : > { %8627 = vmatpush3.bf16.msra.mxu0 %v8842_v40 }
0x10e4   : > { %8628 = vmatprep.subr.bf16.mxu0 %v13872_v26 }
0x10e7   : > { %8629 = vmatpush3.bf16.msra.mxu0 %v8843_v56 }
0x111b   : > { %v6938_v51 = vpop.f32.mrf.mxu1 }
0x111c   : > { %6946 = vperm.xlu1 %8683, %v6938_v51  }
0x111d   : > { %v6940_v58 = vpop.f32.mrf.mxu1 }
0x111f   : > { %v6941_v7 = vpop.f32.mrf.mxu1 }
0x1121   : > { %v6942_v43 = vpop.f32.mrf.mxu1 }
0x1197   : > { %v6947_v24 = vpop.permute.xlu1 %6946 }
0x1198   : > { %9528 = vrcp.f32 %v6947_v24 }
0x119a   : > { %v6882_v31 = vpop.f32.mrf.mxu0 }
0x119c   : > { %v6884_v52 = vpop.f32.mrf.mxu0 }
0x119e   : > { %v6885_v37 = vpop.f32.mrf.mxu0 }
0x11a0   : > { %v6886_v23 = vpop.f32.mrf.mxu0 }
0x11a5   : > { %v9529_v6 = vpop.eup %9528 }
0x11a6   : > { %v6950_v27 = vmul.f32 %v9529_v6, %v6882_v31 }
0x11a8   : > { %v6951_v47 = vadd.f32 %v6950_v27, %v13873_v63 }
0x11aa   : > { %v6960_v18 = vpack.c.bf16 %v6951_v47, %v6951_v47 }
0x11ac   : > { %8631 = vmatmul.mubr.msk.bf16.vlgmr.msra.gmra.mxu0 %vm2126_vm2, %v6960_v18 }
0x126c   : > { %v7023_v61 = vpop.f32.mrf.mxu0 }
0x126d   : > { %v7024_v39 = vadd.f32 %v7023_v61, %v6961_v8 }
0x126e   : > { %v8632_v16 = vpop.f32.mrf.mxu0 }
0x126f   : > { %7029 = vst [vmem:[%s609_s29] sm:$0x1] %v7024_v39 }
0x1270   : > { %v7026_v49 = vpop.f32.mrf.mxu0 }
0x1271   : > { %9608 = shalt.err (!%p9605_p3)
}
0x1272   : > { %s9609_s22 = scalar_lea.hbm %s13150_s24, 16  ;;  %s9613_s29 = scalar_lea.hbm %s13210_s19, 32 }
0x1273   : > { %p9610_p4 = scmp.ne.s32.totalorder %s13150_s24, %s9609_s22  ;;  %p9614_p9 = scmp.lt.s32.totalorder %s13150_s24, %s13210_s19 }
0x1274   : > { %p9615_p10 = scmp.lt.s32.totalorder %s9613_s29, %s9609_s22 }
0x1275   : > { %p9611_p7 = pnand %p9610_p4, %p9803_p5 }
0x1276   : > { %p9616_p11 = por %p9615_p10, %p9614_p9 }
0x1277   : > { %p9612_p8 = pneg %p9611_p7 }
0x1279   : > { %p9617_p12 = pnand %p9616_p11, %p9612_p8 }
0x127b   : > { %9620 = shalt.err (!%p9617_p12)
}
0x127c   : > { %8639 = dma.vmem_to_hbm [thread:$0]  (%p9803_p5), %s13152_s30, 16, %s13150_s24, %s7031_s25   ;;  %v8633_v4 = vpop.f32.mrf.mxu0 }
0x127d PF: > { %s13874_s1 = sld [smem:[#allocation8_spill]] }
0x127e   : > { %s13875_s16 = sld [smem:[#allocation6_spill]] }
0x1283   : > { %p8645_p13 = scmp.ge.s32.totalorder %s13874_s1, 2 }
0x1284   : > { %s7055_s20 = sand.u32 1, %s13875_s16  }
0x1285   : > { %p8642_p0 = pnand %p8645_p13, %p9807_p6  ;;  %s7056_s23 = scalar_lea.sflag [#allocation4], %s7055_s20 }
0x1287   : > { %p8643_p1 = pneg %p8642_p0 }
0x1289   : > { %9638 = dma.done.wait (%p8643_p1), %s7056_s23, 16  }
0x128a   : > { %9640 = vsyncadd (%p8643_p1), %s7056_s23, 4294967280  ;;  %s13877_s22 = sld [smem:[#allocation9_spill]]  ;;  %s13880_s20 = smov %s9647_s21 }
0x128b   : > { %s13878_s3 = sld [smem:[#allocation7_spill]] }
0x128c   : > { %s13879_s1 = sld [smem:[#allocation10_spill]] }
0x1290   : > { %p31_p2 = scmp.ge.s32.totalorder %s13877_s22, 4  }
0x1291   : > { %s13881_s21 = smov %s13878_s3 }
0x1292   :  { %33 = sbr.rel (!%p31_p2) target bundleno = 8 (0x8), region = 144 }
0x1297   :  { %7060 = vsyncpa [#allocation4], 1 }
0x1298   :  { %7062 = vsyncpa [#allocation4 + $0x1], 1 }

</bundles_post_ra>
